<compile_context>
chip_gen: v7x
topology: tpu7x:2x2x1
jax: 0.10.0
libtpu: 0.0.40
codegen_flags: <defaults>
</compile_context>

<pallas_src>
import functools

import numpy as np
import jax
import jax.numpy as jnp
from jax.experimental import pallas as pl
from jax.experimental.pallas import tpu as pltpu

INV_SQRT2 = 0.7071067811865476

_COMPILER_PARAMS = pltpu.CompilerParams(
    dimension_semantics=("parallel",),
    vmem_limit_bytes=32 * 1024 * 1024,
)


# ----------------------------------------------------------------------------
# In-kernel math helpers
# ----------------------------------------------------------------------------
def _erf(x):
    # Abramowitz & Stegun 7.1.26; exp() goes to the EUP slot.
    a1, a2, a3, a4, a5 = 0.254829592, -0.284496736, 1.421413741, -1.453152027, 1.061405429
    p = 0.3275911
    s = jnp.where(x >= 0.0, 1.0, -1.0)
    ax = jnp.abs(x)
    t = 1.0 / (1.0 + p * ax)
    poly = t * (a1 + t * (a2 + t * (a3 + t * (a4 + t * a5))))
    return s * (1.0 - poly * jnp.exp(-ax * ax))


def _gelu_exact(x):
    # nn.GELU() default = erf formulation
    return 0.5 * x * (1.0 + _erf(x * INV_SQRT2))


# ----------------------------------------------------------------------------
# Kernel 1: fused reduction conv (1x1) + 4-level db1 'zero' DWT cascade
#   input  x      : (B, Cin, H, W)  (one batch image per grid step)
#   outputs x_l   : (B, 16, H/2^l, W/2^l), channels = [LL(4), c0b1,c0b2,c0b3, c1b1,...]
# ----------------------------------------------------------------------------
def _reduce_dwt_kernel(x_ref, rw_ref, rb_ref,
                       aw1_ref, aht1_ref, aw2_ref, aht2_ref,
                       aw3_ref, aht3_ref, aw4_ref, aht4_ref,
                       o1_ref, o2_ref, o3_ref, o4_ref):
    H, W = x_ref.shape[2], x_ref.shape[3]
    cin = x_ref.shape[1]
    n_red = rw_ref.shape[1]
    mats = [(aw1_ref[...], aht1_ref[...]), (aw2_ref[...], aht2_ref[...]),
            (aw3_ref[...], aht3_ref[...]), (aw4_ref[...], aht4_ref[...])]
    outs = [o1_ref, o2_ref, o3_ref, o4_ref]

    for cr in range(n_red):
        # 1x1 reduction conv for this reduced channel (SMEM scalar weights).
        acc = jnp.zeros((H, W), jnp.float32)
        for c in range(cin):
            acc = acc + rw_ref[c, cr] * x_ref[0, c]
        ll = acc + rb_ref[cr]

        # 4-level Haar cascade; LL stays resident in-kernel.
        for lvl in range(4):
            a_w, a_h_t = mats[lvl]
            z = jnp.dot(a_h_t,
                        jnp.dot(ll, a_w, preferred_element_type=jnp.float32),
                        preferred_element_type=jnp.float32)
            m = z.shape[0] // 2
            n = z.shape[1] // 2
            out = outs[lvl]
            out[0, cr] = z[:m, :n]                     # LL  (== Y_{lvl+1})
            out[0, n_red + 3 * cr + 0] = z[m:, :n]     # (lo_w, hi_h)
            out[0, n_red + 3 * cr + 1] = z[:m, n:]     # (hi_w, lo_h)
            out[0, n_red + 3 * cr + 2] = z[m:, n:]     # (hi_w, hi_h)
            ll = z[:m, :n]


def reduce_dwt(x, red_w, red_b, haar_mats):
    B, C, H, W = x.shape
    CR = red_w.shape[1]
    out_shapes = tuple(
        jax.ShapeDtypeStruct((B, 4 * CR, H // (2 ** (l + 1)), W // (2 ** (l + 1))),
                             jnp.float32)
        for l in range(4))
    in_specs = [
        pl.BlockSpec((1, C, H, W), lambda b: (b, 0, 0, 0)),
        pl.BlockSpec(memory_space=pltpu.MemorySpace.SMEM),   # reduction weight (16,4)
        pl.BlockSpec(memory_space=pltpu.MemorySpace.SMEM),   # reduction bias   (4,)
    ]
    for a in haar_mats:
        in_specs.append(pl.BlockSpec(a.shape, lambda b: (0, 0)))
    out_specs = tuple(
        pl.BlockSpec((1, 4 * CR, H // (2 ** (l + 1)), W // (2 ** (l + 1))),
                     lambda b: (b, 0, 0, 0))
        for l in range(4))
    return pl.pallas_call(
        _reduce_dwt_kernel,
        out_shape=out_shapes,
        grid=(B,),
        in_specs=in_specs,
        out_specs=out_specs,
        compiler_params=_COMPILER_PARAMS,
    )(x, red_w, red_b, *haar_mats)


# ----------------------------------------------------------------------------
# Kernel 2: fused feedforward
#   Conv1x1 -> GELU -> (Dropout: identity) -> Conv1x1 -> ConvT(4,s2,p1) + folded BN
#   activations: channels on sublanes, pixels (flat h*w) on lanes.
#   ConvT = 9 shifted matmuls; shifted reads come from a zero-padded VMEM scratch,
#   border semantics enforced by precomputed (9, h*w) masks.
# ----------------------------------------------------------------------------
def _ff_kernel(x_ref, w1t_ref, b1_ref, w2t_ref, b2_ref,
               wtap_ref, bout_ref, mask_ref, o_ref, zpad_ref, *, w, pad):
    hw = x_ref.shape[2]
    ffc = zpad_ref.shape[0]

    x = x_ref[0]                                                   # (Cin, hw)
    hdn = jnp.dot(w1t_ref[...], x, preferred_element_type=jnp.float32) + b1_ref[...]
    hdn = _gelu_exact(hdn)
    # TODO(synk): nn.Dropout(0.5) is identity here (eval mode).
    z = jnp.dot(w2t_ref[...], hdn, preferred_element_type=jnp.float32) + b2_ref[...]

    # Stage z in a zero-padded scratch so every shifted read is a static slice.
    zpad_ref[...] = jnp.zeros((ffc, hw + 2 * pad), jnp.float32)
    zpad_ref[:, pad:pad + hw] = z

    acc = bout_ref[...] + jnp.zeros((o_ref.shape[1], hw), jnp.float32)
    k = 0
    for dr in (-1, 0, 1):
        for dc in (-1, 0, 1):
            shift = dr * w + dc
            zs = zpad_ref[:, pad - shift:pad - shift + hw]         # halo read
            zs = zs * mask_ref[k:k + 1, :]                         # zero-pad borders
            acc = acc + jnp.dot(wtap_ref[k], zs, preferred_element_type=jnp.float32)
            k += 1
    o_ref[0] = acc


def feedforward(x_flat, fp, h, w):
    """x_flat: (B, Cin, h*w).  Returns (B, cout, (2h)*(2w)) in standard pixel order."""
    B, cin, hw = x_flat.shape
    hid = fp['w1t'].shape[0]
    ffc = fp['w2t'].shape[0]
    cout4 = fp['wtap'].shape[1]
    cout = cout4 // 4
    pad = w + 1
    kernel = functools.partial(_ff_kernel, w=w, pad=pad)
    y = pl.pallas_call(
        kernel,
        out_shape=jax.ShapeDtypeStruct((B, cout4, hw), jnp.float32),
        grid=(B,),
        in_specs=[
            pl.BlockSpec((1, cin, hw), lambda b: (b, 0, 0)),
            pl.BlockSpec((hid, cin), lambda b: (0, 0)),
            pl.BlockSpec((hid, 1), lambda b: (0, 0)),
            pl.BlockSpec((ffc, hid), lambda b: (0, 0)),
            pl.BlockSpec((ffc, 1), lambda b: (0, 0)),
            pl.BlockSpec((9, cout4, ffc), lambda b: (0, 0, 0)),
            pl.BlockSpec((cout4, 1), lambda b: (0, 0)),
            pl.BlockSpec((9, hw), lambda b: (0, 0)),
        ],
        out_specs=pl.BlockSpec((1, cout4, hw), lambda b: (b, 0, 0)),
        scratch_shapes=[pltpu.VMEM((ffc, hw + 2 * pad), jnp.float32)],
        compiler_params=_COMPILER_PARAMS,
    )(x_flat, fp['w1t'], fp['b1'], fp['w2t'], fp['b2'],
      fp['wtap'], fp['bout'], fp['masks'])
    # Phase de-interleave (layout plumbing on tiny arrays, done in the wrapper):
    # kernel rows are ordered (dy, dx, cout); pixels are (i, j) at input resolution.
    y = y.reshape(B, 2, 2, cout, h, w)
    y = jnp.transpose(y, (0, 3, 4, 1, 5, 2)).reshape(B, cout, 2 * h, 2 * w)
    return y.reshape(B, cout, 4 * hw)


# ----------------------------------------------------------------------------
# Parameter preparation (done once, outside jit): transpose 1x1 weights, fold BN
# into the ConvT weights/bias, build the 9 shift-tap matrices, Haar matrices, masks.
# ----------------------------------------------------------------------------
def _haar_analysis_matrix(n):
    a = np.zeros((n, n), np.float32)
    for k in range(n // 2):
        a[2 * k, k] = INV_SQRT2
        a[2 * k + 1, k] = INV_SQRT2
        a[2 * k, n // 2 + k] = INV_SQRT2
        a[2 * k + 1, n // 2 + k] = -INV_SQRT2
    return a


def _convt_border_masks(h, w):
    i = np.arange(h)[:, None]
    j = np.arange(w)[None, :]
    masks = []
    for dr in (-1, 0, 1):
        for dc in (-1, 0, 1):
            m = (i - dr >= 0) & (i - dr < h) & (j - dc >= 0) & (j - dc < w)
            masks.append(m.astype(np.float32).reshape(-1))
    return np.stack(masks)                       # (9, h*w)


_KY = {(0, 0): 1, (0, 1): 3, (1, -1): 0, (1, 0): 2}   # (phase, shift) -> ConvT tap


def _prep_ff(p, h, w, eps=1e-5):
    scale = p['bn_gamma'] / jnp.sqrt(p['bn_var'] + eps)
    shift = p['bn_beta'] - p['bn_mean'] * scale
    wt = p['wt'] * scale[None, :, None, None]          # BN folded into ConvT weight
    bfold = p['bt'] * scale + shift                    # BN folded into ConvT bias
    ffc, cout = wt.shape[0], wt.shape[1]
    wtap = jnp.zeros((9, 4 * cout, ffc), jnp.float32)
    for ti, dr in enumerate((-1, 0, 1)):
        for tj, dc in enumerate((-1, 0, 1)):
            k = ti * 3 + tj
            for dy in (0, 1):
                for dx in (0, 1):
                    if (dy, dr) in _KY and (dx, dc) in _KY:
                        ky, kx = _KY[(dy, dr)], _KY[(dx, dc)]
                        r0 = (dy * 2 + dx) * cout
                        wtap = wtap.at[k, r0:r0 + cout, :].set(wt[:, :, ky, kx].T)
    return {
        'w1t': p['w1'].T,
        'b1': p['b1'].reshape(-1, 1),
        'w2t': p['w2'].T,
        'b2': p['b2'].reshape(-1, 1),
        'wtap': wtap,
        'bout': jnp.tile(bfold, 4).reshape(-1, 1),
        'masks': jnp.asarray(_convt_border_masks(h, w)),
    }


def prepare_params(params, H, W):
    haar = []
    for l in range(4):
        haar.append(jnp.asarray(_haar_analysis_matrix(W // (2 ** l))))     # A_w
        haar.append(jnp.asarray(_haar_analysis_matrix(H // (2 ** l)).T))   # A_h^T
    return {
        'red_w': params['red_w'],
        'red_b': params['red_b'],
        'haar': haar,
        'ff1': _prep_ff(params['ff1'], H // 2, W // 2),
        'ff2': _prep_ff(params['ff2'], H // 4, W // 4),
        'ff3': _prep_ff(params['ff3'], H // 8, W // 8),
        'ff4': _prep_ff(params['ff4'], H // 16, W // 16),
    }


# ----------------------------------------------------------------------------
# Waveblock forward
# ----------------------------------------------------------------------------
def waveblock_forward(x, prep):
    B, C, H, W = x.shape
    x1r, x2r, x3r, x4r = reduce_dwt(x, prep['red_w'], prep['red_b'], prep['haar'])
    x1 = x1r.reshape(B, x1r.shape[1], -1)
    x2 = x2r.reshape(B, x2r.shape[1], -1)
    x3 = x3r.reshape(B, x3r.shape[1], -1)
    x4 = x4r.reshape(B, x4r.shape[1], -1)

    y4 = feedforward(x4, prep['ff4'], H // 16, W // 16)
    y3 = feedforward(jnp.concatenate([x3, y4], axis=1), prep['ff3'], H // 8, W // 8)
    y2 = feedforward(jnp.concatenate([x2, y3], axis=1), prep['ff2'], H // 4, W // 4)
    y1 = feedforward(jnp.concatenate([x1, y2], axis=1), prep['ff1'], H // 2, W // 2)
    return y1.reshape(B, -1, H, W)


# ----------------------------------------------------------------------------
# Deterministic synthetic parameters (shapes from Waveblock.__init__)
# ----------------------------------------------------------------------------
def init_params(key, mult=2, ff_channel=16, final_dim=16):
    half = final_dim // 2
    hid = final_dim * mult

    def ff_params(k, cin, cout):
        ks = jax.random.split(k, 6)
        return {
            'w1': jax.random.normal(ks[0], (cin, hid), jnp.float32) / jnp.sqrt(cin),
            'b1': 0.01 * jax.random.normal(ks[1], (hid,), jnp.float32),
            'w2': jax.random.normal(ks[2], (hid, ff_channel), jnp.float32) / jnp.sqrt(hid),
            'b2': 0.01 * jax.random.normal(ks[3], (ff_channel,), jnp.float32),
            'wt': jax.random.normal(ks[4], (ff_channel, cout, 4, 4), jnp.float32)
                  / jnp.sqrt(ff_channel * 16.0),
            'bt': 0.01 * jax.random.normal(ks[5], (cout,), jnp.float32),
            'bn_gamma': jnp.ones((cout,), jnp.float32),
            'bn_beta': jnp.zeros((cout,), jnp.float32),
            'bn_mean': jnp.zeros((cout,), jnp.float32),
            'bn_var': jnp.ones((cout,), jnp.float32),
        }

    k = jax.random.split(key, 6)
    return {
        'ff1': ff_params(k[0], final_dim + half, final_dim),
        'ff2': ff_params(k[1], final_dim + half, half),
        'ff3': ff_params(k[2], final_dim + half, half),
        'ff4': ff_params(k[3], final_dim, half),
        'red_w': jax.random.normal(k[4], (final_dim, final_dim // 4), jnp.float32)
                 / jnp.sqrt(final_dim),
        'red_b': 0.01 * jax.random.normal(k[5], (final_dim // 4,), jnp.float32),
    }


if __name__ == "__main__":
    key = jax.random.PRNGKey(0)
    kx, kp = jax.random.split(key)
    B, C, H, W = 2, 16, 32, 32            # C == final_dim; H, W divisible by 16 (4 DWT levels)
    x = jax.random.normal(kx, (B, C, H, W), jnp.float32)
    params = init_params(kp)
    prep = prepare_params(params, H, W)   # one-time weight folding / constants

    fwd = jax.jit(waveblock_forward)
    out = fwd(x, prep)
    out = jax.block_until_ready(out)
    assert out.shape == (B, 16, H, W), out.shape
    assert bool(jnp.all(jnp.isfinite(out)))
    print("KERNEL_OK")
</pallas_src>

<mosaic_0001>
module attributes {stable_mosaic.version = 11 : i64} {
  func.func @_ff_kernel(%arg0: i32, %arg1: memref<1x16x4xf32, #tpu.memory_space<vmem>>, %arg2: memref<32x16xf32, #tpu.memory_space<vmem>>, %arg3: memref<32x1xf32, #tpu.memory_space<vmem>>, %arg4: memref<16x32xf32, #tpu.memory_space<vmem>>, %arg5: memref<16x1xf32, #tpu.memory_space<vmem>>, %arg6: memref<9x32x16xf32, #tpu.memory_space<vmem>>, %arg7: memref<32x1xf32, #tpu.memory_space<vmem>>, %arg8: memref<9x4xf32, #tpu.memory_space<vmem>>, %arg9: memref<1x32x4xf32, #tpu.memory_space<vmem>>, %arg10: memref<16x10xf32, #tpu.memory_space<vmem>>) attributes {dimension_semantics = [#tpu.dimension_semantics<parallel>], iteration_bounds = array<i64: 2>, scalar_prefetch = 0 : i64, scratch_operands = 1 : i64, tpu.core_type = #tpu.core_type<tc>, window_params = [{transform_indices = @transform_0, window_bounds = array<i64: 1, 16, 4>}, {pipeline_mode = #tpu.pipeline_mode<synchronous>, transform_indices = @transform_1, window_bounds = array<i64: 32, 16>}, {pipeline_mode = #tpu.pipeline_mode<synchronous>, transform_indices = @transform_2, window_bounds = array<i64: 32, 1>}, {pipeline_mode = #tpu.pipeline_mode<synchronous>, transform_indices = @transform_3, window_bounds = array<i64: 16, 32>}, {pipeline_mode = #tpu.pipeline_mode<synchronous>, transform_indices = @transform_4, window_bounds = array<i64: 16, 1>}, {pipeline_mode = #tpu.pipeline_mode<synchronous>, transform_indices = @transform_5, window_bounds = array<i64: 9, 32, 16>}, {pipeline_mode = #tpu.pipeline_mode<synchronous>, transform_indices = @transform_6, window_bounds = array<i64: 32, 1>}, {pipeline_mode = #tpu.pipeline_mode<synchronous>, transform_indices = @transform_7, window_bounds = array<i64: 9, 4>}, {transform_indices = @transform_8, window_bounds = array<i64: 1, 32, 4>}]} {
    %c0 = arith.constant 0 : index
    %c0_0 = arith.constant 0 : index
    %c0_1 = arith.constant 0 : index
    %0 = vector.load %arg1[%c0, %c0_0, %c0_1] : memref<1x16x4xf32, #tpu.memory_space<vmem>>, vector<1x16x4xf32>
    %1 = vector.shape_cast %0 : vector<1x16x4xf32> to vector<16x4xf32>
    %c0_2 = arith.constant 0 : index
    %c0_3 = arith.constant 0 : index
    %2 = vector.load %arg2[%c0_2, %c0_3] : memref<32x16xf32, #tpu.memory_space<vmem>>, vector<32x16xf32>
    %cst = arith.constant dense<0.000000e+00> : vector<32x4xf32>
    %3 = tpu.matmul %2, %1, %cst {dimension_numbers = #tpu.dot_dimension_numbers<[1], [0], [0], [1], [0, 0, 1, 1], [], []>} : vector<32x16xf32>, vector<16x4xf32>, vector<32x4xf32> -> vector<32x4xf32>
    %c0_4 = arith.constant 0 : index
    %c0_5 = arith.constant 0 : index
    %4 = vector.load %arg3[%c0_4, %c0_5] : memref<32x1xf32, #tpu.memory_space<vmem>>, vector<32x1xf32>
    %5 = vector.broadcast %4 : vector<32x1xf32> to vector<32x4xf32>
    %6 = arith.addf %3, %5 : vector<32x4xf32>
    %cst_6 = arith.constant 5.000000e-01 : f32
    %7 = vector.broadcast %cst_6 : f32 to vector<32x4xf32>
    %8 = arith.mulf %7, %6 : vector<32x4xf32>
    %cst_7 = arith.constant 0.707106769 : f32
    %9 = vector.broadcast %cst_7 : f32 to vector<32x4xf32>
    %10 = arith.mulf %6, %9 : vector<32x4xf32>
    %cst_8 = arith.constant 0.000000e+00 : f32
    %11 = vector.broadcast %cst_8 : f32 to vector<32x4xf32>
    %12 = arith.cmpf oge, %10, %11 : vector<32x4xf32>
    %cst_9 = arith.constant 1.000000e+00 : f32
    %cst_10 = arith.constant -1.000000e+00 : f32
    %13 = vector.broadcast %cst_9 : f32 to vector<32x4xf32>
    %14 = vector.broadcast %cst_10 : f32 to vector<32x4xf32>
    %15 = arith.select %12, %13, %14 : vector<32x4xi1>, vector<32x4xf32>
    %16 = math.absf %10 : vector<32x4xf32>
    %cst_11 = arith.constant 0.327591091 : f32
    %17 = vector.broadcast %cst_11 : f32 to vector<32x4xf32>
    %18 = arith.mulf %17, %16 : vector<32x4xf32>
    %cst_12 = arith.constant 1.000000e+00 : f32
    %19 = vector.broadcast %cst_12 : f32 to vector<32x4xf32>
    %20 = arith.addf %19, %18 : vector<32x4xf32>
    %cst_13 = arith.constant 1.000000e+00 : f32
    %21 = vector.broadcast %cst_13 : f32 to vector<32x4xf32>
    %22 = arith.divf %21, %20 : vector<32x4xf32>
    %cst_14 = arith.constant 1.06140542 : f32
    %23 = vector.broadcast %cst_14 : f32 to vector<32x4xf32>
    %24 = arith.mulf %22, %23 : vector<32x4xf32>
    %cst_15 = arith.constant -1.45315206 : f32
    %25 = vector.broadcast %cst_15 : f32 to vector<32x4xf32>
    %26 = arith.addf %25, %24 : vector<32x4xf32>
    %27 = arith.mulf %22, %26 : vector<32x4xf32>
    %cst_16 = arith.constant 1.42141378 : f32
    %28 = vector.broadcast %cst_16 : f32 to vector<32x4xf32>
    %29 = arith.addf %28, %27 : vector<32x4xf32>
    %30 = arith.mulf %22, %29 : vector<32x4xf32>
    %cst_17 = arith.constant -0.284496725 : f32
    %31 = vector.broadcast %cst_17 : f32 to vector<32x4xf32>
    %32 = arith.addf %31, %30 : vector<32x4xf32>
    %33 = arith.mulf %22, %32 : vector<32x4xf32>
    %cst_18 = arith.constant 0.254829586 : f32
    %34 = vector.broadcast %cst_18 : f32 to vector<32x4xf32>
    %35 = arith.addf %34, %33 : vector<32x4xf32>
    %36 = arith.mulf %22, %35 : vector<32x4xf32>
    %cst_19 = arith.constant 0.000000e+00 : f32
    %37 = vector.broadcast %cst_19 : f32 to vector<32x4xf32>
    %38 = arith.subf %37, %16 : vector<32x4xf32>
    %39 = arith.mulf %38, %16 : vector<32x4xf32>
    %40 = math.exp %39 : vector<32x4xf32>
    %41 = arith.mulf %36, %40 : vector<32x4xf32>
    %cst_20 = arith.constant 1.000000e+00 : f32
    %42 = vector.broadcast %cst_20 : f32 to vector<32x4xf32>
    %43 = arith.subf %42, %41 : vector<32x4xf32>
    %44 = arith.mulf %15, %43 : vector<32x4xf32>
    %cst_21 = arith.constant 1.000000e+00 : f32
    %45 = vector.broadcast %cst_21 : f32 to vector<32x4xf32>
    %46 = arith.addf %45, %44 : vector<32x4xf32>
    %47 = arith.mulf %8, %46 : vector<32x4xf32>
    %c0_22 = arith.constant 0 : index
    %c0_23 = arith.constant 0 : index
    %48 = vector.load %arg4[%c0_22, %c0_23] : memref<16x32xf32, #tpu.memory_space<vmem>>, vector<16x32xf32>
    %cst_24 = arith.constant dense<0.000000e+00> : vector<16x4xf32>
    %49 = tpu.matmul %48, %47, %cst_24 {dimension_numbers = #tpu.dot_dimension_numbers<[1], [0], [0], [1], [0, 0, 1, 1], [], []>} : vector<16x32xf32>, vector<32x4xf32>, vector<16x4xf32> -> vector<16x4xf32>
    %c0_25 = arith.constant 0 : index
    %c0_26 = arith.constant 0 : index
    %50 = vector.load %arg5[%c0_25, %c0_26] : memref<16x1xf32, #tpu.memory_space<vmem>>, vector<16x1xf32>
    %51 = vector.broadcast %50 : vector<16x1xf32> to vector<16x4xf32>
    %52 = arith.addf %49, %51 : vector<16x4xf32>
    %cst_27 = arith.constant 0.000000e+00 : f32
    %53 = vector.broadcast %cst_27 : f32 to vector<16x10xf32>
    %c0_28 = arith.constant 0 : index
    %c0_29 = arith.constant 0 : index
    %54 = vector.load %arg10[%c0_28, %c0_29] : memref<16x10xf32, #tpu.memory_space<vmem>>, vector<16x10xf32>
    tpu.vector_store %arg10[%c0_28, %c0_29], %53 {strides = array<i32>} : memref<16x10xf32, #tpu.memory_space<vmem>>, vector<16x10xf32>,
    %c0_30 = arith.constant 0 : index
    %c3 = arith.constant 3 : index
    %55 = vector.load %arg10[%c0_30, %c3] : memref<16x10xf32, #tpu.memory_space<vmem>>, vector<16x4xf32>
    tpu.vector_store %arg10[%c0_30, %c3], %52 {strides = array<i32>} : memref<16x10xf32, #tpu.memory_space<vmem>>, vector<16x4xf32>,
    %c0_31 = arith.constant 0 : index
    %c0_32 = arith.constant 0 : index
    %56 = vector.load %arg7[%c0_31, %c0_32] : memref<32x1xf32, #tpu.memory_space<vmem>>, vector<32x1xf32>
    %cst_33 = arith.constant 0.000000e+00 : f32
    %57 = vector.broadcast %cst_33 : f32 to vector<32x4xf32>
    %58 = vector.broadcast %56 : vector<32x1xf32> to vector<32x4xf32>
    %59 = arith.addf %58, %57 : vector<32x4xf32>
    %c0_34 = arith.constant 0 : index
    %c6 = arith.constant 6 : index
    %60 = vector.load %arg10[%c0_34, %c6] : memref<16x10xf32, #tpu.memory_space<vmem>>, vector<16x4xf32>
    %c0_35 = arith.constant 0 : index
    %c0_36 = arith.constant 0 : index
    %61 = vector.load %arg8[%c0_35, %c0_36] : memref<9x4xf32, #tpu.memory_space<vmem>>, vector<1x4xf32>
    %62 = vector.broadcast %61 : vector<1x4xf32> to vector<16x4xf32>
    %63 = arith.mulf %60, %62 : vector<16x4xf32>
    %c0_37 = arith.constant 0 : index
    %c0_38 = arith.constant 0 : index
    %c0_39 = arith.constant 0 : index
    %64 = vector.load %arg6[%c0_37, %c0_38, %c0_39] : memref<9x32x16xf32, #tpu.memory_space<vmem>>, vector<1x32x16xf32>
    %65 = vector.shape_cast %64 : vector<1x32x16xf32> to vector<32x16xf32>
    %cst_40 = arith.constant dense<0.000000e+00> : vector<32x4xf32>
    %66 = tpu.matmul %65, %63, %cst_40 {dimension_numbers = #tpu.dot_dimension_numbers<[1], [0], [0], [1], [0, 0, 1, 1], [], []>} : vector<32x16xf32>, vector<16x4xf32>, vector<32x4xf32> -> vector<32x4xf32>
    %67 = arith.addf %59, %66 : vector<32x4xf32>
    %c0_41 = arith.constant 0 : index
    %c5 = arith.constant 5 : index
    %68 = vector.load %arg10[%c0_41, %c5] : memref<16x10xf32, #tpu.memory_space<vmem>>, vector<16x4xf32>
    %c1 = arith.constant 1 : index
    %c0_42 = arith.constant 0 : index
    %69 = vector.load %arg8[%c1, %c0_42] : memref<9x4xf32, #tpu.memory_space<vmem>>, vector<1x4xf32>
    %70 = vector.broadcast %69 : vector<1x4xf32> to vector<16x4xf32>
    %71 = arith.mulf %68, %70 : vector<16x4xf32>
    %c1_43 = arith.constant 1 : index
    %c0_44 = arith.constant 0 : index
    %c0_45 = arith.constant 0 : index
    %72 = vector.load %arg6[%c1_43, %c0_44, %c0_45] : memref<9x32x16xf32, #tpu.memory_space<vmem>>, vector<1x32x16xf32>
    %73 = vector.shape_cast %72 : vector<1x32x16xf32> to vector<32x16xf32>
    %cst_46 = arith.constant dense<0.000000e+00> : vector<32x4xf32>
    %74 = tpu.matmul %73, %71, %cst_46 {dimension_numbers = #tpu.dot_dimension_numbers<[1], [0], [0], [1], [0, 0, 1, 1], [], []>} : vector<32x16xf32>, vector<16x4xf32>, vector<32x4xf32> -> vector<32x4xf32>
    %75 = arith.addf %67, %74 : vector<32x4xf32>
    %c0_47 = arith.constant 0 : index
    %c4 = arith.constant 4 : index
    %76 = vector.load %arg10[%c0_47, %c4] : memref<16x10xf32, #tpu.memory_space<vmem>>, vector<16x4xf32>
    %c2 = arith.constant 2 : index
    %c0_48 = arith.constant 0 : index
    %77 = vector.load %arg8[%c2, %c0_48] : memref<9x4xf32, #tpu.memory_space<vmem>>, vector<1x4xf32>
    %78 = vector.broadcast %77 : vector<1x4xf32> to vector<16x4xf32>
    %79 = arith.mulf %76, %78 : vector<16x4xf32>
    %c2_49 = arith.constant 2 : index
    %c0_50 = arith.constant 0 : index
    %c0_51 = arith.constant 0 : index
    %80 = vector.load %arg6[%c2_49, %c0_50, %c0_51] : memref<9x32x16xf32, #tpu.memory_space<vmem>>, vector<1x32x16xf32>
    %81 = vector.shape_cast %80 : vector<1x32x16xf32> to vector<32x16xf32>
    %cst_52 = arith.constant dense<0.000000e+00> : vector<32x4xf32>
    %82 = tpu.matmul %81, %79, %cst_52 {dimension_numbers = #tpu.dot_dimension_numbers<[1], [0], [0], [1], [0, 0, 1, 1], [], []>} : vector<32x16xf32>, vector<16x4xf32>, vector<32x4xf32> -> vector<32x4xf32>
    %83 = arith.addf %75, %82 : vector<32x4xf32>
    %c0_53 = arith.constant 0 : index
    %c4_54 = arith.constant 4 : index
    %84 = vector.load %arg10[%c0_53, %c4_54] : memref<16x10xf32, #tpu.memory_space<vmem>>, vector<16x4xf32>
    %c3_55 = arith.constant 3 : index
    %c0_56 = arith.constant 0 : index
    %85 = vector.load %arg8[%c3_55, %c0_56] : memref<9x4xf32, #tpu.memory_space<vmem>>, vector<1x4xf32>
    %86 = vector.broadcast %85 : vector<1x4xf32> to vector<16x4xf32>
    %87 = arith.mulf %84, %86 : vector<16x4xf32>
    %c3_57 = arith.constant 3 : index
    %c0_58 = arith.constant 0 : index
    %c0_59 = arith.constant 0 : index
    %88 = vector.load %arg6[%c3_57, %c0_58, %c0_59] : memref<9x32x16xf32, #tpu.memory_space<vmem>>, vector<1x32x16xf32>
    %89 = vector.shape_cast %88 : vector<1x32x16xf32> to vector<32x16xf32>
    %cst_60 = arith.constant dense<0.000000e+00> : vector<32x4xf32>
    %90 = tpu.matmul %89, %87, %cst_60 {dimension_numbers = #tpu.dot_dimension_numbers<[1], [0], [0], [1], [0, 0, 1, 1], [], []>} : vector<32x16xf32>, vector<16x4xf32>, vector<32x4xf32> -> vector<32x4xf32>
    %91 = arith.addf %83, %90 : vector<32x4xf32>
    %c0_61 = arith.constant 0 : index
    %c3_62 = arith.constant 3 : index
    %92 = vector.load %arg10[%c0_61, %c3_62] : memref<16x10xf32, #tpu.memory_space<vmem>>, vector<16x4xf32>
    %c4_63 = arith.constant 4 : index
    %c0_64 = arith.constant 0 : index
    %93 = vector.load %arg8[%c4_63, %c0_64] : memref<9x4xf32, #tpu.memory_space<vmem>>, vector<1x4xf32>
    %94 = vector.broadcast %93 : vector<1x4xf32> to vector<16x4xf32>
    %95 = arith.mulf %92, %94 : vector<16x4xf32>
    %c4_65 = arith.constant 4 : index
    %c0_66 = arith.constant 0 : index
    %c0_67 = arith.constant 0 : index
    %96 = vector.load %arg6[%c4_65, %c0_66, %c0_67] : memref<9x32x16xf32, #tpu.memory_space<vmem>>, vector<1x32x16xf32>
    %97 = vector.shape_cast %96 : vector<1x32x16xf32> to vector<32x16xf32>
    %cst_68 = arith.constant dense<0.000000e+00> : vector<32x4xf32>
    %98 = tpu.matmul %97, %95, %cst_68 {dimension_numbers = #tpu.dot_dimension_numbers<[1], [0], [0], [1], [0, 0, 1, 1], [], []>} : vector<32x16xf32>, vector<16x4xf32>, vector<32x4xf32> -> vector<32x4xf32>
    %99 = arith.addf %91, %98 : vector<32x4xf32>
    %c0_69 = arith.constant 0 : index
    %c2_70 = arith.constant 2 : index
    %100 = vector.load %arg10[%c0_69, %c2_70] : memref<16x10xf32, #tpu.memory_space<vmem>>, vector<16x4xf32>
    %c5_71 = arith.constant 5 : index
    %c0_72 = arith.constant 0 : index
    %101 = vector.load %arg8[%c5_71, %c0_72] : memref<9x4xf32, #tpu.memory_space<vmem>>, vector<1x4xf32>
    %102 = vector.broadcast %101 : vector<1x4xf32> to vector<16x4xf32>
    %103 = arith.mulf %100, %102 : vector<16x4xf32>
    %c5_73 = arith.constant 5 : index
    %c0_74 = arith.constant 0 : index
    %c0_75 = arith.constant 0 : index
    %104 = vector.load %arg6[%c5_73, %c0_74, %c0_75] : memref<9x32x16xf32, #tpu.memory_space<vmem>>, vector<1x32x16xf32>
    %105 = vector.shape_cast %104 : vector<1x32x16xf32> to vector<32x16xf32>
    %cst_76 = arith.constant dense<0.000000e+00> : vector<32x4xf32>
    %106 = tpu.matmul %105, %103, %cst_76 {dimension_numbers = #tpu.dot_dimension_numbers<[1], [0], [0], [1], [0, 0, 1, 1], [], []>} : vector<32x16xf32>, vector<16x4xf32>, vector<32x4xf32> -> vector<32x4xf32>
    %107 = arith.addf %99, %106 : vector<32x4xf32>
    %c0_77 = arith.constant 0 : index
    %c2_78 = arith.constant 2 : index
    %108 = vector.load %arg10[%c0_77, %c2_78] : memref<16x10xf32, #tpu.memory_space<vmem>>, vector<16x4xf32>
    %c6_79 = arith.constant 6 : index
    %c0_80 = arith.constant 0 : index
    %109 = vector.load %arg8[%c6_79, %c0_80] : memref<9x4xf32, #tpu.memory_space<vmem>>, vector<1x4xf32>
    %110 = vector.broadcast %109 : vector<1x4xf32> to vector<16x4xf32>
    %111 = arith.mulf %108, %110 : vector<16x4xf32>
    %c6_81 = arith.constant 6 : index
    %c0_82 = arith.constant 0 : index
    %c0_83 = arith.constant 0 : index
    %112 = vector.load %arg6[%c6_81, %c0_82, %c0_83] : memref<9x32x16xf32, #tpu.memory_space<vmem>>, vector<1x32x16xf32>
    %113 = vector.shape_cast %112 : vector<1x32x16xf32> to vector<32x16xf32>
    %cst_84 = arith.constant dense<0.000000e+00> : vector<32x4xf32>
    %114 = tpu.matmul %113, %111, %cst_84 {dimension_numbers = #tpu.dot_dimension_numbers<[1], [0], [0], [1], [0, 0, 1, 1], [], []>} : vector<32x16xf32>, vector<16x4xf32>, vector<32x4xf32> -> vector<32x4xf32>
    %115 = arith.addf %107, %114 : vector<32x4xf32>
    %c0_85 = arith.constant 0 : index
    %c1_86 = arith.constant 1 : index
    %116 = vector.load %arg10[%c0_85, %c1_86] : memref<16x10xf32, #tpu.memory_space<vmem>>, vector<16x4xf32>
    %c7 = arith.constant 7 : index
    %c0_87 = arith.constant 0 : index
    %117 = vector.load %arg8[%c7, %c0_87] : memref<9x4xf32, #tpu.memory_space<vmem>>, vector<1x4xf32>
    %118 = vector.broadcast %117 : vector<1x4xf32> to vector<16x4xf32>
    %119 = arith.mulf %116, %118 : vector<16x4xf32>
    %c7_88 = arith.constant 7 : index
    %c0_89 = arith.constant 0 : index
    %c0_90 = arith.constant 0 : index
    %120 = vector.load %arg6[%c7_88, %c0_89, %c0_90] : memref<9x32x16xf32, #tpu.memory_space<vmem>>, vector<1x32x16xf32>
    %121 = vector.shape_cast %120 : vector<1x32x16xf32> to vector<32x16xf32>
    %cst_91 = arith.constant dense<0.000000e+00> : vector<32x4xf32>
    %122 = tpu.matmul %121, %119, %cst_91 {dimension_numbers = #tpu.dot_dimension_numbers<[1], [0], [0], [1], [0, 0, 1, 1], [], []>} : vector<32x16xf32>, vector<16x4xf32>, vector<32x4xf32> -> vector<32x4xf32>
    %123 = arith.addf %115, %122 : vector<32x4xf32>
    %c0_92 = arith.constant 0 : index
    %c0_93 = arith.constant 0 : index
    %124 = vector.load %arg10[%c0_92, %c0_93] : memref<16x10xf32, #tpu.memory_space<vmem>>, vector<16x4xf32>
    %c8 = arith.constant 8 : index
    %c0_94 = arith.constant 0 : index
    %125 = vector.load %arg8[%c8, %c0_94] : memref<9x4xf32, #tpu.memory_space<vmem>>, vector<1x4xf32>
    %126 = vector.broadcast %125 : vector<1x4xf32> to vector<16x4xf32>
    %127 = arith.mulf %124, %126 : vector<16x4xf32>
    %c8_95 = arith.constant 8 : index
    %c0_96 = arith.constant 0 : index
    %c0_97 = arith.constant 0 : index
    %128 = vector.load %arg6[%c8_95, %c0_96, %c0_97] : memref<9x32x16xf32, #tpu.memory_space<vmem>>, vector<1x32x16xf32>
    %129 = vector.shape_cast %128 : vector<1x32x16xf32> to vector<32x16xf32>
    %cst_98 = arith.constant dense<0.000000e+00> : vector<32x4xf32>
    %130 = tpu.matmul %129, %127, %cst_98 {dimension_numbers = #tpu.dot_dimension_numbers<[1], [0], [0], [1], [0, 0, 1, 1], [], []>} : vector<32x16xf32>, vector<16x4xf32>, vector<32x4xf32> -> vector<32x4xf32>
    %131 = arith.addf %123, %130 : vector<32x4xf32>
    %c0_99 = arith.constant 0 : index
    %c0_100 = arith.constant 0 : index
    %c0_101 = arith.constant 0 : index
    %132 = vector.load %arg9[%c0_99, %c0_100, %c0_101] : memref<1x32x4xf32, #tpu.memory_space<vmem>>, vector<1x32x4xf32>
    %133 = vector.shape_cast %132 : vector<1x32x4xf32> to vector<32x4xf32>
    %134 = vector.shape_cast %131 : vector<32x4xf32> to vector<1x32x4xf32>
    tpu.vector_store %arg9[%c0_99, %c0_100, %c0_101], %134 {strides = array<i32>} : memref<1x32x4xf32, #tpu.memory_space<vmem>>, vector<1x32x4xf32>,
    return
  }
  func.func @transform_0(%arg0: i32) -> (i32, i32, i32) {
    %c0_i32 = arith.constant 0 : i32
    %c0_i32_0 = arith.constant 0 : i32
    %c0_i32_1 = arith.constant 0 : i32
    return %arg0, %c0_i32, %c0_i32_0 : i32, i32, i32
  }
  func.func @transform_1(%arg0: i32) -> (i32, i32) {
    %c0_i32 = arith.constant 0 : i32
    %c0_i32_0 = arith.constant 0 : i32
    %c0_i32_1 = arith.constant 0 : i32
    return %c0_i32, %c0_i32_0 : i32, i32
  }
  func.func @transform_2(%arg0: i32) -> (i32, i32) {
    %c0_i32 = arith.constant 0 : i32
    %c0_i32_0 = arith.constant 0 : i32
    %c0_i32_1 = arith.constant 0 : i32
    return %c0_i32, %c0_i32_0 : i32, i32
  }
  func.func @transform_3(%arg0: i32) -> (i32, i32) {
    %c0_i32 = arith.constant 0 : i32
    %c0_i32_0 = arith.constant 0 : i32
    %c0_i32_1 = arith.constant 0 : i32
    return %c0_i32, %c0_i32_0 : i32, i32
  }
  func.func @transform_4(%arg0: i32) -> (i32, i32) {
    %c0_i32 = arith.constant 0 : i32
    %c0_i32_0 = arith.constant 0 : i32
    %c0_i32_1 = arith.constant 0 : i32
    return %c0_i32, %c0_i32_0 : i32, i32
  }
  func.func @transform_5(%arg0: i32) -> (i32, i32, i32) {
    %c0_i32 = arith.constant 0 : i32
    %c0_i32_0 = arith.constant 0 : i32
    %c0_i32_1 = arith.constant 0 : i32
    %c0_i32_2 = arith.constant 0 : i32
    return %c0_i32, %c0_i32_0, %c0_i32_1 : i32, i32, i32
  }
  func.func @transform_6(%arg0: i32) -> (i32, i32) {
    %c0_i32 = arith.constant 0 : i32
    %c0_i32_0 = arith.constant 0 : i32
    %c0_i32_1 = arith.constant 0 : i32
    return %c0_i32, %c0_i32_0 : i32, i32
  }
  func.func @transform_7(%arg0: i32) -> (i32, i32) {
    %c0_i32 = arith.constant 0 : i32
    %c0_i32_0 = arith.constant 0 : i32
    %c0_i32_1 = arith.constant 0 : i32
    return %c0_i32, %c0_i32_0 : i32, i32
  }
  func.func @transform_8(%arg0: i32) -> (i32, i32, i32) {
    %c0_i32 = arith.constant 0 : i32
    %c0_i32_0 = arith.constant 0 : i32
    %c0_i32_1 = arith.constant 0 : i32
    return %arg0, %c0_i32, %c0_i32_0 : i32, i32, i32
  }
}

module attributes {stable_mosaic.version = 11 : i64} {
  func.func @_reduce_dwt_kernel(%arg0: i32, %arg1: memref<1x16x32x32xf32, #tpu.memory_space<vmem>>, %arg2: memref<16x4xf32, #tpu.memory_space<smem>>, %arg3: memref<4xf32, #tpu.memory_space<smem>>, %arg4: memref<32x32xf32, #tpu.memory_space<vmem>>, %arg5: memref<32x32xf32, #tpu.memory_space<vmem>>, %arg6: memref<16x16xf32, #tpu.memory_space<vmem>>, %arg7: memref<16x16xf32, #tpu.memory_space<vmem>>, %arg8: memref<8x8xf32, #tpu.memory_space<vmem>>, %arg9: memref<8x8xf32, #tpu.memory_space<vmem>>, %arg10: memref<4x4xf32, #tpu.memory_space<vmem>>, %arg11: memref<4x4xf32, #tpu.memory_space<vmem>>, %arg12: memref<1x16x16x16xf32, #tpu.memory_space<vmem>>, %arg13: memref<1x16x8x8xf32, #tpu.memory_space<vmem>>, %arg14: memref<1x16x4x4xf32, #tpu.memory_space<vmem>>, %arg15: memref<1x16x2x2xf32, #tpu.memory_space<vmem>>) attributes {dimension_semantics = [#tpu.dimension_semantics<parallel>], iteration_bounds = array<i64: 2>, scalar_prefetch = 0 : i64, scratch_operands = 0 : i64, tpu.core_type = #tpu.core_type<tc>, window_params = [{transform_indices = @transform_0, window_bounds = array<i64: 1, 16, 32, 32>}, {transform_indices = @transform_1, window_bounds = array<i64: 16, 4>}, {transform_indices = @transform_2, window_bounds = array<i64: 4>}, {pipeline_mode = #tpu.pipeline_mode<synchronous>, transform_indices = @transform_3, window_bounds = array<i64: 32, 32>}, {pipeline_mode = #tpu.pipeline_mode<synchronous>, transform_indices = @transform_4, window_bounds = array<i64: 32, 32>}, {pipeline_mode = #tpu.pipeline_mode<synchronous>, transform_indices = @transform_5, window_bounds = array<i64: 16, 16>}, {pipeline_mode = #tpu.pipeline_mode<synchronous>, transform_indices = @transform_6, window_bounds = array<i64: 16, 16>}, {pipeline_mode = #tpu.pipeline_mode<synchronous>, transform_indices = @transform_7, window_bounds = array<i64: 8, 8>}, {pipeline_mode = #tpu.pipeline_mode<synchronous>, transform_indices = @transform_8, window_bounds = array<i64: 8, 8>}, {pipeline_mode = #tpu.pipeline_mode<synchronous>, transform_indices = @transform_9, window_bounds = array<i64: 4, 4>}, {pipeline_mode = #tpu.pipeline_mode<synchronous>, transform_indices = @transform_10, window_bounds = array<i64: 4, 4>}, {transform_indices = @transform_11, window_bounds = array<i64: 1, 16, 16, 16>}, {transform_indices = @transform_12, window_bounds = array<i64: 1, 16, 8, 8>}, {transform_indices = @transform_13, window_bounds = array<i64: 1, 16, 4, 4>}, {transform_indices = @transform_14, window_bounds = array<i64: 1, 16, 2, 2>}]} {
    %c0 = arith.constant 0 : index
    %c0_0 = arith.constant 0 : index
    %0 = vector.load %arg4[%c0, %c0_0] : memref<32x32xf32, #tpu.memory_space<vmem>>, vector<32x32xf32>
    %c0_1 = arith.constant 0 : index
    %c0_2 = arith.constant 0 : index
    %1 = vector.load %arg5[%c0_1, %c0_2] : memref<32x32xf32, #tpu.memory_space<vmem>>, vector<32x32xf32>
    %c0_3 = arith.constant 0 : index
    %c0_4 = arith.constant 0 : index
    %2 = vector.load %arg6[%c0_3, %c0_4] : memref<16x16xf32, #tpu.memory_space<vmem>>, vector<16x16xf32>
    %c0_5 = arith.constant 0 : index
    %c0_6 = arith.constant 0 : index
    %3 = vector.load %arg7[%c0_5, %c0_6] : memref<16x16xf32, #tpu.memory_space<vmem>>, vector<16x16xf32>
    %c0_7 = arith.constant 0 : index
    %c0_8 = arith.constant 0 : index
    %4 = vector.load %arg8[%c0_7, %c0_8] : memref<8x8xf32, #tpu.memory_space<vmem>>, vector<8x8xf32>
    %c0_9 = arith.constant 0 : index
    %c0_10 = arith.constant 0 : index
    %5 = vector.load %arg9[%c0_9, %c0_10] : memref<8x8xf32, #tpu.memory_space<vmem>>, vector<8x8xf32>
    %c0_11 = arith.constant 0 : index
    %c0_12 = arith.constant 0 : index
    %6 = vector.load %arg10[%c0_11, %c0_12] : memref<4x4xf32, #tpu.memory_space<vmem>>, vector<4x4xf32>
    %c0_13 = arith.constant 0 : index
    %c0_14 = arith.constant 0 : index
    %7 = vector.load %arg11[%c0_13, %c0_14] : memref<4x4xf32, #tpu.memory_space<vmem>>, vector<4x4xf32>
    %cst = arith.constant 0.000000e+00 : f32
    %8 = vector.broadcast %cst : f32 to vector<32x32xf32>
    %c0_15 = arith.constant 0 : index
    %c0_16 = arith.constant 0 : index
    %9 = memref.load %arg2[%c0_15, %c0_16] : memref<16x4xf32, #tpu.memory_space<smem>>
    %c0_17 = arith.constant 0 : index
    %c0_18 = arith.constant 0 : index
    %c0_19 = arith.constant 0 : index
    %c0_20 = arith.constant 0 : index
    %10 = vector.load %arg1[%c0_17, %c0_18, %c0_19, %c0_20] : memref<1x16x32x32xf32, #tpu.memory_space<vmem>>, vector<1x1x32x32xf32>
    %11 = vector.shape_cast %10 : vector<1x1x32x32xf32> to vector<32x32xf32>
    %12 = vector.broadcast %9 : f32 to vector<32x32xf32>
    %13 = arith.mulf %12, %11 : vector<32x32xf32>
    %14 = arith.addf %8, %13 : vector<32x32xf32>
    %c1 = arith.constant 1 : index
    %c0_21 = arith.constant 0 : index
    %15 = memref.load %arg2[%c1, %c0_21] : memref<16x4xf32, #tpu.memory_space<smem>>
    %c0_22 = arith.constant 0 : index
    %c1_23 = arith.constant 1 : index
    %c0_24 = arith.constant 0 : index
    %c0_25 = arith.constant 0 : index
    %16 = vector.load %arg1[%c0_22, %c1_23, %c0_24, %c0_25] : memref<1x16x32x32xf32, #tpu.memory_space<vmem>>, vector<1x1x32x32xf32>
    %17 = vector.shape_cast %16 : vector<1x1x32x32xf32> to vector<32x32xf32>
    %18 = vector.broadcast %15 : f32 to vector<32x32xf32>
    %19 = arith.mulf %18, %17 : vector<32x32xf32>
    %20 = arith.addf %14, %19 : vector<32x32xf32>
    %c2 = arith.constant 2 : index
    %c0_26 = arith.constant 0 : index
    %21 = memref.load %arg2[%c2, %c0_26] : memref<16x4xf32, #tpu.memory_space<smem>>
    %c0_27 = arith.constant 0 : index
    %c2_28 = arith.constant 2 : index
    %c0_29 = arith.constant 0 : index
    %c0_30 = arith.constant 0 : index
    %22 = vector.load %arg1[%c0_27, %c2_28, %c0_29, %c0_30] : memref<1x16x32x32xf32, #tpu.memory_space<vmem>>, vector<1x1x32x32xf32>
    %23 = vector.shape_cast %22 : vector<1x1x32x32xf32> to vector<32x32xf32>
    %24 = vector.broadcast %21 : f32 to vector<32x32xf32>
    %25 = arith.mulf %24, %23 : vector<32x32xf32>
    %26 = arith.addf %20, %25 : vector<32x32xf32>
    %c3 = arith.constant 3 : index
    %c0_31 = arith.constant 0 : index
    %27 = memref.load %arg2[%c3, %c0_31] : memref<16x4xf32, #tpu.memory_space<smem>>
    %c0_32 = arith.constant 0 : index
    %c3_33 = arith.constant 3 : index
    %c0_34 = arith.constant 0 : index
    %c0_35 = arith.constant 0 : index
    %28 = vector.load %arg1[%c0_32, %c3_33, %c0_34, %c0_35] : memref<1x16x32x32xf32, #tpu.memory_space<vmem>>, vector<1x1x32x32xf32>
    %29 = vector.shape_cast %28 : vector<1x1x32x32xf32> to vector<32x32xf32>
    %30 = vector.broadcast %27 : f32 to vector<32x32xf32>
    %31 = arith.mulf %30, %29 : vector<32x32xf32>
    %32 = arith.addf %26, %31 : vector<32x32xf32>
    %c4 = arith.constant 4 : index
    %c0_36 = arith.constant 0 : index
    %33 = memref.load %arg2[%c4, %c0_36] : memref<16x4xf32, #tpu.memory_space<smem>>
    %c0_37 = arith.constant 0 : index
    %c4_38 = arith.constant 4 : index
    %c0_39 = arith.constant 0 : index
    %c0_40 = arith.constant 0 : index
    %34 = vector.load %arg1[%c0_37, %c4_38, %c0_39, %c0_40] : memref<1x16x32x32xf32, #tpu.memory_space<vmem>>, vector<1x1x32x32xf32>
    %35 = vector.shape_cast %34 : vector<1x1x32x32xf32> to vector<32x32xf32>
    %36 = vector.broadcast %33 : f32 to vector<32x32xf32>
    %37 = arith.mulf %36, %35 : vector<32x32xf32>
    %38 = arith.addf %32, %37 : vector<32x32xf32>
    %c5 = arith.constant 5 : index
    %c0_41 = arith.constant 0 : index
    %39 = memref.load %arg2[%c5, %c0_41] : memref<16x4xf32, #tpu.memory_space<smem>>
    %c0_42 = arith.constant 0 : index
    %c5_43 = arith.constant 5 : index
    %c0_44 = arith.constant 0 : index
    %c0_45 = arith.constant 0 : index
    %40 = vector.load %arg1[%c0_42, %c5_43, %c0_44, %c0_45] : memref<1x16x32x32xf32, #tpu.memory_space<vmem>>, vector<1x1x32x32xf32>
    %41 = vector.shape_cast %40 : vector<1x1x32x32xf32> to vector<32x32xf32>
    %42 = vector.broadcast %39 : f32 to vector<32x32xf32>
    %43 = arith.mulf %42, %41 : vector<32x32xf32>
    %44 = arith.addf %38, %43 : vector<32x32xf32>
    %c6 = arith.constant 6 : index
    %c0_46 = arith.constant 0 : index
    %45 = memref.load %arg2[%c6, %c0_46] : memref<16x4xf32, #tpu.memory_space<smem>>
    %c0_47 = arith.constant 0 : index
    %c6_48 = arith.constant 6 : index
    %c0_49 = arith.constant 0 : index
    %c0_50 = arith.constant 0 : index
    %46 = vector.load %arg1[%c0_47, %c6_48, %c0_49, %c0_50] : memref<1x16x32x32xf32, #tpu.memory_space<vmem>>, vector<1x1x32x32xf32>
    %47 = vector.shape_cast %46 : vector<1x1x32x32xf32> to vector<32x32xf32>
    %48 = vector.broadcast %45 : f32 to vector<32x32xf32>
    %49 = arith.mulf %48, %47 : vector<32x32xf32>
    %50 = arith.addf %44, %49 : vector<32x32xf32>
    %c7 = arith.constant 7 : index
    %c0_51 = arith.constant 0 : index
    %51 = memref.load %arg2[%c7, %c0_51] : memref<16x4xf32, #tpu.memory_space<smem>>
    %c0_52 = arith.constant 0 : index
    %c7_53 = arith.constant 7 : index
    %c0_54 = arith.constant 0 : index
    %c0_55 = arith.constant 0 : index
    %52 = vector.load %arg1[%c0_52, %c7_53, %c0_54, %c0_55] : memref<1x16x32x32xf32, #tpu.memory_space<vmem>>, vector<1x1x32x32xf32>
    %53 = vector.shape_cast %52 : vector<1x1x32x32xf32> to vector<32x32xf32>
    %54 = vector.broadcast %51 : f32 to vector<32x32xf32>
    %55 = arith.mulf %54, %53 : vector<32x32xf32>
    %56 = arith.addf %50, %55 : vector<32x32xf32>
    %c8 = arith.constant 8 : index
    %c0_56 = arith.constant 0 : index
    %57 = memref.load %arg2[%c8, %c0_56] : memref<16x4xf32, #tpu.memory_space<smem>>
    %c0_57 = arith.constant 0 : index
    %c8_58 = arith.constant 8 : index
    %c0_59 = arith.constant 0 : index
    %c0_60 = arith.constant 0 : index
    %58 = vector.load %arg1[%c0_57, %c8_58, %c0_59, %c0_60] : memref<1x16x32x32xf32, #tpu.memory_space<vmem>>, vector<1x1x32x32xf32>
    %59 = vector.shape_cast %58 : vector<1x1x32x32xf32> to vector<32x32xf32>
    %60 = vector.broadcast %57 : f32 to vector<32x32xf32>
    %61 = arith.mulf %60, %59 : vector<32x32xf32>
    %62 = arith.addf %56, %61 : vector<32x32xf32>
    %c9 = arith.constant 9 : index
    %c0_61 = arith.constant 0 : index
    %63 = memref.load %arg2[%c9, %c0_61] : memref<16x4xf32, #tpu.memory_space<smem>>
    %c0_62 = arith.constant 0 : index
    %c9_63 = arith.constant 9 : index
    %c0_64 = arith.constant 0 : index
    %c0_65 = arith.constant 0 : index
    %64 = vector.load %arg1[%c0_62, %c9_63, %c0_64, %c0_65] : memref<1x16x32x32xf32, #tpu.memory_space<vmem>>, vector<1x1x32x32xf32>
    %65 = vector.shape_cast %64 : vector<1x1x32x32xf32> to vector<32x32xf32>
    %66 = vector.broadcast %63 : f32 to vector<32x32xf32>
    %67 = arith.mulf %66, %65 : vector<32x32xf32>
    %68 = arith.addf %62, %67 : vector<32x32xf32>
    %c10 = arith.constant 10 : index
    %c0_66 = arith.constant 0 : index
    %69 = memref.load %arg2[%c10, %c0_66] : memref<16x4xf32, #tpu.memory_space<smem>>
    %c0_67 = arith.constant 0 : index
    %c10_68 = arith.constant 10 : index
    %c0_69 = arith.constant 0 : index
    %c0_70 = arith.constant 0 : index
    %70 = vector.load %arg1[%c0_67, %c10_68, %c0_69, %c0_70] : memref<1x16x32x32xf32, #tpu.memory_space<vmem>>, vector<1x1x32x32xf32>
    %71 = vector.shape_cast %70 : vector<1x1x32x32xf32> to vector<32x32xf32>
    %72 = vector.broadcast %69 : f32 to vector<32x32xf32>
    %73 = arith.mulf %72, %71 : vector<32x32xf32>
    %74 = arith.addf %68, %73 : vector<32x32xf32>
    %c11 = arith.constant 11 : index
    %c0_71 = arith.constant 0 : index
    %75 = memref.load %arg2[%c11, %c0_71] : memref<16x4xf32, #tpu.memory_space<smem>>
    %c0_72 = arith.constant 0 : index
    %c11_73 = arith.constant 11 : index
    %c0_74 = arith.constant 0 : index
    %c0_75 = arith.constant 0 : index
    %76 = vector.load %arg1[%c0_72, %c11_73, %c0_74, %c0_75] : memref<1x16x32x32xf32, #tpu.memory_space<vmem>>, vector<1x1x32x32xf32>
    %77 = vector.shape_cast %76 : vector<1x1x32x32xf32> to vector<32x32xf32>
    %78 = vector.broadcast %75 : f32 to vector<32x32xf32>
    %79 = arith.mulf %78, %77 : vector<32x32xf32>
    %80 = arith.addf %74, %79 : vector<32x32xf32>
    %c12 = arith.constant 12 : index
    %c0_76 = arith.constant 0 : index
    %81 = memref.load %arg2[%c12, %c0_76] : memref<16x4xf32, #tpu.memory_space<smem>>
    %c0_77 = arith.constant 0 : index
    %c12_78 = arith.constant 12 : index
    %c0_79 = arith.constant 0 : index
    %c0_80 = arith.constant 0 : index
    %82 = vector.load %arg1[%c0_77, %c12_78, %c0_79, %c0_80] : memref<1x16x32x32xf32, #tpu.memory_space<vmem>>, vector<1x1x32x32xf32>
    %83 = vector.shape_cast %82 : vector<1x1x32x32xf32> to vector<32x32xf32>
    %84 = vector.broadcast %81 : f32 to vector<32x32xf32>
    %85 = arith.mulf %84, %83 : vector<32x32xf32>
    %86 = arith.addf %80, %85 : vector<32x32xf32>
    %c13 = arith.constant 13 : index
    %c0_81 = arith.constant 0 : index
    %87 = memref.load %arg2[%c13, %c0_81] : memref<16x4xf32, #tpu.memory_space<smem>>
    %c0_82 = arith.constant 0 : index
    %c13_83 = arith.constant 13 : index
    %c0_84 = arith.constant 0 : index
    %c0_85 = arith.constant 0 : index
    %88 = vector.load %arg1[%c0_82, %c13_83, %c0_84, %c0_85] : memref<1x16x32x32xf32, #tpu.memory_space<vmem>>, vector<1x1x32x32xf32>
    %89 = vector.shape_cast %88 : vector<1x1x32x32xf32> to vector<32x32xf32>
    %90 = vector.broadcast %87 : f32 to vector<32x32xf32>
    %91 = arith.mulf %90, %89 : vector<32x32xf32>
    %92 = arith.addf %86, %91 : vector<32x32xf32>
    %c14 = arith.constant 14 : index
    %c0_86 = arith.constant 0 : index
    %93 = memref.load %arg2[%c14, %c0_86] : memref<16x4xf32, #tpu.memory_space<smem>>
    %c0_87 = arith.constant 0 : index
    %c14_88 = arith.constant 14 : index
    %c0_89 = arith.constant 0 : index
    %c0_90 = arith.constant 0 : index
    %94 = vector.load %arg1[%c0_87, %c14_88, %c0_89, %c0_90] : memref<1x16x32x32xf32, #tpu.memory_space<vmem>>, vector<1x1x32x32xf32>
    %95 = vector.shape_cast %94 : vector<1x1x32x32xf32> to vector<32x32xf32>
    %96 = vector.broadcast %93 : f32 to vector<32x32xf32>
    %97 = arith.mulf %96, %95 : vector<32x32xf32>
    %98 = arith.addf %92, %97 : vector<32x32xf32>
    %c15 = arith.constant 15 : index
    %c0_91 = arith.constant 0 : index
    %99 = memref.load %arg2[%c15, %c0_91] : memref<16x4xf32, #tpu.memory_space<smem>>
    %c0_92 = arith.constant 0 : index
    %c15_93 = arith.constant 15 : index
    %c0_94 = arith.constant 0 : index
    %c0_95 = arith.constant 0 : index
    %100 = vector.load %arg1[%c0_92, %c15_93, %c0_94, %c0_95] : memref<1x16x32x32xf32, #tpu.memory_space<vmem>>, vector<1x1x32x32xf32>
    %101 = vector.shape_cast %100 : vector<1x1x32x32xf32> to vector<32x32xf32>
    %102 = vector.broadcast %99 : f32 to vector<32x32xf32>
    %103 = arith.mulf %102, %101 : vector<32x32xf32>
    %104 = arith.addf %98, %103 : vector<32x32xf32>
    %c0_96 = arith.constant 0 : index
    %105 = memref.load %arg3[%c0_96] : memref<4xf32, #tpu.memory_space<smem>>
    %106 = vector.broadcast %105 : f32 to vector<32x32xf32>
    %107 = arith.addf %104, %106 : vector<32x32xf32>
    %cst_97 = arith.constant dense<0.000000e+00> : vector<32x32xf32>
    %108 = tpu.matmul %107, %0, %cst_97 {dimension_numbers = #tpu.dot_dimension_numbers<[1], [0], [0], [1], [0, 0, 1, 1], [], []>} : vector<32x32xf32>, vector<32x32xf32>, vector<32x32xf32> -> vector<32x32xf32>
    %cst_98 = arith.constant dense<0.000000e+00> : vector<32x32xf32>
    %109 = tpu.matmul %1, %108, %cst_98 {dimension_numbers = #tpu.dot_dimension_numbers<[1], [0], [0], [1], [0, 0, 1, 1], [], []>} : vector<32x32xf32>, vector<32x32xf32>, vector<32x32xf32> -> vector<32x32xf32>
    %110 = vector.extract_strided_slice %109 {offsets = [0, 0], sizes = [16, 16], strides = [1, 1]} : vector<32x32xf32> to vector<16x16xf32>
    %c0_99 = arith.constant 0 : index
    %c0_100 = arith.constant 0 : index
    %c0_101 = arith.constant 0 : index
    %c0_102 = arith.constant 0 : index
    %111 = vector.load %arg12[%c0_99, %c0_100, %c0_101, %c0_102] : memref<1x16x16x16xf32, #tpu.memory_space<vmem>>, vector<1x1x16x16xf32>
    %112 = vector.shape_cast %111 : vector<1x1x16x16xf32> to vector<16x16xf32>
    %113 = vector.shape_cast %110 : vector<16x16xf32> to vector<1x1x16x16xf32>
    tpu.vector_store %arg12[%c0_99, %c0_100, %c0_101, %c0_102], %113 {strides = array<i32>} : memref<1x16x16x16xf32, #tpu.memory_space<vmem>>, vector<1x1x16x16xf32>,
    %114 = vector.extract_strided_slice %109 {offsets = [16, 0], sizes = [16, 16], strides = [1, 1]} : vector<32x32xf32> to vector<16x16xf32>
    %c0_103 = arith.constant 0 : index
    %c4_104 = arith.constant 4 : index
    %c0_105 = arith.constant 0 : index
    %c0_106 = arith.constant 0 : index
    %115 = vector.load %arg12[%c0_103, %c4_104, %c0_105, %c0_106] : memref<1x16x16x16xf32, #tpu.memory_space<vmem>>, vector<1x1x16x16xf32>
    %116 = vector.shape_cast %115 : vector<1x1x16x16xf32> to vector<16x16xf32>
    %117 = vector.shape_cast %114 : vector<16x16xf32> to vector<1x1x16x16xf32>
    tpu.vector_store %arg12[%c0_103, %c4_104, %c0_105, %c0_106], %117 {strides = array<i32>} : memref<1x16x16x16xf32, #tpu.memory_space<vmem>>, vector<1x1x16x16xf32>,
    %118 = vector.extract_strided_slice %109 {offsets = [0, 16], sizes = [16, 16], strides = [1, 1]} : vector<32x32xf32> to vector<16x16xf32>
    %c0_107 = arith.constant 0 : index
    %c5_108 = arith.constant 5 : index
    %c0_109 = arith.constant 0 : index
    %c0_110 = arith.constant 0 : index
    %119 = vector.load %arg12[%c0_107, %c5_108, %c0_109, %c0_110] : memref<1x16x16x16xf32, #tpu.memory_space<vmem>>, vector<1x1x16x16xf32>
    %120 = vector.shape_cast %119 : vector<1x1x16x16xf32> to vector<16x16xf32>
    %121 = vector.shape_cast %118 : vector<16x16xf32> to vector<1x1x16x16xf32>
    tpu.vector_store %arg12[%c0_107, %c5_108, %c0_109, %c0_110], %121 {strides = array<i32>} : memref<1x16x16x16xf32, #tpu.memory_space<vmem>>, vector<1x1x16x16xf32>,
    %122 = vector.extract_strided_slice %109 {offsets = [16, 16], sizes = [16, 16], strides = [1, 1]} : vector<32x32xf32> to vector<16x16xf32>
    %c0_111 = arith.constant 0 : index
    %c6_112 = arith.constant 6 : index
    %c0_113 = arith.constant 0 : index
    %c0_114 = arith.constant 0 : index
    %123 = vector.load %arg12[%c0_111, %c6_112, %c0_113, %c0_114] : memref<1x16x16x16xf32, #tpu.memory_space<vmem>>, vector<1x1x16x16xf32>
    %124 = vector.shape_cast %123 : vector<1x1x16x16xf32> to vector<16x16xf32>
    %125 = vector.shape_cast %122 : vector<16x16xf32> to vector<1x1x16x16xf32>
    tpu.vector_store %arg12[%c0_111, %c6_112, %c0_113, %c0_114], %125 {strides = array<i32>} : memref<1x16x16x16xf32, #tpu.memory_space<vmem>>, vector<1x1x16x16xf32>,
    %126 = vector.extract_strided_slice %109 {offsets = [0, 0], sizes = [16, 16], strides = [1, 1]} : vector<32x32xf32> to vector<16x16xf32>
    %cst_115 = arith.constant dense<0.000000e+00> : vector<16x16xf32>
    %127 = tpu.matmul %126, %2, %cst_115 {dimension_numbers = #tpu.dot_dimension_numbers<[1], [0], [0], [1], [0, 0, 1, 1], [], []>} : vector<16x16xf32>, vector<16x16xf32>, vector<16x16xf32> -> vector<16x16xf32>
    %cst_116 = arith.constant dense<0.000000e+00> : vector<16x16xf32>
    %128 = tpu.matmul %3, %127, %cst_116 {dimension_numbers = #tpu.dot_dimension_numbers<[1], [0], [0], [1], [0, 0, 1, 1], [], []>} : vector<16x16xf32>, vector<16x16xf32>, vector<16x16xf32> -> vector<16x16xf32>
    %129 = vector.extract_strided_slice %128 {offsets = [0, 0], sizes = [8, 8], strides = [1, 1]} : vector<16x16xf32> to vector<8x8xf32>
    %c0_117 = arith.constant 0 : index
    %c0_118 = arith.constant 0 : index
    %c0_119 = arith.constant 0 : index
    %c0_120 = arith.constant 0 : index
    %130 = vector.load %arg13[%c0_117, %c0_118, %c0_119, %c0_120] : memref<1x16x8x8xf32, #tpu.memory_space<vmem>>, vector<1x1x8x8xf32>
    %131 = vector.shape_cast %130 : vector<1x1x8x8xf32> to vector<8x8xf32>
    %132 = vector.shape_cast %129 : vector<8x8xf32> to vector<1x1x8x8xf32>
    tpu.vector_store %arg13[%c0_117, %c0_118, %c0_119, %c0_120], %132 {strides = array<i32>} : memref<1x16x8x8xf32, #tpu.memory_space<vmem>>, vector<1x1x8x8xf32>,
    %133 = vector.extract_strided_slice %128 {offsets = [8, 0], sizes = [8, 8], strides = [1, 1]} : vector<16x16xf32> to vector<8x8xf32>
    %c0_121 = arith.constant 0 : index
    %c4_122 = arith.constant 4 : index
    %c0_123 = arith.constant 0 : index
    %c0_124 = arith.constant 0 : index
    %134 = vector.load %arg13[%c0_121, %c4_122, %c0_123, %c0_124] : memref<1x16x8x8xf32, #tpu.memory_space<vmem>>, vector<1x1x8x8xf32>
    %135 = vector.shape_cast %134 : vector<1x1x8x8xf32> to vector<8x8xf32>
    %136 = vector.shape_cast %133 : vector<8x8xf32> to vector<1x1x8x8xf32>
    tpu.vector_store %arg13[%c0_121, %c4_122, %c0_123, %c0_124], %136 {strides = array<i32>} : memref<1x16x8x8xf32, #tpu.memory_space<vmem>>, vector<1x1x8x8xf32>,
    %137 = vector.extract_strided_slice %128 {offsets = [0, 8], sizes = [8, 8], strides = [1, 1]} : vector<16x16xf32> to vector<8x8xf32>
    %c0_125 = arith.constant 0 : index
    %c5_126 = arith.constant 5 : index
    %c0_127 = arith.constant 0 : index
    %c0_128 = arith.constant 0 : index
    %138 = vector.load %arg13[%c0_125, %c5_126, %c0_127, %c0_128] : memref<1x16x8x8xf32, #tpu.memory_space<vmem>>, vector<1x1x8x8xf32>
    %139 = vector.shape_cast %138 : vector<1x1x8x8xf32> to vector<8x8xf32>
    %140 = vector.shape_cast %137 : vector<8x8xf32> to vector<1x1x8x8xf32>
    tpu.vector_store %arg13[%c0_125, %c5_126, %c0_127, %c0_128], %140 {strides = array<i32>} : memref<1x16x8x8xf32, #tpu.memory_space<vmem>>, vector<1x1x8x8xf32>,
    %141 = vector.extract_strided_slice %128 {offsets = [8, 8], sizes = [8, 8], strides = [1, 1]} : vector<16x16xf32> to vector<8x8xf32>
    %c0_129 = arith.constant 0 : index
    %c6_130 = arith.constant 6 : index
    %c0_131 = arith.constant 0 : index
    %c0_132 = arith.constant 0 : index
    %142 = vector.load %arg13[%c0_129, %c6_130, %c0_131, %c0_132] : memref<1x16x8x8xf32, #tpu.memory_space<vmem>>, vector<1x1x8x8xf32>
    %143 = vector.shape_cast %142 : vector<1x1x8x8xf32> to vector<8x8xf32>
    %144 = vector.shape_cast %141 : vector<8x8xf32> to vector<1x1x8x8xf32>
    tpu.vector_store %arg13[%c0_129, %c6_130, %c0_131, %c0_132], %144 {strides = array<i32>} : memref<1x16x8x8xf32, #tpu.memory_space<vmem>>, vector<1x1x8x8xf32>,
    %145 = vector.extract_strided_slice %128 {offsets = [0, 0], sizes = [8, 8], strides = [1, 1]} : vector<16x16xf32> to vector<8x8xf32>
    %cst_133 = arith.constant dense<0.000000e+00> : vector<8x8xf32>
    %146 = tpu.matmul %145, %4, %cst_133 {dimension_numbers = #tpu.dot_dimension_numbers<[1], [0], [0], [1], [0, 0, 1, 1], [], []>} : vector<8x8xf32>, vector<8x8xf32>, vector<8x8xf32> -> vector<8x8xf32>
    %cst_134 = arith.constant dense<0.000000e+00> : vector<8x8xf32>
    %147 = tpu.matmul %5, %146, %cst_134 {dimension_numbers = #tpu.dot_dimension_numbers<[1], [0], [0], [1], [0, 0, 1, 1], [], []>} : vector<8x8xf32>, vector<8x8xf32>, vector<8x8xf32> -> vector<8x8xf32>
    %148 = vector.extract_strided_slice %147 {offsets = [0, 0], sizes = [4, 4], strides = [1, 1]} : vector<8x8xf32> to vector<4x4xf32>
    %c0_135 = arith.constant 0 : index
    %c0_136 = arith.constant 0 : index
    %c0_137 = arith.constant 0 : index
    %c0_138 = arith.constant 0 : index
    %149 = vector.load %arg14[%c0_135, %c0_136, %c0_137, %c0_138] : memref<1x16x4x4xf32, #tpu.memory_space<vmem>>, vector<1x1x4x4xf32>
    %150 = vector.shape_cast %149 : vector<1x1x4x4xf32> to vector<4x4xf32>
    %151 = vector.shape_cast %148 : vector<4x4xf32> to vector<1x1x4x4xf32>
    tpu.vector_store %arg14[%c0_135, %c0_136, %c0_137, %c0_138], %151 {strides = array<i32>} : memref<1x16x4x4xf32, #tpu.memory_space<vmem>>, vector<1x1x4x4xf32>,
    %152 = vector.extract_strided_slice %147 {offsets = [4, 0], sizes = [4, 4], strides = [1, 1]} : vector<8x8xf32> to vector<4x4xf32>
    %c0_139 = arith.constant 0 : index
    %c4_140 = arith.constant 4 : index
    %c0_141 = arith.constant 0 : index
    %c0_142 = arith.constant 0 : index
    %153 = vector.load %arg14[%c0_139, %c4_140, %c0_141, %c0_142] : memref<1x16x4x4xf32, #tpu.memory_space<vmem>>, vector<1x1x4x4xf32>
    %154 = vector.shape_cast %153 : vector<1x1x4x4xf32> to vector<4x4xf32>
    %155 = vector.shape_cast %152 : vector<4x4xf32> to vector<1x1x4x4xf32>
    tpu.vector_store %arg14[%c0_139, %c4_140, %c0_141, %c0_142], %155 {strides = array<i32>} : memref<1x16x4x4xf32, #tpu.memory_space<vmem>>, vector<1x1x4x4xf32>,
    %156 = vector.extract_strided_slice %147 {offsets = [0, 4], sizes = [4, 4], strides = [1, 1]} : vector<8x8xf32> to vector<4x4xf32>
    %c0_143 = arith.constant 0 : index
    %c5_144 = arith.constant 5 : index
    %c0_145 = arith.constant 0 : index
    %c0_146 = arith.constant 0 : index
    %157 = vector.load %arg14[%c0_143, %c5_144, %c0_145, %c0_146] : memref<1x16x4x4xf32, #tpu.memory_space<vmem>>, vector<1x1x4x4xf32>
    %158 = vector.shape_cast %157 : vector<1x1x4x4xf32> to vector<4x4xf32>
    %159 = vector.shape_cast %156 : vector<4x4xf32> to vector<1x1x4x4xf32>
    tpu.vector_store %arg14[%c0_143, %c5_144, %c0_145, %c0_146], %159 {strides = array<i32>} : memref<1x16x4x4xf32, #tpu.memory_space<vmem>>, vector<1x1x4x4xf32>,
    %160 = vector.extract_strided_slice %147 {offsets = [4, 4], sizes = [4, 4], strides = [1, 1]} : vector<8x8xf32> to vector<4x4xf32>
    %c0_147 = arith.constant 0 : index
    %c6_148 = arith.constant 6 : index
    %c0_149 = arith.constant 0 : index
    %c0_150 = arith.constant 0 : index
    %161 = vector.load %arg14[%c0_147, %c6_148, %c0_149, %c0_150] : memref<1x16x4x4xf32, #tpu.memory_space<vmem>>, vector<1x1x4x4xf32>
    %162 = vector.shape_cast %161 : vector<1x1x4x4xf32> to vector<4x4xf32>
    %163 = vector.shape_cast %160 : vector<4x4xf32> to vector<1x1x4x4xf32>
    tpu.vector_store %arg14[%c0_147, %c6_148, %c0_149, %c0_150], %163 {strides = array<i32>} : memref<1x16x4x4xf32, #tpu.memory_space<vmem>>, vector<1x1x4x4xf32>,
    %164 = vector.extract_strided_slice %147 {offsets = [0, 0], sizes = [4, 4], strides = [1, 1]} : vector<8x8xf32> to vector<4x4xf32>
    %cst_151 = arith.constant dense<0.000000e+00> : vector<4x4xf32>
    %165 = tpu.matmul %164, %6, %cst_151 {dimension_numbers = #tpu.dot_dimension_numbers<[1], [0], [0], [1], [0, 0, 1, 1], [], []>} : vector<4x4xf32>, vector<4x4xf32>, vector<4x4xf32> -> vector<4x4xf32>
    %cst_152 = arith.constant dense<0.000000e+00> : vector<4x4xf32>
    %166 = tpu.matmul %7, %165, %cst_152 {dimension_numbers = #tpu.dot_dimension_numbers<[1], [0], [0], [1], [0, 0, 1, 1], [], []>} : vector<4x4xf32>, vector<4x4xf32>, vector<4x4xf32> -> vector<4x4xf32>
    %167 = vector.extract_strided_slice %166 {offsets = [0, 0], sizes = [2, 2], strides = [1, 1]} : vector<4x4xf32> to vector<2x2xf32>
    %c0_153 = arith.constant 0 : index
    %c0_154 = arith.constant 0 : index
    %c0_155 = arith.constant 0 : index
    %c0_156 = arith.constant 0 : index
    %168 = vector.load %arg15[%c0_153, %c0_154, %c0_155, %c0_156] : memref<1x16x2x2xf32, #tpu.memory_space<vmem>>, vector<1x1x2x2xf32>
    %169 = vector.shape_cast %168 : vector<1x1x2x2xf32> to vector<2x2xf32>
    %170 = vector.shape_cast %167 : vector<2x2xf32> to vector<1x1x2x2xf32>
    tpu.vector_store %arg15[%c0_153, %c0_154, %c0_155, %c0_156], %170 {strides = array<i32>} : memref<1x16x2x2xf32, #tpu.memory_space<vmem>>, vector<1x1x2x2xf32>,
    %171 = vector.extract_strided_slice %166 {offsets = [2, 0], sizes = [2, 2], strides = [1, 1]} : vector<4x4xf32> to vector<2x2xf32>
    %c0_157 = arith.constant 0 : index
    %c4_158 = arith.constant 4 : index
    %c0_159 = arith.constant 0 : index
    %c0_160 = arith.constant 0 : index
    %172 = vector.load %arg15[%c0_157, %c4_158, %c0_159, %c0_160] : memref<1x16x2x2xf32, #tpu.memory_space<vmem>>, vector<1x1x2x2xf32>
    %173 = vector.shape_cast %172 : vector<1x1x2x2xf32> to vector<2x2xf32>
    %174 = vector.shape_cast %171 : vector<2x2xf32> to vector<1x1x2x2xf32>
    tpu.vector_store %arg15[%c0_157, %c4_158, %c0_159, %c0_160], %174 {strides = array<i32>} : memref<1x16x2x2xf32, #tpu.memory_space<vmem>>, vector<1x1x2x2xf32>,
    %175 = vector.extract_strided_slice %166 {offsets = [0, 2], sizes = [2, 2], strides = [1, 1]} : vector<4x4xf32> to vector<2x2xf32>
    %c0_161 = arith.constant 0 : index
    %c5_162 = arith.constant 5 : index
    %c0_163 = arith.constant 0 : index
    %c0_164 = arith.constant 0 : index
    %176 = vector.load %arg15[%c0_161, %c5_162, %c0_163, %c0_164] : memref<1x16x2x2xf32, #tpu.memory_space<vmem>>, vector<1x1x2x2xf32>
    %177 = vector.shape_cast %176 : vector<1x1x2x2xf32> to vector<2x2xf32>
    %178 = vector.shape_cast %175 : vector<2x2xf32> to vector<1x1x2x2xf32>
    tpu.vector_store %arg15[%c0_161, %c5_162, %c0_163, %c0_164], %178 {strides = array<i32>} : memref<1x16x2x2xf32, #tpu.memory_space<vmem>>, vector<1x1x2x2xf32>,
    %179 = vector.extract_strided_slice %166 {offsets = [2, 2], sizes = [2, 2], strides = [1, 1]} : vector<4x4xf32> to vector<2x2xf32>
    %c0_165 = arith.constant 0 : index
    %c6_166 = arith.constant 6 : index
    %c0_167 = arith.constant 0 : index
    %c0_168 = arith.constant 0 : index
    %180 = vector.load %arg15[%c0_165, %c6_166, %c0_167, %c0_168] : memref<1x16x2x2xf32, #tpu.memory_space<vmem>>, vector<1x1x2x2xf32>
    %181 = vector.shape_cast %180 : vector<1x1x2x2xf32> to vector<2x2xf32>
    %182 = vector.shape_cast %179 : vector<2x2xf32> to vector<1x1x2x2xf32>
    tpu.vector_store %arg15[%c0_165, %c6_166, %c0_167, %c0_168], %182 {strides = array<i32>} : memref<1x16x2x2xf32, #tpu.memory_space<vmem>>, vector<1x1x2x2xf32>,
    %cst_169 = arith.constant 0.000000e+00 : f32
    %183 = vector.broadcast %cst_169 : f32 to vector<32x32xf32>
    %c0_170 = arith.constant 0 : index
    %c1_171 = arith.constant 1 : index
    %184 = memref.load %arg2[%c0_170, %c1_171] : memref<16x4xf32, #tpu.memory_space<smem>>
    %c0_172 = arith.constant 0 : index
    %c0_173 = arith.constant 0 : index
    %c0_174 = arith.constant 0 : index
    %c0_175 = arith.constant 0 : index
    %185 = vector.load %arg1[%c0_172, %c0_173, %c0_174, %c0_175] : memref<1x16x32x32xf32, #tpu.memory_space<vmem>>, vector<1x1x32x32xf32>
    %186 = vector.shape_cast %185 : vector<1x1x32x32xf32> to vector<32x32xf32>
    %187 = vector.broadcast %184 : f32 to vector<32x32xf32>
    %188 = arith.mulf %187, %186 : vector<32x32xf32>
    %189 = arith.addf %183, %188 : vector<32x32xf32>
    %c1_176 = arith.constant 1 : index
    %c1_177 = arith.constant 1 : index
    %190 = memref.load %arg2[%c1_176, %c1_177] : memref<16x4xf32, #tpu.memory_space<smem>>
    %c0_178 = arith.constant 0 : index
    %c1_179 = arith.constant 1 : index
    %c0_180 = arith.constant 0 : index
    %c0_181 = arith.constant 0 : index
    %191 = vector.load %arg1[%c0_178, %c1_179, %c0_180, %c0_181] : memref<1x16x32x32xf32, #tpu.memory_space<vmem>>, vector<1x1x32x32xf32>
    %192 = vector.shape_cast %191 : vector<1x1x32x32xf32> to vector<32x32xf32>
    %193 = vector.broadcast %190 : f32 to vector<32x32xf32>
    %194 = arith.mulf %193, %192 : vector<32x32xf32>
    %195 = arith.addf %189, %194 : vector<32x32xf32>
    %c2_182 = arith.constant 2 : index
    %c1_183 = arith.constant 1 : index
    %196 = memref.load %arg2[%c2_182, %c1_183] : memref<16x4xf32, #tpu.memory_space<smem>>
    %c0_184 = arith.constant 0 : index
    %c2_185 = arith.constant 2 : index
    %c0_186 = arith.constant 0 : index
    %c0_187 = arith.constant 0 : index
    %197 = vector.load %arg1[%c0_184, %c2_185, %c0_186, %c0_187] : memref<1x16x32x32xf32, #tpu.memory_space<vmem>>, vector<1x1x32x32xf32>
    %198 = vector.shape_cast %197 : vector<1x1x32x32xf32> to vector<32x32xf32>
    %199 = vector.broadcast %196 : f32 to vector<32x32xf32>
    %200 = arith.mulf %199, %198 : vector<32x32xf32>
    %201 = arith.addf %195, %200 : vector<32x32xf32>
    %c3_188 = arith.constant 3 : index
    %c1_189 = arith.constant 1 : index
    %202 = memref.load %arg2[%c3_188, %c1_189] : memref<16x4xf32, #tpu.memory_space<smem>>
    %c0_190 = arith.constant 0 : index
    %c3_191 = arith.constant 3 : index
    %c0_192 = arith.constant 0 : index
    %c0_193 = arith.constant 0 : index
    %203 = vector.load %arg1[%c0_190, %c3_191, %c0_192, %c0_193] : memref<1x16x32x32xf32, #tpu.memory_space<vmem>>, vector<1x1x32x32xf32>
    %204 = vector.shape_cast %203 : vector<1x1x32x32xf32> to vector<32x32xf32>
    %205 = vector.broadcast %202 : f32 to vector<32x32xf32>
    %206 = arith.mulf %205, %204 : vector<32x32xf32>
    %207 = arith.addf %201, %206 : vector<32x32xf32>
    %c4_194 = arith.constant 4 : index
    %c1_195 = arith.constant 1 : index
    %208 = memref.load %arg2[%c4_194, %c1_195] : memref<16x4xf32, #tpu.memory_space<smem>>
    %c0_196 = arith.constant 0 : index
    %c4_197 = arith.constant 4 : index
    %c0_198 = arith.constant 0 : index
    %c0_199 = arith.constant 0 : index
    %209 = vector.load %arg1[%c0_196, %c4_197, %c0_198, %c0_199] : memref<1x16x32x32xf32, #tpu.memory_space<vmem>>, vector<1x1x32x32xf32>
    %210 = vector.shape_cast %209 : vector<1x1x32x32xf32> to vector<32x32xf32>
    %211 = vector.broadcast %208 : f32 to vector<32x32xf32>
    %212 = arith.mulf %211, %210 : vector<32x32xf32>
    %213 = arith.addf %207, %212 : vector<32x32xf32>
    %c5_200 = arith.constant 5 : index
    %c1_201 = arith.constant 1 : index
    %214 = memref.load %arg2[%c5_200, %c1_201] : memref<16x4xf32, #tpu.memory_space<smem>>
    %c0_202 = arith.constant 0 : index
    %c5_203 = arith.constant 5 : index
    %c0_204 = arith.constant 0 : index
    %c0_205 = arith.constant 0 : index
    %215 = vector.load %arg1[%c0_202, %c5_203, %c0_204, %c0_205] : memref<1x16x32x32xf32, #tpu.memory_space<vmem>>, vector<1x1x32x32xf32>
    %216 = vector.shape_cast %215 : vector<1x1x32x32xf32> to vector<32x32xf32>
    %217 = vector.broadcast %214 : f32 to vector<32x32xf32>
    %218 = arith.mulf %217, %216 : vector<32x32xf32>
    %219 = arith.addf %213, %218 : vector<32x32xf32>
    %c6_206 = arith.constant 6 : index
    %c1_207 = arith.constant 1 : index
    %220 = memref.load %arg2[%c6_206, %c1_207] : memref<16x4xf32, #tpu.memory_space<smem>>
    %c0_208 = arith.constant 0 : index
    %c6_209 = arith.constant 6 : index
    %c0_210 = arith.constant 0 : index
    %c0_211 = arith.constant 0 : index
    %221 = vector.load %arg1[%c0_208, %c6_209, %c0_210, %c0_211] : memref<1x16x32x32xf32, #tpu.memory_space<vmem>>, vector<1x1x32x32xf32>
    %222 = vector.shape_cast %221 : vector<1x1x32x32xf32> to vector<32x32xf32>
    %223 = vector.broadcast %220 : f32 to vector<32x32xf32>
    %224 = arith.mulf %223, %222 : vector<32x32xf32>
    %225 = arith.addf %219, %224 : vector<32x32xf32>
    %c7_212 = arith.constant 7 : index
    %c1_213 = arith.constant 1 : index
    %226 = memref.load %arg2[%c7_212, %c1_213] : memref<16x4xf32, #tpu.memory_space<smem>>
    %c0_214 = arith.constant 0 : index
    %c7_215 = arith.constant 7 : index
    %c0_216 = arith.constant 0 : index
    %c0_217 = arith.constant 0 : index
    %227 = vector.load %arg1[%c0_214, %c7_215, %c0_216, %c0_217] : memref<1x16x32x32xf32, #tpu.memory_space<vmem>>, vector<1x1x32x32xf32>
    %228 = vector.shape_cast %227 : vector<1x1x32x32xf32> to vector<32x32xf32>
    %229 = vector.broadcast %226 : f32 to vector<32x32xf32>
    %230 = arith.mulf %229, %228 : vector<32x32xf32>
    %231 = arith.addf %225, %230 : vector<32x32xf32>
    %c8_218 = arith.constant 8 : index
    %c1_219 = arith.constant 1 : index
    %232 = memref.load %arg2[%c8_218, %c1_219] : memref<16x4xf32, #tpu.memory_space<smem>>
    %c0_220 = arith.constant 0 : index
    %c8_221 = arith.constant 8 : index
    %c0_222 = arith.constant 0 : index
    %c0_223 = arith.constant 0 : index
    %233 = vector.load %arg1[%c0_220, %c8_221, %c0_222, %c0_223] : memref<1x16x32x32xf32, #tpu.memory_space<vmem>>, vector<1x1x32x32xf32>
    %234 = vector.shape_cast %233 : vector<1x1x32x32xf32> to vector<32x32xf32>
    %235 = vector.broadcast %232 : f32 to vector<32x32xf32>
    %236 = arith.mulf %235, %234 : vector<32x32xf32>
    %237 = arith.addf %231, %236 : vector<32x32xf32>
    %c9_224 = arith.constant 9 : index
    %c1_225 = arith.constant 1 : index
    %238 = memref.load %arg2[%c9_224, %c1_225] : memref<16x4xf32, #tpu.memory_space<smem>>
    %c0_226 = arith.constant 0 : index
    %c9_227 = arith.constant 9 : index
    %c0_228 = arith.constant 0 : index
    %c0_229 = arith.constant 0 : index
    %239 = vector.load %arg1[%c0_226, %c9_227, %c0_228, %c0_229] : memref<1x16x32x32xf32, #tpu.memory_space<vmem>>, vector<1x1x32x32xf32>
    %240 = vector.shape_cast %239 : vector<1x1x32x32xf32> to vector<32x32xf32>
    %241 = vector.broadcast %238 : f32 to vector<32x32xf32>
    %242 = arith.mulf %241, %240 : vector<32x32xf32>
    %243 = arith.addf %237, %242 : vector<32x32xf32>
    %c10_230 = arith.constant 10 : index
    %c1_231 = arith.constant 1 : index
    %244 = memref.load %arg2[%c10_230, %c1_231] : memref<16x4xf32, #tpu.memory_space<smem>>
    %c0_232 = arith.constant 0 : index
    %c10_233 = arith.constant 10 : index
    %c0_234 = arith.constant 0 : index
    %c0_235 = arith.constant 0 : index
    %245 = vector.load %arg1[%c0_232, %c10_233, %c0_234, %c0_235] : memref<1x16x32x32xf32, #tpu.memory_space<vmem>>, vector<1x1x32x32xf32>
    %246 = vector.shape_cast %245 : vector<1x1x32x32xf32> to vector<32x32xf32>
    %247 = vector.broadcast %244 : f32 to vector<32x32xf32>
    %248 = arith.mulf %247, %246 : vector<32x32xf32>
    %249 = arith.addf %243, %248 : vector<32x32xf32>
    %c11_236 = arith.constant 11 : index
    %c1_237 = arith.constant 1 : index
    %250 = memref.load %arg2[%c11_236, %c1_237] : memref<16x4xf32, #tpu.memory_space<smem>>
    %c0_238 = arith.constant 0 : index
    %c11_239 = arith.constant 11 : index
    %c0_240 = arith.constant 0 : index
    %c0_241 = arith.constant 0 : index
    %251 = vector.load %arg1[%c0_238, %c11_239, %c0_240, %c0_241] : memref<1x16x32x32xf32, #tpu.memory_space<vmem>>, vector<1x1x32x32xf32>
    %252 = vector.shape_cast %251 : vector<1x1x32x32xf32> to vector<32x32xf32>
    %253 = vector.broadcast %250 : f32 to vector<32x32xf32>
    %254 = arith.mulf %253, %252 : vector<32x32xf32>
    %255 = arith.addf %249, %254 : vector<32x32xf32>
    %c12_242 = arith.constant 12 : index
    %c1_243 = arith.constant 1 : index
    %256 = memref.load %arg2[%c12_242, %c1_243] : memref<16x4xf32, #tpu.memory_space<smem>>
    %c0_244 = arith.constant 0 : index
    %c12_245 = arith.constant 12 : index
    %c0_246 = arith.constant 0 : index
    %c0_247 = arith.constant 0 : index
    %257 = vector.load %arg1[%c0_244, %c12_245, %c0_246, %c0_247] : memref<1x16x32x32xf32, #tpu.memory_space<vmem>>, vector<1x1x32x32xf32>
    %258 = vector.shape_cast %257 : vector<1x1x32x32xf32> to vector<32x32xf32>
    %259 = vector.broadcast %256 : f32 to vector<32x32xf32>
    %260 = arith.mulf %259, %258 : vector<32x32xf32>
    %261 = arith.addf %255, %260 : vector<32x32xf32>
    %c13_248 = arith.constant 13 : index
    %c1_249 = arith.constant 1 : index
    %262 = memref.load %arg2[%c13_248, %c1_249] : memref<16x4xf32, #tpu.memory_space<smem>>
    %c0_250 = arith.constant 0 : index
    %c13_251 = arith.constant 13 : index
    %c0_252 = arith.constant 0 : index
    %c0_253 = arith.constant 0 : index
    %263 = vector.load %arg1[%c0_250, %c13_251, %c0_252, %c0_253] : memref<1x16x32x32xf32, #tpu.memory_space<vmem>>, vector<1x1x32x32xf32>
    %264 = vector.shape_cast %263 : vector<1x1x32x32xf32> to vector<32x32xf32>
    %265 = vector.broadcast %262 : f32 to vector<32x32xf32>
    %266 = arith.mulf %265, %264 : vector<32x32xf32>
    %267 = arith.addf %261, %266 : vector<32x32xf32>
    %c14_254 = arith.constant 14 : index
    %c1_255 = arith.constant 1 : index
    %268 = memref.load %arg2[%c14_254, %c1_255] : memref<16x4xf32, #tpu.memory_space<smem>>
    %c0_256 = arith.constant 0 : index
    %c14_257 = arith.constant 14 : index
    %c0_258 = arith.constant 0 : index
    %c0_259 = arith.constant 0 : index
    %269 = vector.load %arg1[%c0_256, %c14_257, %c0_258, %c0_259] : memref<1x16x32x32xf32, #tpu.memory_space<vmem>>, vector<1x1x32x32xf32>
    %270 = vector.shape_cast %269 : vector<1x1x32x32xf32> to vector<32x32xf32>
    %271 = vector.broadcast %268 : f32 to vector<32x32xf32>
    %272 = arith.mulf %271, %270 : vector<32x32xf32>
    %273 = arith.addf %267, %272 : vector<32x32xf32>
    %c15_260 = arith.constant 15 : index
    %c1_261 = arith.constant 1 : index
    %274 = memref.load %arg2[%c15_260, %c1_261] : memref<16x4xf32, #tpu.memory_space<smem>>
    %c0_262 = arith.constant 0 : index
    %c15_263 = arith.constant 15 : index
    %c0_264 = arith.constant 0 : index
    %c0_265 = arith.constant 0 : index
    %275 = vector.load %arg1[%c0_262, %c15_263, %c0_264, %c0_265] : memref<1x16x32x32xf32, #tpu.memory_space<vmem>>, vector<1x1x32x32xf32>
    %276 = vector.shape_cast %275 : vector<1x1x32x32xf32> to vector<32x32xf32>
    %277 = vector.broadcast %274 : f32 to vector<32x32xf32>
    %278 = arith.mulf %277, %276 : vector<32x32xf32>
    %279 = arith.addf %273, %278 : vector<32x32xf32>
    %c1_266 = arith.constant 1 : index
    %280 = memref.load %arg3[%c1_266] : memref<4xf32, #tpu.memory_space<smem>>
    %281 = vector.broadcast %280 : f32 to vector<32x32xf32>
    %282 = arith.addf %279, %281 : vector<32x32xf32>
    %cst_267 = arith.constant dense<0.000000e+00> : vector<32x32xf32>
    %283 = tpu.matmul %282, %0, %cst_267 {dimension_numbers = #tpu.dot_dimension_numbers<[1], [0], [0], [1], [0, 0, 1, 1], [], []>} : vector<32x32xf32>, vector<32x32xf32>, vector<32x32xf32> -> vector<32x32xf32>
    %cst_268 = arith.constant dense<0.000000e+00> : vector<32x32xf32>
    %284 = tpu.matmul %1, %283, %cst_268 {dimension_numbers = #tpu.dot_dimension_numbers<[1], [0], [0], [1], [0, 0, 1, 1], [], []>} : vector<32x32xf32>, vector<32x32xf32>, vector<32x32xf32> -> vector<32x32xf32>
    %285 = vector.extract_strided_slice %284 {offsets = [0, 0], sizes = [16, 16], strides = [1, 1]} : vector<32x32xf32> to vector<16x16xf32>
    %c0_269 = arith.constant 0 : index
    %c1_270 = arith.constant 1 : index
    %c0_271 = arith.constant 0 : index
    %c0_272 = arith.constant 0 : index
    %286 = vector.load %arg12[%c0_269, %c1_270, %c0_271, %c0_272] : memref<1x16x16x16xf32, #tpu.memory_space<vmem>>, vector<1x1x16x16xf32>
    %287 = vector.shape_cast %286 : vector<1x1x16x16xf32> to vector<16x16xf32>
    %288 = vector.shape_cast %285 : vector<16x16xf32> to vector<1x1x16x16xf32>
    tpu.vector_store %arg12[%c0_269, %c1_270, %c0_271, %c0_272], %288 {strides = array<i32>} : memref<1x16x16x16xf32, #tpu.memory_space<vmem>>, vector<1x1x16x16xf32>,
    %289 = vector.extract_strided_slice %284 {offsets = [16, 0], sizes = [16, 16], strides = [1, 1]} : vector<32x32xf32> to vector<16x16xf32>
    %c0_273 = arith.constant 0 : index
    %c7_274 = arith.constant 7 : index
    %c0_275 = arith.constant 0 : index
    %c0_276 = arith.constant 0 : index
    %290 = vector.load %arg12[%c0_273, %c7_274, %c0_275, %c0_276] : memref<1x16x16x16xf32, #tpu.memory_space<vmem>>, vector<1x1x16x16xf32>
    %291 = vector.shape_cast %290 : vector<1x1x16x16xf32> to vector<16x16xf32>
    %292 = vector.shape_cast %289 : vector<16x16xf32> to vector<1x1x16x16xf32>
    tpu.vector_store %arg12[%c0_273, %c7_274, %c0_275, %c0_276], %292 {strides = array<i32>} : memref<1x16x16x16xf32, #tpu.memory_space<vmem>>, vector<1x1x16x16xf32>,
    %293 = vector.extract_strided_slice %284 {offsets = [0, 16], sizes = [16, 16], strides = [1, 1]} : vector<32x32xf32> to vector<16x16xf32>
    %c0_277 = arith.constant 0 : index
    %c8_278 = arith.constant 8 : index
    %c0_279 = arith.constant 0 : index
    %c0_280 = arith.constant 0 : index
    %294 = vector.load %arg12[%c0_277, %c8_278, %c0_279, %c0_280] : memref<1x16x16x16xf32, #tpu.memory_space<vmem>>, vector<1x1x16x16xf32>
    %295 = vector.shape_cast %294 : vector<1x1x16x16xf32> to vector<16x16xf32>
    %296 = vector.shape_cast %293 : vector<16x16xf32> to vector<1x1x16x16xf32>
    tpu.vector_store %arg12[%c0_277, %c8_278, %c0_279, %c0_280], %296 {strides = array<i32>} : memref<1x16x16x16xf32, #tpu.memory_space<vmem>>, vector<1x1x16x16xf32>,
    %297 = vector.extract_strided_slice %284 {offsets = [16, 16], sizes = [16, 16], strides = [1, 1]} : vector<32x32xf32> to vector<16x16xf32>
    %c0_281 = arith.constant 0 : index
    %c9_282 = arith.constant 9 : index
    %c0_283 = arith.constant 0 : index
    %c0_284 = arith.constant 0 : index
    %298 = vector.load %arg12[%c0_281, %c9_282, %c0_283, %c0_284] : memref<1x16x16x16xf32, #tpu.memory_space<vmem>>, vector<1x1x16x16xf32>
    %299 = vector.shape_cast %298 : vector<1x1x16x16xf32> to vector<16x16xf32>
    %300 = vector.shape_cast %297 : vector<16x16xf32> to vector<1x1x16x16xf32>
    tpu.vector_store %arg12[%c0_281, %c9_282, %c0_283, %c0_284], %300 {strides = array<i32>} : memref<1x16x16x16xf32, #tpu.memory_space<vmem>>, vector<1x1x16x16xf32>,
    %301 = vector.extract_strided_slice %284 {offsets = [0, 0], sizes = [16, 16], strides = [1, 1]} : vector<32x32xf32> to vector<16x16xf32>
    %cst_285 = arith.constant dense<0.000000e+00> : vector<16x16xf32>
    %302 = tpu.matmul %301, %2, %cst_285 {dimension_numbers = #tpu.dot_dimension_numbers<[1], [0], [0], [1], [0, 0, 1, 1], [], []>} : vector<16x16xf32>, vector<16x16xf32>, vector<16x16xf32> -> vector<16x16xf32>
    %cst_286 = arith.constant dense<0.000000e+00> : vector<16x16xf32>
    %303 = tpu.matmul %3, %302, %cst_286 {dimension_numbers = #tpu.dot_dimension_numbers<[1], [0], [0], [1], [0, 0, 1, 1], [], []>} : vector<16x16xf32>, vector<16x16xf32>, vector<16x16xf32> -> vector<16x16xf32>
    %304 = vector.extract_strided_slice %303 {offsets = [0, 0], sizes = [8, 8], strides = [1, 1]} : vector<16x16xf32> to vector<8x8xf32>
    %c0_287 = arith.constant 0 : index
    %c1_288 = arith.constant 1 : index
    %c0_289 = arith.constant 0 : index
    %c0_290 = arith.constant 0 : index
    %305 = vector.load %arg13[%c0_287, %c1_288, %c0_289, %c0_290] : memref<1x16x8x8xf32, #tpu.memory_space<vmem>>, vector<1x1x8x8xf32>
    %306 = vector.shape_cast %305 : vector<1x1x8x8xf32> to vector<8x8xf32>
    %307 = vector.shape_cast %304 : vector<8x8xf32> to vector<1x1x8x8xf32>
    tpu.vector_store %arg13[%c0_287, %c1_288, %c0_289, %c0_290], %307 {strides = array<i32>} : memref<1x16x8x8xf32, #tpu.memory_space<vmem>>, vector<1x1x8x8xf32>,
    %308 = vector.extract_strided_slice %303 {offsets = [8, 0], sizes = [8, 8], strides = [1, 1]} : vector<16x16xf32> to vector<8x8xf32>
    %c0_291 = arith.constant 0 : index
    %c7_292 = arith.constant 7 : index
    %c0_293 = arith.constant 0 : index
    %c0_294 = arith.constant 0 : index
    %309 = vector.load %arg13[%c0_291, %c7_292, %c0_293, %c0_294] : memref<1x16x8x8xf32, #tpu.memory_space<vmem>>, vector<1x1x8x8xf32>
    %310 = vector.shape_cast %309 : vector<1x1x8x8xf32> to vector<8x8xf32>
    %311 = vector.shape_cast %308 : vector<8x8xf32> to vector<1x1x8x8xf32>
    tpu.vector_store %arg13[%c0_291, %c7_292, %c0_293, %c0_294], %311 {strides = array<i32>} : memref<1x16x8x8xf32, #tpu.memory_space<vmem>>, vector<1x1x8x8xf32>,
    %312 = vector.extract_strided_slice %303 {offsets = [0, 8], sizes = [8, 8], strides = [1, 1]} : vector<16x16xf32> to vector<8x8xf32>
    %c0_295 = arith.constant 0 : index
    %c8_296 = arith.constant 8 : index
    %c0_297 = arith.constant 0 : index
    %c0_298 = arith.constant 0 : index
    %313 = vector.load %arg13[%c0_295, %c8_296, %c0_297, %c0_298] : memref<1x16x8x8xf32, #tpu.memory_space<vmem>>, vector<1x1x8x8xf32>
    %314 = vector.shape_cast %313 : vector<1x1x8x8xf32> to vector<8x8xf32>
    %315 = vector.shape_cast %312 : vector<8x8xf32> to vector<1x1x8x8xf32>
    tpu.vector_store %arg13[%c0_295, %c8_296, %c0_297, %c0_298], %315 {strides = array<i32>} : memref<1x16x8x8xf32, #tpu.memory_space<vmem>>, vector<1x1x8x8xf32>,
    %316 = vector.extract_strided_slice %303 {offsets = [8, 8], sizes = [8, 8], strides = [1, 1]} : vector<16x16xf32> to vector<8x8xf32>
    %c0_299 = arith.constant 0 : index
    %c9_300 = arith.constant 9 : index
    %c0_301 = arith.constant 0 : index
    %c0_302 = arith.constant 0 : index
    %317 = vector.load %arg13[%c0_299, %c9_300, %c0_301, %c0_302] : memref<1x16x8x8xf32, #tpu.memory_space<vmem>>, vector<1x1x8x8xf32>
    %318 = vector.shape_cast %317 : vector<1x1x8x8xf32> to vector<8x8xf32>
    %319 = vector.shape_cast %316 : vector<8x8xf32> to vector<1x1x8x8xf32>
    tpu.vector_store %arg13[%c0_299, %c9_300, %c0_301, %c0_302], %319 {strides = array<i32>} : memref<1x16x8x8xf32, #tpu.memory_space<vmem>>, vector<1x1x8x8xf32>,
    %320 = vector.extract_strided_slice %303 {offsets = [0, 0], sizes = [8, 8], strides = [1, 1]} : vector<16x16xf32> to vector<8x8xf32>
    %cst_303 = arith.constant dense<0.000000e+00> : vector<8x8xf32>
    %321 = tpu.matmul %320, %4, %cst_303 {dimension_numbers = #tpu.dot_dimension_numbers<[1], [0], [0], [1], [0, 0, 1, 1], [], []>} : vector<8x8xf32>, vector<8x8xf32>, vector<8x8xf32> -> vector<8x8xf32>
    %cst_304 = arith.constant dense<0.000000e+00> : vector<8x8xf32>
    %322 = tpu.matmul %5, %321, %cst_304 {dimension_numbers = #tpu.dot_dimension_numbers<[1], [0], [0], [1], [0, 0, 1, 1], [], []>} : vector<8x8xf32>, vector<8x8xf32>, vector<8x8xf32> -> vector<8x8xf32>
    %323 = vector.extract_strided_slice %322 {offsets = [0, 0], sizes = [4, 4], strides = [1, 1]} : vector<8x8xf32> to vector<4x4xf32>
    %c0_305 = arith.constant 0 : index
    %c1_306 = arith.constant 1 : index
    %c0_307 = arith.constant 0 : index
    %c0_308 = arith.constant 0 : index
    %324 = vector.load %arg14[%c0_305, %c1_306, %c0_307, %c0_308] : memref<1x16x4x4xf32, #tpu.memory_space<vmem>>, vector<1x1x4x4xf32>
    %325 = vector.shape_cast %324 : vector<1x1x4x4xf32> to vector<4x4xf32>
    %326 = vector.shape_cast %323 : vector<4x4xf32> to vector<1x1x4x4xf32>
    tpu.vector_store %arg14[%c0_305, %c1_306, %c0_307, %c0_308], %326 {strides = array<i32>} : memref<1x16x4x4xf32, #tpu.memory_space<vmem>>, vector<1x1x4x4xf32>,
    %327 = vector.extract_strided_slice %322 {offsets = [4, 0], sizes = [4, 4], strides = [1, 1]} : vector<8x8xf32> to vector<4x4xf32>
    %c0_309 = arith.constant 0 : index
    %c7_310 = arith.constant 7 : index
    %c0_311 = arith.constant 0 : index
    %c0_312 = arith.constant 0 : index
    %328 = vector.load %arg14[%c0_309, %c7_310, %c0_311, %c0_312] : memref<1x16x4x4xf32, #tpu.memory_space<vmem>>, vector<1x1x4x4xf32>
    %329 = vector.shape_cast %328 : vector<1x1x4x4xf32> to vector<4x4xf32>
    %330 = vector.shape_cast %327 : vector<4x4xf32> to vector<1x1x4x4xf32>
    tpu.vector_store %arg14[%c0_309, %c7_310, %c0_311, %c0_312], %330 {strides = array<i32>} : memref<1x16x4x4xf32, #tpu.memory_space<vmem>>, vector<1x1x4x4xf32>,
    %331 = vector.extract_strided_slice %322 {offsets = [0, 4], sizes = [4, 4], strides = [1, 1]} : vector<8x8xf32> to vector<4x4xf32>
    %c0_313 = arith.constant 0 : index
    %c8_314 = arith.constant 8 : index
    %c0_315 = arith.constant 0 : index
    %c0_316 = arith.constant 0 : index
    %332 = vector.load %arg14[%c0_313, %c8_314, %c0_315, %c0_316] : memref<1x16x4x4xf32, #tpu.memory_space<vmem>>, vector<1x1x4x4xf32>
    %333 = vector.shape_cast %332 : vector<1x1x4x4xf32> to vector<4x4xf32>
    %334 = vector.shape_cast %331 : vector<4x4xf32> to vector<1x1x4x4xf32>
    tpu.vector_store %arg14[%c0_313, %c8_314, %c0_315, %c0_316], %334 {strides = array<i32>} : memref<1x16x4x4xf32, #tpu.memory_space<vmem>>, vector<1x1x4x4xf32>,
    %335 = vector.extract_strided_slice %322 {offsets = [4, 4], sizes = [4, 4], strides = [1, 1]} : vector<8x8xf32> to vector<4x4xf32>
    %c0_317 = arith.constant 0 : index
    %c9_318 = arith.constant 9 : index
    %c0_319 = arith.constant 0 : index
    %c0_320 = arith.constant 0 : index
    %336 = vector.load %arg14[%c0_317, %c9_318, %c0_319, %c0_320] : memref<1x16x4x4xf32, #tpu.memory_space<vmem>>, vector<1x1x4x4xf32>
    %337 = vector.shape_cast %336 : vector<1x1x4x4xf32> to vector<4x4xf32>
    %338 = vector.shape_cast %335 : vector<4x4xf32> to vector<1x1x4x4xf32>
    tpu.vector_store %arg14[%c0_317, %c9_318, %c0_319, %c0_320], %338 {strides = array<i32>} : memref<1x16x4x4xf32, #tpu.memory_space<vmem>>, vector<1x1x4x4xf32>,
    %339 = vector.extract_strided_slice %322 {offsets = [0, 0], sizes = [4, 4], strides = [1, 1]} : vector<8x8xf32> to vector<4x4xf32>
    %cst_321 = arith.constant dense<0.000000e+00> : vector<4x4xf32>
    %340 = tpu.matmul %339, %6, %cst_321 {dimension_numbers = #tpu.dot_dimension_numbers<[1], [0], [0], [1], [0, 0, 1, 1], [], []>} : vector<4x4xf32>, vector<4x4xf32>, vector<4x4xf32> -> vector<4x4xf32>
    %cst_322 = arith.constant dense<0.000000e+00> : vector<4x4xf32>
    %341 = tpu.matmul %7, %340, %cst_322 {dimension_numbers = #tpu.dot_dimension_numbers<[1], [0], [0], [1], [0, 0, 1, 1], [], []>} : vector<4x4xf32>, vector<4x4xf32>, vector<4x4xf32> -> vector<4x4xf32>
    %342 = vector.extract_strided_slice %341 {offsets = [0, 0], sizes = [2, 2], strides = [1, 1]} : vector<4x4xf32> to vector<2x2xf32>
    %c0_323 = arith.constant 0 : index
    %c1_324 = arith.constant 1 : index
    %c0_325 = arith.constant 0 : index
    %c0_326 = arith.constant 0 : index
    %343 = vector.load %arg15[%c0_323, %c1_324, %c0_325, %c0_326] : memref<1x16x2x2xf32, #tpu.memory_space<vmem>>, vector<1x1x2x2xf32>
    %344 = vector.shape_cast %343 : vector<1x1x2x2xf32> to vector<2x2xf32>
    %345 = vector.shape_cast %342 : vector<2x2xf32> to vector<1x1x2x2xf32>
    tpu.vector_store %arg15[%c0_323, %c1_324, %c0_325, %c0_326], %345 {strides = array<i32>} : memref<1x16x2x2xf32, #tpu.memory_space<vmem>>, vector<1x1x2x2xf32>,
    %346 = vector.extract_strided_slice %341 {offsets = [2, 0], sizes = [2, 2], strides = [1, 1]} : vector<4x4xf32> to vector<2x2xf32>
    %c0_327 = arith.constant 0 : index
    %c7_328 = arith.constant 7 : index
    %c0_329 = arith.constant 0 : index
    %c0_330 = arith.constant 0 : index
    %347 = vector.load %arg15[%c0_327, %c7_328, %c0_329, %c0_330] : memref<1x16x2x2xf32, #tpu.memory_space<vmem>>, vector<1x1x2x2xf32>
    %348 = vector.shape_cast %347 : vector<1x1x2x2xf32> to vector<2x2xf32>
    %349 = vector.shape_cast %346 : vector<2x2xf32> to vector<1x1x2x2xf32>
    tpu.vector_store %arg15[%c0_327, %c7_328, %c0_329, %c0_330], %349 {strides = array<i32>} : memref<1x16x2x2xf32, #tpu.memory_space<vmem>>, vector<1x1x2x2xf32>,
    %350 = vector.extract_strided_slice %341 {offsets = [0, 2], sizes = [2, 2], strides = [1, 1]} : vector<4x4xf32> to vector<2x2xf32>
    %c0_331 = arith.constant 0 : index
    %c8_332 = arith.constant 8 : index
    %c0_333 = arith.constant 0 : index
    %c0_334 = arith.constant 0 : index
    %351 = vector.load %arg15[%c0_331, %c8_332, %c0_333, %c0_334] : memref<1x16x2x2xf32, #tpu.memory_space<vmem>>, vector<1x1x2x2xf32>
    %352 = vector.shape_cast %351 : vector<1x1x2x2xf32> to vector<2x2xf32>
    %353 = vector.shape_cast %350 : vector<2x2xf32> to vector<1x1x2x2xf32>
    tpu.vector_store %arg15[%c0_331, %c8_332, %c0_333, %c0_334], %353 {strides = array<i32>} : memref<1x16x2x2xf32, #tpu.memory_space<vmem>>, vector<1x1x2x2xf32>,
    %354 = vector.extract_strided_slice %341 {offsets = [2, 2], sizes = [2, 2], strides = [1, 1]} : vector<4x4xf32> to vector<2x2xf32>
    %c0_335 = arith.constant 0 : index
    %c9_336 = arith.constant 9 : index
    %c0_337 = arith.constant 0 : index
    %c0_338 = arith.constant 0 : index
    %355 = vector.load %arg15[%c0_335, %c9_336, %c0_337, %c0_338] : memref<1x16x2x2xf32, #tpu.memory_space<vmem>>, vector<1x1x2x2xf32>
    %356 = vector.shape_cast %355 : vector<1x1x2x2xf32> to vector<2x2xf32>
    %357 = vector.shape_cast %354 : vector<2x2xf32> to vector<1x1x2x2xf32>
    tpu.vector_store %arg15[%c0_335, %c9_336, %c0_337, %c0_338], %357 {strides = array<i32>} : memref<1x16x2x2xf32, #tpu.memory_space<vmem>>, vector<1x1x2x2xf32>,
    %cst_339 = arith.constant 0.000000e+00 : f32
    %358 = vector.broadcast %cst_339 : f32 to vector<32x32xf32>
    %c0_340 = arith.constant 0 : index
    %c2_341 = arith.constant 2 : index
    %359 = memref.load %arg2[%c0_340, %c2_341] : memref<16x4xf32, #tpu.memory_space<smem>>
    %c0_342 = arith.constant 0 : index
    %c0_343 = arith.constant 0 : index
    %c0_344 = arith.constant 0 : index
    %c0_345 = arith.constant 0 : index
    %360 = vector.load %arg1[%c0_342, %c0_343, %c0_344, %c0_345] : memref<1x16x32x32xf32, #tpu.memory_space<vmem>>, vector<1x1x32x32xf32>
    %361 = vector.shape_cast %360 : vector<1x1x32x32xf32> to vector<32x32xf32>
    %362 = vector.broadcast %359 : f32 to vector<32x32xf32>
    %363 = arith.mulf %362, %361 : vector<32x32xf32>
    %364 = arith.addf %358, %363 : vector<32x32xf32>
    %c1_346 = arith.constant 1 : index
    %c2_347 = arith.constant 2 : index
    %365 = memref.load %arg2[%c1_346, %c2_347] : memref<16x4xf32, #tpu.memory_space<smem>>
    %c0_348 = arith.constant 0 : index
    %c1_349 = arith.constant 1 : index
    %c0_350 = arith.constant 0 : index
    %c0_351 = arith.constant 0 : index
    %366 = vector.load %arg1[%c0_348, %c1_349, %c0_350, %c0_351] : memref<1x16x32x32xf32, #tpu.memory_space<vmem>>, vector<1x1x32x32xf32>
    %367 = vector.shape_cast %366 : vector<1x1x32x32xf32> to vector<32x32xf32>
    %368 = vector.broadcast %365 : f32 to vector<32x32xf32>
    %369 = arith.mulf %368, %367 : vector<32x32xf32>
    %370 = arith.addf %364, %369 : vector<32x32xf32>
    %c2_352 = arith.constant 2 : index
    %c2_353 = arith.constant 2 : index
    %371 = memref.load %arg2[%c2_352, %c2_353] : memref<16x4xf32, #tpu.memory_space<smem>>
    %c0_354 = arith.constant 0 : index
    %c2_355 = arith.constant 2 : index
    %c0_356 = arith.constant 0 : index
    %c0_357 = arith.constant 0 : index
    %372 = vector.load %arg1[%c0_354, %c2_355, %c0_356, %c0_357] : memref<1x16x32x32xf32, #tpu.memory_space<vmem>>, vector<1x1x32x32xf32>
    %373 = vector.shape_cast %372 : vector<1x1x32x32xf32> to vector<32x32xf32>
    %374 = vector.broadcast %371 : f32 to vector<32x32xf32>
    %375 = arith.mulf %374, %373 : vector<32x32xf32>
    %376 = arith.addf %370, %375 : vector<32x32xf32>
    %c3_358 = arith.constant 3 : index
    %c2_359 = arith.constant 2 : index
    %377 = memref.load %arg2[%c3_358, %c2_359] : memref<16x4xf32, #tpu.memory_space<smem>>
    %c0_360 = arith.constant 0 : index
    %c3_361 = arith.constant 3 : index
    %c0_362 = arith.constant 0 : index
    %c0_363 = arith.constant 0 : index
    %378 = vector.load %arg1[%c0_360, %c3_361, %c0_362, %c0_363] : memref<1x16x32x32xf32, #tpu.memory_space<vmem>>, vector<1x1x32x32xf32>
    %379 = vector.shape_cast %378 : vector<1x1x32x32xf32> to vector<32x32xf32>
    %380 = vector.broadcast %377 : f32 to vector<32x32xf32>
    %381 = arith.mulf %380, %379 : vector<32x32xf32>
    %382 = arith.addf %376, %381 : vector<32x32xf32>
    %c4_364 = arith.constant 4 : index
    %c2_365 = arith.constant 2 : index
    %383 = memref.load %arg2[%c4_364, %c2_365] : memref<16x4xf32, #tpu.memory_space<smem>>
    %c0_366 = arith.constant 0 : index
    %c4_367 = arith.constant 4 : index
    %c0_368 = arith.constant 0 : index
    %c0_369 = arith.constant 0 : index
    %384 = vector.load %arg1[%c0_366, %c4_367, %c0_368, %c0_369] : memref<1x16x32x32xf32, #tpu.memory_space<vmem>>, vector<1x1x32x32xf32>
    %385 = vector.shape_cast %384 : vector<1x1x32x32xf32> to vector<32x32xf32>
    %386 = vector.broadcast %383 : f32 to vector<32x32xf32>
    %387 = arith.mulf %386, %385 : vector<32x32xf32>
    %388 = arith.addf %382, %387 : vector<32x32xf32>
    %c5_370 = arith.constant 5 : index
    %c2_371 = arith.constant 2 : index
    %389 = memref.load %arg2[%c5_370, %c2_371] : memref<16x4xf32, #tpu.memory_space<smem>>
    %c0_372 = arith.constant 0 : index
    %c5_373 = arith.constant 5 : index
    %c0_374 = arith.constant 0 : index
    %c0_375 = arith.constant 0 : index
    %390 = vector.load %arg1[%c0_372, %c5_373, %c0_374, %c0_375] : memref<1x16x32x32xf32, #tpu.memory_space<vmem>>, vector<1x1x32x32xf32>
    %391 = vector.shape_cast %390 : vector<1x1x32x32xf32> to vector<32x32xf32>
    %392 = vector.broadcast %389 : f32 to vector<32x32xf32>
    %393 = arith.mulf %392, %391 : vector<32x32xf32>
    %394 = arith.addf %388, %393 : vector<32x32xf32>
    %c6_376 = arith.constant 6 : index
    %c2_377 = arith.constant 2 : index
    %395 = memref.load %arg2[%c6_376, %c2_377] : memref<16x4xf32, #tpu.memory_space<smem>>
    %c0_378 = arith.constant 0 : index
    %c6_379 = arith.constant 6 : index
    %c0_380 = arith.constant 0 : index
    %c0_381 = arith.constant 0 : index
    %396 = vector.load %arg1[%c0_378, %c6_379, %c0_380, %c0_381] : memref<1x16x32x32xf32, #tpu.memory_space<vmem>>, vector<1x1x32x32xf32>
    %397 = vector.shape_cast %396 : vector<1x1x32x32xf32> to vector<32x32xf32>
    %398 = vector.broadcast %395 : f32 to vector<32x32xf32>
    %399 = arith.mulf %398, %397 : vector<32x32xf32>
    %400 = arith.addf %394, %399 : vector<32x32xf32>
    %c7_382 = arith.constant 7 : index
    %c2_383 = arith.constant 2 : index
    %401 = memref.load %arg2[%c7_382, %c2_383] : memref<16x4xf32, #tpu.memory_space<smem>>
    %c0_384 = arith.constant 0 : index
    %c7_385 = arith.constant 7 : index
    %c0_386 = arith.constant 0 : index
    %c0_387 = arith.constant 0 : index
    %402 = vector.load %arg1[%c0_384, %c7_385, %c0_386, %c0_387] : memref<1x16x32x32xf32, #tpu.memory_space<vmem>>, vector<1x1x32x32xf32>
    %403 = vector.shape_cast %402 : vector<1x1x32x32xf32> to vector<32x32xf32>
    %404 = vector.broadcast %401 : f32 to vector<32x32xf32>
    %405 = arith.mulf %404, %403 : vector<32x32xf32>
    %406 = arith.addf %400, %405 : vector<32x32xf32>
    %c8_388 = arith.constant 8 : index
    %c2_389 = arith.constant 2 : index
    %407 = memref.load %arg2[%c8_388, %c2_389] : memref<16x4xf32, #tpu.memory_space<smem>>
    %c0_390 = arith.constant 0 : index
    %c8_391 = arith.constant 8 : index
    %c0_392 = arith.constant 0 : index
    %c0_393 = arith.constant 0 : index
    %408 = vector.load %arg1[%c0_390, %c8_391, %c0_392, %c0_393] : memref<1x16x32x32xf32, #tpu.memory_space<vmem>>, vector<1x1x32x32xf32>
    %409 = vector.shape_cast %408 : vector<1x1x32x32xf32> to vector<32x32xf32>
    %410 = vector.broadcast %407 : f32 to vector<32x32xf32>
    %411 = arith.mulf %410, %409 : vector<32x32xf32>
    %412 = arith.addf %406, %411 : vector<32x32xf32>
    %c9_394 = arith.constant 9 : index
    %c2_395 = arith.constant 2 : index
    %413 = memref.load %arg2[%c9_394, %c2_395] : memref<16x4xf32, #tpu.memory_space<smem>>
    %c0_396 = arith.constant 0 : index
    %c9_397 = arith.constant 9 : index
    %c0_398 = arith.constant 0 : index
    %c0_399 = arith.constant 0 : index
    %414 = vector.load %arg1[%c0_396, %c9_397, %c0_398, %c0_399] : memref<1x16x32x32xf32, #tpu.memory_space<vmem>>, vector<1x1x32x32xf32>
    %415 = vector.shape_cast %414 : vector<1x1x32x32xf32> to vector<32x32xf32>
    %416 = vector.broadcast %413 : f32 to vector<32x32xf32>
    %417 = arith.mulf %416, %415 : vector<32x32xf32>
    %418 = arith.addf %412, %417 : vector<32x32xf32>
    %c10_400 = arith.constant 10 : index
    %c2_401 = arith.constant 2 : index
    %419 = memref.load %arg2[%c10_400, %c2_401] : memref<16x4xf32, #tpu.memory_space<smem>>
    %c0_402 = arith.constant 0 : index
    %c10_403 = arith.constant 10 : index
    %c0_404 = arith.constant 0 : index
    %c0_405 = arith.constant 0 : index
    %420 = vector.load %arg1[%c0_402, %c10_403, %c0_404, %c0_405] : memref<1x16x32x32xf32, #tpu.memory_space<vmem>>, vector<1x1x32x32xf32>
    %421 = vector.shape_cast %420 : vector<1x1x32x32xf32> to vector<32x32xf32>
    %422 = vector.broadcast %419 : f32 to vector<32x32xf32>
    %423 = arith.mulf %422, %421 : vector<32x32xf32>
    %424 = arith.addf %418, %423 : vector<32x32xf32>
    %c11_406 = arith.constant 11 : index
    %c2_407 = arith.constant 2 : index
    %425 = memref.load %arg2[%c11_406, %c2_407] : memref<16x4xf32, #tpu.memory_space<smem>>
    %c0_408 = arith.constant 0 : index
    %c11_409 = arith.constant 11 : index
    %c0_410 = arith.constant 0 : index
    %c0_411 = arith.constant 0 : index
    %426 = vector.load %arg1[%c0_408, %c11_409, %c0_410, %c0_411] : memref<1x16x32x32xf32, #tpu.memory_space<vmem>>, vector<1x1x32x32xf32>
    %427 = vector.shape_cast %426 : vector<1x1x32x32xf32> to vector<32x32xf32>
    %428 = vector.broadcast %425 : f32 to vector<32x32xf32>
    %429 = arith.mulf %428, %427 : vector<32x32xf32>
    %430 = arith.addf %424, %429 : vector<32x32xf32>
    %c12_412 = arith.constant 12 : index
    %c2_413 = arith.constant 2 : index
    %431 = memref.load %arg2[%c12_412, %c2_413] : memref<16x4xf32, #tpu.memory_space<smem>>
    %c0_414 = arith.constant 0 : index
    %c12_415 = arith.constant 12 : index
    %c0_416 = arith.constant 0 : index
    %c0_417 = arith.constant 0 : index
    %432 = vector.load %arg1[%c0_414, %c12_415, %c0_416, %c0_417] : memref<1x16x32x32xf32, #tpu.memory_space<vmem>>, vector<1x1x32x32xf32>
    %433 = vector.shape_cast %432 : vector<1x1x32x32xf32> to vector<32x32xf32>
    %434 = vector.broadcast %431 : f32 to vector<32x32xf32>
    %435 = arith.mulf %434, %433 : vector<32x32xf32>
    %436 = arith.addf %430, %435 : vector<32x32xf32>
    %c13_418 = arith.constant 13 : index
    %c2_419 = arith.constant 2 : index
    %437 = memref.load %arg2[%c13_418, %c2_419] : memref<16x4xf32, #tpu.memory_space<smem>>
    %c0_420 = arith.constant 0 : index
    %c13_421 = arith.constant 13 : index
    %c0_422 = arith.constant 0 : index
    %c0_423 = arith.constant 0 : index
    %438 = vector.load %arg1[%c0_420, %c13_421, %c0_422, %c0_423] : memref<1x16x32x32xf32, #tpu.memory_space<vmem>>, vector<1x1x32x32xf32>
    %439 = vector.shape_cast %438 : vector<1x1x32x32xf32> to vector<32x32xf32>
    %440 = vector.broadcast %437 : f32 to vector<32x32xf32>
    %441 = arith.mulf %440, %439 : vector<32x32xf32>
    %442 = arith.addf %436, %441 : vector<32x32xf32>
    %c14_424 = arith.constant 14 : index
    %c2_425 = arith.constant 2 : index
    %443 = memref.load %arg2[%c14_424, %c2_425] : memref<16x4xf32, #tpu.memory_space<smem>>
    %c0_426 = arith.constant 0 : index
    %c14_427 = arith.constant 14 : index
    %c0_428 = arith.constant 0 : index
    %c0_429 = arith.constant 0 : index
    %444 = vector.load %arg1[%c0_426, %c14_427, %c0_428, %c0_429] : memref<1x16x32x32xf32, #tpu.memory_space<vmem>>, vector<1x1x32x32xf32>
    %445 = vector.shape_cast %444 : vector<1x1x32x32xf32> to vector<32x32xf32>
    %446 = vector.broadcast %443 : f32 to vector<32x32xf32>
    %447 = arith.mulf %446, %445 : vector<32x32xf32>
    %448 = arith.addf %442, %447 : vector<32x32xf32>
    %c15_430 = arith.constant 15 : index
    %c2_431 = arith.constant 2 : index
    %449 = memref.load %arg2[%c15_430, %c2_431] : memref<16x4xf32, #tpu.memory_space<smem>>
    %c0_432 = arith.constant 0 : index
    %c15_433 = arith.constant 15 : index
    %c0_434 = arith.constant 0 : index
    %c0_435 = arith.constant 0 : index
    %450 = vector.load %arg1[%c0_432, %c15_433, %c0_434, %c0_435] : memref<1x16x32x32xf32, #tpu.memory_space<vmem>>, vector<1x1x32x32xf32>
    %451 = vector.shape_cast %450 : vector<1x1x32x32xf32> to vector<32x32xf32>
    %452 = vector.broadcast %449 : f32 to vector<32x32xf32>
    %453 = arith.mulf %452, %451 : vector<32x32xf32>
    %454 = arith.addf %448, %453 : vector<32x32xf32>
    %c2_436 = arith.constant 2 : index
    %455 = memref.load %arg3[%c2_436] : memref<4xf32, #tpu.memory_space<smem>>
    %456 = vector.broadcast %455 : f32 to vector<32x32xf32>
    %457 = arith.addf %454, %456 : vector<32x32xf32>
    %cst_437 = arith.constant dense<0.000000e+00> : vector<32x32xf32>
    %458 = tpu.matmul %457, %0, %cst_437 {dimension_numbers = #tpu.dot_dimension_numbers<[1], [0], [0], [1], [0, 0, 1, 1], [], []>} : vector<32x32xf32>, vector<32x32xf32>, vector<32x32xf32> -> vector<32x32xf32>
    %cst_438 = arith.constant dense<0.000000e+00> : vector<32x32xf32>
    %459 = tpu.matmul %1, %458, %cst_438 {dimension_numbers = #tpu.dot_dimension_numbers<[1], [0], [0], [1], [0, 0, 1, 1], [], []>} : vector<32x32xf32>, vector<32x32xf32>, vector<32x32xf32> -> vector<32x32xf32>
    %460 = vector.extract_strided_slice %459 {offsets = [0, 0], sizes = [16, 16], strides = [1, 1]} : vector<32x32xf32> to vector<16x16xf32>
    %c0_439 = arith.constant 0 : index
    %c2_440 = arith.constant 2 : index
    %c0_441 = arith.constant 0 : index
    %c0_442 = arith.constant 0 : index
    %461 = vector.load %arg12[%c0_439, %c2_440, %c0_441, %c0_442] : memref<1x16x16x16xf32, #tpu.memory_space<vmem>>, vector<1x1x16x16xf32>
    %462 = vector.shape_cast %461 : vector<1x1x16x16xf32> to vector<16x16xf32>
    %463 = vector.shape_cast %460 : vector<16x16xf32> to vector<1x1x16x16xf32>
    tpu.vector_store %arg12[%c0_439, %c2_440, %c0_441, %c0_442], %463 {strides = array<i32>} : memref<1x16x16x16xf32, #tpu.memory_space<vmem>>, vector<1x1x16x16xf32>,
    %464 = vector.extract_strided_slice %459 {offsets = [16, 0], sizes = [16, 16], strides = [1, 1]} : vector<32x32xf32> to vector<16x16xf32>
    %c0_443 = arith.constant 0 : index
    %c10_444 = arith.constant 10 : index
    %c0_445 = arith.constant 0 : index
    %c0_446 = arith.constant 0 : index
    %465 = vector.load %arg12[%c0_443, %c10_444, %c0_445, %c0_446] : memref<1x16x16x16xf32, #tpu.memory_space<vmem>>, vector<1x1x16x16xf32>
    %466 = vector.shape_cast %465 : vector<1x1x16x16xf32> to vector<16x16xf32>
    %467 = vector.shape_cast %464 : vector<16x16xf32> to vector<1x1x16x16xf32>
    tpu.vector_store %arg12[%c0_443, %c10_444, %c0_445, %c0_446], %467 {strides = array<i32>} : memref<1x16x16x16xf32, #tpu.memory_space<vmem>>, vector<1x1x16x16xf32>,
    %468 = vector.extract_strided_slice %459 {offsets = [0, 16], sizes = [16, 16], strides = [1, 1]} : vector<32x32xf32> to vector<16x16xf32>
    %c0_447 = arith.constant 0 : index
    %c11_448 = arith.constant 11 : index
    %c0_449 = arith.constant 0 : index
    %c0_450 = arith.constant 0 : index
    %469 = vector.load %arg12[%c0_447, %c11_448, %c0_449, %c0_450] : memref<1x16x16x16xf32, #tpu.memory_space<vmem>>, vector<1x1x16x16xf32>
    %470 = vector.shape_cast %469 : vector<1x1x16x16xf32> to vector<16x16xf32>
    %471 = vector.shape_cast %468 : vector<16x16xf32> to vector<1x1x16x16xf32>
    tpu.vector_store %arg12[%c0_447, %c11_448, %c0_449, %c0_450], %471 {strides = array<i32>} : memref<1x16x16x16xf32, #tpu.memory_space<vmem>>, vector<1x1x16x16xf32>,
    %472 = vector.extract_strided_slice %459 {offsets = [16, 16], sizes = [16, 16], strides = [1, 1]} : vector<32x32xf32> to vector<16x16xf32>
    %c0_451 = arith.constant 0 : index
    %c12_452 = arith.constant 12 : index
    %c0_453 = arith.constant 0 : index
    %c0_454 = arith.constant 0 : index
    %473 = vector.load %arg12[%c0_451, %c12_452, %c0_453, %c0_454] : memref<1x16x16x16xf32, #tpu.memory_space<vmem>>, vector<1x1x16x16xf32>
    %474 = vector.shape_cast %473 : vector<1x1x16x16xf32> to vector<16x16xf32>
    %475 = vector.shape_cast %472 : vector<16x16xf32> to vector<1x1x16x16xf32>
    tpu.vector_store %arg12[%c0_451, %c12_452, %c0_453, %c0_454], %475 {strides = array<i32>} : memref<1x16x16x16xf32, #tpu.memory_space<vmem>>, vector<1x1x16x16xf32>,
    %476 = vector.extract_strided_slice %459 {offsets = [0, 0], sizes = [16, 16], strides = [1, 1]} : vector<32x32xf32> to vector<16x16xf32>
    %cst_455 = arith.constant dense<0.000000e+00> : vector<16x16xf32>
    %477 = tpu.matmul %476, %2, %cst_455 {dimension_numbers = #tpu.dot_dimension_numbers<[1], [0], [0], [1], [0, 0, 1, 1], [], []>} : vector<16x16xf32>, vector<16x16xf32>, vector<16x16xf32> -> vector<16x16xf32>
    %cst_456 = arith.constant dense<0.000000e+00> : vector<16x16xf32>
    %478 = tpu.matmul %3, %477, %cst_456 {dimension_numbers = #tpu.dot_dimension_numbers<[1], [0], [0], [1], [0, 0, 1, 1], [], []>} : vector<16x16xf32>, vector<16x16xf32>, vector<16x16xf32> -> vector<16x16xf32>
    %479 = vector.extract_strided_slice %478 {offsets = [0, 0], sizes = [8, 8], strides = [1, 1]} : vector<16x16xf32> to vector<8x8xf32>
    %c0_457 = arith.constant 0 : index
    %c2_458 = arith.constant 2 : index
    %c0_459 = arith.constant 0 : index
    %c0_460 = arith.constant 0 : index
    %480 = vector.load %arg13[%c0_457, %c2_458, %c0_459, %c0_460] : memref<1x16x8x8xf32, #tpu.memory_space<vmem>>, vector<1x1x8x8xf32>
    %481 = vector.shape_cast %480 : vector<1x1x8x8xf32> to vector<8x8xf32>
    %482 = vector.shape_cast %479 : vector<8x8xf32> to vector<1x1x8x8xf32>
    tpu.vector_store %arg13[%c0_457, %c2_458, %c0_459, %c0_460], %482 {strides = array<i32>} : memref<1x16x8x8xf32, #tpu.memory_space<vmem>>, vector<1x1x8x8xf32>,
    %483 = vector.extract_strided_slice %478 {offsets = [8, 0], sizes = [8, 8], strides = [1, 1]} : vector<16x16xf32> to vector<8x8xf32>
    %c0_461 = arith.constant 0 : index
    %c10_462 = arith.constant 10 : index
    %c0_463 = arith.constant 0 : index
    %c0_464 = arith.constant 0 : index
    %484 = vector.load %arg13[%c0_461, %c10_462, %c0_463, %c0_464] : memref<1x16x8x8xf32, #tpu.memory_space<vmem>>, vector<1x1x8x8xf32>
    %485 = vector.shape_cast %484 : vector<1x1x8x8xf32> to vector<8x8xf32>
    %486 = vector.shape_cast %483 : vector<8x8xf32> to vector<1x1x8x8xf32>
    tpu.vector_store %arg13[%c0_461, %c10_462, %c0_463, %c0_464], %486 {strides = array<i32>} : memref<1x16x8x8xf32, #tpu.memory_space<vmem>>, vector<1x1x8x8xf32>,
    %487 = vector.extract_strided_slice %478 {offsets = [0, 8], sizes = [8, 8], strides = [1, 1]} : vector<16x16xf32> to vector<8x8xf32>
    %c0_465 = arith.constant 0 : index
    %c11_466 = arith.constant 11 : index
    %c0_467 = arith.constant 0 : index
    %c0_468 = arith.constant 0 : index
    %488 = vector.load %arg13[%c0_465, %c11_466, %c0_467, %c0_468] : memref<1x16x8x8xf32, #tpu.memory_space<vmem>>, vector<1x1x8x8xf32>
    %489 = vector.shape_cast %488 : vector<1x1x8x8xf32> to vector<8x8xf32>
    %490 = vector.shape_cast %487 : vector<8x8xf32> to vector<1x1x8x8xf32>
    tpu.vector_store %arg13[%c0_465, %c11_466, %c0_467, %c0_468], %490 {strides = array<i32>} : memref<1x16x8x8xf32, #tpu.memory_space<vmem>>, vector<1x1x8x8xf32>,
    %491 = vector.extract_strided_slice %478 {offsets = [8, 8], sizes = [8, 8], strides = [1, 1]} : vector<16x16xf32> to vector<8x8xf32>
    %c0_469 = arith.constant 0 : index
    %c12_470 = arith.constant 12 : index
    %c0_471 = arith.constant 0 : index
    %c0_472 = arith.constant 0 : index
    %492 = vector.load %arg13[%c0_469, %c12_470, %c0_471, %c0_472] : memref<1x16x8x8xf32, #tpu.memory_space<vmem>>, vector<1x1x8x8xf32>
    %493 = vector.shape_cast %492 : vector<1x1x8x8xf32> to vector<8x8xf32>
    %494 = vector.shape_cast %491 : vector<8x8xf32> to vector<1x1x8x8xf32>
    tpu.vector_store %arg13[%c0_469, %c12_470, %c0_471, %c0_472], %494 {strides = array<i32>} : memref<1x16x8x8xf32, #tpu.memory_space<vmem>>, vector<1x1x8x8xf32>,
    %495 = vector.extract_strided_slice %478 {offsets = [0, 0], sizes = [8, 8], strides = [1, 1]} : vector<16x16xf32> to vector<8x8xf32>
    %cst_473 = arith.constant dense<0.000000e+00> : vector<8x8xf32>
    %496 = tpu.matmul %495, %4, %cst_473 {dimension_numbers = #tpu.dot_dimension_numbers<[1], [0], [0], [1], [0, 0, 1, 1], [], []>} : vector<8x8xf32>, vector<8x8xf32>, vector<8x8xf32> -> vector<8x8xf32>
    %cst_474 = arith.constant dense<0.000000e+00> : vector<8x8xf32>
    %497 = tpu.matmul %5, %496, %cst_474 {dimension_numbers = #tpu.dot_dimension_numbers<[1], [0], [0], [1], [0, 0, 1, 1], [], []>} : vector<8x8xf32>, vector<8x8xf32>, vector<8x8xf32> -> vector<8x8xf32>
    %498 = vector.extract_strided_slice %497 {offsets = [0, 0], sizes = [4, 4], strides = [1, 1]} : vector<8x8xf32> to vector<4x4xf32>
    %c0_475 = arith.constant 0 : index
    %c2_476 = arith.constant 2 : index
    %c0_477 = arith.constant 0 : index
    %c0_478 = arith.constant 0 : index
    %499 = vector.load %arg14[%c0_475, %c2_476, %c0_477, %c0_478] : memref<1x16x4x4xf32, #tpu.memory_space<vmem>>, vector<1x1x4x4xf32>
    %500 = vector.shape_cast %499 : vector<1x1x4x4xf32> to vector<4x4xf32>
    %501 = vector.shape_cast %498 : vector<4x4xf32> to vector<1x1x4x4xf32>
    tpu.vector_store %arg14[%c0_475, %c2_476, %c0_477, %c0_478], %501 {strides = array<i32>} : memref<1x16x4x4xf32, #tpu.memory_space<vmem>>, vector<1x1x4x4xf32>,
    %502 = vector.extract_strided_slice %497 {offsets = [4, 0], sizes = [4, 4], strides = [1, 1]} : vector<8x8xf32> to vector<4x4xf32>
    %c0_479 = arith.constant 0 : index
    %c10_480 = arith.constant 10 : index
    %c0_481 = arith.constant 0 : index
    %c0_482 = arith.constant 0 : index
    %503 = vector.load %arg14[%c0_479, %c10_480, %c0_481, %c0_482] : memref<1x16x4x4xf32, #tpu.memory_space<vmem>>, vector<1x1x4x4xf32>
    %504 = vector.shape_cast %503 : vector<1x1x4x4xf32> to vector<4x4xf32>
    %505 = vector.shape_cast %502 : vector<4x4xf32> to vector<1x1x4x4xf32>
    tpu.vector_store %arg14[%c0_479, %c10_480, %c0_481, %c0_482], %505 {strides = array<i32>} : memref<1x16x4x4xf32, #tpu.memory_space<vmem>>, vector<1x1x4x4xf32>,
    %506 = vector.extract_strided_slice %497 {offsets = [0, 4], sizes = [4, 4], strides = [1, 1]} : vector<8x8xf32> to vector<4x4xf32>
    %c0_483 = arith.constant 0 : index
    %c11_484 = arith.constant 11 : index
    %c0_485 = arith.constant 0 : index
    %c0_486 = arith.constant 0 : index
    %507 = vector.load %arg14[%c0_483, %c11_484, %c0_485, %c0_486] : memref<1x16x4x4xf32, #tpu.memory_space<vmem>>, vector<1x1x4x4xf32>
    %508 = vector.shape_cast %507 : vector<1x1x4x4xf32> to vector<4x4xf32>
    %509 = vector.shape_cast %506 : vector<4x4xf32> to vector<1x1x4x4xf32>
    tpu.vector_store %arg14[%c0_483, %c11_484, %c0_485, %c0_486], %509 {strides = array<i32>} : memref<1x16x4x4xf32, #tpu.memory_space<vmem>>, vector<1x1x4x4xf32>,
    %510 = vector.extract_strided_slice %497 {offsets = [4, 4], sizes = [4, 4], strides = [1, 1]} : vector<8x8xf32> to vector<4x4xf32>
    %c0_487 = arith.constant 0 : index
    %c12_488 = arith.constant 12 : index
    %c0_489 = arith.constant 0 : index
    %c0_490 = arith.constant 0 : index
    %511 = vector.load %arg14[%c0_487, %c12_488, %c0_489, %c0_490] : memref<1x16x4x4xf32, #tpu.memory_space<vmem>>, vector<1x1x4x4xf32>
    %512 = vector.shape_cast %511 : vector<1x1x4x4xf32> to vector<4x4xf32>
    %513 = vector.shape_cast %510 : vector<4x4xf32> to vector<1x1x4x4xf32>
    tpu.vector_store %arg14[%c0_487, %c12_488, %c0_489, %c0_490], %513 {strides = array<i32>} : memref<1x16x4x4xf32, #tpu.memory_space<vmem>>, vector<1x1x4x4xf32>,
    %514 = vector.extract_strided_slice %497 {offsets = [0, 0], sizes = [4, 4], strides = [1, 1]} : vector<8x8xf32> to vector<4x4xf32>
    %cst_491 = arith.constant dense<0.000000e+00> : vector<4x4xf32>
    %515 = tpu.matmul %514, %6, %cst_491 {dimension_numbers = #tpu.dot_dimension_numbers<[1], [0], [0], [1], [0, 0, 1, 1], [], []>} : vector<4x4xf32>, vector<4x4xf32>, vector<4x4xf32> -> vector<4x4xf32>
    %cst_492 = arith.constant dense<0.000000e+00> : vector<4x4xf32>
    %516 = tpu.matmul %7, %515, %cst_492 {dimension_numbers = #tpu.dot_dimension_numbers<[1], [0], [0], [1], [0, 0, 1, 1], [], []>} : vector<4x4xf32>, vector<4x4xf32>, vector<4x4xf32> -> vector<4x4xf32>
    %517 = vector.extract_strided_slice %516 {offsets = [0, 0], sizes = [2, 2], strides = [1, 1]} : vector<4x4xf32> to vector<2x2xf32>
    %c0_493 = arith.constant 0 : index
    %c2_494 = arith.constant 2 : index
    %c0_495 = arith.constant 0 : index
    %c0_496 = arith.constant 0 : index
    %518 = vector.load %arg15[%c0_493, %c2_494, %c0_495, %c0_496] : memref<1x16x2x2xf32, #tpu.memory_space<vmem>>, vector<1x1x2x2xf32>
    %519 = vector.shape_cast %518 : vector<1x1x2x2xf32> to vector<2x2xf32>
    %520 = vector.shape_cast %517 : vector<2x2xf32> to vector<1x1x2x2xf32>
    tpu.vector_store %arg15[%c0_493, %c2_494, %c0_495, %c0_496], %520 {strides = array<i32>} : memref<1x16x2x2xf32, #tpu.memory_space<vmem>>, vector<1x1x2x2xf32>,
    %521 = vector.extract_strided_slice %516 {offsets = [2, 0], sizes = [2, 2], strides = [1, 1]} : vector<4x4xf32> to vector<2x2xf32>
    %c0_497 = arith.constant 0 : index
    %c10_498 = arith.constant 10 : index
    %c0_499 = arith.constant 0 : index
    %c0_500 = arith.constant 0 : index
    %522 = vector.load %arg15[%c0_497, %c10_498, %c0_499, %c0_500] : memref<1x16x2x2xf32, #tpu.memory_space<vmem>>, vector<1x1x2x2xf32>
    %523 = vector.shape_cast %522 : vector<1x1x2x2xf32> to vector<2x2xf32>
    %524 = vector.shape_cast %521 : vector<2x2xf32> to vector<1x1x2x2xf32>
    tpu.vector_store %arg15[%c0_497, %c10_498, %c0_499, %c0_500], %524 {strides = array<i32>} : memref<1x16x2x2xf32, #tpu.memory_space<vmem>>, vector<1x1x2x2xf32>,
    %525 = vector.extract_strided_slice %516 {offsets = [0, 2], sizes = [2, 2], strides = [1, 1]} : vector<4x4xf32> to vector<2x2xf32>
    %c0_501 = arith.constant 0 : index
    %c11_502 = arith.constant 11 : index
    %c0_503 = arith.constant 0 : index
    %c0_504 = arith.constant 0 : index
    %526 = vector.load %arg15[%c0_501, %c11_502, %c0_503, %c0_504] : memref<1x16x2x2xf32, #tpu.memory_space<vmem>>, vector<1x1x2x2xf32>
    %527 = vector.shape_cast %526 : vector<1x1x2x2xf32> to vector<2x2xf32>
    %528 = vector.shape_cast %525 : vector<2x2xf32> to vector<1x1x2x2xf32>
    tpu.vector_store %arg15[%c0_501, %c11_502, %c0_503, %c0_504], %528 {strides = array<i32>} : memref<1x16x2x2xf32, #tpu.memory_space<vmem>>, vector<1x1x2x2xf32>,
    %529 = vector.extract_strided_slice %516 {offsets = [2, 2], sizes = [2, 2], strides = [1, 1]} : vector<4x4xf32> to vector<2x2xf32>
    %c0_505 = arith.constant 0 : index
    %c12_506 = arith.constant 12 : index
    %c0_507 = arith.constant 0 : index
    %c0_508 = arith.constant 0 : index
    %530 = vector.load %arg15[%c0_505, %c12_506, %c0_507, %c0_508] : memref<1x16x2x2xf32, #tpu.memory_space<vmem>>, vector<1x1x2x2xf32>
    %531 = vector.shape_cast %530 : vector<1x1x2x2xf32> to vector<2x2xf32>
    %532 = vector.shape_cast %529 : vector<2x2xf32> to vector<1x1x2x2xf32>
    tpu.vector_store %arg15[%c0_505, %c12_506, %c0_507, %c0_508], %532 {strides = array<i32>} : memref<1x16x2x2xf32, #tpu.memory_space<vmem>>, vector<1x1x2x2xf32>,
    %cst_509 = arith.constant 0.000000e+00 : f32
    %533 = vector.broadcast %cst_509 : f32 to vector<32x32xf32>
    %c0_510 = arith.constant 0 : index
    %c3_511 = arith.constant 3 : index
    %534 = memref.load %arg2[%c0_510, %c3_511] : memref<16x4xf32, #tpu.memory_space<smem>>
    %c0_512 = arith.constant 0 : index
    %c0_513 = arith.constant 0 : index
    %c0_514 = arith.constant 0 : index
    %c0_515 = arith.constant 0 : index
    %535 = vector.load %arg1[%c0_512, %c0_513, %c0_514, %c0_515] : memref<1x16x32x32xf32, #tpu.memory_space<vmem>>, vector<1x1x32x32xf32>
    %536 = vector.shape_cast %535 : vector<1x1x32x32xf32> to vector<32x32xf32>
    %537 = vector.broadcast %534 : f32 to vector<32x32xf32>
    %538 = arith.mulf %537, %536 : vector<32x32xf32>
    %539 = arith.addf %533, %538 : vector<32x32xf32>
    %c1_516 = arith.constant 1 : index
    %c3_517 = arith.constant 3 : index
    %540 = memref.load %arg2[%c1_516, %c3_517] : memref<16x4xf32, #tpu.memory_space<smem>>
    %c0_518 = arith.constant 0 : index
    %c1_519 = arith.constant 1 : index
    %c0_520 = arith.constant 0 : index
    %c0_521 = arith.constant 0 : index
    %541 = vector.load %arg1[%c0_518, %c1_519, %c0_520, %c0_521] : memref<1x16x32x32xf32, #tpu.memory_space<vmem>>, vector<1x1x32x32xf32>
    %542 = vector.shape_cast %541 : vector<1x1x32x32xf32> to vector<32x32xf32>
    %543 = vector.broadcast %540 : f32 to vector<32x32xf32>
    %544 = arith.mulf %543, %542 : vector<32x32xf32>
    %545 = arith.addf %539, %544 : vector<32x32xf32>
    %c2_522 = arith.constant 2 : index
    %c3_523 = arith.constant 3 : index
    %546 = memref.load %arg2[%c2_522, %c3_523] : memref<16x4xf32, #tpu.memory_space<smem>>
    %c0_524 = arith.constant 0 : index
    %c2_525 = arith.constant 2 : index
    %c0_526 = arith.constant 0 : index
    %c0_527 = arith.constant 0 : index
    %547 = vector.load %arg1[%c0_524, %c2_525, %c0_526, %c0_527] : memref<1x16x32x32xf32, #tpu.memory_space<vmem>>, vector<1x1x32x32xf32>
    %548 = vector.shape_cast %547 : vector<1x1x32x32xf32> to vector<32x32xf32>
    %549 = vector.broadcast %546 : f32 to vector<32x32xf32>
    %550 = arith.mulf %549, %548 : vector<32x32xf32>
    %551 = arith.addf %545, %550 : vector<32x32xf32>
    %c3_528 = arith.constant 3 : index
    %c3_529 = arith.constant 3 : index
    %552 = memref.load %arg2[%c3_528, %c3_529] : memref<16x4xf32, #tpu.memory_space<smem>>
    %c0_530 = arith.constant 0 : index
    %c3_531 = arith.constant 3 : index
    %c0_532 = arith.constant 0 : index
    %c0_533 = arith.constant 0 : index
    %553 = vector.load %arg1[%c0_530, %c3_531, %c0_532, %c0_533] : memref<1x16x32x32xf32, #tpu.memory_space<vmem>>, vector<1x1x32x32xf32>
    %554 = vector.shape_cast %553 : vector<1x1x32x32xf32> to vector<32x32xf32>
    %555 = vector.broadcast %552 : f32 to vector<32x32xf32>
    %556 = arith.mulf %555, %554 : vector<32x32xf32>
    %557 = arith.addf %551, %556 : vector<32x32xf32>
    %c4_534 = arith.constant 4 : index
    %c3_535 = arith.constant 3 : index
    %558 = memref.load %arg2[%c4_534, %c3_535] : memref<16x4xf32, #tpu.memory_space<smem>>
    %c0_536 = arith.constant 0 : index
    %c4_537 = arith.constant 4 : index
    %c0_538 = arith.constant 0 : index
    %c0_539 = arith.constant 0 : index
    %559 = vector.load %arg1[%c0_536, %c4_537, %c0_538, %c0_539] : memref<1x16x32x32xf32, #tpu.memory_space<vmem>>, vector<1x1x32x32xf32>
    %560 = vector.shape_cast %559 : vector<1x1x32x32xf32> to vector<32x32xf32>
    %561 = vector.broadcast %558 : f32 to vector<32x32xf32>
    %562 = arith.mulf %561, %560 : vector<32x32xf32>
    %563 = arith.addf %557, %562 : vector<32x32xf32>
    %c5_540 = arith.constant 5 : index
    %c3_541 = arith.constant 3 : index
    %564 = memref.load %arg2[%c5_540, %c3_541] : memref<16x4xf32, #tpu.memory_space<smem>>
    %c0_542 = arith.constant 0 : index
    %c5_543 = arith.constant 5 : index
    %c0_544 = arith.constant 0 : index
    %c0_545 = arith.constant 0 : index
    %565 = vector.load %arg1[%c0_542, %c5_543, %c0_544, %c0_545] : memref<1x16x32x32xf32, #tpu.memory_space<vmem>>, vector<1x1x32x32xf32>
    %566 = vector.shape_cast %565 : vector<1x1x32x32xf32> to vector<32x32xf32>
    %567 = vector.broadcast %564 : f32 to vector<32x32xf32>
    %568 = arith.mulf %567, %566 : vector<32x32xf32>
    %569 = arith.addf %563, %568 : vector<32x32xf32>
    %c6_546 = arith.constant 6 : index
    %c3_547 = arith.constant 3 : index
    %570 = memref.load %arg2[%c6_546, %c3_547] : memref<16x4xf32, #tpu.memory_space<smem>>
    %c0_548 = arith.constant 0 : index
    %c6_549 = arith.constant 6 : index
    %c0_550 = arith.constant 0 : index
    %c0_551 = arith.constant 0 : index
    %571 = vector.load %arg1[%c0_548, %c6_549, %c0_550, %c0_551] : memref<1x16x32x32xf32, #tpu.memory_space<vmem>>, vector<1x1x32x32xf32>
    %572 = vector.shape_cast %571 : vector<1x1x32x32xf32> to vector<32x32xf32>
    %573 = vector.broadcast %570 : f32 to vector<32x32xf32>
    %574 = arith.mulf %573, %572 : vector<32x32xf32>
    %575 = arith.addf %569, %574 : vector<32x32xf32>
    %c7_552 = arith.constant 7 : index
    %c3_553 = arith.constant 3 : index
    %576 = memref.load %arg2[%c7_552, %c3_553] : memref<16x4xf32, #tpu.memory_space<smem>>
    %c0_554 = arith.constant 0 : index
    %c7_555 = arith.constant 7 : index
    %c0_556 = arith.constant 0 : index
    %c0_557 = arith.constant 0 : index
    %577 = vector.load %arg1[%c0_554, %c7_555, %c0_556, %c0_557] : memref<1x16x32x32xf32, #tpu.memory_space<vmem>>, vector<1x1x32x32xf32>
    %578 = vector.shape_cast %577 : vector<1x1x32x32xf32> to vector<32x32xf32>
    %579 = vector.broadcast %576 : f32 to vector<32x32xf32>
    %580 = arith.mulf %579, %578 : vector<32x32xf32>
    %581 = arith.addf %575, %580 : vector<32x32xf32>
    %c8_558 = arith.constant 8 : index
    %c3_559 = arith.constant 3 : index
    %582 = memref.load %arg2[%c8_558, %c3_559] : memref<16x4xf32, #tpu.memory_space<smem>>
    %c0_560 = arith.constant 0 : index
    %c8_561 = arith.constant 8 : index
    %c0_562 = arith.constant 0 : index
    %c0_563 = arith.constant 0 : index
    %583 = vector.load %arg1[%c0_560, %c8_561, %c0_562, %c0_563] : memref<1x16x32x32xf32, #tpu.memory_space<vmem>>, vector<1x1x32x32xf32>
    %584 = vector.shape_cast %583 : vector<1x1x32x32xf32> to vector<32x32xf32>
    %585 = vector.broadcast %582 : f32 to vector<32x32xf32>
    %586 = arith.mulf %585, %584 : vector<32x32xf32>
    %587 = arith.addf %581, %586 : vector<32x32xf32>
    %c9_564 = arith.constant 9 : index
    %c3_565 = arith.constant 3 : index
    %588 = memref.load %arg2[%c9_564, %c3_565] : memref<16x4xf32, #tpu.memory_space<smem>>
    %c0_566 = arith.constant 0 : index
    %c9_567 = arith.constant 9 : index
    %c0_568 = arith.constant 0 : index
    %c0_569 = arith.constant 0 : index
    %589 = vector.load %arg1[%c0_566, %c9_567, %c0_568, %c0_569] : memref<1x16x32x32xf32, #tpu.memory_space<vmem>>, vector<1x1x32x32xf32>
    %590 = vector.shape_cast %589 : vector<1x1x32x32xf32> to vector<32x32xf32>
    %591 = vector.broadcast %588 : f32 to vector<32x32xf32>
    %592 = arith.mulf %591, %590 : vector<32x32xf32>
    %593 = arith.addf %587, %592 : vector<32x32xf32>
    %c10_570 = arith.constant 10 : index
    %c3_571 = arith.constant 3 : index
    %594 = memref.load %arg2[%c10_570, %c3_571] : memref<16x4xf32, #tpu.memory_space<smem>>
    %c0_572 = arith.constant 0 : index
    %c10_573 = arith.constant 10 : index
    %c0_574 = arith.constant 0 : index
    %c0_575 = arith.constant 0 : index
    %595 = vector.load %arg1[%c0_572, %c10_573, %c0_574, %c0_575] : memref<1x16x32x32xf32, #tpu.memory_space<vmem>>, vector<1x1x32x32xf32>
    %596 = vector.shape_cast %595 : vector<1x1x32x32xf32> to vector<32x32xf32>
    %597 = vector.broadcast %594 : f32 to vector<32x32xf32>
    %598 = arith.mulf %597, %596 : vector<32x32xf32>
    %599 = arith.addf %593, %598 : vector<32x32xf32>
    %c11_576 = arith.constant 11 : index
    %c3_577 = arith.constant 3 : index
    %600 = memref.load %arg2[%c11_576, %c3_577] : memref<16x4xf32, #tpu.memory_space<smem>>
    %c0_578 = arith.constant 0 : index
    %c11_579 = arith.constant 11 : index
    %c0_580 = arith.constant 0 : index
    %c0_581 = arith.constant 0 : index
    %601 = vector.load %arg1[%c0_578, %c11_579, %c0_580, %c0_581] : memref<1x16x32x32xf32, #tpu.memory_space<vmem>>, vector<1x1x32x32xf32>
    %602 = vector.shape_cast %601 : vector<1x1x32x32xf32> to vector<32x32xf32>
    %603 = vector.broadcast %600 : f32 to vector<32x32xf32>
    %604 = arith.mulf %603, %602 : vector<32x32xf32>
    %605 = arith.addf %599, %604 : vector<32x32xf32>
    %c12_582 = arith.constant 12 : index
    %c3_583 = arith.constant 3 : index
    %606 = memref.load %arg2[%c12_582, %c3_583] : memref<16x4xf32, #tpu.memory_space<smem>>
    %c0_584 = arith.constant 0 : index
    %c12_585 = arith.constant 12 : index
    %c0_586 = arith.constant 0 : index
    %c0_587 = arith.constant 0 : index
    %607 = vector.load %arg1[%c0_584, %c12_585, %c0_586, %c0_587] : memref<1x16x32x32xf32, #tpu.memory_space<vmem>>, vector<1x1x32x32xf32>
    %608 = vector.shape_cast %607 : vector<1x1x32x32xf32> to vector<32x32xf32>
    %609 = vector.broadcast %606 : f32 to vector<32x32xf32>
    %610 = arith.mulf %609, %608 : vector<32x32xf32>
    %611 = arith.addf %605, %610 : vector<32x32xf32>
    %c13_588 = arith.constant 13 : index
    %c3_589 = arith.constant 3 : index
    %612 = memref.load %arg2[%c13_588, %c3_589] : memref<16x4xf32, #tpu.memory_space<smem>>
    %c0_590 = arith.constant 0 : index
    %c13_591 = arith.constant 13 : index
    %c0_592 = arith.constant 0 : index
    %c0_593 = arith.constant 0 : index
    %613 = vector.load %arg1[%c0_590, %c13_591, %c0_592, %c0_593] : memref<1x16x32x32xf32, #tpu.memory_space<vmem>>, vector<1x1x32x32xf32>
    %614 = vector.shape_cast %613 : vector<1x1x32x32xf32> to vector<32x32xf32>
    %615 = vector.broadcast %612 : f32 to vector<32x32xf32>
    %616 = arith.mulf %615, %614 : vector<32x32xf32>
    %617 = arith.addf %611, %616 : vector<32x32xf32>
    %c14_594 = arith.constant 14 : index
    %c3_595 = arith.constant 3 : index
    %618 = memref.load %arg2[%c14_594, %c3_595] : memref<16x4xf32, #tpu.memory_space<smem>>
    %c0_596 = arith.constant 0 : index
    %c14_597 = arith.constant 14 : index
    %c0_598 = arith.constant 0 : index
    %c0_599 = arith.constant 0 : index
    %619 = vector.load %arg1[%c0_596, %c14_597, %c0_598, %c0_599] : memref<1x16x32x32xf32, #tpu.memory_space<vmem>>, vector<1x1x32x32xf32>
    %620 = vector.shape_cast %619 : vector<1x1x32x32xf32> to vector<32x32xf32>
    %621 = vector.broadcast %618 : f32 to vector<32x32xf32>
    %622 = arith.mulf %621, %620 : vector<32x32xf32>
    %623 = arith.addf %617, %622 : vector<32x32xf32>
    %c15_600 = arith.constant 15 : index
    %c3_601 = arith.constant 3 : index
    %624 = memref.load %arg2[%c15_600, %c3_601] : memref<16x4xf32, #tpu.memory_space<smem>>
    %c0_602 = arith.constant 0 : index
    %c15_603 = arith.constant 15 : index
    %c0_604 = arith.constant 0 : index
    %c0_605 = arith.constant 0 : index
    %625 = vector.load %arg1[%c0_602, %c15_603, %c0_604, %c0_605] : memref<1x16x32x32xf32, #tpu.memory_space<vmem>>, vector<1x1x32x32xf32>
    %626 = vector.shape_cast %625 : vector<1x1x32x32xf32> to vector<32x32xf32>
    %627 = vector.broadcast %624 : f32 to vector<32x32xf32>
    %628 = arith.mulf %627, %626 : vector<32x32xf32>
    %629 = arith.addf %623, %628 : vector<32x32xf32>
    %c3_606 = arith.constant 3 : index
    %630 = memref.load %arg3[%c3_606] : memref<4xf32, #tpu.memory_space<smem>>
    %631 = vector.broadcast %630 : f32 to vector<32x32xf32>
    %632 = arith.addf %629, %631 : vector<32x32xf32>
    %cst_607 = arith.constant dense<0.000000e+00> : vector<32x32xf32>
    %633 = tpu.matmul %632, %0, %cst_607 {dimension_numbers = #tpu.dot_dimension_numbers<[1], [0], [0], [1], [0, 0, 1, 1], [], []>} : vector<32x32xf32>, vector<32x32xf32>, vector<32x32xf32> -> vector<32x32xf32>
    %cst_608 = arith.constant dense<0.000000e+00> : vector<32x32xf32>
    %634 = tpu.matmul %1, %633, %cst_608 {dimension_numbers = #tpu.dot_dimension_numbers<[1], [0], [0], [1], [0, 0, 1, 1], [], []>} : vector<32x32xf32>, vector<32x32xf32>, vector<32x32xf32> -> vector<32x32xf32>
    %635 = vector.extract_strided_slice %634 {offsets = [0, 0], sizes = [16, 16], strides = [1, 1]} : vector<32x32xf32> to vector<16x16xf32>
    %c0_609 = arith.constant 0 : index
    %c3_610 = arith.constant 3 : index
    %c0_611 = arith.constant 0 : index
    %c0_612 = arith.constant 0 : index
    %636 = vector.load %arg12[%c0_609, %c3_610, %c0_611, %c0_612] : memref<1x16x16x16xf32, #tpu.memory_space<vmem>>, vector<1x1x16x16xf32>
    %637 = vector.shape_cast %636 : vector<1x1x16x16xf32> to vector<16x16xf32>
    %638 = vector.shape_cast %635 : vector<16x16xf32> to vector<1x1x16x16xf32>
    tpu.vector_store %arg12[%c0_609, %c3_610, %c0_611, %c0_612], %638 {strides = array<i32>} : memref<1x16x16x16xf32, #tpu.memory_space<vmem>>, vector<1x1x16x16xf32>,
    %639 = vector.extract_strided_slice %634 {offsets = [16, 0], sizes = [16, 16], strides = [1, 1]} : vector<32x32xf32> to vector<16x16xf32>
    %c0_613 = arith.constant 0 : index
    %c13_614 = arith.constant 13 : index
    %c0_615 = arith.constant 0 : index
    %c0_616 = arith.constant 0 : index
    %640 = vector.load %arg12[%c0_613, %c13_614, %c0_615, %c0_616] : memref<1x16x16x16xf32, #tpu.memory_space<vmem>>, vector<1x1x16x16xf32>
    %641 = vector.shape_cast %640 : vector<1x1x16x16xf32> to vector<16x16xf32>
    %642 = vector.shape_cast %639 : vector<16x16xf32> to vector<1x1x16x16xf32>
    tpu.vector_store %arg12[%c0_613, %c13_614, %c0_615, %c0_616], %642 {strides = array<i32>} : memref<1x16x16x16xf32, #tpu.memory_space<vmem>>, vector<1x1x16x16xf32>,
    %643 = vector.extract_strided_slice %634 {offsets = [0, 16], sizes = [16, 16], strides = [1, 1]} : vector<32x32xf32> to vector<16x16xf32>
    %c0_617 = arith.constant 0 : index
    %c14_618 = arith.constant 14 : index
    %c0_619 = arith.constant 0 : index
    %c0_620 = arith.constant 0 : index
    %644 = vector.load %arg12[%c0_617, %c14_618, %c0_619, %c0_620] : memref<1x16x16x16xf32, #tpu.memory_space<vmem>>, vector<1x1x16x16xf32>
    %645 = vector.shape_cast %644 : vector<1x1x16x16xf32> to vector<16x16xf32>
    %646 = vector.shape_cast %643 : vector<16x16xf32> to vector<1x1x16x16xf32>
    tpu.vector_store %arg12[%c0_617, %c14_618, %c0_619, %c0_620], %646 {strides = array<i32>} : memref<1x16x16x16xf32, #tpu.memory_space<vmem>>, vector<1x1x16x16xf32>,
    %647 = vector.extract_strided_slice %634 {offsets = [16, 16], sizes = [16, 16], strides = [1, 1]} : vector<32x32xf32> to vector<16x16xf32>
    %c0_621 = arith.constant 0 : index
    %c15_622 = arith.constant 15 : index
    %c0_623 = arith.constant 0 : index
    %c0_624 = arith.constant 0 : index
    %648 = vector.load %arg12[%c0_621, %c15_622, %c0_623, %c0_624] : memref<1x16x16x16xf32, #tpu.memory_space<vmem>>, vector<1x1x16x16xf32>
    %649 = vector.shape_cast %648 : vector<1x1x16x16xf32> to vector<16x16xf32>
    %650 = vector.shape_cast %647 : vector<16x16xf32> to vector<1x1x16x16xf32>
    tpu.vector_store %arg12[%c0_621, %c15_622, %c0_623, %c0_624], %650 {strides = array<i32>} : memref<1x16x16x16xf32, #tpu.memory_space<vmem>>, vector<1x1x16x16xf32>,
    %651 = vector.extract_strided_slice %634 {offsets = [0, 0], sizes = [16, 16], strides = [1, 1]} : vector<32x32xf32> to vector<16x16xf32>
    %cst_625 = arith.constant dense<0.000000e+00> : vector<16x16xf32>
    %652 = tpu.matmul %651, %2, %cst_625 {dimension_numbers = #tpu.dot_dimension_numbers<[1], [0], [0], [1], [0, 0, 1, 1], [], []>} : vector<16x16xf32>, vector<16x16xf32>, vector<16x16xf32> -> vector<16x16xf32>
    %cst_626 = arith.constant dense<0.000000e+00> : vector<16x16xf32>
    %653 = tpu.matmul %3, %652, %cst_626 {dimension_numbers = #tpu.dot_dimension_numbers<[1], [0], [0], [1], [0, 0, 1, 1], [], []>} : vector<16x16xf32>, vector<16x16xf32>, vector<16x16xf32> -> vector<16x16xf32>
    %654 = vector.extract_strided_slice %653 {offsets = [0, 0], sizes = [8, 8], strides = [1, 1]} : vector<16x16xf32> to vector<8x8xf32>
    %c0_627 = arith.constant 0 : index
    %c3_628 = arith.constant 3 : index
    %c0_629 = arith.constant 0 : index
    %c0_630 = arith.constant 0 : index
    %655 = vector.load %arg13[%c0_627, %c3_628, %c0_629, %c0_630] : memref<1x16x8x8xf32, #tpu.memory_space<vmem>>, vector<1x1x8x8xf32>
    %656 = vector.shape_cast %655 : vector<1x1x8x8xf32> to vector<8x8xf32>
    %657 = vector.shape_cast %654 : vector<8x8xf32> to vector<1x1x8x8xf32>
    tpu.vector_store %arg13[%c0_627, %c3_628, %c0_629, %c0_630], %657 {strides = array<i32>} : memref<1x16x8x8xf32, #tpu.memory_space<vmem>>, vector<1x1x8x8xf32>,
    %658 = vector.extract_strided_slice %653 {offsets = [8, 0], sizes = [8, 8], strides = [1, 1]} : vector<16x16xf32> to vector<8x8xf32>
    %c0_631 = arith.constant 0 : index
    %c13_632 = arith.constant 13 : index
    %c0_633 = arith.constant 0 : index
    %c0_634 = arith.constant 0 : index
    %659 = vector.load %arg13[%c0_631, %c13_632, %c0_633, %c0_634] : memref<1x16x8x8xf32, #tpu.memory_space<vmem>>, vector<1x1x8x8xf32>
    %660 = vector.shape_cast %659 : vector<1x1x8x8xf32> to vector<8x8xf32>
    %661 = vector.shape_cast %658 : vector<8x8xf32> to vector<1x1x8x8xf32>
    tpu.vector_store %arg13[%c0_631, %c13_632, %c0_633, %c0_634], %661 {strides = array<i32>} : memref<1x16x8x8xf32, #tpu.memory_space<vmem>>, vector<1x1x8x8xf32>,
    %662 = vector.extract_strided_slice %653 {offsets = [0, 8], sizes = [8, 8], strides = [1, 1]} : vector<16x16xf32> to vector<8x8xf32>
    %c0_635 = arith.constant 0 : index
    %c14_636 = arith.constant 14 : index
    %c0_637 = arith.constant 0 : index
    %c0_638 = arith.constant 0 : index
    %663 = vector.load %arg13[%c0_635, %c14_636, %c0_637, %c0_638] : memref<1x16x8x8xf32, #tpu.memory_space<vmem>>, vector<1x1x8x8xf32>
    %664 = vector.shape_cast %663 : vector<1x1x8x8xf32> to vector<8x8xf32>
    %665 = vector.shape_cast %662 : vector<8x8xf32> to vector<1x1x8x8xf32>
    tpu.vector_store %arg13[%c0_635, %c14_636, %c0_637, %c0_638], %665 {strides = array<i32>} : memref<1x16x8x8xf32, #tpu.memory_space<vmem>>, vector<1x1x8x8xf32>,
    %666 = vector.extract_strided_slice %653 {offsets = [8, 8], sizes = [8, 8], strides = [1, 1]} : vector<16x16xf32> to vector<8x8xf32>
    %c0_639 = arith.constant 0 : index
    %c15_640 = arith.constant 15 : index
    %c0_641 = arith.constant 0 : index
    %c0_642 = arith.constant 0 : index
    %667 = vector.load %arg13[%c0_639, %c15_640, %c0_641, %c0_642] : memref<1x16x8x8xf32, #tpu.memory_space<vmem>>, vector<1x1x8x8xf32>
    %668 = vector.shape_cast %667 : vector<1x1x8x8xf32> to vector<8x8xf32>
    %669 = vector.shape_cast %666 : vector<8x8xf32> to vector<1x1x8x8xf32>
    tpu.vector_store %arg13[%c0_639, %c15_640, %c0_641, %c0_642], %669 {strides = array<i32>} : memref<1x16x8x8xf32, #tpu.memory_space<vmem>>, vector<1x1x8x8xf32>,
    %670 = vector.extract_strided_slice %653 {offsets = [0, 0], sizes = [8, 8], strides = [1, 1]} : vector<16x16xf32> to vector<8x8xf32>
    %cst_643 = arith.constant dense<0.000000e+00> : vector<8x8xf32>
    %671 = tpu.matmul %670, %4, %cst_643 {dimension_numbers = #tpu.dot_dimension_numbers<[1], [0], [0], [1], [0, 0, 1, 1], [], []>} : vector<8x8xf32>, vector<8x8xf32>, vector<8x8xf32> -> vector<8x8xf32>
    %cst_644 = arith.constant dense<0.000000e+00> : vector<8x8xf32>
    %672 = tpu.matmul %5, %671, %cst_644 {dimension_numbers = #tpu.dot_dimension_numbers<[1], [0], [0], [1], [0, 0, 1, 1], [], []>} : vector<8x8xf32>, vector<8x8xf32>, vector<8x8xf32> -> vector<8x8xf32>
    %673 = vector.extract_strided_slice %672 {offsets = [0, 0], sizes = [4, 4], strides = [1, 1]} : vector<8x8xf32> to vector<4x4xf32>
    %c0_645 = arith.constant 0 : index
    %c3_646 = arith.constant 3 : index
    %c0_647 = arith.constant 0 : index
    %c0_648 = arith.constant 0 : index
    %674 = vector.load %arg14[%c0_645, %c3_646, %c0_647, %c0_648] : memref<1x16x4x4xf32, #tpu.memory_space<vmem>>, vector<1x1x4x4xf32>
    %675 = vector.shape_cast %674 : vector<1x1x4x4xf32> to vector<4x4xf32>
    %676 = vector.shape_cast %673 : vector<4x4xf32> to vector<1x1x4x4xf32>
    tpu.vector_store %arg14[%c0_645, %c3_646, %c0_647, %c0_648], %676 {strides = array<i32>} : memref<1x16x4x4xf32, #tpu.memory_space<vmem>>, vector<1x1x4x4xf32>,
    %677 = vector.extract_strided_slice %672 {offsets = [4, 0], sizes = [4, 4], strides = [1, 1]} : vector<8x8xf32> to vector<4x4xf32>
    %c0_649 = arith.constant 0 : index
    %c13_650 = arith.constant 13 : index
    %c0_651 = arith.constant 0 : index
    %c0_652 = arith.constant 0 : index
    %678 = vector.load %arg14[%c0_649, %c13_650, %c0_651, %c0_652] : memref<1x16x4x4xf32, #tpu.memory_space<vmem>>, vector<1x1x4x4xf32>
    %679 = vector.shape_cast %678 : vector<1x1x4x4xf32> to vector<4x4xf32>
    %680 = vector.shape_cast %677 : vector<4x4xf32> to vector<1x1x4x4xf32>
    tpu.vector_store %arg14[%c0_649, %c13_650, %c0_651, %c0_652], %680 {strides = array<i32>} : memref<1x16x4x4xf32, #tpu.memory_space<vmem>>, vector<1x1x4x4xf32>,
    %681 = vector.extract_strided_slice %672 {offsets = [0, 4], sizes = [4, 4], strides = [1, 1]} : vector<8x8xf32> to vector<4x4xf32>
    %c0_653 = arith.constant 0 : index
    %c14_654 = arith.constant 14 : index
    %c0_655 = arith.constant 0 : index
    %c0_656 = arith.constant 0 : index
    %682 = vector.load %arg14[%c0_653, %c14_654, %c0_655, %c0_656] : memref<1x16x4x4xf32, #tpu.memory_space<vmem>>, vector<1x1x4x4xf32>
    %683 = vector.shape_cast %682 : vector<1x1x4x4xf32> to vector<4x4xf32>
    %684 = vector.shape_cast %681 : vector<4x4xf32> to vector<1x1x4x4xf32>
    tpu.vector_store %arg14[%c0_653, %c14_654, %c0_655, %c0_656], %684 {strides = array<i32>} : memref<1x16x4x4xf32, #tpu.memory_space<vmem>>, vector<1x1x4x4xf32>,
    %685 = vector.extract_strided_slice %672 {offsets = [4, 4], sizes = [4, 4], strides = [1, 1]} : vector<8x8xf32> to vector<4x4xf32>
    %c0_657 = arith.constant 0 : index
    %c15_658 = arith.constant 15 : index
    %c0_659 = arith.constant 0 : index
    %c0_660 = arith.constant 0 : index
    %686 = vector.load %arg14[%c0_657, %c15_658, %c0_659, %c0_660] : memref<1x16x4x4xf32, #tpu.memory_space<vmem>>, vector<1x1x4x4xf32>
    %687 = vector.shape_cast %686 : vector<1x1x4x4xf32> to vector<4x4xf32>
    %688 = vector.shape_cast %685 : vector<4x4xf32> to vector<1x1x4x4xf32>
    tpu.vector_store %arg14[%c0_657, %c15_658, %c0_659, %c0_660], %688 {strides = array<i32>} : memref<1x16x4x4xf32, #tpu.memory_space<vmem>>, vector<1x1x4x4xf32>,
    %689 = vector.extract_strided_slice %672 {offsets = [0, 0], sizes = [4, 4], strides = [1, 1]} : vector<8x8xf32> to vector<4x4xf32>
    %cst_661 = arith.constant dense<0.000000e+00> : vector<4x4xf32>
    %690 = tpu.matmul %689, %6, %cst_661 {dimension_numbers = #tpu.dot_dimension_numbers<[1], [0], [0], [1], [0, 0, 1, 1], [], []>} : vector<4x4xf32>, vector<4x4xf32>, vector<4x4xf32> -> vector<4x4xf32>
    %cst_662 = arith.constant dense<0.000000e+00> : vector<4x4xf32>
    %691 = tpu.matmul %7, %690, %cst_662 {dimension_numbers = #tpu.dot_dimension_numbers<[1], [0], [0], [1], [0, 0, 1, 1], [], []>} : vector<4x4xf32>, vector<4x4xf32>, vector<4x4xf32> -> vector<4x4xf32>
    %692 = vector.extract_strided_slice %691 {offsets = [0, 0], sizes = [2, 2], strides = [1, 1]} : vector<4x4xf32> to vector<2x2xf32>
    %c0_663 = arith.constant 0 : index
    %c3_664 = arith.constant 3 : index
    %c0_665 = arith.constant 0 : index
    %c0_666 = arith.constant 0 : index
    %693 = vector.load %arg15[%c0_663, %c3_664, %c0_665, %c0_666] : memref<1x16x2x2xf32, #tpu.memory_space<vmem>>, vector<1x1x2x2xf32>
    %694 = vector.shape_cast %693 : vector<1x1x2x2xf32> to vector<2x2xf32>
    %695 = vector.shape_cast %692 : vector<2x2xf32> to vector<1x1x2x2xf32>
    tpu.vector_store %arg15[%c0_663, %c3_664, %c0_665, %c0_666], %695 {strides = array<i32>} : memref<1x16x2x2xf32, #tpu.memory_space<vmem>>, vector<1x1x2x2xf32>,
    %696 = vector.extract_strided_slice %691 {offsets = [2, 0], sizes = [2, 2], strides = [1, 1]} : vector<4x4xf32> to vector<2x2xf32>
    %c0_667 = arith.constant 0 : index
    %c13_668 = arith.constant 13 : index
    %c0_669 = arith.constant 0 : index
    %c0_670 = arith.constant 0 : index
    %697 = vector.load %arg15[%c0_667, %c13_668, %c0_669, %c0_670] : memref<1x16x2x2xf32, #tpu.memory_space<vmem>>, vector<1x1x2x2xf32>
    %698 = vector.shape_cast %697 : vector<1x1x2x2xf32> to vector<2x2xf32>
    %699 = vector.shape_cast %696 : vector<2x2xf32> to vector<1x1x2x2xf32>
    tpu.vector_store %arg15[%c0_667, %c13_668, %c0_669, %c0_670], %699 {strides = array<i32>} : memref<1x16x2x2xf32, #tpu.memory_space<vmem>>, vector<1x1x2x2xf32>,
    %700 = vector.extract_strided_slice %691 {offsets = [0, 2], sizes = [2, 2], strides = [1, 1]} : vector<4x4xf32> to vector<2x2xf32>
    %c0_671 = arith.constant 0 : index
    %c14_672 = arith.constant 14 : index
    %c0_673 = arith.constant 0 : index
    %c0_674 = arith.constant 0 : index
    %701 = vector.load %arg15[%c0_671, %c14_672, %c0_673, %c0_674] : memref<1x16x2x2xf32, #tpu.memory_space<vmem>>, vector<1x1x2x2xf32>
    %702 = vector.shape_cast %701 : vector<1x1x2x2xf32> to vector<2x2xf32>
    %703 = vector.shape_cast %700 : vector<2x2xf32> to vector<1x1x2x2xf32>
    tpu.vector_store %arg15[%c0_671, %c14_672, %c0_673, %c0_674], %703 {strides = array<i32>} : memref<1x16x2x2xf32, #tpu.memory_space<vmem>>, vector<1x1x2x2xf32>,
    %704 = vector.extract_strided_slice %691 {offsets = [2, 2], sizes = [2, 2], strides = [1, 1]} : vector<4x4xf32> to vector<2x2xf32>
    %c0_675 = arith.constant 0 : index
    %c15_676 = arith.constant 15 : index
    %c0_677 = arith.constant 0 : index
    %c0_678 = arith.constant 0 : index
    %705 = vector.load %arg15[%c0_675, %c15_676, %c0_677, %c0_678] : memref<1x16x2x2xf32, #tpu.memory_space<vmem>>, vector<1x1x2x2xf32>
    %706 = vector.shape_cast %705 : vector<1x1x2x2xf32> to vector<2x2xf32>
    %707 = vector.shape_cast %704 : vector<2x2xf32> to vector<1x1x2x2xf32>
    tpu.vector_store %arg15[%c0_675, %c15_676, %c0_677, %c0_678], %707 {strides = array<i32>} : memref<1x16x2x2xf32, #tpu.memory_space<vmem>>, vector<1x1x2x2xf32>,
    return
  }
  func.func @transform_0(%arg0: i32) -> (i32, i32, i32, i32) {
    %c0_i32 = arith.constant 0 : i32
    %c0_i32_0 = arith.constant 0 : i32
    %c0_i32_1 = arith.constant 0 : i32
    %c0_i32_2 = arith.constant 0 : i32
    return %arg0, %c0_i32, %c0_i32_0, %c0_i32_1 : i32, i32, i32, i32
  }
  func.func @transform_1(%arg0: i32) -> (i32, i32) {
    %c0_i32 = arith.constant 0 : i32
    %c0_i32_0 = arith.constant 0 : i32
    %c0_i32_1 = arith.constant 0 : i32
    return %c0_i32, %c0_i32_0 : i32, i32
  }
  func.func @transform_2(%arg0: i32) -> i32 {
    %c0_i32 = arith.constant 0 : i32
    %c0_i32_0 = arith.constant 0 : i32
    return %c0_i32 : i32
  }
  func.func @transform_3(%arg0: i32) -> (i32, i32) {
    %c0_i32 = arith.constant 0 : i32
    %c0_i32_0 = arith.constant 0 : i32
    %c0_i32_1 = arith.constant 0 : i32
    return %c0_i32, %c0_i32_0 : i32, i32
  }
  func.func @transform_4(%arg0: i32) -> (i32, i32) {
    %c0_i32 = arith.constant 0 : i32
    %c0_i32_0 = arith.constant 0 : i32
    %c0_i32_1 = arith.constant 0 : i32
    return %c0_i32, %c0_i32_0 : i32, i32
  }
  func.func @transform_5(%arg0: i32) -> (i32, i32) {
    %c0_i32 = arith.constant 0 : i32
    %c0_i32_0 = arith.constant 0 : i32
    %c0_i32_1 = arith.constant 0 : i32
    return %c0_i32, %c0_i32_0 : i32, i32
  }
  func.func @transform_6(%arg0: i32) -> (i32, i32) {
    %c0_i32 = arith.constant 0 : i32
    %c0_i32_0 = arith.constant 0 : i32
    %c0_i32_1 = arith.constant 0 : i32
    return %c0_i32, %c0_i32_0 : i32, i32
  }
  func.func @transform_7(%arg0: i32) -> (i32, i32) {
    %c0_i32 = arith.constant 0 : i32
    %c0_i32_0 = arith.constant 0 : i32
    %c0_i32_1 = arith.constant 0 : i32
    return %c0_i32, %c0_i32_0 : i32, i32
  }
  func.func @transform_8(%arg0: i32) -> (i32, i32) {
    %c0_i32 = arith.constant 0 : i32
    %c0_i32_0 = arith.constant 0 : i32
    %c0_i32_1 = arith.constant 0 : i32
    return %c0_i32, %c0_i32_0 : i32, i32
  }
  func.func @transform_9(%arg0: i32) -> (i32, i32) {
    %c0_i32 = arith.constant 0 : i32
    %c0_i32_0 = arith.constant 0 : i32
    %c0_i32_1 = arith.constant 0 : i32
    return %c0_i32, %c0_i32_0 : i32, i32
  }
  func.func @transform_10(%arg0: i32) -> (i32, i32) {
    %c0_i32 = arith.constant 0 : i32
    %c0_i32_0 = arith.constant 0 : i32
    %c0_i32_1 = arith.constant 0 : i32
    return %c0_i32, %c0_i32_0 : i32, i32
  }
  func.func @transform_11(%arg0: i32) -> (i32, i32, i32, i32) {
    %c0_i32 = arith.constant 0 : i32
    %c0_i32_0 = arith.constant 0 : i32
    %c0_i32_1 = arith.constant 0 : i32
    %c0_i32_2 = arith.constant 0 : i32
    return %arg0, %c0_i32, %c0_i32_0, %c0_i32_1 : i32, i32, i32, i32
  }
  func.func @transform_12(%arg0: i32) -> (i32, i32, i32, i32) {
    %c0_i32 = arith.constant 0 : i32
    %c0_i32_0 = arith.constant 0 : i32
    %c0_i32_1 = arith.constant 0 : i32
    %c0_i32_2 = arith.constant 0 : i32
    return %arg0, %c0_i32, %c0_i32_0, %c0_i32_1 : i32, i32, i32, i32
  }
  func.func @transform_13(%arg0: i32) -> (i32, i32, i32, i32) {
    %c0_i32 = arith.constant 0 : i32
    %c0_i32_0 = arith.constant 0 : i32
    %c0_i32_1 = arith.constant 0 : i32
    %c0_i32_2 = arith.constant 0 : i32
    return %arg0, %c0_i32, %c0_i32_0, %c0_i32_1 : i32, i32, i32, i32
  }
  func.func @transform_14(%arg0: i32) -> (i32, i32, i32, i32) {
    %c0_i32 = arith.constant 0 : i32
    %c0_i32_0 = arith.constant 0 : i32
    %c0_i32_1 = arith.constant 0 : i32
    %c0_i32_2 = arith.constant 0 : i32
    return %arg0, %c0_i32, %c0_i32_0, %c0_i32_1 : i32, i32, i32, i32
  }
}

module attributes {stable_mosaic.version = 11 : i64} {
  func.func @_ff_kernel(%arg0: i32, %arg1: memref<1x24x16xf32, #tpu.memory_space<vmem>>, %arg2: memref<32x24xf32, #tpu.memory_space<vmem>>, %arg3: memref<32x1xf32, #tpu.memory_space<vmem>>, %arg4: memref<16x32xf32, #tpu.memory_space<vmem>>, %arg5: memref<16x1xf32, #tpu.memory_space<vmem>>, %arg6: memref<9x32x16xf32, #tpu.memory_space<vmem>>, %arg7: memref<32x1xf32, #tpu.memory_space<vmem>>, %arg8: memref<9x16xf32, #tpu.memory_space<vmem>>, %arg9: memref<1x32x16xf32, #tpu.memory_space<vmem>>, %arg10: memref<16x26xf32, #tpu.memory_space<vmem>>) attributes {dimension_semantics = [#tpu.dimension_semantics<parallel>], iteration_bounds = array<i64: 2>, scalar_prefetch = 0 : i64, scratch_operands = 1 : i64, tpu.core_type = #tpu.core_type<tc>, window_params = [{transform_indices = @transform_0, window_bounds = array<i64: 1, 24, 16>}, {pipeline_mode = #tpu.pipeline_mode<synchronous>, transform_indices = @transform_1, window_bounds = array<i64: 32, 24>}, {pipeline_mode = #tpu.pipeline_mode<synchronous>, transform_indices = @transform_2, window_bounds = array<i64: 32, 1>}, {pipeline_mode = #tpu.pipeline_mode<synchronous>, transform_indices = @transform_3, window_bounds = array<i64: 16, 32>}, {pipeline_mode = #tpu.pipeline_mode<synchronous>, transform_indices = @transform_4, window_bounds = array<i64: 16, 1>}, {pipeline_mode = #tpu.pipeline_mode<synchronous>, transform_indices = @transform_5, window_bounds = array<i64: 9, 32, 16>}, {pipeline_mode = #tpu.pipeline_mode<synchronous>, transform_indices = @transform_6, window_bounds = array<i64: 32, 1>}, {pipeline_mode = #tpu.pipeline_mode<synchronous>, transform_indices = @transform_7, window_bounds = array<i64: 9, 16>}, {transform_indices = @transform_8, window_bounds = array<i64: 1, 32, 16>}]} {
    %c0 = arith.constant 0 : index
    %c0_0 = arith.constant 0 : index
    %c0_1 = arith.constant 0 : index
    %0 = vector.load %arg1[%c0, %c0_0, %c0_1] : memref<1x24x16xf32, #tpu.memory_space<vmem>>, vector<1x24x16xf32>
    %1 = vector.shape_cast %0 : vector<1x24x16xf32> to vector<24x16xf32>
    %c0_2 = arith.constant 0 : index
    %c0_3 = arith.constant 0 : index
    %2 = vector.load %arg2[%c0_2, %c0_3] : memref<32x24xf32, #tpu.memory_space<vmem>>, vector<32x24xf32>
    %cst = arith.constant dense<0.000000e+00> : vector<32x16xf32>
    %3 = tpu.matmul %2, %1, %cst {dimension_numbers = #tpu.dot_dimension_numbers<[1], [0], [0], [1], [0, 0, 1, 1], [], []>} : vector<32x24xf32>, vector<24x16xf32>, vector<32x16xf32> -> vector<32x16xf32>
    %c0_4 = arith.constant 0 : index
    %c0_5 = arith.constant 0 : index
    %4 = vector.load %arg3[%c0_4, %c0_5] : memref<32x1xf32, #tpu.memory_space<vmem>>, vector<32x1xf32>
    %5 = vector.broadcast %4 : vector<32x1xf32> to vector<32x16xf32>
    %6 = arith.addf %3, %5 : vector<32x16xf32>
    %cst_6 = arith.constant 5.000000e-01 : f32
    %7 = vector.broadcast %cst_6 : f32 to vector<32x16xf32>
    %8 = arith.mulf %7, %6 : vector<32x16xf32>
    %cst_7 = arith.constant 0.707106769 : f32
    %9 = vector.broadcast %cst_7 : f32 to vector<32x16xf32>
    %10 = arith.mulf %6, %9 : vector<32x16xf32>
    %cst_8 = arith.constant 0.000000e+00 : f32
    %11 = vector.broadcast %cst_8 : f32 to vector<32x16xf32>
    %12 = arith.cmpf oge, %10, %11 : vector<32x16xf32>
    %cst_9 = arith.constant 1.000000e+00 : f32
    %cst_10 = arith.constant -1.000000e+00 : f32
    %13 = vector.broadcast %cst_9 : f32 to vector<32x16xf32>
    %14 = vector.broadcast %cst_10 : f32 to vector<32x16xf32>
    %15 = arith.select %12, %13, %14 : vector<32x16xi1>, vector<32x16xf32>
    %16 = math.absf %10 : vector<32x16xf32>
    %cst_11 = arith.constant 0.327591091 : f32
    %17 = vector.broadcast %cst_11 : f32 to vector<32x16xf32>
    %18 = arith.mulf %17, %16 : vector<32x16xf32>
    %cst_12 = arith.constant 1.000000e+00 : f32
    %19 = vector.broadcast %cst_12 : f32 to vector<32x16xf32>
    %20 = arith.addf %19, %18 : vector<32x16xf32>
    %cst_13 = arith.constant 1.000000e+00 : f32
    %21 = vector.broadcast %cst_13 : f32 to vector<32x16xf32>
    %22 = arith.divf %21, %20 : vector<32x16xf32>
    %cst_14 = arith.constant 1.06140542 : f32
    %23 = vector.broadcast %cst_14 : f32 to vector<32x16xf32>
    %24 = arith.mulf %22, %23 : vector<32x16xf32>
    %cst_15 = arith.constant -1.45315206 : f32
    %25 = vector.broadcast %cst_15 : f32 to vector<32x16xf32>
    %26 = arith.addf %25, %24 : vector<32x16xf32>
    %27 = arith.mulf %22, %26 : vector<32x16xf32>
    %cst_16 = arith.constant 1.42141378 : f32
    %28 = vector.broadcast %cst_16 : f32 to vector<32x16xf32>
    %29 = arith.addf %28, %27 : vector<32x16xf32>
    %30 = arith.mulf %22, %29 : vector<32x16xf32>
    %cst_17 = arith.constant -0.284496725 : f32
    %31 = vector.broadcast %cst_17 : f32 to vector<32x16xf32>
    %32 = arith.addf %31, %30 : vector<32x16xf32>
    %33 = arith.mulf %22, %32 : vector<32x16xf32>
    %cst_18 = arith.constant 0.254829586 : f32
    %34 = vector.broadcast %cst_18 : f32 to vector<32x16xf32>
    %35 = arith.addf %34, %33 : vector<32x16xf32>
    %36 = arith.mulf %22, %35 : vector<32x16xf32>
    %cst_19 = arith.constant 0.000000e+00 : f32
    %37 = vector.broadcast %cst_19 : f32 to vector<32x16xf32>
    %38 = arith.subf %37, %16 : vector<32x16xf32>
    %39 = arith.mulf %38, %16 : vector<32x16xf32>
    %40 = math.exp %39 : vector<32x16xf32>
    %41 = arith.mulf %36, %40 : vector<32x16xf32>
    %cst_20 = arith.constant 1.000000e+00 : f32
    %42 = vector.broadcast %cst_20 : f32 to vector<32x16xf32>
    %43 = arith.subf %42, %41 : vector<32x16xf32>
    %44 = arith.mulf %15, %43 : vector<32x16xf32>
    %cst_21 = arith.constant 1.000000e+00 : f32
    %45 = vector.broadcast %cst_21 : f32 to vector<32x16xf32>
    %46 = arith.addf %45, %44 : vector<32x16xf32>
    %47 = arith.mulf %8, %46 : vector<32x16xf32>
    %c0_22 = arith.constant 0 : index
    %c0_23 = arith.constant 0 : index
    %48 = vector.load %arg4[%c0_22, %c0_23] : memref<16x32xf32, #tpu.memory_space<vmem>>, vector<16x32xf32>
    %cst_24 = arith.constant dense<0.000000e+00> : vector<16x16xf32>
    %49 = tpu.matmul %48, %47, %cst_24 {dimension_numbers = #tpu.dot_dimension_numbers<[1], [0], [0], [1], [0, 0, 1, 1], [], []>} : vector<16x32xf32>, vector<32x16xf32>, vector<16x16xf32> -> vector<16x16xf32>
    %c0_25 = arith.constant 0 : index
    %c0_26 = arith.constant 0 : index
    %50 = vector.load %arg5[%c0_25, %c0_26] : memref<16x1xf32, #tpu.memory_space<vmem>>, vector<16x1xf32>
    %51 = vector.broadcast %50 : vector<16x1xf32> to vector<16x16xf32>
    %52 = arith.addf %49, %51 : vector<16x16xf32>
    %cst_27 = arith.constant 0.000000e+00 : f32
    %53 = vector.broadcast %cst_27 : f32 to vector<16x26xf32>
    %c0_28 = arith.constant 0 : index
    %c0_29 = arith.constant 0 : index
    %54 = vector.load %arg10[%c0_28, %c0_29] : memref<16x26xf32, #tpu.memory_space<vmem>>, vector<16x26xf32>
    tpu.vector_store %arg10[%c0_28, %c0_29], %53 {strides = array<i32>} : memref<16x26xf32, #tpu.memory_space<vmem>>, vector<16x26xf32>,
    %c0_30 = arith.constant 0 : index
    %c5 = arith.constant 5 : index
    %55 = vector.load %arg10[%c0_30, %c5] : memref<16x26xf32, #tpu.memory_space<vmem>>, vector<16x16xf32>
    tpu.vector_store %arg10[%c0_30, %c5], %52 {strides = array<i32>} : memref<16x26xf32, #tpu.memory_space<vmem>>, vector<16x16xf32>,
    %c0_31 = arith.constant 0 : index
    %c0_32 = arith.constant 0 : index
    %56 = vector.load %arg7[%c0_31, %c0_32] : memref<32x1xf32, #tpu.memory_space<vmem>>, vector<32x1xf32>
    %cst_33 = arith.constant 0.000000e+00 : f32
    %57 = vector.broadcast %cst_33 : f32 to vector<32x16xf32>
    %58 = vector.broadcast %56 : vector<32x1xf32> to vector<32x16xf32>
    %59 = arith.addf %58, %57 : vector<32x16xf32>
    %c0_34 = arith.constant 0 : index
    %c10 = arith.constant 10 : index
    %60 = vector.load %arg10[%c0_34, %c10] : memref<16x26xf32, #tpu.memory_space<vmem>>, vector<16x16xf32>
    %c0_35 = arith.constant 0 : index
    %c0_36 = arith.constant 0 : index
    %61 = vector.load %arg8[%c0_35, %c0_36] : memref<9x16xf32, #tpu.memory_space<vmem>>, vector<1x16xf32>
    %62 = vector.broadcast %61 : vector<1x16xf32> to vector<16x16xf32>
    %63 = arith.mulf %60, %62 : vector<16x16xf32>
    %c0_37 = arith.constant 0 : index
    %c0_38 = arith.constant 0 : index
    %c0_39 = arith.constant 0 : index
    %64 = vector.load %arg6[%c0_37, %c0_38, %c0_39] : memref<9x32x16xf32, #tpu.memory_space<vmem>>, vector<1x32x16xf32>
    %65 = vector.shape_cast %64 : vector<1x32x16xf32> to vector<32x16xf32>
    %cst_40 = arith.constant dense<0.000000e+00> : vector<32x16xf32>
    %66 = tpu.matmul %65, %63, %cst_40 {dimension_numbers = #tpu.dot_dimension_numbers<[1], [0], [0], [1], [0, 0, 1, 1], [], []>} : vector<32x16xf32>, vector<16x16xf32>, vector<32x16xf32> -> vector<32x16xf32>
    %67 = arith.addf %59, %66 : vector<32x16xf32>
    %c0_41 = arith.constant 0 : index
    %c9 = arith.constant 9 : index
    %68 = vector.load %arg10[%c0_41, %c9] : memref<16x26xf32, #tpu.memory_space<vmem>>, vector<16x16xf32>
    %c1 = arith.constant 1 : index
    %c0_42 = arith.constant 0 : index
    %69 = vector.load %arg8[%c1, %c0_42] : memref<9x16xf32, #tpu.memory_space<vmem>>, vector<1x16xf32>
    %70 = vector.broadcast %69 : vector<1x16xf32> to vector<16x16xf32>
    %71 = arith.mulf %68, %70 : vector<16x16xf32>
    %c1_43 = arith.constant 1 : index
    %c0_44 = arith.constant 0 : index
    %c0_45 = arith.constant 0 : index
    %72 = vector.load %arg6[%c1_43, %c0_44, %c0_45] : memref<9x32x16xf32, #tpu.memory_space<vmem>>, vector<1x32x16xf32>
    %73 = vector.shape_cast %72 : vector<1x32x16xf32> to vector<32x16xf32>
    %cst_46 = arith.constant dense<0.000000e+00> : vector<32x16xf32>
    %74 = tpu.matmul %73, %71, %cst_46 {dimension_numbers = #tpu.dot_dimension_numbers<[1], [0], [0], [1], [0, 0, 1, 1], [], []>} : vector<32x16xf32>, vector<16x16xf32>, vector<32x16xf32> -> vector<32x16xf32>
    %75 = arith.addf %67, %74 : vector<32x16xf32>
    %c0_47 = arith.constant 0 : index
    %c8 = arith.constant 8 : index
    %76 = vector.load %arg10[%c0_47, %c8] : memref<16x26xf32, #tpu.memory_space<vmem>>, vector<16x16xf32>
    %c2 = arith.constant 2 : index
    %c0_48 = arith.constant 0 : index
    %77 = vector.load %arg8[%c2, %c0_48] : memref<9x16xf32, #tpu.memory_space<vmem>>, vector<1x16xf32>
    %78 = vector.broadcast %77 : vector<1x16xf32> to vector<16x16xf32>
    %79 = arith.mulf %76, %78 : vector<16x16xf32>
    %c2_49 = arith.constant 2 : index
    %c0_50 = arith.constant 0 : index
    %c0_51 = arith.constant 0 : index
    %80 = vector.load %arg6[%c2_49, %c0_50, %c0_51] : memref<9x32x16xf32, #tpu.memory_space<vmem>>, vector<1x32x16xf32>
    %81 = vector.shape_cast %80 : vector<1x32x16xf32> to vector<32x16xf32>
    %cst_52 = arith.constant dense<0.000000e+00> : vector<32x16xf32>
    %82 = tpu.matmul %81, %79, %cst_52 {dimension_numbers = #tpu.dot_dimension_numbers<[1], [0], [0], [1], [0, 0, 1, 1], [], []>} : vector<32x16xf32>, vector<16x16xf32>, vector<32x16xf32> -> vector<32x16xf32>
    %83 = arith.addf %75, %82 : vector<32x16xf32>
    %c0_53 = arith.constant 0 : index
    %c6 = arith.constant 6 : index
    %84 = vector.load %arg10[%c0_53, %c6] : memref<16x26xf32, #tpu.memory_space<vmem>>, vector<16x16xf32>
    %c3 = arith.constant 3 : index
    %c0_54 = arith.constant 0 : index
    %85 = vector.load %arg8[%c3, %c0_54] : memref<9x16xf32, #tpu.memory_space<vmem>>, vector<1x16xf32>
    %86 = vector.broadcast %85 : vector<1x16xf32> to vector<16x16xf32>
    %87 = arith.mulf %84, %86 : vector<16x16xf32>
    %c3_55 = arith.constant 3 : index
    %c0_56 = arith.constant 0 : index
    %c0_57 = arith.constant 0 : index
    %88 = vector.load %arg6[%c3_55, %c0_56, %c0_57] : memref<9x32x16xf32, #tpu.memory_space<vmem>>, vector<1x32x16xf32>
    %89 = vector.shape_cast %88 : vector<1x32x16xf32> to vector<32x16xf32>
    %cst_58 = arith.constant dense<0.000000e+00> : vector<32x16xf32>
    %90 = tpu.matmul %89, %87, %cst_58 {dimension_numbers = #tpu.dot_dimension_numbers<[1], [0], [0], [1], [0, 0, 1, 1], [], []>} : vector<32x16xf32>, vector<16x16xf32>, vector<32x16xf32> -> vector<32x16xf32>
    %91 = arith.addf %83, %90 : vector<32x16xf32>
    %c0_59 = arith.constant 0 : index
    %c5_60 = arith.constant 5 : index
    %92 = vector.load %arg10[%c0_59, %c5_60] : memref<16x26xf32, #tpu.memory_space<vmem>>, vector<16x16xf32>
    %c4 = arith.constant 4 : index
    %c0_61 = arith.constant 0 : index
    %93 = vector.load %arg8[%c4, %c0_61] : memref<9x16xf32, #tpu.memory_space<vmem>>, vector<1x16xf32>
    %94 = vector.broadcast %93 : vector<1x16xf32> to vector<16x16xf32>
    %95 = arith.mulf %92, %94 : vector<16x16xf32>
    %c4_62 = arith.constant 4 : index
    %c0_63 = arith.constant 0 : index
    %c0_64 = arith.constant 0 : index
    %96 = vector.load %arg6[%c4_62, %c0_63, %c0_64] : memref<9x32x16xf32, #tpu.memory_space<vmem>>, vector<1x32x16xf32>
    %97 = vector.shape_cast %96 : vector<1x32x16xf32> to vector<32x16xf32>
    %cst_65 = arith.constant dense<0.000000e+00> : vector<32x16xf32>
    %98 = tpu.matmul %97, %95, %cst_65 {dimension_numbers = #tpu.dot_dimension_numbers<[1], [0], [0], [1], [0, 0, 1, 1], [], []>} : vector<32x16xf32>, vector<16x16xf32>, vector<32x16xf32> -> vector<32x16xf32>
    %99 = arith.addf %91, %98 : vector<32x16xf32>
    %c0_66 = arith.constant 0 : index
    %c4_67 = arith.constant 4 : index
    %100 = vector.load %arg10[%c0_66, %c4_67] : memref<16x26xf32, #tpu.memory_space<vmem>>, vector<16x16xf32>
    %c5_68 = arith.constant 5 : index
    %c0_69 = arith.constant 0 : index
    %101 = vector.load %arg8[%c5_68, %c0_69] : memref<9x16xf32, #tpu.memory_space<vmem>>, vector<1x16xf32>
    %102 = vector.broadcast %101 : vector<1x16xf32> to vector<16x16xf32>
    %103 = arith.mulf %100, %102 : vector<16x16xf32>
    %c5_70 = arith.constant 5 : index
    %c0_71 = arith.constant 0 : index
    %c0_72 = arith.constant 0 : index
    %104 = vector.load %arg6[%c5_70, %c0_71, %c0_72] : memref<9x32x16xf32, #tpu.memory_space<vmem>>, vector<1x32x16xf32>
    %105 = vector.shape_cast %104 : vector<1x32x16xf32> to vector<32x16xf32>
    %cst_73 = arith.constant dense<0.000000e+00> : vector<32x16xf32>
    %106 = tpu.matmul %105, %103, %cst_73 {dimension_numbers = #tpu.dot_dimension_numbers<[1], [0], [0], [1], [0, 0, 1, 1], [], []>} : vector<32x16xf32>, vector<16x16xf32>, vector<32x16xf32> -> vector<32x16xf32>
    %107 = arith.addf %99, %106 : vector<32x16xf32>
    %c0_74 = arith.constant 0 : index
    %c2_75 = arith.constant 2 : index
    %108 = vector.load %arg10[%c0_74, %c2_75] : memref<16x26xf32, #tpu.memory_space<vmem>>, vector<16x16xf32>
    %c6_76 = arith.constant 6 : index
    %c0_77 = arith.constant 0 : index
    %109 = vector.load %arg8[%c6_76, %c0_77] : memref<9x16xf32, #tpu.memory_space<vmem>>, vector<1x16xf32>
    %110 = vector.broadcast %109 : vector<1x16xf32> to vector<16x16xf32>
    %111 = arith.mulf %108, %110 : vector<16x16xf32>
    %c6_78 = arith.constant 6 : index
    %c0_79 = arith.constant 0 : index
    %c0_80 = arith.constant 0 : index
    %112 = vector.load %arg6[%c6_78, %c0_79, %c0_80] : memref<9x32x16xf32, #tpu.memory_space<vmem>>, vector<1x32x16xf32>
    %113 = vector.shape_cast %112 : vector<1x32x16xf32> to vector<32x16xf32>
    %cst_81 = arith.constant dense<0.000000e+00> : vector<32x16xf32>
    %114 = tpu.matmul %113, %111, %cst_81 {dimension_numbers = #tpu.dot_dimension_numbers<[1], [0], [0], [1], [0, 0, 1, 1], [], []>} : vector<32x16xf32>, vector<16x16xf32>, vector<32x16xf32> -> vector<32x16xf32>
    %115 = arith.addf %107, %114 : vector<32x16xf32>
    %c0_82 = arith.constant 0 : index
    %c1_83 = arith.constant 1 : index
    %116 = vector.load %arg10[%c0_82, %c1_83] : memref<16x26xf32, #tpu.memory_space<vmem>>, vector<16x16xf32>
    %c7 = arith.constant 7 : index
    %c0_84 = arith.constant 0 : index
    %117 = vector.load %arg8[%c7, %c0_84] : memref<9x16xf32, #tpu.memory_space<vmem>>, vector<1x16xf32>
    %118 = vector.broadcast %117 : vector<1x16xf32> to vector<16x16xf32>
    %119 = arith.mulf %116, %118 : vector<16x16xf32>
    %c7_85 = arith.constant 7 : index
    %c0_86 = arith.constant 0 : index
    %c0_87 = arith.constant 0 : index
    %120 = vector.load %arg6[%c7_85, %c0_86, %c0_87] : memref<9x32x16xf32, #tpu.memory_space<vmem>>, vector<1x32x16xf32>
    %121 = vector.shape_cast %120 : vector<1x32x16xf32> to vector<32x16xf32>
    %cst_88 = arith.constant dense<0.000000e+00> : vector<32x16xf32>
    %122 = tpu.matmul %121, %119, %cst_88 {dimension_numbers = #tpu.dot_dimension_numbers<[1], [0], [0], [1], [0, 0, 1, 1], [], []>} : vector<32x16xf32>, vector<16x16xf32>, vector<32x16xf32> -> vector<32x16xf32>
    %123 = arith.addf %115, %122 : vector<32x16xf32>
    %c0_89 = arith.constant 0 : index
    %c0_90 = arith.constant 0 : index
    %124 = vector.load %arg10[%c0_89, %c0_90] : memref<16x26xf32, #tpu.memory_space<vmem>>, vector<16x16xf32>
    %c8_91 = arith.constant 8 : index
    %c0_92 = arith.constant 0 : index
    %125 = vector.load %arg8[%c8_91, %c0_92] : memref<9x16xf32, #tpu.memory_space<vmem>>, vector<1x16xf32>
    %126 = vector.broadcast %125 : vector<1x16xf32> to vector<16x16xf32>
    %127 = arith.mulf %124, %126 : vector<16x16xf32>
    %c8_93 = arith.constant 8 : index
    %c0_94 = arith.constant 0 : index
    %c0_95 = arith.constant 0 : index
    %128 = vector.load %arg6[%c8_93, %c0_94, %c0_95] : memref<9x32x16xf32, #tpu.memory_space<vmem>>, vector<1x32x16xf32>
    %129 = vector.shape_cast %128 : vector<1x32x16xf32> to vector<32x16xf32>
    %cst_96 = arith.constant dense<0.000000e+00> : vector<32x16xf32>
    %130 = tpu.matmul %129, %127, %cst_96 {dimension_numbers = #tpu.dot_dimension_numbers<[1], [0], [0], [1], [0, 0, 1, 1], [], []>} : vector<32x16xf32>, vector<16x16xf32>, vector<32x16xf32> -> vector<32x16xf32>
    %131 = arith.addf %123, %130 : vector<32x16xf32>
    %c0_97 = arith.constant 0 : index
    %c0_98 = arith.constant 0 : index
    %c0_99 = arith.constant 0 : index
    %132 = vector.load %arg9[%c0_97, %c0_98, %c0_99] : memref<1x32x16xf32, #tpu.memory_space<vmem>>, vector<1x32x16xf32>
    %133 = vector.shape_cast %132 : vector<1x32x16xf32> to vector<32x16xf32>
    %134 = vector.shape_cast %131 : vector<32x16xf32> to vector<1x32x16xf32>
    tpu.vector_store %arg9[%c0_97, %c0_98, %c0_99], %134 {strides = array<i32>} : memref<1x32x16xf32, #tpu.memory_space<vmem>>, vector<1x32x16xf32>,
    return
  }
  func.func @transform_0(%arg0: i32) -> (i32, i32, i32) {
    %c0_i32 = arith.constant 0 : i32
    %c0_i32_0 = arith.constant 0 : i32
    %c0_i32_1 = arith.constant 0 : i32
    return %arg0, %c0_i32, %c0_i32_0 : i32, i32, i32
  }
  func.func @transform_1(%arg0: i32) -> (i32, i32) {
    %c0_i32 = arith.constant 0 : i32
    %c0_i32_0 = arith.constant 0 : i32
    %c0_i32_1 = arith.constant 0 : i32
    return %c0_i32, %c0_i32_0 : i32, i32
  }
  func.func @transform_2(%arg0: i32) -> (i32, i32) {
    %c0_i32 = arith.constant 0 : i32
    %c0_i32_0 = arith.constant 0 : i32
    %c0_i32_1 = arith.constant 0 : i32
    return %c0_i32, %c0_i32_0 : i32, i32
  }
  func.func @transform_3(%arg0: i32) -> (i32, i32) {
    %c0_i32 = arith.constant 0 : i32
    %c0_i32_0 = arith.constant 0 : i32
    %c0_i32_1 = arith.constant 0 : i32
    return %c0_i32, %c0_i32_0 : i32, i32
  }
  func.func @transform_4(%arg0: i32) -> (i32, i32) {
    %c0_i32 = arith.constant 0 : i32
    %c0_i32_0 = arith.constant 0 : i32
    %c0_i32_1 = arith.constant 0 : i32
    return %c0_i32, %c0_i32_0 : i32, i32
  }
  func.func @transform_5(%arg0: i32) -> (i32, i32, i32) {
    %c0_i32 = arith.constant 0 : i32
    %c0_i32_0 = arith.constant 0 : i32
    %c0_i32_1 = arith.constant 0 : i32
    %c0_i32_2 = arith.constant 0 : i32
    return %c0_i32, %c0_i32_0, %c0_i32_1 : i32, i32, i32
  }
  func.func @transform_6(%arg0: i32) -> (i32, i32) {
    %c0_i32 = arith.constant 0 : i32
    %c0_i32_0 = arith.constant 0 : i32
    %c0_i32_1 = arith.constant 0 : i32
    return %c0_i32, %c0_i32_0 : i32, i32
  }
  func.func @transform_7(%arg0: i32) -> (i32, i32) {
    %c0_i32 = arith.constant 0 : i32
    %c0_i32_0 = arith.constant 0 : i32
    %c0_i32_1 = arith.constant 0 : i32
    return %c0_i32, %c0_i32_0 : i32, i32
  }
  func.func @transform_8(%arg0: i32) -> (i32, i32, i32) {
    %c0_i32 = arith.constant 0 : i32
    %c0_i32_0 = arith.constant 0 : i32
    %c0_i32_1 = arith.constant 0 : i32
    return %arg0, %c0_i32, %c0_i32_0 : i32, i32, i32
  }
}

module attributes {stable_mosaic.version = 11 : i64} {
  func.func @_ff_kernel(%arg0: i32, %arg1: memref<1x24x64xf32, #tpu.memory_space<vmem>>, %arg2: memref<32x24xf32, #tpu.memory_space<vmem>>, %arg3: memref<32x1xf32, #tpu.memory_space<vmem>>, %arg4: memref<16x32xf32, #tpu.memory_space<vmem>>, %arg5: memref<16x1xf32, #tpu.memory_space<vmem>>, %arg6: memref<9x32x16xf32, #tpu.memory_space<vmem>>, %arg7: memref<32x1xf32, #tpu.memory_space<vmem>>, %arg8: memref<9x64xf32, #tpu.memory_space<vmem>>, %arg9: memref<1x32x64xf32, #tpu.memory_space<vmem>>, %arg10: memref<16x82xf32, #tpu.memory_space<vmem>>) attributes {dimension_semantics = [#tpu.dimension_semantics<parallel>], iteration_bounds = array<i64: 2>, scalar_prefetch = 0 : i64, scratch_operands = 1 : i64, tpu.core_type = #tpu.core_type<tc>, window_params = [{transform_indices = @transform_0, window_bounds = array<i64: 1, 24, 64>}, {pipeline_mode = #tpu.pipeline_mode<synchronous>, transform_indices = @transform_1, window_bounds = array<i64: 32, 24>}, {pipeline_mode = #tpu.pipeline_mode<synchronous>, transform_indices = @transform_2, window_bounds = array<i64: 32, 1>}, {pipeline_mode = #tpu.pipeline_mode<synchronous>, transform_indices = @transform_3, window_bounds = array<i64: 16, 32>}, {pipeline_mode = #tpu.pipeline_mode<synchronous>, transform_indices = @transform_4, window_bounds = array<i64: 16, 1>}, {pipeline_mode = #tpu.pipeline_mode<synchronous>, transform_indices = @transform_5, window_bounds = array<i64: 9, 32, 16>}, {pipeline_mode = #tpu.pipeline_mode<synchronous>, transform_indices = @transform_6, window_bounds = array<i64: 32, 1>}, {pipeline_mode = #tpu.pipeline_mode<synchronous>, transform_indices = @transform_7, window_bounds = array<i64: 9, 64>}, {transform_indices = @transform_8, window_bounds = array<i64: 1, 32, 64>}]} {
    %c0 = arith.constant 0 : index
    %c0_0 = arith.constant 0 : index
    %c0_1 = arith.constant 0 : index
    %0 = vector.load %arg1[%c0, %c0_0, %c0_1] : memref<1x24x64xf32, #tpu.memory_space<vmem>>, vector<1x24x64xf32>
    %1 = vector.shape_cast %0 : vector<1x24x64xf32> to vector<24x64xf32>
    %c0_2 = arith.constant 0 : index
    %c0_3 = arith.constant 0 : index
    %2 = vector.load %arg2[%c0_2, %c0_3] : memref<32x24xf32, #tpu.memory_space<vmem>>, vector<32x24xf32>
    %cst = arith.constant dense<0.000000e+00> : vector<32x64xf32>
    %3 = tpu.matmul %2, %1, %cst {dimension_numbers = #tpu.dot_dimension_numbers<[1], [0], [0], [1], [0, 0, 1, 1], [], []>} : vector<32x24xf32>, vector<24x64xf32>, vector<32x64xf32> -> vector<32x64xf32>
    %c0_4 = arith.constant 0 : index
    %c0_5 = arith.constant 0 : index
    %4 = vector.load %arg3[%c0_4, %c0_5] : memref<32x1xf32, #tpu.memory_space<vmem>>, vector<32x1xf32>
    %5 = vector.broadcast %4 : vector<32x1xf32> to vector<32x64xf32>
    %6 = arith.addf %3, %5 : vector<32x64xf32>
    %cst_6 = arith.constant 5.000000e-01 : f32
    %7 = vector.broadcast %cst_6 : f32 to vector<32x64xf32>
    %8 = arith.mulf %7, %6 : vector<32x64xf32>
    %cst_7 = arith.constant 0.707106769 : f32
    %9 = vector.broadcast %cst_7 : f32 to vector<32x64xf32>
    %10 = arith.mulf %6, %9 : vector<32x64xf32>
    %cst_8 = arith.constant 0.000000e+00 : f32
    %11 = vector.broadcast %cst_8 : f32 to vector<32x64xf32>
    %12 = arith.cmpf oge, %10, %11 : vector<32x64xf32>
    %cst_9 = arith.constant 1.000000e+00 : f32
    %cst_10 = arith.constant -1.000000e+00 : f32
    %13 = vector.broadcast %cst_9 : f32 to vector<32x64xf32>
    %14 = vector.broadcast %cst_10 : f32 to vector<32x64xf32>
    %15 = arith.select %12, %13, %14 : vector<32x64xi1>, vector<32x64xf32>
    %16 = math.absf %10 : vector<32x64xf32>
    %cst_11 = arith.constant 0.327591091 : f32
    %17 = vector.broadcast %cst_11 : f32 to vector<32x64xf32>
    %18 = arith.mulf %17, %16 : vector<32x64xf32>
    %cst_12 = arith.constant 1.000000e+00 : f32
    %19 = vector.broadcast %cst_12 : f32 to vector<32x64xf32>
    %20 = arith.addf %19, %18 : vector<32x64xf32>
    %cst_13 = arith.constant 1.000000e+00 : f32
    %21 = vector.broadcast %cst_13 : f32 to vector<32x64xf32>
    %22 = arith.divf %21, %20 : vector<32x64xf32>
    %cst_14 = arith.constant 1.06140542 : f32
    %23 = vector.broadcast %cst_14 : f32 to vector<32x64xf32>
    %24 = arith.mulf %22, %23 : vector<32x64xf32>
    %cst_15 = arith.constant -1.45315206 : f32
    %25 = vector.broadcast %cst_15 : f32 to vector<32x64xf32>
    %26 = arith.addf %25, %24 : vector<32x64xf32>
    %27 = arith.mulf %22, %26 : vector<32x64xf32>
    %cst_16 = arith.constant 1.42141378 : f32
    %28 = vector.broadcast %cst_16 : f32 to vector<32x64xf32>
    %29 = arith.addf %28, %27 : vector<32x64xf32>
    %30 = arith.mulf %22, %29 : vector<32x64xf32>
    %cst_17 = arith.constant -0.284496725 : f32
    %31 = vector.broadcast %cst_17 : f32 to vector<32x64xf32>
    %32 = arith.addf %31, %30 : vector<32x64xf32>
    %33 = arith.mulf %22, %32 : vector<32x64xf32>
    %cst_18 = arith.constant 0.254829586 : f32
    %34 = vector.broadcast %cst_18 : f32 to vector<32x64xf32>
    %35 = arith.addf %34, %33 : vector<32x64xf32>
    %36 = arith.mulf %22, %35 : vector<32x64xf32>
    %cst_19 = arith.constant 0.000000e+00 : f32
    %37 = vector.broadcast %cst_19 : f32 to vector<32x64xf32>
    %38 = arith.subf %37, %16 : vector<32x64xf32>
    %39 = arith.mulf %38, %16 : vector<32x64xf32>
    %40 = math.exp %39 : vector<32x64xf32>
    %41 = arith.mulf %36, %40 : vector<32x64xf32>
    %cst_20 = arith.constant 1.000000e+00 : f32
    %42 = vector.broadcast %cst_20 : f32 to vector<32x64xf32>
    %43 = arith.subf %42, %41 : vector<32x64xf32>
    %44 = arith.mulf %15, %43 : vector<32x64xf32>
    %cst_21 = arith.constant 1.000000e+00 : f32
    %45 = vector.broadcast %cst_21 : f32 to vector<32x64xf32>
    %46 = arith.addf %45, %44 : vector<32x64xf32>
    %47 = arith.mulf %8, %46 : vector<32x64xf32>
    %c0_22 = arith.constant 0 : index
    %c0_23 = arith.constant 0 : index
    %48 = vector.load %arg4[%c0_22, %c0_23] : memref<16x32xf32, #tpu.memory_space<vmem>>, vector<16x32xf32>
    %cst_24 = arith.constant dense<0.000000e+00> : vector<16x64xf32>
    %49 = tpu.matmul %48, %47, %cst_24 {dimension_numbers = #tpu.dot_dimension_numbers<[1], [0], [0], [1], [0, 0, 1, 1], [], []>} : vector<16x32xf32>, vector<32x64xf32>, vector<16x64xf32> -> vector<16x64xf32>
    %c0_25 = arith.constant 0 : index
    %c0_26 = arith.constant 0 : index
    %50 = vector.load %arg5[%c0_25, %c0_26] : memref<16x1xf32, #tpu.memory_space<vmem>>, vector<16x1xf32>
    %51 = vector.broadcast %50 : vector<16x1xf32> to vector<16x64xf32>
    %52 = arith.addf %49, %51 : vector<16x64xf32>
    %cst_27 = arith.constant 0.000000e+00 : f32
    %53 = vector.broadcast %cst_27 : f32 to vector<16x82xf32>
    %c0_28 = arith.constant 0 : index
    %c0_29 = arith.constant 0 : index
    %54 = vector.load %arg10[%c0_28, %c0_29] : memref<16x82xf32, #tpu.memory_space<vmem>>, vector<16x82xf32>
    tpu.vector_store %arg10[%c0_28, %c0_29], %53 {strides = array<i32>} : memref<16x82xf32, #tpu.memory_space<vmem>>, vector<16x82xf32>,
    %c0_30 = arith.constant 0 : index
    %c9 = arith.constant 9 : index
    %55 = vector.load %arg10[%c0_30, %c9] : memref<16x82xf32, #tpu.memory_space<vmem>>, vector<16x64xf32>
    tpu.vector_store %arg10[%c0_30, %c9], %52 {strides = array<i32>} : memref<16x82xf32, #tpu.memory_space<vmem>>, vector<16x64xf32>,
    %c0_31 = arith.constant 0 : index
    %c0_32 = arith.constant 0 : index
    %56 = vector.load %arg7[%c0_31, %c0_32] : memref<32x1xf32, #tpu.memory_space<vmem>>, vector<32x1xf32>
    %cst_33 = arith.constant 0.000000e+00 : f32
    %57 = vector.broadcast %cst_33 : f32 to vector<32x64xf32>
    %58 = vector.broadcast %56 : vector<32x1xf32> to vector<32x64xf32>
    %59 = arith.addf %58, %57 : vector<32x64xf32>
    %c0_34 = arith.constant 0 : index
    %c18 = arith.constant 18 : index
    %60 = vector.load %arg10[%c0_34, %c18] : memref<16x82xf32, #tpu.memory_space<vmem>>, vector<16x64xf32>
    %c0_35 = arith.constant 0 : index
    %c0_36 = arith.constant 0 : index
    %61 = vector.load %arg8[%c0_35, %c0_36] : memref<9x64xf32, #tpu.memory_space<vmem>>, vector<1x64xf32>
    %62 = vector.broadcast %61 : vector<1x64xf32> to vector<16x64xf32>
    %63 = arith.mulf %60, %62 : vector<16x64xf32>
    %c0_37 = arith.constant 0 : index
    %c0_38 = arith.constant 0 : index
    %c0_39 = arith.constant 0 : index
    %64 = vector.load %arg6[%c0_37, %c0_38, %c0_39] : memref<9x32x16xf32, #tpu.memory_space<vmem>>, vector<1x32x16xf32>
    %65 = vector.shape_cast %64 : vector<1x32x16xf32> to vector<32x16xf32>
    %cst_40 = arith.constant dense<0.000000e+00> : vector<32x64xf32>
    %66 = tpu.matmul %65, %63, %cst_40 {dimension_numbers = #tpu.dot_dimension_numbers<[1], [0], [0], [1], [0, 0, 1, 1], [], []>} : vector<32x16xf32>, vector<16x64xf32>, vector<32x64xf32> -> vector<32x64xf32>
    %67 = arith.addf %59, %66 : vector<32x64xf32>
    %c0_41 = arith.constant 0 : index
    %c17 = arith.constant 17 : index
    %68 = vector.load %arg10[%c0_41, %c17] : memref<16x82xf32, #tpu.memory_space<vmem>>, vector<16x64xf32>
    %c1 = arith.constant 1 : index
    %c0_42 = arith.constant 0 : index
    %69 = vector.load %arg8[%c1, %c0_42] : memref<9x64xf32, #tpu.memory_space<vmem>>, vector<1x64xf32>
    %70 = vector.broadcast %69 : vector<1x64xf32> to vector<16x64xf32>
    %71 = arith.mulf %68, %70 : vector<16x64xf32>
    %c1_43 = arith.constant 1 : index
    %c0_44 = arith.constant 0 : index
    %c0_45 = arith.constant 0 : index
    %72 = vector.load %arg6[%c1_43, %c0_44, %c0_45] : memref<9x32x16xf32, #tpu.memory_space<vmem>>, vector<1x32x16xf32>
    %73 = vector.shape_cast %72 : vector<1x32x16xf32> to vector<32x16xf32>
    %cst_46 = arith.constant dense<0.000000e+00> : vector<32x64xf32>
    %74 = tpu.matmul %73, %71, %cst_46 {dimension_numbers = #tpu.dot_dimension_numbers<[1], [0], [0], [1], [0, 0, 1, 1], [], []>} : vector<32x16xf32>, vector<16x64xf32>, vector<32x64xf32> -> vector<32x64xf32>
    %75 = arith.addf %67, %74 : vector<32x64xf32>
    %c0_47 = arith.constant 0 : index
    %c16 = arith.constant 16 : index
    %76 = vector.load %arg10[%c0_47, %c16] : memref<16x82xf32, #tpu.memory_space<vmem>>, vector<16x64xf32>
    %c2 = arith.constant 2 : index
    %c0_48 = arith.constant 0 : index
    %77 = vector.load %arg8[%c2, %c0_48] : memref<9x64xf32, #tpu.memory_space<vmem>>, vector<1x64xf32>
    %78 = vector.broadcast %77 : vector<1x64xf32> to vector<16x64xf32>
    %79 = arith.mulf %76, %78 : vector<16x64xf32>
    %c2_49 = arith.constant 2 : index
    %c0_50 = arith.constant 0 : index
    %c0_51 = arith.constant 0 : index
    %80 = vector.load %arg6[%c2_49, %c0_50, %c0_51] : memref<9x32x16xf32, #tpu.memory_space<vmem>>, vector<1x32x16xf32>
    %81 = vector.shape_cast %80 : vector<1x32x16xf32> to vector<32x16xf32>
    %cst_52 = arith.constant dense<0.000000e+00> : vector<32x64xf32>
    %82 = tpu.matmul %81, %79, %cst_52 {dimension_numbers = #tpu.dot_dimension_numbers<[1], [0], [0], [1], [0, 0, 1, 1], [], []>} : vector<32x16xf32>, vector<16x64xf32>, vector<32x64xf32> -> vector<32x64xf32>
    %83 = arith.addf %75, %82 : vector<32x64xf32>
    %c0_53 = arith.constant 0 : index
    %c10 = arith.constant 10 : index
    %84 = vector.load %arg10[%c0_53, %c10] : memref<16x82xf32, #tpu.memory_space<vmem>>, vector<16x64xf32>
    %c3 = arith.constant 3 : index
    %c0_54 = arith.constant 0 : index
    %85 = vector.load %arg8[%c3, %c0_54] : memref<9x64xf32, #tpu.memory_space<vmem>>, vector<1x64xf32>
    %86 = vector.broadcast %85 : vector<1x64xf32> to vector<16x64xf32>
    %87 = arith.mulf %84, %86 : vector<16x64xf32>
    %c3_55 = arith.constant 3 : index
    %c0_56 = arith.constant 0 : index
    %c0_57 = arith.constant 0 : index
    %88 = vector.load %arg6[%c3_55, %c0_56, %c0_57] : memref<9x32x16xf32, #tpu.memory_space<vmem>>, vector<1x32x16xf32>
    %89 = vector.shape_cast %88 : vector<1x32x16xf32> to vector<32x16xf32>
    %cst_58 = arith.constant dense<0.000000e+00> : vector<32x64xf32>
    %90 = tpu.matmul %89, %87, %cst_58 {dimension_numbers = #tpu.dot_dimension_numbers<[1], [0], [0], [1], [0, 0, 1, 1], [], []>} : vector<32x16xf32>, vector<16x64xf32>, vector<32x64xf32> -> vector<32x64xf32>
    %91 = arith.addf %83, %90 : vector<32x64xf32>
    %c0_59 = arith.constant 0 : index
    %c9_60 = arith.constant 9 : index
    %92 = vector.load %arg10[%c0_59, %c9_60] : memref<16x82xf32, #tpu.memory_space<vmem>>, vector<16x64xf32>
    %c4 = arith.constant 4 : index
    %c0_61 = arith.constant 0 : index
    %93 = vector.load %arg8[%c4, %c0_61] : memref<9x64xf32, #tpu.memory_space<vmem>>, vector<1x64xf32>
    %94 = vector.broadcast %93 : vector<1x64xf32> to vector<16x64xf32>
    %95 = arith.mulf %92, %94 : vector<16x64xf32>
    %c4_62 = arith.constant 4 : index
    %c0_63 = arith.constant 0 : index
    %c0_64 = arith.constant 0 : index
    %96 = vector.load %arg6[%c4_62, %c0_63, %c0_64] : memref<9x32x16xf32, #tpu.memory_space<vmem>>, vector<1x32x16xf32>
    %97 = vector.shape_cast %96 : vector<1x32x16xf32> to vector<32x16xf32>
    %cst_65 = arith.constant dense<0.000000e+00> : vector<32x64xf32>
    %98 = tpu.matmul %97, %95, %cst_65 {dimension_numbers = #tpu.dot_dimension_numbers<[1], [0], [0], [1], [0, 0, 1, 1], [], []>} : vector<32x16xf32>, vector<16x64xf32>, vector<32x64xf32> -> vector<32x64xf32>
    %99 = arith.addf %91, %98 : vector<32x64xf32>
    %c0_66 = arith.constant 0 : index
    %c8 = arith.constant 8 : index
    %100 = vector.load %arg10[%c0_66, %c8] : memref<16x82xf32, #tpu.memory_space<vmem>>, vector<16x64xf32>
    %c5 = arith.constant 5 : index
    %c0_67 = arith.constant 0 : index
    %101 = vector.load %arg8[%c5, %c0_67] : memref<9x64xf32, #tpu.memory_space<vmem>>, vector<1x64xf32>
    %102 = vector.broadcast %101 : vector<1x64xf32> to vector<16x64xf32>
    %103 = arith.mulf %100, %102 : vector<16x64xf32>
    %c5_68 = arith.constant 5 : index
    %c0_69 = arith.constant 0 : index
    %c0_70 = arith.constant 0 : index
    %104 = vector.load %arg6[%c5_68, %c0_69, %c0_70] : memref<9x32x16xf32, #tpu.memory_space<vmem>>, vector<1x32x16xf32>
    %105 = vector.shape_cast %104 : vector<1x32x16xf32> to vector<32x16xf32>
    %cst_71 = arith.constant dense<0.000000e+00> : vector<32x64xf32>
    %106 = tpu.matmul %105, %103, %cst_71 {dimension_numbers = #tpu.dot_dimension_numbers<[1], [0], [0], [1], [0, 0, 1, 1], [], []>} : vector<32x16xf32>, vector<16x64xf32>, vector<32x64xf32> -> vector<32x64xf32>
    %107 = arith.addf %99, %106 : vector<32x64xf32>
    %c0_72 = arith.constant 0 : index
    %c2_73 = arith.constant 2 : index
    %108 = vector.load %arg10[%c0_72, %c2_73] : memref<16x82xf32, #tpu.memory_space<vmem>>, vector<16x64xf32>
    %c6 = arith.constant 6 : index
    %c0_74 = arith.constant 0 : index
    %109 = vector.load %arg8[%c6, %c0_74] : memref<9x64xf32, #tpu.memory_space<vmem>>, vector<1x64xf32>
    %110 = vector.broadcast %109 : vector<1x64xf32> to vector<16x64xf32>
    %111 = arith.mulf %108, %110 : vector<16x64xf32>
    %c6_75 = arith.constant 6 : index
    %c0_76 = arith.constant 0 : index
    %c0_77 = arith.constant 0 : index
    %112 = vector.load %arg6[%c6_75, %c0_76, %c0_77] : memref<9x32x16xf32, #tpu.memory_space<vmem>>, vector<1x32x16xf32>
    %113 = vector.shape_cast %112 : vector<1x32x16xf32> to vector<32x16xf32>
    %cst_78 = arith.constant dense<0.000000e+00> : vector<32x64xf32>
    %114 = tpu.matmul %113, %111, %cst_78 {dimension_numbers = #tpu.dot_dimension_numbers<[1], [0], [0], [1], [0, 0, 1, 1], [], []>} : vector<32x16xf32>, vector<16x64xf32>, vector<32x64xf32> -> vector<32x64xf32>
    %115 = arith.addf %107, %114 : vector<32x64xf32>
    %c0_79 = arith.constant 0 : index
    %c1_80 = arith.constant 1 : index
    %116 = vector.load %arg10[%c0_79, %c1_80] : memref<16x82xf32, #tpu.memory_space<vmem>>, vector<16x64xf32>
    %c7 = arith.constant 7 : index
    %c0_81 = arith.constant 0 : index
    %117 = vector.load %arg8[%c7, %c0_81] : memref<9x64xf32, #tpu.memory_space<vmem>>, vector<1x64xf32>
    %118 = vector.broadcast %117 : vector<1x64xf32> to vector<16x64xf32>
    %119 = arith.mulf %116, %118 : vector<16x64xf32>
    %c7_82 = arith.constant 7 : index
    %c0_83 = arith.constant 0 : index
    %c0_84 = arith.constant 0 : index
    %120 = vector.load %arg6[%c7_82, %c0_83, %c0_84] : memref<9x32x16xf32, #tpu.memory_space<vmem>>, vector<1x32x16xf32>
    %121 = vector.shape_cast %120 : vector<1x32x16xf32> to vector<32x16xf32>
    %cst_85 = arith.constant dense<0.000000e+00> : vector<32x64xf32>
    %122 = tpu.matmul %121, %119, %cst_85 {dimension_numbers = #tpu.dot_dimension_numbers<[1], [0], [0], [1], [0, 0, 1, 1], [], []>} : vector<32x16xf32>, vector<16x64xf32>, vector<32x64xf32> -> vector<32x64xf32>
    %123 = arith.addf %115, %122 : vector<32x64xf32>
    %c0_86 = arith.constant 0 : index
    %c0_87 = arith.constant 0 : index
    %124 = vector.load %arg10[%c0_86, %c0_87] : memref<16x82xf32, #tpu.memory_space<vmem>>, vector<16x64xf32>
    %c8_88 = arith.constant 8 : index
    %c0_89 = arith.constant 0 : index
    %125 = vector.load %arg8[%c8_88, %c0_89] : memref<9x64xf32, #tpu.memory_space<vmem>>, vector<1x64xf32>
    %126 = vector.broadcast %125 : vector<1x64xf32> to vector<16x64xf32>
    %127 = arith.mulf %124, %126 : vector<16x64xf32>
    %c8_90 = arith.constant 8 : index
    %c0_91 = arith.constant 0 : index
    %c0_92 = arith.constant 0 : index
    %128 = vector.load %arg6[%c8_90, %c0_91, %c0_92] : memref<9x32x16xf32, #tpu.memory_space<vmem>>, vector<1x32x16xf32>
    %129 = vector.shape_cast %128 : vector<1x32x16xf32> to vector<32x16xf32>
    %cst_93 = arith.constant dense<0.000000e+00> : vector<32x64xf32>
    %130 = tpu.matmul %129, %127, %cst_93 {dimension_numbers = #tpu.dot_dimension_numbers<[1], [0], [0], [1], [0, 0, 1, 1], [], []>} : vector<32x16xf32>, vector<16x64xf32>, vector<32x64xf32> -> vector<32x64xf32>
    %131 = arith.addf %123, %130 : vector<32x64xf32>
    %c0_94 = arith.constant 0 : index
    %c0_95 = arith.constant 0 : index
    %c0_96 = arith.constant 0 : index
    %132 = vector.load %arg9[%c0_94, %c0_95, %c0_96] : memref<1x32x64xf32, #tpu.memory_space<vmem>>, vector<1x32x64xf32>
    %133 = vector.shape_cast %132 : vector<1x32x64xf32> to vector<32x64xf32>
    %134 = vector.shape_cast %131 : vector<32x64xf32> to vector<1x32x64xf32>
    tpu.vector_store %arg9[%c0_94, %c0_95, %c0_96], %134 {strides = array<i32>} : memref<1x32x64xf32, #tpu.memory_space<vmem>>, vector<1x32x64xf32>,
    return
  }
  func.func @transform_0(%arg0: i32) -> (i32, i32, i32) {
    %c0_i32 = arith.constant 0 : i32
    %c0_i32_0 = arith.constant 0 : i32
    %c0_i32_1 = arith.constant 0 : i32
    return %arg0, %c0_i32, %c0_i32_0 : i32, i32, i32
  }
  func.func @transform_1(%arg0: i32) -> (i32, i32) {
    %c0_i32 = arith.constant 0 : i32
    %c0_i32_0 = arith.constant 0 : i32
    %c0_i32_1 = arith.constant 0 : i32
    return %c0_i32, %c0_i32_0 : i32, i32
  }
  func.func @transform_2(%arg0: i32) -> (i32, i32) {
    %c0_i32 = arith.constant 0 : i32
    %c0_i32_0 = arith.constant 0 : i32
    %c0_i32_1 = arith.constant 0 : i32
    return %c0_i32, %c0_i32_0 : i32, i32
  }
  func.func @transform_3(%arg0: i32) -> (i32, i32) {
    %c0_i32 = arith.constant 0 : i32
    %c0_i32_0 = arith.constant 0 : i32
    %c0_i32_1 = arith.constant 0 : i32
    return %c0_i32, %c0_i32_0 : i32, i32
  }
  func.func @transform_4(%arg0: i32) -> (i32, i32) {
    %c0_i32 = arith.constant 0 : i32
    %c0_i32_0 = arith.constant 0 : i32
    %c0_i32_1 = arith.constant 0 : i32
    return %c0_i32, %c0_i32_0 : i32, i32
  }
  func.func @transform_5(%arg0: i32) -> (i32, i32, i32) {
    %c0_i32 = arith.constant 0 : i32
    %c0_i32_0 = arith.constant 0 : i32
    %c0_i32_1 = arith.constant 0 : i32
    %c0_i32_2 = arith.constant 0 : i32
    return %c0_i32, %c0_i32_0, %c0_i32_1 : i32, i32, i32
  }
  func.func @transform_6(%arg0: i32) -> (i32, i32) {
    %c0_i32 = arith.constant 0 : i32
    %c0_i32_0 = arith.constant 0 : i32
    %c0_i32_1 = arith.constant 0 : i32
    return %c0_i32, %c0_i32_0 : i32, i32
  }
  func.func @transform_7(%arg0: i32) -> (i32, i32) {
    %c0_i32 = arith.constant 0 : i32
    %c0_i32_0 = arith.constant 0 : i32
    %c0_i32_1 = arith.constant 0 : i32
    return %c0_i32, %c0_i32_0 : i32, i32
  }
  func.func @transform_8(%arg0: i32) -> (i32, i32, i32) {
    %c0_i32 = arith.constant 0 : i32
    %c0_i32_0 = arith.constant 0 : i32
    %c0_i32_1 = arith.constant 0 : i32
    return %arg0, %c0_i32, %c0_i32_0 : i32, i32, i32
  }
}

module attributes {stable_mosaic.version = 11 : i64} {
  func.func @_ff_kernel(%arg0: i32, %arg1: memref<1x24x256xf32, #tpu.memory_space<vmem>>, %arg2: memref<32x24xf32, #tpu.memory_space<vmem>>, %arg3: memref<32x1xf32, #tpu.memory_space<vmem>>, %arg4: memref<16x32xf32, #tpu.memory_space<vmem>>, %arg5: memref<16x1xf32, #tpu.memory_space<vmem>>, %arg6: memref<9x64x16xf32, #tpu.memory_space<vmem>>, %arg7: memref<64x1xf32, #tpu.memory_space<vmem>>, %arg8: memref<9x256xf32, #tpu.memory_space<vmem>>, %arg9: memref<1x64x256xf32, #tpu.memory_space<vmem>>, %arg10: memref<16x290xf32, #tpu.memory_space<vmem>>) attributes {dimension_semantics = [#tpu.dimension_semantics<parallel>], iteration_bounds = array<i64: 2>, scalar_prefetch = 0 : i64, scratch_operands = 1 : i64, tpu.core_type = #tpu.core_type<tc>, window_params = [{transform_indices = @transform_0, window_bounds = array<i64: 1, 24, 256>}, {pipeline_mode = #tpu.pipeline_mode<synchronous>, transform_indices = @transform_1, window_bounds = array<i64: 32, 24>}, {pipeline_mode = #tpu.pipeline_mode<synchronous>, transform_indices = @transform_2, window_bounds = array<i64: 32, 1>}, {pipeline_mode = #tpu.pipeline_mode<synchronous>, transform_indices = @transform_3, window_bounds = array<i64: 16, 32>}, {pipeline_mode = #tpu.pipeline_mode<synchronous>, transform_indices = @transform_4, window_bounds = array<i64: 16, 1>}, {pipeline_mode = #tpu.pipeline_mode<synchronous>, transform_indices = @transform_5, window_bounds = array<i64: 9, 64, 16>}, {pipeline_mode = #tpu.pipeline_mode<synchronous>, transform_indices = @transform_6, window_bounds = array<i64: 64, 1>}, {pipeline_mode = #tpu.pipeline_mode<synchronous>, transform_indices = @transform_7, window_bounds = array<i64: 9, 256>}, {transform_indices = @transform_8, window_bounds = array<i64: 1, 64, 256>}]} {
    %c0 = arith.constant 0 : index
    %c0_0 = arith.constant 0 : index
    %c0_1 = arith.constant 0 : index
    %0 = vector.load %arg1[%c0, %c0_0, %c0_1] : memref<1x24x256xf32, #tpu.memory_space<vmem>>, vector<1x24x256xf32>
    %1 = vector.shape_cast %0 : vector<1x24x256xf32> to vector<24x256xf32>
    %c0_2 = arith.constant 0 : index
    %c0_3 = arith.constant 0 : index
    %2 = vector.load %arg2[%c0_2, %c0_3] : memref<32x24xf32, #tpu.memory_space<vmem>>, vector<32x24xf32>
    %cst = arith.constant dense<0.000000e+00> : vector<32x256xf32>
    %3 = tpu.matmul %2, %1, %cst {dimension_numbers = #tpu.dot_dimension_numbers<[1], [0], [0], [1], [0, 0, 1, 1], [], []>} : vector<32x24xf32>, vector<24x256xf32>, vector<32x256xf32> -> vector<32x256xf32>
    %c0_4 = arith.constant 0 : index
    %c0_5 = arith.constant 0 : index
    %4 = vector.load %arg3[%c0_4, %c0_5] : memref<32x1xf32, #tpu.memory_space<vmem>>, vector<32x1xf32>
    %5 = vector.broadcast %4 : vector<32x1xf32> to vector<32x256xf32>
    %6 = arith.addf %3, %5 : vector<32x256xf32>
    %cst_6 = arith.constant 5.000000e-01 : f32
    %7 = vector.broadcast %cst_6 : f32 to vector<32x256xf32>
    %8 = arith.mulf %7, %6 : vector<32x256xf32>
    %cst_7 = arith.constant 0.707106769 : f32
    %9 = vector.broadcast %cst_7 : f32 to vector<32x256xf32>
    %10 = arith.mulf %6, %9 : vector<32x256xf32>
    %cst_8 = arith.constant 0.000000e+00 : f32
    %11 = vector.broadcast %cst_8 : f32 to vector<32x256xf32>
    %12 = arith.cmpf oge, %10, %11 : vector<32x256xf32>
    %cst_9 = arith.constant 1.000000e+00 : f32
    %cst_10 = arith.constant -1.000000e+00 : f32
    %13 = vector.broadcast %cst_9 : f32 to vector<32x256xf32>
    %14 = vector.broadcast %cst_10 : f32 to vector<32x256xf32>
    %15 = arith.select %12, %13, %14 : vector<32x256xi1>, vector<32x256xf32>
    %16 = math.absf %10 : vector<32x256xf32>
    %cst_11 = arith.constant 0.327591091 : f32
    %17 = vector.broadcast %cst_11 : f32 to vector<32x256xf32>
    %18 = arith.mulf %17, %16 : vector<32x256xf32>
    %cst_12 = arith.constant 1.000000e+00 : f32
    %19 = vector.broadcast %cst_12 : f32 to vector<32x256xf32>
    %20 = arith.addf %19, %18 : vector<32x256xf32>
    %cst_13 = arith.constant 1.000000e+00 : f32
    %21 = vector.broadcast %cst_13 : f32 to vector<32x256xf32>
    %22 = arith.divf %21, %20 : vector<32x256xf32>
    %cst_14 = arith.constant 1.06140542 : f32
    %23 = vector.broadcast %cst_14 : f32 to vector<32x256xf32>
    %24 = arith.mulf %22, %23 : vector<32x256xf32>
    %cst_15 = arith.constant -1.45315206 : f32
    %25 = vector.broadcast %cst_15 : f32 to vector<32x256xf32>
    %26 = arith.addf %25, %24 : vector<32x256xf32>
    %27 = arith.mulf %22, %26 : vector<32x256xf32>
    %cst_16 = arith.constant 1.42141378 : f32
    %28 = vector.broadcast %cst_16 : f32 to vector<32x256xf32>
    %29 = arith.addf %28, %27 : vector<32x256xf32>
    %30 = arith.mulf %22, %29 : vector<32x256xf32>
    %cst_17 = arith.constant -0.284496725 : f32
    %31 = vector.broadcast %cst_17 : f32 to vector<32x256xf32>
    %32 = arith.addf %31, %30 : vector<32x256xf32>
    %33 = arith.mulf %22, %32 : vector<32x256xf32>
    %cst_18 = arith.constant 0.254829586 : f32
    %34 = vector.broadcast %cst_18 : f32 to vector<32x256xf32>
    %35 = arith.addf %34, %33 : vector<32x256xf32>
    %36 = arith.mulf %22, %35 : vector<32x256xf32>
    %cst_19 = arith.constant 0.000000e+00 : f32
    %37 = vector.broadcast %cst_19 : f32 to vector<32x256xf32>
    %38 = arith.subf %37, %16 : vector<32x256xf32>
    %39 = arith.mulf %38, %16 : vector<32x256xf32>
    %40 = math.exp %39 : vector<32x256xf32>
    %41 = arith.mulf %36, %40 : vector<32x256xf32>
    %cst_20 = arith.constant 1.000000e+00 : f32
    %42 = vector.broadcast %cst_20 : f32 to vector<32x256xf32>
    %43 = arith.subf %42, %41 : vector<32x256xf32>
    %44 = arith.mulf %15, %43 : vector<32x256xf32>
    %cst_21 = arith.constant 1.000000e+00 : f32
    %45 = vector.broadcast %cst_21 : f32 to vector<32x256xf32>
    %46 = arith.addf %45, %44 : vector<32x256xf32>
    %47 = arith.mulf %8, %46 : vector<32x256xf32>
    %c0_22 = arith.constant 0 : index
    %c0_23 = arith.constant 0 : index
    %48 = vector.load %arg4[%c0_22, %c0_23] : memref<16x32xf32, #tpu.memory_space<vmem>>, vector<16x32xf32>
    %cst_24 = arith.constant dense<0.000000e+00> : vector<16x256xf32>
    %49 = tpu.matmul %48, %47, %cst_24 {dimension_numbers = #tpu.dot_dimension_numbers<[1], [0], [0], [1], [0, 0, 1, 1], [], []>} : vector<16x32xf32>, vector<32x256xf32>, vector<16x256xf32> -> vector<16x256xf32>
    %c0_25 = arith.constant 0 : index
    %c0_26 = arith.constant 0 : index
    %50 = vector.load %arg5[%c0_25, %c0_26] : memref<16x1xf32, #tpu.memory_space<vmem>>, vector<16x1xf32>
    %51 = vector.broadcast %50 : vector<16x1xf32> to vector<16x256xf32>
    %52 = arith.addf %49, %51 : vector<16x256xf32>
    %cst_27 = arith.constant 0.000000e+00 : f32
    %53 = vector.broadcast %cst_27 : f32 to vector<16x290xf32>
    %c0_28 = arith.constant 0 : index
    %c0_29 = arith.constant 0 : index
    %54 = vector.load %arg10[%c0_28, %c0_29] : memref<16x290xf32, #tpu.memory_space<vmem>>, vector<16x290xf32>
    tpu.vector_store %arg10[%c0_28, %c0_29], %53 {strides = array<i32>} : memref<16x290xf32, #tpu.memory_space<vmem>>, vector<16x290xf32>,
    %c0_30 = arith.constant 0 : index
    %c17 = arith.constant 17 : index
    %55 = vector.load %arg10[%c0_30, %c17] : memref<16x290xf32, #tpu.memory_space<vmem>>, vector<16x256xf32>
    tpu.vector_store %arg10[%c0_30, %c17], %52 {strides = array<i32>} : memref<16x290xf32, #tpu.memory_space<vmem>>, vector<16x256xf32>,
    %c0_31 = arith.constant 0 : index
    %c0_32 = arith.constant 0 : index
    %56 = vector.load %arg7[%c0_31, %c0_32] : memref<64x1xf32, #tpu.memory_space<vmem>>, vector<64x1xf32>
    %cst_33 = arith.constant 0.000000e+00 : f32
    %57 = vector.broadcast %cst_33 : f32 to vector<64x256xf32>
    %58 = vector.broadcast %56 : vector<64x1xf32> to vector<64x256xf32>
    %59 = arith.addf %58, %57 : vector<64x256xf32>
    %c0_34 = arith.constant 0 : index
    %c34 = arith.constant 34 : index
    %60 = vector.load %arg10[%c0_34, %c34] : memref<16x290xf32, #tpu.memory_space<vmem>>, vector<16x256xf32>
    %c0_35 = arith.constant 0 : index
    %c0_36 = arith.constant 0 : index
    %61 = vector.load %arg8[%c0_35, %c0_36] : memref<9x256xf32, #tpu.memory_space<vmem>>, vector<1x256xf32>
    %62 = vector.broadcast %61 : vector<1x256xf32> to vector<16x256xf32>
    %63 = arith.mulf %60, %62 : vector<16x256xf32>
    %c0_37 = arith.constant 0 : index
    %c0_38 = arith.constant 0 : index
    %c0_39 = arith.constant 0 : index
    %64 = vector.load %arg6[%c0_37, %c0_38, %c0_39] : memref<9x64x16xf32, #tpu.memory_space<vmem>>, vector<1x64x16xf32>
    %65 = vector.shape_cast %64 : vector<1x64x16xf32> to vector<64x16xf32>
    %cst_40 = arith.constant dense<0.000000e+00> : vector<64x256xf32>
    %66 = tpu.matmul %65, %63, %cst_40 {dimension_numbers = #tpu.dot_dimension_numbers<[1], [0], [0], [1], [0, 0, 1, 1], [], []>} : vector<64x16xf32>, vector<16x256xf32>, vector<64x256xf32> -> vector<64x256xf32>
    %67 = arith.addf %59, %66 : vector<64x256xf32>
    %c0_41 = arith.constant 0 : index
    %c33 = arith.constant 33 : index
    %68 = vector.load %arg10[%c0_41, %c33] : memref<16x290xf32, #tpu.memory_space<vmem>>, vector<16x256xf32>
    %c1 = arith.constant 1 : index
    %c0_42 = arith.constant 0 : index
    %69 = vector.load %arg8[%c1, %c0_42] : memref<9x256xf32, #tpu.memory_space<vmem>>, vector<1x256xf32>
    %70 = vector.broadcast %69 : vector<1x256xf32> to vector<16x256xf32>
    %71 = arith.mulf %68, %70 : vector<16x256xf32>
    %c1_43 = arith.constant 1 : index
    %c0_44 = arith.constant 0 : index
    %c0_45 = arith.constant 0 : index
    %72 = vector.load %arg6[%c1_43, %c0_44, %c0_45] : memref<9x64x16xf32, #tpu.memory_space<vmem>>, vector<1x64x16xf32>
    %73 = vector.shape_cast %72 : vector<1x64x16xf32> to vector<64x16xf32>
    %cst_46 = arith.constant dense<0.000000e+00> : vector<64x256xf32>
    %74 = tpu.matmul %73, %71, %cst_46 {dimension_numbers = #tpu.dot_dimension_numbers<[1], [0], [0], [1], [0, 0, 1, 1], [], []>} : vector<64x16xf32>, vector<16x256xf32>, vector<64x256xf32> -> vector<64x256xf32>
    %75 = arith.addf %67, %74 : vector<64x256xf32>
    %c0_47 = arith.constant 0 : index
    %c32 = arith.constant 32 : index
    %76 = vector.load %arg10[%c0_47, %c32] : memref<16x290xf32, #tpu.memory_space<vmem>>, vector<16x256xf32>
    %c2 = arith.constant 2 : index
    %c0_48 = arith.constant 0 : index
    %77 = vector.load %arg8[%c2, %c0_48] : memref<9x256xf32, #tpu.memory_space<vmem>>, vector<1x256xf32>
    %78 = vector.broadcast %77 : vector<1x256xf32> to vector<16x256xf32>
    %79 = arith.mulf %76, %78 : vector<16x256xf32>
    %c2_49 = arith.constant 2 : index
    %c0_50 = arith.constant 0 : index
    %c0_51 = arith.constant 0 : index
    %80 = vector.load %arg6[%c2_49, %c0_50, %c0_51] : memref<9x64x16xf32, #tpu.memory_space<vmem>>, vector<1x64x16xf32>
    %81 = vector.shape_cast %80 : vector<1x64x16xf32> to vector<64x16xf32>
    %cst_52 = arith.constant dense<0.000000e+00> : vector<64x256xf32>
    %82 = tpu.matmul %81, %79, %cst_52 {dimension_numbers = #tpu.dot_dimension_numbers<[1], [0], [0], [1], [0, 0, 1, 1], [], []>} : vector<64x16xf32>, vector<16x256xf32>, vector<64x256xf32> -> vector<64x256xf32>
    %83 = arith.addf %75, %82 : vector<64x256xf32>
    %c0_53 = arith.constant 0 : index
    %c18 = arith.constant 18 : index
    %84 = vector.load %arg10[%c0_53, %c18] : memref<16x290xf32, #tpu.memory_space<vmem>>, vector<16x256xf32>
    %c3 = arith.constant 3 : index
    %c0_54 = arith.constant 0 : index
    %85 = vector.load %arg8[%c3, %c0_54] : memref<9x256xf32, #tpu.memory_space<vmem>>, vector<1x256xf32>
    %86 = vector.broadcast %85 : vector<1x256xf32> to vector<16x256xf32>
    %87 = arith.mulf %84, %86 : vector<16x256xf32>
    %c3_55 = arith.constant 3 : index
    %c0_56 = arith.constant 0 : index
    %c0_57 = arith.constant 0 : index
    %88 = vector.load %arg6[%c3_55, %c0_56, %c0_57] : memref<9x64x16xf32, #tpu.memory_space<vmem>>, vector<1x64x16xf32>
    %89 = vector.shape_cast %88 : vector<1x64x16xf32> to vector<64x16xf32>
    %cst_58 = arith.constant dense<0.000000e+00> : vector<64x256xf32>
    %90 = tpu.matmul %89, %87, %cst_58 {dimension_numbers = #tpu.dot_dimension_numbers<[1], [0], [0], [1], [0, 0, 1, 1], [], []>} : vector<64x16xf32>, vector<16x256xf32>, vector<64x256xf32> -> vector<64x256xf32>
    %91 = arith.addf %83, %90 : vector<64x256xf32>
    %c0_59 = arith.constant 0 : index
    %c17_60 = arith.constant 17 : index
    %92 = vector.load %arg10[%c0_59, %c17_60] : memref<16x290xf32, #tpu.memory_space<vmem>>, vector<16x256xf32>
    %c4 = arith.constant 4 : index
    %c0_61 = arith.constant 0 : index
    %93 = vector.load %arg8[%c4, %c0_61] : memref<9x256xf32, #tpu.memory_space<vmem>>, vector<1x256xf32>
    %94 = vector.broadcast %93 : vector<1x256xf32> to vector<16x256xf32>
    %95 = arith.mulf %92, %94 : vector<16x256xf32>
    %c4_62 = arith.constant 4 : index
    %c0_63 = arith.constant 0 : index
    %c0_64 = arith.constant 0 : index
    %96 = vector.load %arg6[%c4_62, %c0_63, %c0_64] : memref<9x64x16xf32, #tpu.memory_space<vmem>>, vector<1x64x16xf32>
    %97 = vector.shape_cast %96 : vector<1x64x16xf32> to vector<64x16xf32>
    %cst_65 = arith.constant dense<0.000000e+00> : vector<64x256xf32>
    %98 = tpu.matmul %97, %95, %cst_65 {dimension_numbers = #tpu.dot_dimension_numbers<[1], [0], [0], [1], [0, 0, 1, 1], [], []>} : vector<64x16xf32>, vector<16x256xf32>, vector<64x256xf32> -> vector<64x256xf32>
    %99 = arith.addf %91, %98 : vector<64x256xf32>
    %c0_66 = arith.constant 0 : index
    %c16 = arith.constant 16 : index
    %100 = vector.load %arg10[%c0_66, %c16] : memref<16x290xf32, #tpu.memory_space<vmem>>, vector<16x256xf32>
    %c5 = arith.constant 5 : index
    %c0_67 = arith.constant 0 : index
    %101 = vector.load %arg8[%c5, %c0_67] : memref<9x256xf32, #tpu.memory_space<vmem>>, vector<1x256xf32>
    %102 = vector.broadcast %101 : vector<1x256xf32> to vector<16x256xf32>
    %103 = arith.mulf %100, %102 : vector<16x256xf32>
    %c5_68 = arith.constant 5 : index
    %c0_69 = arith.constant 0 : index
    %c0_70 = arith.constant 0 : index
    %104 = vector.load %arg6[%c5_68, %c0_69, %c0_70] : memref<9x64x16xf32, #tpu.memory_space<vmem>>, vector<1x64x16xf32>
    %105 = vector.shape_cast %104 : vector<1x64x16xf32> to vector<64x16xf32>
    %cst_71 = arith.constant dense<0.000000e+00> : vector<64x256xf32>
    %106 = tpu.matmul %105, %103, %cst_71 {dimension_numbers = #tpu.dot_dimension_numbers<[1], [0], [0], [1], [0, 0, 1, 1], [], []>} : vector<64x16xf32>, vector<16x256xf32>, vector<64x256xf32> -> vector<64x256xf32>
    %107 = arith.addf %99, %106 : vector<64x256xf32>
    %c0_72 = arith.constant 0 : index
    %c2_73 = arith.constant 2 : index
    %108 = vector.load %arg10[%c0_72, %c2_73] : memref<16x290xf32, #tpu.memory_space<vmem>>, vector<16x256xf32>
    %c6 = arith.constant 6 : index
    %c0_74 = arith.constant 0 : index
    %109 = vector.load %arg8[%c6, %c0_74] : memref<9x256xf32, #tpu.memory_space<vmem>>, vector<1x256xf32>
    %110 = vector.broadcast %109 : vector<1x256xf32> to vector<16x256xf32>
    %111 = arith.mulf %108, %110 : vector<16x256xf32>
    %c6_75 = arith.constant 6 : index
    %c0_76 = arith.constant 0 : index
    %c0_77 = arith.constant 0 : index
    %112 = vector.load %arg6[%c6_75, %c0_76, %c0_77] : memref<9x64x16xf32, #tpu.memory_space<vmem>>, vector<1x64x16xf32>
    %113 = vector.shape_cast %112 : vector<1x64x16xf32> to vector<64x16xf32>
    %cst_78 = arith.constant dense<0.000000e+00> : vector<64x256xf32>
    %114 = tpu.matmul %113, %111, %cst_78 {dimension_numbers = #tpu.dot_dimension_numbers<[1], [0], [0], [1], [0, 0, 1, 1], [], []>} : vector<64x16xf32>, vector<16x256xf32>, vector<64x256xf32> -> vector<64x256xf32>
    %115 = arith.addf %107, %114 : vector<64x256xf32>
    %c0_79 = arith.constant 0 : index
    %c1_80 = arith.constant 1 : index
    %116 = vector.load %arg10[%c0_79, %c1_80] : memref<16x290xf32, #tpu.memory_space<vmem>>, vector<16x256xf32>
    %c7 = arith.constant 7 : index
    %c0_81 = arith.constant 0 : index
    %117 = vector.load %arg8[%c7, %c0_81] : memref<9x256xf32, #tpu.memory_space<vmem>>, vector<1x256xf32>
    %118 = vector.broadcast %117 : vector<1x256xf32> to vector<16x256xf32>
    %119 = arith.mulf %116, %118 : vector<16x256xf32>
    %c7_82 = arith.constant 7 : index
    %c0_83 = arith.constant 0 : index
    %c0_84 = arith.constant 0 : index
    %120 = vector.load %arg6[%c7_82, %c0_83, %c0_84] : memref<9x64x16xf32, #tpu.memory_space<vmem>>, vector<1x64x16xf32>
    %121 = vector.shape_cast %120 : vector<1x64x16xf32> to vector<64x16xf32>
    %cst_85 = arith.constant dense<0.000000e+00> : vector<64x256xf32>
    %122 = tpu.matmul %121, %119, %cst_85 {dimension_numbers = #tpu.dot_dimension_numbers<[1], [0], [0], [1], [0, 0, 1, 1], [], []>} : vector<64x16xf32>, vector<16x256xf32>, vector<64x256xf32> -> vector<64x256xf32>
    %123 = arith.addf %115, %122 : vector<64x256xf32>
    %c0_86 = arith.constant 0 : index
    %c0_87 = arith.constant 0 : index
    %124 = vector.load %arg10[%c0_86, %c0_87] : memref<16x290xf32, #tpu.memory_space<vmem>>, vector<16x256xf32>
    %c8 = arith.constant 8 : index
    %c0_88 = arith.constant 0 : index
    %125 = vector.load %arg8[%c8, %c0_88] : memref<9x256xf32, #tpu.memory_space<vmem>>, vector<1x256xf32>
    %126 = vector.broadcast %125 : vector<1x256xf32> to vector<16x256xf32>
    %127 = arith.mulf %124, %126 : vector<16x256xf32>
    %c8_89 = arith.constant 8 : index
    %c0_90 = arith.constant 0 : index
    %c0_91 = arith.constant 0 : index
    %128 = vector.load %arg6[%c8_89, %c0_90, %c0_91] : memref<9x64x16xf32, #tpu.memory_space<vmem>>, vector<1x64x16xf32>
    %129 = vector.shape_cast %128 : vector<1x64x16xf32> to vector<64x16xf32>
    %cst_92 = arith.constant dense<0.000000e+00> : vector<64x256xf32>
    %130 = tpu.matmul %129, %127, %cst_92 {dimension_numbers = #tpu.dot_dimension_numbers<[1], [0], [0], [1], [0, 0, 1, 1], [], []>} : vector<64x16xf32>, vector<16x256xf32>, vector<64x256xf32> -> vector<64x256xf32>
    %131 = arith.addf %123, %130 : vector<64x256xf32>
    %c0_93 = arith.constant 0 : index
    %c0_94 = arith.constant 0 : index
    %c0_95 = arith.constant 0 : index
    %132 = vector.load %arg9[%c0_93, %c0_94, %c0_95] : memref<1x64x256xf32, #tpu.memory_space<vmem>>, vector<1x64x256xf32>
    %133 = vector.shape_cast %132 : vector<1x64x256xf32> to vector<64x256xf32>
    %134 = vector.shape_cast %131 : vector<64x256xf32> to vector<1x64x256xf32>
    tpu.vector_store %arg9[%c0_93, %c0_94, %c0_95], %134 {strides = array<i32>} : memref<1x64x256xf32, #tpu.memory_space<vmem>>, vector<1x64x256xf32>,
    return
  }
  func.func @transform_0(%arg0: i32) -> (i32, i32, i32) {
    %c0_i32 = arith.constant 0 : i32
    %c0_i32_0 = arith.constant 0 : i32
    %c0_i32_1 = arith.constant 0 : i32
    return %arg0, %c0_i32, %c0_i32_0 : i32, i32, i32
  }
  func.func @transform_1(%arg0: i32) -> (i32, i32) {
    %c0_i32 = arith.constant 0 : i32
    %c0_i32_0 = arith.constant 0 : i32
    %c0_i32_1 = arith.constant 0 : i32
    return %c0_i32, %c0_i32_0 : i32, i32
  }
  func.func @transform_2(%arg0: i32) -> (i32, i32) {
    %c0_i32 = arith.constant 0 : i32
    %c0_i32_0 = arith.constant 0 : i32
    %c0_i32_1 = arith.constant 0 : i32
    return %c0_i32, %c0_i32_0 : i32, i32
  }
  func.func @transform_3(%arg0: i32) -> (i32, i32) {
    %c0_i32 = arith.constant 0 : i32
    %c0_i32_0 = arith.constant 0 : i32
    %c0_i32_1 = arith.constant 0 : i32
    return %c0_i32, %c0_i32_0 : i32, i32
  }
  func.func @transform_4(%arg0: i32) -> (i32, i32) {
    %c0_i32 = arith.constant 0 : i32
    %c0_i32_0 = arith.constant 0 : i32
    %c0_i32_1 = arith.constant 0 : i32
    return %c0_i32, %c0_i32_0 : i32, i32
  }
  func.func @transform_5(%arg0: i32) -> (i32, i32, i32) {
    %c0_i32 = arith.constant 0 : i32
    %c0_i32_0 = arith.constant 0 : i32
    %c0_i32_1 = arith.constant 0 : i32
    %c0_i32_2 = arith.constant 0 : i32
    return %c0_i32, %c0_i32_0, %c0_i32_1 : i32, i32, i32
  }
  func.func @transform_6(%arg0: i32) -> (i32, i32) {
    %c0_i32 = arith.constant 0 : i32
    %c0_i32_0 = arith.constant 0 : i32
    %c0_i32_1 = arith.constant 0 : i32
    return %c0_i32, %c0_i32_0 : i32, i32
  }
  func.func @transform_7(%arg0: i32) -> (i32, i32) {
    %c0_i32 = arith.constant 0 : i32
    %c0_i32_0 = arith.constant 0 : i32
    %c0_i32_1 = arith.constant 0 : i32
    return %c0_i32, %c0_i32_0 : i32, i32
  }
  func.func @transform_8(%arg0: i32) -> (i32, i32, i32) {
    %c0_i32 = arith.constant 0 : i32
    %c0_i32_0 = arith.constant 0 : i32
    %c0_i32_1 = arith.constant 0 : i32
    return %arg0, %c0_i32, %c0_i32_0 : i32, i32, i32
  }
}

</mosaic_0001>

<bundles_post_ra>
// kernel: waveblock_forward.6
= control target key start
LH: loop header
LB: loop body
LE: loop exit
PB: predicated region body
PF: predicated region fallthrough
CT: control target
= control target key end

     0   :  { %s2360_s27 = smov 0   ;;  %s2642_s0 = inlined_call_operand.vmem [shape: f32[2,16,4], index: 0, kind: input, shape index: {}]   ;;  %s2643_s1 = inlined_call_operand.vmem [shape: f32[32,16], index: 1, kind: input, shape index: {}]   ;;  %s2644_s2 = inlined_call_operand.vmem [shape: f32[32,1], index: 2, kind: input, shape index: {}]   ;;  %s2645_s3 = inlined_call_operand.vmem [shape: f32[16,32], index: 3, kind: input, shape index: {}]   ;;  %s2646_s4 = inlined_call_operand.vmem [shape: f32[16,1], index: 4, kind: input, shape index: {}]   ;;  %s2647_s5 = inlined_call_operand.vmem [shape: f32[9,32,16], index: 5, kind: input, shape index: {}]   ;;  %s2648_s6 = inlined_call_operand.vmem [shape: f32[32,1], index: 6, kind: input, shape index: {}]   ;;  %s2649_s7 = inlined_call_operand.vmem [shape: f32[9,4], index: 7, kind: input, shape index: {}]   ;;  %s2650_s8 = inlined_call_operand.vmem [shape: f32[2,32,4], index: 8, kind: output, shape index: {}]  }
   0x1 LB: > { %s1854_s28 = sadd.s32 4294967295, %s2298_s27   ;;  %p1858_p0 = scmp.ge.s32.totalorder %s2298_s27, 1  ;;  %s2298_s27 = sphi %s2360_s27, %s18_s27  }
   0x2   : > { %p262_p1 = scmp.lt.s32.totalorder %s2298_s27, 3 }
   0x4   : > { %p263_p2 = pnand %p1858_p0, %p262_p1 }
   0x5   : > { %p296_p3 = scmp.lt.s32.totalorder (!%p263_p2), %s1854_s28, 1  ;;  %v308_v0 = vld [vmem:[%s2643_s1] sm:$0xff] (!%p263_p2)  ;;  %vm336_vm0 = vcmask (!%p263_p2), 130048   ;;  %v2300_v1 = vmov (!%p263_p2), 0   ;;  %v314_v3 = vld [vmem:[%s2644_s2 + $0x10] sm:$0xff] (!%p263_p2)  ;;  %v313_v4 = vld [vmem:[%s2644_s2 + $0x8] sm:$0xff] (!%p263_p2) }
   0x6   : > { %266 = sbr.rel (%p263_p2) target bundleno = 1013 (0x3f5), region = 52  ;;  %2020 = vmatprep.mubr.msk.f32.mxu1 (!%p263_p2), %vm336_vm0, %v308_v0  ;;  %2234 = vset.pattern.permute.xlu0 (!%p263_p2), %v2300_v1  ;;  %v312_v2 = vld [vmem:[%s2644_s2] sm:$0xff] (!%p263_p2)  ;;  %v315_v5 = vld [vmem:[%s2644_s2 + $0x18] sm:$0xff] (!%p263_p2)  ;;  %v545_v10 = vld [vmem:[%s2646_s4 + $0x8] sm:$0xff] (!%p263_p2)  ;;  %vm556_vm1 = vcmask (!%p263_p2), 261120   ;;  %vm638_vm6 = vcmask (!%p263_p2), 80896  }
   0x7   : > { %318 = vperm.xlu0 (!%p263_p2), %2234, %v312_v2   ;;  %2235 = vset.pattern.permute.xlu1 (!%p263_p2), %v2300_v1  ;;  %v544_v9 = vld [vmem:[%s2646_s4] sm:$0xff] (!%p263_p2)  ;;  %v309_v11 = vld [vmem:[%s2643_s1 + $0x8] sm:$0xff] (!%p263_p2)  ;;  %v310_v12 = vld [vmem:[%s2643_s1 + $0x10] sm:$0xff] (!%p263_p2)  ;;  %s2305_s25 = smov (!%p263_p2), 5   ;;  %s2306_s26 = smov (!%p263_p2), 2   ;;  %vm649_vm7 = vcmask (!%p263_p2), 56344  }
   0x8   : > { %328 = vperm.xlu1 (!%p263_p2), %2235, %v314_v3   ;;  %v311_v13 = vld [vmem:[%s2643_s1 + $0x18] sm:$0xff] (!%p263_p2)  ;;  %v542_v14 = vld [vmem:[%s2645_s3] sm:$0xff] (!%p263_p2)  ;;  %s2307_s11 = smov (!%p263_p2), 4   ;;  %s2308_s16 = smov (!%p263_p2), 1   ;;  %vm1794_vm8 = vcmask (!%p263_p2), 31744  }
   0x9   : > { %s2309_s23 = smov (!%p263_p2), 122   ;;  %s2310_s24 = smov (!%p263_p2), 125  }
   0xa   : > { %s2313_s29 = smov (!%p263_p2), 124   ;;  %s2314_s30 = smov (!%p263_p2), 127  }
   0xb   : > { %323 = vperm.xlu0 (!%p263_p2), %2234, %v313_v4  }
   0xc   : > { %333 = vperm.xlu1 (!%p263_p2), %2235, %v315_v5  }
   0xd   : > { %s2652_s28 = smov (!%p296_p3, %s1854_s28), 1 }
   0xe   : > { %s1948_s15 = sshll.u32 %s2652_s28, 4 }
   0xf   : > { %s300_s20 = scalar_lea.vmem %s2642_s0, %s1948_s15  ;;  %548 = vperm.xlu0 %2234, %v544_v9   ;;  %s2303_s15 = smov 3  }
  0x10   : > { %v306_v6 = vld [vmem:[%s300_s20] sm:$0xff]  ;;  %v307_v7 = vld [vmem:[%s300_s20 + $0x8] sm:$0xff]  ;;  %553 = vperm.xlu1 %2235, %v545_v10   ;;  %s2304_s20 = smov 6  }
  0x11   : > { %v2127_v8 = vpack.c.bf16 %v307_v7, %v306_v6 }
  0x13   : > { %2128 = vmatprep.subr.bf16.mxu1 %v2127_v8 }
  0x14   : > { %2130 = vmatpush3.bf16.msra.mxu1 %v2127_v8 }
  0x17   : > { %2021 = vmatmul.mubr.msk.f32.vlgmr.msra.gmra.mrb[0].mxu1 %vm336_vm0, %v309_v11 }
  0x18   : > { %2023 = vmatprep.mubr.msk.f32.mxu1 %vm336_vm0, %v310_v12 }
  0x1b   : > { %2024 = vmatmul.mubr.msk.f32.gmra.mrb[2].mxu1 %vm336_vm0, %v311_v13 }
  0x1c   : > { %2034 = vmatprep.mubr.msk.f32.mxu1 %vm556_vm1, %v542_v14 }
  0x86   : > { %v319_v15 = vpop.permute.xlu0 %318 }
  0x87   : > { %v329_v16 = vpop.permute.xlu1 %328 }
  0x8a   : > { %v324_v17 = vpop.permute.xlu0 %323 }
  0x8b   : > { %v334_v23 = vpop.permute.xlu1 %333 }
  0xea   : > { %v2022_v18 = vpop.f32.mrb[0].mxu1 }
  0xeb   : > { %v2412_v19 = vadd.f32 %v2022_v18, %v324_v17  ;;  %v415_v20 = vpop.f32.mrb[1].mxu1 }
  0xec   : > { %v2414_v21 = vadd.f32 %v415_v20, %v319_v15 }
  0xed   : > { %v2417_v22 = vmul.f32 0.70710677, %v2412_v19 }
  0xee   : > { %v2420_v24 = vmul.f32 0.70710677, %v2414_v21  ;;  %v2025_v25 = vpop.f32.mrb[2].mxu1 }
  0xef   : > { %v451_v26 = vand.u32 2147483647, %v2417_v22  ;;  %v2423_v27 = vadd.f32 %v2025_v25, %v334_v23  ;;  %v425_v28 = vpop.f32.mrb[3].mxu1  ;;  %vm443_vm2 = vcmp.ge.f32.partialorder %v2417_v22, 0.0 }
  0xf0   : > { %v450_v29 = vand.u32 2147483647, %v2420_v24  ;;  %v2426_v30 = vadd.f32 %v425_v28, %v329_v16  ;;  %vm442_vm3 = vcmp.ge.f32.partialorder %v2420_v24, 0.0 }
  0xf1   : > { %v455_v31 = vmul.f32 0.3275911, %v451_v26  ;;  %v2429_v33 = vmul.f32 0.70710677, %v2423_v27  ;;  %v507_v42 = vsub.f32 0.0, %v451_v26 }
  0xf2   : > { %v454_v32 = vmul.f32 0.3275911, %v450_v29  ;;  %v2432_v35 = vmul.f32 0.70710677, %v2426_v30  ;;  %v506_v44 = vsub.f32 0.0, %v450_v29 }
  0xf3   : > { %v459_v34 = vadd.f32 1.0, %v455_v31  ;;  %v453_v37 = vand.u32 2147483647, %v2429_v33  ;;  %v511_v46 = vmul.f32 %v507_v42, %v451_v26  ;;  %vm445_vm4 = vcmp.ge.f32.partialorder %v2429_v33, 0.0 }
  0xf4   : > { %v458_v36 = vadd.f32 1.0, %v454_v32  ;;  %v452_v39 = vand.u32 2147483647, %v2432_v35  ;;  %v510_v49 = vmul.f32 %v506_v44, %v450_v29  ;;  %vm444_vm5 = vcmp.ge.f32.partialorder %v2432_v35, 0.0  ;;  %v543_v35 = vld [vmem:[%s2645_s3 + $0x8] sm:$0xff] }
  0xf5   : > { %2276 = vrcp.f32 %v459_v34  ;;  %v457_v38 = vmul.f32 0.3275911, %v453_v37  ;;  %v509_v50 = vsub.f32 0.0, %v453_v37  ;;  %v516_v53 = vmul.f32 1.442695, %v511_v46 }
  0xf6   : > { %2278 = vrcp.f32 %v458_v36  ;;  %v456_v41 = vmul.f32 0.3275911, %v452_v39  ;;  %v508_v55 = vsub.f32 0.0, %v452_v39  ;;  %v514_v58 = vmul.f32 1.442695, %v510_v49 }
  0xf7   : > { %v461_v40 = vadd.f32 1.0, %v457_v38  ;;  %v513_v59 = vmul.f32 %v509_v50, %v453_v37  ;;  %v435_v50 = vmul.f32 0.5, %v2412_v19  ;;  %v437_v19 = vmul.f32 0.5, %v2423_v27  ;;  %v554_v27 = vpop.permute.xlu1 %553 }
  0xf8   : > { %v460_v43 = vadd.f32 1.0, %v456_v41  ;;  %v512_v2 = vmul.f32 %v508_v55, %v452_v39  ;;  %v2301_v41 = vmov -1.0  }
  0xf9   : > { %2280 = vrcp.f32 %v461_v40  ;;  %v520_v4 = vmul.f32 1.442695, %v513_v59  ;;  %v447_v42 = vsel %vm443_vm2, 1.0, %v2301_v41  ;;  %v448_v33 = vsel %vm444_vm5, 1.0, %v2301_v41 }
  0xfa   : > { %2282 = vrcp.f32 %v460_v43  ;;  %v518_v12 = vmul.f32 1.442695, %v512_v2 }
  0xfb   : > { %2284 = vpow2.f32 %v516_v53  ;;  %v434_v53 = vmul.f32 0.5, %v2414_v21  ;;  %v436_v21 = vmul.f32 0.5, %v2426_v30 }
  0xfc   : > { %2286 = vpow2.f32 %v514_v58  ;;  %v449_v58 = vsel %vm445_vm4, 1.0, %v2301_v41 }
  0xfd   : > { %2288 = vpow2.f32 %v520_v4 }
  0xfe   : > { %2290 = vpow2.f32 %v518_v12  ;;  %v1874_v12 = vld [vmem:[%s2649_s7 + $0x1] ss:$0 sm:$0xff] }
  0xff   : > { %v2277_v45 = vpop.eup %2276 }
 0x100   : > { %v2279_v47 = vpop.eup %2278  ;;  %v471_v48 = vmul.f32 1.0614054, %v2277_v45 }
 0x101   : > { %v470_v51 = vmul.f32 1.0614054, %v2279_v47 }
 0x102   : > { %v475_v52 = vadd.f32 -1.4531521, %v471_v48  ;;  %v446_v48 = vsel %vm442_vm3, 1.0, %v2301_v41 }
 0x103   : > { %v474_v54 = vadd.f32 -1.4531521, %v470_v51  ;;  %v2281_v56 = vpop.eup %2280 }
 0x104   : > { %v479_v57 = vmul.f32 %v2277_v45, %v475_v52  ;;  %v473_v61 = vmul.f32 1.0614054, %v2281_v56  ;;  %v2283_v63 = vpop.eup %2282 }
 0x105   : > { %v478_v60 = vmul.f32 %v2279_v47, %v474_v54  ;;  %v472_v5 = vmul.f32 1.0614054, %v2283_v63  ;;  %v2285_v28 = vpop.eup %2284 }
 0x106   : > { %v483_v62 = vadd.f32 1.4214138, %v479_v57  ;;  %v477_v1 = vadd.f32 -1.4531521, %v473_v61  ;;  %v2287_v32 = vpop.eup %2286 }
 0x107   : > { %v482_v0 = vadd.f32 1.4214138, %v478_v60  ;;  %v476_v9 = vadd.f32 -1.4531521, %v472_v5  ;;  %v2302_v5 = vmov 0.0  }
 0x108   : > { %v487_v3 = vmul.f32 %v2277_v45, %v483_v62  ;;  %v481_v7 = vmul.f32 %v2281_v56, %v477_v1  ;;  %640 = vst.msk [vmem:[#allocation2 + $0x8] sm:$0xff] %vm638_vm6, %v2302_v5  ;;  %639 = vst.msk [vmem:[#allocation2] sm:$0xff] %vm638_vm6, %v2302_v5 }
 0x109   : > { %v486_v6 = vmul.f32 %v2279_v47, %v482_v0  ;;  %v480_v14 = vmul.f32 %v2283_v63, %v476_v9 }
 0x10a   : > { %v491_v8 = vadd.f32 -0.28449672, %v487_v3  ;;  %v485_v11 = vadd.f32 1.4214138, %v481_v7  ;;  %v549_v7 = vpop.permute.xlu0 %548 }
 0x10b   : > { %v490_v10 = vadd.f32 -0.28449672, %v486_v6  ;;  %v484_v18 = vadd.f32 1.4214138, %v480_v14  ;;  %v1883_v14 = vld [vmem:[%s2649_s7 + $0x2] ss:$0 sm:$0xff] }
 0x10c   : > { %v495_v13 = vmul.f32 %v2277_v45, %v491_v8  ;;  %v489_v16 = vmul.f32 %v2281_v56, %v485_v11  ;;  %v1901_v11 = vld [vmem:[%s2649_s7 + $0x4] ss:$0 sm:$0xff] }
 0x10d   : > { %v494_v15 = vmul.f32 %v2279_v47, %v490_v10  ;;  %v488_v26 = vmul.f32 %v2283_v63, %v484_v18  ;;  %v1869_v10 = vld [vmem:[%s2649_s7] ss:$0 sm:$0xff] }
 0x10e   : > { %v499_v17 = vadd.f32 0.2548296, %v495_v13  ;;  %v493_v23 = vadd.f32 -0.28449672, %v489_v16  ;;  %v1910_v13 = vld [vmem:[%s2649_s7 + $0x5] ss:$0 sm:$0xff] }
 0x10f   : > { %v498_v20 = vadd.f32 0.2548296, %v494_v15  ;;  %v492_v36 = vadd.f32 -0.28449672, %v488_v26  ;;  %v1919_v15 = vld [vmem:[%s2649_s7 + $0x6] ss:$0 sm:$0xff] }
 0x110   : > { %v503_v25 = vmul.f32 %v2277_v45, %v499_v17  ;;  %v497_v31 = vmul.f32 %v2281_v56, %v493_v23  ;;  %v2289_v45 = vpop.eup %2288  ;;  %v1892_v16 = vld [vmem:[%s2649_s7 + $0x3] ss:$0 sm:$0xff]  ;;  %v1928_v17 = vld [vmem:[%s2649_s7 + $0x7] ss:$0 sm:$0xff]  ;;  %v1937_v26 = vld [vmem:[%s2649_s7 + $0x8] ss:$0 sm:$0xff] }
 0x111   : > { %v502_v29 = vmul.f32 %v2279_v47, %v498_v20  ;;  %v496_v40 = vmul.f32 %v2283_v63, %v492_v36  ;;  %v2291_v52 = vpop.eup %2290 }
 0x112   : > { %v523_v34 = vmul.f32 %v2285_v28, %v503_v25  ;;  %v501_v38 = vadd.f32 0.2548296, %v497_v31  ;;  %v693_v28 = vld [vmem:[%s2647_s5] sm:$0xff] }
 0x113   : > { %v522_v37 = vmul.f32 %v2287_v32, %v502_v29  ;;  %v500_v47 = vadd.f32 0.2548296, %v496_v40  ;;  %v1902_v29 = vld [vmem:[%s2647_s5 + $0x80] sm:$0xff] }
 0x114   : > { %v527_v39 = vsub.f32 1.0, %v523_v34  ;;  %v505_v44 = vmul.f32 %v2281_v56, %v501_v38  ;;  %2081 = vmatprep.mubr.msk.f32.mxu0 %vm336_vm0, %v1902_v29  ;;  %v695_v29 = vld [vmem:[%s2647_s5 + $0x10] sm:$0xff] }
 0x115   : > { %v526_v43 = vsub.f32 1.0, %v522_v37  ;;  %v504_v24 = vmul.f32 %v2283_v63, %v500_v47 }
 0x116   : > { %v531_v46 = vmul.f32 %v527_v39, %v447_v42  ;;  %v525_v22 = vmul.f32 %v2289_v45, %v505_v44 }
 0x117   : > { %v530_v49 = vmul.f32 %v526_v43, %v446_v48  ;;  %v524_v56 = vmul.f32 %v2291_v52, %v504_v24 }
 0x118   : > { %v535_v51 = vadd.f32 1.0, %v531_v46  ;;  %v529_v55 = vsub.f32 1.0, %v525_v22 }
 0x119   : > { %v534_v54 = vadd.f32 1.0, %v530_v49  ;;  %v528_v61 = vsub.f32 1.0, %v524_v56 }
 0x11a   : > { %v539_v57 = vmul.f32 %v535_v51, %v435_v50  ;;  %v533_v60 = vmul.f32 %v529_v55, %v449_v58 }
 0x11b   : > { %v538_v59 = vmul.f32 %v534_v54, %v434_v53  ;;  %v532_v1 = vmul.f32 %v528_v61, %v448_v33 }
 0x11c   : > { %v537_v62 = vadd.f32 1.0, %v533_v60 }
 0x11d   : > { %v2131_v0 = vpack.c.bf16 %v539_v57, %v538_v59  ;;  %v536_v2 = vadd.f32 1.0, %v532_v1  ;;  %v653_v1 = vld [vmem:[%s2648_s6 + $0x8] sm:$0xff] }
 0x11e   : > { %v541_v63 = vmul.f32 %v537_v62, %v437_v19 }
 0x11f   : > { %2132 = vmatprep.subr.bf16.mxu1 %v2131_v0  ;;  %v540_v3 = vmul.f32 %v536_v2, %v436_v21  ;;  %v655_v21 = vld [vmem:[%s2648_s6 + $0x18] sm:$0xff]  ;;  %v654_v2 = vld [vmem:[%s2648_s6 + $0x10] sm:$0xff] }
 0x120   : > { %2134 = vmatpush3.bf16.msra.mxu1 %v2131_v0 }
 0x121   : > { %v2135_v4 = vpack.c.bf16 %v541_v63, %v540_v3  ;;  %v652_v63 = vld [vmem:[%s2648_s6] sm:$0xff] }
 0x123   : > { %2136 = vmatprep.subr.bf16.mxu1 %v2135_v4 }
 0x124   : > { %2138 = vmatpush3.bf16.msra.mxu1 %v2135_v4 }
 0x127   : > { %2035 = vmatmul.mubr.msk.f32.vlgmr.msra.gmra.mrb[4].mxu1 %vm556_vm1, %v543_v35 }
 0x128   : > { %2041 = vmatprep.mubr.msk.f32.mxu1 %vm336_vm0, %v693_v28 }
 0x1fa   : > { %v2036_v6 = vpop.f32.mrb[4].mxu1 }
 0x1fb   : > { %v635_v30 = vadd.f32 %v2036_v6, %v554_v27  ;;  %v629_v8 = vpop.f32.mrb[5].mxu1 }
 0x1fc   : > { %v630_v9 = vadd.f32 %v629_v8, %v549_v7 }
 0x1fd   : > { %645 = vrot.lane.b32.xlu1 %v635_v30, %s2303_s15 }
 0x1fe   : > { %643 = vrot.lane.b32.xlu0 %v630_v9, %s2303_s15 }
 0x201   : > { %688 = vrot.lane.b32.xlu1 %v1869_v10, %s2304_s20 }
 0x202   : > { %1187 = vrot.lane.b32.xlu0 %v1901_v11, %s2303_s15 }
 0x205   : > { %812 = vrot.lane.b32.xlu1 %v1874_v12, %s2305_s25  ;;  %s2311_s25 = smov 123  }
 0x206   : > { %1312 = vrot.lane.b32.xlu0 %v1910_v13, %s2306_s26 }
 0x209   : > { %937 = vrot.lane.b32.xlu1 %v1883_v14, %s2307_s11  ;;  %v694_v14 = vld [vmem:[%s2647_s5 + $0x8] sm:$0xff] }
 0x20a   : > { %1437 = vrot.lane.b32.xlu0 %v1919_v15, %s2306_s26  ;;  %s2312_s26 = smov 126  }
 0x20d   : > { %1062 = vrot.lane.b32.xlu1 %v1892_v16, %s2307_s11 }
 0x20e   : > { %1562 = vrot.lane.b32.xlu0 %v1928_v17, %s2308_s16  ;;  %v1903_v17 = vld [vmem:[%s2647_s5 + $0x88] sm:$0xff] }
 0x26f   : > { %v646_v18 = vpop.permute.xlu1 %645 }
 0x270   : > { %651 = vst.msk [vmem:[#allocation2 + $0x8] sm:$0xff] %vm649_vm7, %v646_v18  ;;  %v644_v20 = vpop.permute.xlu0 %643 }
 0x271   : > { %650 = vst.msk [vmem:[#allocation2] sm:$0xff] %vm649_vm7, %v644_v20 }
 0x273   : > { %v689_v23 = vpop.permute.xlu1 %688 }
 0x274   : > { %v1188_v25 = vpop.permute.xlu0 %1187 }
 0x277   : > { %v681_v31 = vld [vmem:[#allocation2 + $0x8] sm:$0xff]  ;;  %v813_v32 = vpop.permute.xlu1 %812 }
 0x278   : > { %v680_v34 = vld [vmem:[#allocation2] sm:$0xff]  ;;  %v692_v36 = vmul.f32 %v689_v23, %v681_v31  ;;  %v1191_v37 = vmul.f32 %v1188_v25, %v681_v31  ;;  %v1313_v38 = vpop.permute.xlu0 %1312  ;;  %v1687_v39 = vmul.f32 %v1937_v26, %v681_v31  ;;  %v816_v43 = vmul.f32 %v813_v32, %v681_v31 }
 0x279   : > { %v691_v40 = vmul.f32 %v689_v23, %v680_v34  ;;  %v1190_v41 = vmul.f32 %v1188_v25, %v680_v34  ;;  %v815_v42 = vmul.f32 %v813_v32, %v680_v34  ;;  %v1686_v44 = vmul.f32 %v1937_v26, %v680_v34  ;;  %v696_v32 = vld [vmem:[%s2647_s5 + $0x18] sm:$0xff] }
 0x27a   : > { %v1315_v48 = vmul.f32 %v1313_v38, %v680_v34  ;;  %v1316_v47 = vmul.f32 %v1313_v38, %v681_v31 }
 0x27b   : > { %v2241_v45 = vpack.i.bf16 %v692_v36, %v691_v40  ;;  %v2236_v46 = vpack.i.bf16 %v1191_v37, %v1190_v41  ;;  %v938_v49 = vpop.permute.xlu1 %937  ;;  %v2483_v50 = vpack.c.bf16 %v1687_v39, %v1686_v44  ;;  %v2251_v54 = vpack.i.bf16 %v816_v43, %v815_v42  ;;  %v1905_v37 = vld [vmem:[%s2647_s5 + $0x98] sm:$0xff]  ;;  %v1875_v40 = vld [vmem:[%s2647_s5 + $0x20] sm:$0xff] }
 0x27c   : > { %v1438_v22 = vpop.permute.xlu0 %1437  ;;  %v940_v51 = vmul.f32 %v938_v49, %v680_v34  ;;  %v941_v24 = vmul.f32 %v938_v49, %v681_v31  ;;  %v2246_v55 = vpack.i.bf16 %v1316_v47, %v1315_v48  ;;  %v1911_v41 = vld [vmem:[%s2647_s5 + $0xa0] sm:$0xff]  ;;  %v1912_v47 = vld [vmem:[%s2647_s5 + $0xa8] sm:$0xff] }
 0x27d   : > { %2242 = vrot.lane.b32.xlu1 %v2241_v45, %s2309_s23  ;;  %2237 = vrot.lane.b32.xlu0 %v2236_v46, %s2310_s24  ;;  %v1440_v52 = vmul.f32 %v1438_v22, %v680_v34  ;;  %v1441_v53 = vmul.f32 %v1438_v22, %v681_v31  ;;  %v1876_v46 = vld [vmem:[%s2647_s5 + $0x28] sm:$0xff]  ;;  %v1877_v22 = vld [vmem:[%s2647_s5 + $0x30] sm:$0xff] }
 0x27e   : > { %v2261_v56 = vpack.i.bf16 %v941_v24, %v940_v51  ;;  %v1913_v51 = vld [vmem:[%s2647_s5 + $0xb0] sm:$0xff]  ;;  %v1878_v24 = vld [vmem:[%s2647_s5 + $0x38] sm:$0xff] }
 0x27f   : > { %v1063_v57 = vpop.permute.xlu1 %1062  ;;  %v2256_v59 = vpack.i.bf16 %v1441_v53, %v1440_v52  ;;  %v1914_v52 = vld [vmem:[%s2647_s5 + $0xb8] sm:$0xff]  ;;  %v1884_v53 = vld [vmem:[%s2647_s5 + $0x40] sm:$0xff] }
 0x280   : > { %v1563_v58 = vpop.permute.xlu0 %1562  ;;  %v1065_v60 = vmul.f32 %v1063_v57, %v680_v34  ;;  %v1066_v61 = vmul.f32 %v1063_v57, %v681_v31  ;;  %v1921_v57 = vld [vmem:[%s2647_s5 + $0xc8] sm:$0xff] }
 0x281   : > { %2252 = vrot.lane.b32.xlu1 %v2251_v54, %s2311_s25  ;;  %2247 = vrot.lane.b32.xlu0 %v2246_v55, %s2312_s26  ;;  %v1565_v62 = vmul.f32 %v1563_v58, %v680_v34  ;;  %v1566_v33 = vmul.f32 %v1563_v58, %v681_v31  ;;  %v1904_v31 = vld [vmem:[%s2647_s5 + $0x90] sm:$0xff]  ;;  %v1920_v54 = vld [vmem:[%s2647_s5 + $0xc0] sm:$0xff]  ;;  %s1949_s25 = sshll.u32 %s2652_s28, 5 }
 0x282   : > { %v2271_v0 = vpack.i.bf16 %v1066_v61, %v1065_v60  ;;  %v1885_v55 = vld [vmem:[%s2647_s5 + $0x48] sm:$0xff]  ;;  %v1886_v58 = vld [vmem:[%s2647_s5 + $0x50] sm:$0xff]  ;;  %v1923_v60 = vld [vmem:[%s2647_s5 + $0xd8] sm:$0xff] }
 0x283   : > { %v2266_v19 = vpack.i.bf16 %v1566_v33, %v1565_v62  ;;  %v1893_v61 = vld [vmem:[%s2647_s5 + $0x60] sm:$0xff]  ;;  %v1894_v33 = vld [vmem:[%s2647_s5 + $0x68] sm:$0xff] }
 0x284   : > { %v1929_v62 = vld [vmem:[%s2647_s5 + $0xe0] sm:$0xff] }
 0x285   : > { %2262 = vrot.lane.b32.xlu1 %v2261_v56, %s2313_s29  ;;  %2257 = vrot.lane.b32.xlu0 %v2256_v59, %s2312_s26  ;;  %v1922_v56 = vld [vmem:[%s2647_s5 + $0xd0] sm:$0xff]  ;;  %v1887_v59 = vld [vmem:[%s2647_s5 + $0x58] sm:$0xff] }
 0x289   : > { %2272 = vrot.lane.b32.xlu1 %v2271_v0, %s2313_s29  ;;  %2267 = vrot.lane.b32.xlu0 %v2266_v19, %s2314_s30  ;;  %v1930_v0 = vld [vmem:[%s2647_s5 + $0xe8] sm:$0xff]  ;;  %v1895_v19 = vld [vmem:[%s2647_s5 + $0x70] sm:$0xff]  ;;  %s305_s30 = scalar_lea.vmem %s2650_s8, %s1949_s25 }
 0x28d   : > { %663 = vperm.xlu1 %2235, %v653_v1   ;;  %658 = vperm.xlu0 %2234, %v652_v63   ;;  %v1931_v1 = vld [vmem:[%s2647_s5 + $0xf0] sm:$0xff]  ;;  %v1896_v63 = vld [vmem:[%s2647_s5 + $0x78] sm:$0xff] }
 0x291   : > { %673 = vperm.xlu1 %2235, %v655_v21   ;;  %668 = vperm.xlu0 %2234, %v654_v2   ;;  %v1932_v21 = vld [vmem:[%s2647_s5 + $0xf8] sm:$0xff]  ;;  %v1938_v2 = vld [vmem:[%s2647_s5 + $0x100] sm:$0xff] }
 0x2ef   : > { %v2243_v3 = vpop.permute.xlu1 %2242  ;;  %v2238_v4 = vpop.permute.xlu0 %2237 }
 0x2f0   : > { %v2245_v35 = vunpack.i.h.bf16 %v2243_v3  ;;  %v2244_v5 = vunpack.i.l.bf16 %v2243_v3  ;;  %v2240_v27 = vunpack.i.h.bf16 %v2238_v4  ;;  %v2239_v6 = vunpack.i.l.bf16 %v2238_v4  ;;  %v1940_v3 = vld [vmem:[%s2647_s5 + $0x110] sm:$0xff]  ;;  %v1941_v4 = vld [vmem:[%s2647_s5 + $0x118] sm:$0xff] }
 0x2f2   : > { %v2139_v7 = vpack.c.bf16 %v2245_v35, %v2244_v5  ;;  %v2155_v30 = vpack.c.bf16 %v2240_v27, %v2239_v6 }
 0x2f3   : > { %v2253_v8 = vpop.permute.xlu1 %2252  ;;  %v2248_v9 = vpop.permute.xlu0 %2247 }
 0x2f4   : > { %v2255_v10 = vunpack.i.h.bf16 %v2253_v8  ;;  %v2254_v11 = vunpack.i.l.bf16 %v2253_v8  ;;  %v2250_v12 = vunpack.i.h.bf16 %v2248_v9  ;;  %v2249_v13 = vunpack.i.l.bf16 %v2248_v9  ;;  %2140 = vmatprep.subr.bf16.mxu1 %v2139_v7  ;;  %2156 = vmatprep.subr.bf16.mxu0 %v2155_v30 }
 0x2f5   : > { %2142 = vmatpush3.bf16.msra.mxu1 %v2139_v7  ;;  %2158 = vmatpush3.bf16.msra.mxu0 %v2155_v30 }
 0x2f6   : > { %v2143_v15 = vpack.c.bf16 %v2255_v10, %v2254_v11  ;;  %v2159_v16 = vpack.c.bf16 %v2250_v12, %v2249_v13 }
 0x2f7   : > { %v2263_v18 = vpop.permute.xlu1 %2262  ;;  %v2258_v20 = vpop.permute.xlu0 %2257 }
 0x2f8   : > { %v2265_v23 = vunpack.i.h.bf16 %v2263_v18  ;;  %v2264_v25 = vunpack.i.l.bf16 %v2263_v18  ;;  %v2260_v26 = vunpack.i.h.bf16 %v2258_v20  ;;  %v2259_v28 = vunpack.i.l.bf16 %v2258_v20  ;;  %2042 = vmatmul.mubr.msk.f32.vlgmr.msra.gmra.mrb[6].mxu1 %vm336_vm0, %v694_v14  ;;  %2144 = vmatprep.subr.bf16.mxu1 %v2143_v15 }
 0x2f9   : > { %2082 = vmatmul.mubr.msk.f32.vlgmr.msra.gmra.mrb[0].mxu0 %vm336_vm0, %v1903_v17  ;;  %2160 = vmatprep.subr.bf16.mxu0 %v2159_v16 }
 0x2fa   : > { %v2147_v34 = vpack.c.bf16 %v2265_v23, %v2264_v25  ;;  %v2163_v36 = vpack.c.bf16 %v2260_v26, %v2259_v28  ;;  %2146 = vmatpush3.bf16.msra.mxu1 %v2143_v15  ;;  %2162 = vmatpush3.bf16.msra.mxu0 %v2159_v16 }
 0x2fb   : > { %v2273_v38 = vpop.permute.xlu1 %2272  ;;  %2044 = vmatprep.mubr.msk.f32.mxu1 %vm336_vm0, %v695_v29  ;;  %v2268_v39 = vpop.permute.xlu0 %2267  ;;  %2084 = vmatprep.mubr.msk.f32.mxu0 %vm336_vm0, %v1904_v31 }
 0x2fc   : > { %v2275_v42 = vunpack.i.h.bf16 %v2273_v38  ;;  %v2274_v43 = vunpack.i.l.bf16 %v2273_v38  ;;  %v2270_v44 = vunpack.i.h.bf16 %v2268_v39  ;;  %v2269_v45 = vunpack.i.l.bf16 %v2268_v39  ;;  %2045 = vmatmul.mubr.msk.f32.gmra.mrb[8].mxu1 %vm336_vm0, %v696_v32  ;;  %2148 = vmatprep.subr.bf16.mxu1 %v2147_v34 }
 0x2fd   : > { %2085 = vmatmul.mubr.msk.f32.gmra.mrb[2].mxu0 %vm336_vm0, %v1905_v37  ;;  %2164 = vmatprep.subr.bf16.mxu0 %v2163_v36 }
 0x2fe   : > { %v2151_v48 = vpack.c.bf16 %v2275_v42, %v2274_v43  ;;  %2051 = vmatprep.mubr.msk.f32.mxu1 %vm336_vm0, %v1875_v40  ;;  %2091 = vmatprep.mubr.msk.f32.mxu0 %vm336_vm0, %v1911_v41  ;;  %v2167_v49 = vpack.c.bf16 %v2270_v44, %v2269_v45 }
 0x300   : > { %2052 = vmatmul.mubr.msk.f32.vlgmr.msra.gmra.mrb[6].mxu1 %vm336_vm0, %v1876_v46 }
 0x301   : > { %2150 = vmatpush3.bf16.msra.mxu1 %v2147_v34  ;;  %2092 = vmatmul.mubr.msk.f32.vlgmr.msra.gmra.mrb[0].mxu0 %vm336_vm0, %v1912_v47 }
 0x302   : > { %2166 = vmatpush3.bf16.msra.mxu0 %v2163_v36  ;;  %2152 = vmatprep.subr.bf16.mxu1 %v2151_v48 }
 0x303   : > { %2168 = vmatprep.subr.bf16.mxu0 %v2167_v49  ;;  %2054 = vmatprep.mubr.msk.f32.mxu1 %vm336_vm0, %v1877_v22 }
 0x304   : > { %2094 = vmatprep.mubr.msk.f32.mxu0 %vm336_vm0, %v1913_v51  ;;  %2055 = vmatmul.mubr.msk.f32.gmra.mrb[8].mxu1 %vm336_vm0, %v1878_v24 }
 0x305   : > { %2095 = vmatmul.mubr.msk.f32.gmra.mrb[2].mxu0 %vm336_vm0, %v1914_v52  ;;  %2061 = vmatprep.mubr.msk.f32.mxu1 %vm336_vm0, %v1884_v53 }
 0x306   : > { %2101 = vmatprep.mubr.msk.f32.mxu0 %vm336_vm0, %v1920_v54 }
 0x308   : > { %2062 = vmatmul.mubr.msk.f32.vlgmr.msra.gmra.mrb[6].mxu1 %vm336_vm0, %v1885_v55 }
 0x309   : > { %2154 = vmatpush3.bf16.msra.mxu1 %v2151_v48  ;;  %2102 = vmatmul.mubr.msk.f32.vlgmr.msra.gmra.mrb[0].mxu0 %vm336_vm0, %v1921_v57 }
 0x30a   : > { %2170 = vmatpush3.bf16.msra.mxu0 %v2167_v49  ;;  %2064 = vmatprep.mubr.msk.f32.mxu1 %vm336_vm0, %v1886_v58 }
 0x30b   : > { %2172 = vmatprep.subr.bf16.mxu0 %v2483_v50  ;;  %2104 = vmatprep.mubr.msk.f32.mxu0 %vm336_vm0, %v1922_v56 }
 0x30c   : > { %2065 = vmatmul.mubr.msk.f32.gmra.mrb[8].mxu1 %vm336_vm0, %v1887_v59  ;;  %v664_v6 = vpop.permute.xlu1 %663  ;;  %v659_v30 = vpop.permute.xlu0 %658 }
 0x30d   : > { %2105 = vmatmul.mubr.msk.f32.gmra.mrb[2].mxu0 %vm336_vm0, %v1923_v60  ;;  %2071 = vmatprep.mubr.msk.f32.mxu1 %vm336_vm0, %v1893_v61 }
 0x30e   : > { %2111 = vmatprep.mubr.msk.f32.mxu0 %vm336_vm0, %v1929_v62 }
 0x310   : > { %2072 = vmatmul.mubr.msk.f32.vlgmr.msra.gmra.mrb[6].mxu1 %vm336_vm0, %v1894_v33  ;;  %v674_v13 = vpop.permute.xlu1 %673  ;;  %v669_v15 = vpop.permute.xlu0 %668 }
 0x311   : > { %2112 = vmatmul.mubr.msk.f32.vlgmr.msra.gmra.mrb[0].mxu0 %vm336_vm0, %v1930_v0  ;;  %2074 = vmatprep.mubr.msk.f32.mxu1 %vm336_vm0, %v1895_v19 }
 0x312   : > { %2174 = vmatpush3.bf16.msra.mxu0 %v2483_v50  ;;  %2114 = vmatprep.mubr.msk.f32.mxu0 %vm336_vm0, %v1931_v1  ;;  %v1939_v50 = vld [vmem:[%s2647_s5 + $0x108] sm:$0xff] }
 0x314   : > { %2075 = vmatmul.mubr.msk.f32.gmra.mrb[8].mxu1 %vm336_vm0, %v1896_v63 }
 0x315   : > { %2115 = vmatmul.mubr.msk.f32.gmra.mrb[2].mxu0 %vm336_vm0, %v1932_v21 }
 0x316   : > { %2121 = vmatprep.mubr.msk.f32.mxu0 %vm336_vm0, %v1938_v2 }
 0x319   : > { %2122 = vmatmul.mubr.msk.f32.vlgmr.msra.gmra.mrb[0].mxu0 %vm336_vm0, %v1939_v50 }
 0x31a   : > { %2124 = vmatprep.mubr.msk.f32.mxu0 %vm336_vm0, %v1940_v3 }
 0x31d   : > { %2125 = vmatmul.mubr.msk.f32.gmra.mrb[2].mxu0 %vm336_vm0, %v1941_v4 }
 0x3e3   : > { %v2073_v35 = vpop.f32.mrb[6].mxu1 }
 0x3e4   : > { %v1158_v5 = vpop.f32.mrb[7].mxu1  ;;  %v2175_v8 = vadd.f32 %v2073_v35, %v664_v6 }
 0x3e5   : > { %v2177_v9 = vadd.f32 %v1158_v5, %v659_v30 }
 0x3e7   : > { %v2076_v27 = vpop.f32.mrb[8].mxu1 }
 0x3e8   : > { %v1168_v7 = vpop.f32.mrb[9].mxu1  ;;  %v2179_v16 = vadd.f32 %v2076_v27, %v674_v13 }
 0x3e9   : > { %v2181_v17 = vadd.f32 %v1168_v7, %v669_v15 }
 0x3ec   : > { %v2123_v10 = vpop.f32.mrb[0].mxu0 }
 0x3ed   : > { %v2176_v11 = vadd.f32 %v2175_v8, %v2123_v10  ;;  %v1771_v12 = vpop.f32.mrb[1].mxu0 }
 0x3ee   : > { %v2178_v14 = vadd.f32 %v2177_v9, %v1771_v12 }
 0x3ef   : > { %1796 = vst.msk [vmem:[%s305_s30 + $0x8] sm:$0xff] %vm1794_vm8, %v2176_v11 }
 0x3f0   : > { %1795 = vst.msk [vmem:[%s305_s30] sm:$0xff] %vm1794_vm8, %v2178_v14  ;;  %v2126_v18 = vpop.f32.mrb[2].mxu0 }
 0x3f1   : > { %v2180_v20 = vadd.f32 %v2179_v16, %v2126_v18  ;;  %v1781_v23 = vpop.f32.mrb[3].mxu0 }
 0x3f2   : > { %v2182_v25 = vadd.f32 %v2181_v17, %v1781_v23 }
 0x3f3   : > { %1798 = vst.msk [vmem:[%s305_s30 + $0x18] sm:$0xff] %vm1794_vm8, %v2180_v20 }
 0x3f4   : > { %1797 = vst.msk [vmem:[%s305_s30 + $0x10] sm:$0xff] %vm1794_vm8, %v2182_v25 }
 0x3f5 PF: > { %s18_s27 = sadd.s32 1, %s2298_s27  }
 0x3f6   : > { %p15_p4 = scmp.ge.s32.totalorder %s18_s27, 4  }
 0x3f8   :  { %17 = sbr.rel (!%p15_p4) target bundleno = 1 (0x1), region = 90 }

// kernel: waveblock_forward.7
= control target key start
LH: loop header
LB: loop body
LE: loop exit
PB: predicated region body
PF: predicated region fallthrough
CT: control target
= control target key end

     0   :  { %s2373_s27 = smov 0   ;;  %s2665_s0 = inlined_call_operand.vmem [shape: f32[2,24,16], index: 0, kind: input, shape index: {}]   ;;  %s2666_s1 = inlined_call_operand.vmem [shape: f32[32,24], index: 1, kind: input, shape index: {}]   ;;  %s2667_s2 = inlined_call_operand.vmem [shape: f32[32,1], index: 2, kind: input, shape index: {}]   ;;  %s2668_s3 = inlined_call_operand.vmem [shape: f32[16,32], index: 3, kind: input, shape index: {}]   ;;  %s2669_s4 = inlined_call_operand.vmem [shape: f32[16,1], index: 4, kind: input, shape index: {}]   ;;  %s2670_s5 = inlined_call_operand.vmem [shape: f32[9,32,16], index: 5, kind: input, shape index: {}]   ;;  %s2671_s6 = inlined_call_operand.vmem [shape: f32[32,1], index: 6, kind: input, shape index: {}]   ;;  %s2672_s7 = inlined_call_operand.vmem [shape: f32[9,16], index: 7, kind: input, shape index: {}]   ;;  %s2673_s8 = inlined_call_operand.vmem [shape: f32[2,32,16], index: 8, kind: output, shape index: {}]  }
   0x1 LB: > { %s1855_s28 = sadd.s32 4294967295, %s2307_s27   ;;  %p1859_p0 = scmp.ge.s32.totalorder %s2307_s27, 1  ;;  %s2307_s27 = sphi %s2373_s27, %s18_s27  }
   0x2   : > { %p262_p1 = scmp.lt.s32.totalorder %s2307_s27, 3 }
   0x4   : > { %p263_p2 = pnand %p1859_p0, %p262_p1 }
   0x5   : > { %p296_p3 = scmp.lt.s32.totalorder (!%p263_p2), %s1855_s28, 1  ;;  %v309_v0 = vld [vmem:[%s2666_s1] sm:$0xff] (!%p263_p2)  ;;  %vm337_vm0 = vcmask (!%p263_p2), 195584   ;;  %v2309_v1 = vmov (!%p263_p2), 0   ;;  %v315_v3 = vld [vmem:[%s2667_s2 + $0x10] sm:$0xff] (!%p263_p2)  ;;  %v314_v4 = vld [vmem:[%s2667_s2 + $0x8] sm:$0xff] (!%p263_p2) }
   0x6   : > { %266 = sbr.rel (%p263_p2) target bundleno = 1020 (0x3fc), region = 52  ;;  %2022 = vmatprep.mubr.msk.f32.mxu0 (!%p263_p2), %vm337_vm0, %v309_v0  ;;  %2243 = vset.pattern.permute.xlu0 (!%p263_p2), %v2309_v1  ;;  %v313_v2 = vld [vmem:[%s2667_s2] sm:$0xff] (!%p263_p2)  ;;  %v316_v5 = vld [vmem:[%s2667_s2 + $0x18] sm:$0xff] (!%p263_p2)  ;;  %v546_v10 = vld [vmem:[%s2669_s4 + $0x8] sm:$0xff] (!%p263_p2)  ;;  %vm557_vm1 = vcmask (!%p263_p2), 261120   ;;  %vm639_vm6 = vcmask (!%p263_p2), 211968  }
   0x7   : > { %319 = vperm.xlu0 (!%p263_p2), %2243, %v313_v2   ;;  %2244 = vset.pattern.permute.xlu1 (!%p263_p2), %v2309_v1  ;;  %v545_v8 = vld [vmem:[%s2669_s4] sm:$0xff] (!%p263_p2)  ;;  %v310_v12 = vld [vmem:[%s2666_s1 + $0x8] sm:$0xff] (!%p263_p2)  ;;  %v311_v13 = vld [vmem:[%s2666_s1 + $0x10] sm:$0xff] (!%p263_p2)  ;;  %s2314_s25 = smov (!%p263_p2), 10   ;;  %s2315_s26 = smov (!%p263_p2), 4   ;;  %vm650_vm7 = vcmask (!%p263_p2), 171048  }
   0x8   : > { %329 = vperm.xlu1 (!%p263_p2), %2244, %v315_v3   ;;  %v312_v14 = vld [vmem:[%s2666_s1 + $0x18] sm:$0xff] (!%p263_p2)  ;;  %v543_v15 = vld [vmem:[%s2668_s3] sm:$0xff] (!%p263_p2)  ;;  %s2316_s11 = smov (!%p263_p2), 9   ;;  %s2317_s12 = smov (!%p263_p2), 2   ;;  %vm706_vm8 = vcmask (!%p263_p2), 130048  }
   0x9   : > { %s2318_s17 = smov (!%p263_p2), 8   ;;  %s2319_s18 = smov (!%p263_p2), 1  }
   0xa   : > { %s2322_s29 = smov (!%p263_p2), 118   ;;  %s2323_s30 = smov (!%p263_p2), 124  }
   0xb   : > { %324 = vperm.xlu0 (!%p263_p2), %2243, %v314_v4   ;;  %s2324_s9 = smov (!%p263_p2), 119   ;;  %s2325_s10 = smov (!%p263_p2), 126  }
   0xc   : > { %334 = vperm.xlu1 (!%p263_p2), %2244, %v316_v5  }
   0xd   : > { %s2675_s28 = smov (!%p296_p3, %s1855_s28), 1 }
   0xe   : > { %s2215_s15 = smul.u32 24, %s2675_s28 }
   0xf   : > { %549 = vperm.xlu0 %2243, %v545_v8  }
  0x10   : > { %s300_s20 = scalar_lea.vmem %s2665_s0, %s2215_s15  ;;  %554 = vperm.xlu1 %2244, %v546_v10   ;;  %s2312_s15 = smov 5  }
  0x11   : > { %v306_v6 = vld [vmem:[%s300_s20] sm:$0xff]  ;;  %v307_v7 = vld [vmem:[%s300_s20 + $0x8] sm:$0xff]  ;;  %v308_v11 = vld [vmem:[%s300_s20 + $0x10] sm:$0xff]  ;;  %s2313_s20 = smov 6  }
  0x12   : > { %v2129_v9 = vpack.c.bf16 %v307_v7, %v306_v6 }
  0x14   : > { %2130 = vmatprep.subr.bf16.mxu0 %v2129_v9 }
  0x15   : > { %2132 = vmatpush3.bf16.msra.mxu0 %v2129_v9 }
  0x16   : > { %2020 = vmatprep.subr.mxu0 %v308_v11 }
  0x19   : > { %2021 = vmatpush3.msra.mxu0 %v308_v11 }
  0x1a   : > { %2023 = vmatmul.mubr.msk.f32.vlgmr.msra.gmra.mrb[0].mxu0 %vm337_vm0, %v310_v12 }
  0x1b   : > { %2025 = vmatprep.mubr.msk.f32.mxu0 %vm337_vm0, %v311_v13 }
  0x1e   : > { %2026 = vmatmul.mubr.msk.f32.gmra.mrb[2].mxu0 %vm337_vm0, %v312_v14 }
  0x1f   : > { %2036 = vmatprep.mubr.msk.f32.mxu0 %vm557_vm1, %v543_v15 }
  0x86   : > { %v320_v16 = vpop.permute.xlu0 %319 }
  0x87   : > { %v330_v17 = vpop.permute.xlu1 %329 }
  0x8a   : > { %v325_v18 = vpop.permute.xlu0 %324 }
  0x8b   : > { %v335_v24 = vpop.permute.xlu1 %334 }
  0xed   : > { %v2024_v19 = vpop.f32.mrb[0].mxu0 }
  0xee   : > { %v2425_v20 = vadd.f32 %v2024_v19, %v325_v18  ;;  %v416_v21 = vpop.f32.mrb[1].mxu0 }
  0xef   : > { %v2427_v22 = vadd.f32 %v416_v21, %v320_v16 }
  0xf0   : > { %v2430_v23 = vmul.f32 0.70710677, %v2425_v20 }
  0xf1   : > { %v2433_v25 = vmul.f32 0.70710677, %v2427_v22  ;;  %v2027_v26 = vpop.f32.mrb[2].mxu0 }
  0xf2   : > { %v452_v27 = vand.u32 2147483647, %v2430_v23  ;;  %v2436_v28 = vadd.f32 %v2027_v26, %v335_v24  ;;  %v426_v29 = vpop.f32.mrb[3].mxu0  ;;  %vm444_vm2 = vcmp.ge.f32.partialorder %v2430_v23, 0.0 }
  0xf3   : > { %v451_v30 = vand.u32 2147483647, %v2433_v25  ;;  %v2439_v31 = vadd.f32 %v426_v29, %v330_v17  ;;  %vm443_vm3 = vcmp.ge.f32.partialorder %v2433_v25, 0.0 }
  0xf4   : > { %v456_v32 = vmul.f32 0.3275911, %v452_v27  ;;  %v2442_v34 = vmul.f32 0.70710677, %v2436_v28  ;;  %v508_v43 = vsub.f32 0.0, %v452_v27 }
  0xf5   : > { %v455_v33 = vmul.f32 0.3275911, %v451_v30  ;;  %v2445_v36 = vmul.f32 0.70710677, %v2439_v31  ;;  %v507_v45 = vsub.f32 0.0, %v451_v30 }
  0xf6   : > { %v460_v35 = vadd.f32 1.0, %v456_v32  ;;  %v454_v38 = vand.u32 2147483647, %v2442_v34  ;;  %v512_v47 = vmul.f32 %v508_v43, %v452_v27  ;;  %vm446_vm4 = vcmp.ge.f32.partialorder %v2442_v34, 0.0 }
  0xf7   : > { %v459_v37 = vadd.f32 1.0, %v455_v33  ;;  %v453_v40 = vand.u32 2147483647, %v2445_v36  ;;  %v511_v50 = vmul.f32 %v507_v45, %v451_v30  ;;  %vm445_vm5 = vcmp.ge.f32.partialorder %v2445_v36, 0.0  ;;  %v544_v36 = vld [vmem:[%s2668_s3 + $0x8] sm:$0xff] }
  0xf8   : > { %2285 = vrcp.f32 %v460_v35  ;;  %v458_v39 = vmul.f32 0.3275911, %v454_v38  ;;  %v510_v51 = vsub.f32 0.0, %v454_v38  ;;  %v517_v54 = vmul.f32 1.442695, %v512_v47 }
  0xf9   : > { %2287 = vrcp.f32 %v459_v37  ;;  %v457_v42 = vmul.f32 0.3275911, %v453_v40  ;;  %v509_v56 = vsub.f32 0.0, %v453_v40  ;;  %v515_v59 = vmul.f32 1.442695, %v511_v50 }
  0xfa   : > { %v462_v41 = vadd.f32 1.0, %v458_v39  ;;  %v514_v60 = vmul.f32 %v510_v51, %v454_v38  ;;  %v436_v51 = vmul.f32 0.5, %v2425_v20  ;;  %v438_v20 = vmul.f32 0.5, %v2436_v28  ;;  %v555_v28 = vpop.permute.xlu1 %554 }
  0xfb   : > { %v461_v44 = vadd.f32 1.0, %v457_v42  ;;  %v513_v3 = vmul.f32 %v509_v56, %v453_v40  ;;  %v2310_v42 = vmov -1.0  }
  0xfc   : > { %2289 = vrcp.f32 %v462_v41  ;;  %v521_v5 = vmul.f32 1.442695, %v514_v60  ;;  %v448_v43 = vsel %vm444_vm2, 1.0, %v2310_v42  ;;  %v449_v34 = vsel %vm445_vm5, 1.0, %v2310_v42 }
  0xfd   : > { %2291 = vrcp.f32 %v461_v44  ;;  %v519_v13 = vmul.f32 1.442695, %v513_v3 }
  0xfe   : > { %2293 = vpow2.f32 %v517_v54  ;;  %v435_v54 = vmul.f32 0.5, %v2427_v22  ;;  %v437_v22 = vmul.f32 0.5, %v2439_v31 }
  0xff   : > { %2295 = vpow2.f32 %v515_v59  ;;  %v450_v59 = vsel %vm446_vm4, 1.0, %v2310_v42 }
 0x100   : > { %2297 = vpow2.f32 %v521_v5 }
 0x101   : > { %2299 = vpow2.f32 %v519_v13  ;;  %v1869_v13 = vld [vmem:[%s2672_s7] ss:$0 sm:$0xff] }
 0x102   : > { %v2286_v46 = vpop.eup %2285 }
 0x103   : > { %v2288_v48 = vpop.eup %2287  ;;  %v472_v49 = vmul.f32 1.0614054, %v2286_v46 }
 0x104   : > { %v471_v52 = vmul.f32 1.0614054, %v2288_v48 }
 0x105   : > { %v476_v53 = vadd.f32 -1.4531521, %v472_v49  ;;  %v447_v49 = vsel %vm443_vm3, 1.0, %v2310_v42 }
 0x106   : > { %v475_v55 = vadd.f32 -1.4531521, %v471_v52  ;;  %v2290_v57 = vpop.eup %2289 }
 0x107   : > { %v480_v58 = vmul.f32 %v2286_v46, %v476_v53  ;;  %v474_v62 = vmul.f32 1.0614054, %v2290_v57  ;;  %v2292_v0 = vpop.eup %2291 }
 0x108   : > { %v479_v61 = vmul.f32 %v2288_v48, %v475_v55  ;;  %v473_v6 = vmul.f32 1.0614054, %v2292_v0  ;;  %v2294_v29 = vpop.eup %2293 }
 0x109   : > { %v484_v63 = vadd.f32 1.4214138, %v480_v58  ;;  %v478_v2 = vadd.f32 -1.4531521, %v474_v62  ;;  %v2296_v33 = vpop.eup %2295 }
 0x10a   : > { %v483_v1 = vadd.f32 1.4214138, %v479_v61  ;;  %v477_v10 = vadd.f32 -1.4531521, %v473_v6  ;;  %v2311_v6 = vmov 0.0  }
 0x10b   : > { %v488_v4 = vmul.f32 %v2286_v46, %v484_v63  ;;  %v482_v8 = vmul.f32 %v2290_v57, %v478_v2  ;;  %641 = vst.msk [vmem:[#allocation2 + $0x8] sm:$0xff] %vm639_vm6, %v2311_v6  ;;  %640 = vst.msk [vmem:[#allocation2] sm:$0xff] %vm639_vm6, %v2311_v6 }
 0x10c   : > { %v487_v7 = vmul.f32 %v2288_v48, %v483_v1  ;;  %v481_v15 = vmul.f32 %v2292_v0, %v477_v10 }
 0x10d   : > { %v492_v9 = vadd.f32 -0.28449672, %v488_v4  ;;  %v486_v12 = vadd.f32 1.4214138, %v482_v8  ;;  %v550_v8 = vpop.permute.xlu0 %549 }
 0x10e   : > { %v491_v11 = vadd.f32 -0.28449672, %v487_v7  ;;  %v485_v19 = vadd.f32 1.4214138, %v481_v15  ;;  %v1874_v15 = vld [vmem:[%s2672_s7 + $0x1] ss:$0 sm:$0xff] }
 0x10f   : > { %v496_v14 = vmul.f32 %v2286_v46, %v492_v9  ;;  %v490_v17 = vmul.f32 %v2290_v57, %v486_v12  ;;  %v1892_v12 = vld [vmem:[%s2672_s7 + $0x3] ss:$0 sm:$0xff] }
 0x110   : > { %v495_v16 = vmul.f32 %v2288_v48, %v491_v11  ;;  %v489_v27 = vmul.f32 %v2292_v0, %v485_v19  ;;  %v1901_v11 = vld [vmem:[%s2672_s7 + $0x4] ss:$0 sm:$0xff] }
 0x111   : > { %v500_v18 = vadd.f32 0.2548296, %v496_v14  ;;  %v494_v24 = vadd.f32 -0.28449672, %v490_v17  ;;  %v1910_v14 = vld [vmem:[%s2672_s7 + $0x5] ss:$0 sm:$0xff] }
 0x112   : > { %v499_v21 = vadd.f32 0.2548296, %v495_v16  ;;  %v493_v37 = vadd.f32 -0.28449672, %v489_v27  ;;  %v1919_v16 = vld [vmem:[%s2672_s7 + $0x6] ss:$0 sm:$0xff] }
 0x113   : > { %v504_v26 = vmul.f32 %v2286_v46, %v500_v18  ;;  %v498_v32 = vmul.f32 %v2290_v57, %v494_v24  ;;  %v2298_v46 = vpop.eup %2297  ;;  %v1883_v17 = vld [vmem:[%s2672_s7 + $0x2] ss:$0 sm:$0xff]  ;;  %v1928_v18 = vld [vmem:[%s2672_s7 + $0x7] ss:$0 sm:$0xff]  ;;  %v1937_v27 = vld [vmem:[%s2672_s7 + $0x8] ss:$0 sm:$0xff] }
 0x114   : > { %v503_v30 = vmul.f32 %v2288_v48, %v499_v21  ;;  %v497_v41 = vmul.f32 %v2292_v0, %v493_v37  ;;  %v2300_v53 = vpop.eup %2299 }
 0x115   : > { %v524_v35 = vmul.f32 %v2294_v29, %v504_v26  ;;  %v502_v39 = vadd.f32 0.2548296, %v498_v32  ;;  %v1895_v29 = vld [vmem:[%s2670_s5 + $0x70] sm:$0xff] }
 0x116   : > { %v523_v38 = vmul.f32 %v2296_v33, %v503_v30  ;;  %v501_v48 = vadd.f32 0.2548296, %v497_v41  ;;  %2076 = vmatprep.mubr.msk.f32.mxu1 %vm706_vm8, %v1895_v29 }
 0x117   : > { %v528_v40 = vsub.f32 1.0, %v524_v35  ;;  %v506_v45 = vmul.f32 %v2290_v57, %v502_v39 }
 0x118   : > { %v527_v44 = vsub.f32 1.0, %v523_v38  ;;  %v505_v25 = vmul.f32 %v2292_v0, %v501_v48 }
 0x119   : > { %v532_v47 = vmul.f32 %v528_v40, %v448_v43  ;;  %v526_v23 = vmul.f32 %v2298_v46, %v506_v45 }
 0x11a   : > { %v531_v50 = vmul.f32 %v527_v44, %v447_v49  ;;  %v525_v57 = vmul.f32 %v2300_v53, %v505_v25  ;;  %v694_v44 = vld [vmem:[%s2670_s5] sm:$0xff] }
 0x11b   : > { %v536_v52 = vadd.f32 1.0, %v532_v47  ;;  %v530_v56 = vsub.f32 1.0, %v526_v23 }
 0x11c   : > { %v535_v55 = vadd.f32 1.0, %v531_v50  ;;  %v529_v62 = vsub.f32 1.0, %v525_v57 }
 0x11d   : > { %v540_v58 = vmul.f32 %v536_v52, %v436_v51  ;;  %v534_v61 = vmul.f32 %v530_v56, %v450_v59 }
 0x11e   : > { %v539_v60 = vmul.f32 %v535_v55, %v435_v54  ;;  %v533_v2 = vmul.f32 %v529_v62, %v449_v34 }
 0x11f   : > { %v538_v63 = vadd.f32 1.0, %v534_v61 }
 0x120   : > { %v2133_v1 = vpack.c.bf16 %v540_v58, %v539_v60  ;;  %v537_v3 = vadd.f32 1.0, %v533_v2  ;;  %v654_v2 = vld [vmem:[%s2671_s6 + $0x8] sm:$0xff] }
 0x121   : > { %v542_v0 = vmul.f32 %v538_v63, %v438_v20 }
 0x122   : > { %2134 = vmatprep.subr.bf16.mxu0 %v2133_v1  ;;  %v541_v4 = vmul.f32 %v537_v3, %v437_v22  ;;  %v656_v22 = vld [vmem:[%s2671_s6 + $0x18] sm:$0xff]  ;;  %v655_v3 = vld [vmem:[%s2671_s6 + $0x10] sm:$0xff] }
 0x123   : > { %2136 = vmatpush3.bf16.msra.mxu0 %v2133_v1 }
 0x124   : > { %v2137_v5 = vpack.c.bf16 %v542_v0, %v541_v4  ;;  %v653_v0 = vld [vmem:[%s2671_s6] sm:$0xff] }
 0x126   : > { %2138 = vmatprep.subr.bf16.mxu0 %v2137_v5 }
 0x127   : > { %2140 = vmatpush3.bf16.msra.mxu0 %v2137_v5 }
 0x12a   : > { %2037 = vmatmul.mubr.msk.f32.vlgmr.msra.gmra.mrb[4].mxu0 %vm557_vm1, %v544_v36 }
 0x12b   : > { %2043 = vmatprep.mubr.msk.f32.mxu0 %vm706_vm8, %v694_v44 }
 0x1fd   : > { %v2038_v7 = vpop.f32.mrb[4].mxu0 }
 0x1fe   : > { %v636_v31 = vadd.f32 %v2038_v7, %v555_v28  ;;  %v630_v9 = vpop.f32.mrb[5].mxu0 }
 0x1ff   : > { %v631_v10 = vadd.f32 %v630_v9, %v550_v8 }
 0x200   : > { %646 = vrot.lane.b32.xlu1 %v636_v31, %s2312_s15 }
 0x201   : > { %644 = vrot.lane.b32.xlu0 %v631_v10, %s2312_s15 }
 0x204   : > { %1189 = vrot.lane.b32.xlu1 %v1901_v11, %s2312_s15 }
 0x205   : > { %1064 = vrot.lane.b32.xlu0 %v1892_v12, %s2313_s20 }
 0x208   : > { %689 = vrot.lane.b32.xlu1 %v1869_v13, %s2314_s25  ;;  %s2320_s25 = smov 123  }
 0x209   : > { %1314 = vrot.lane.b32.xlu0 %v1910_v14, %s2315_s26  ;;  %s2321_s26 = smov 122  }
 0x20c   : > { %814 = vrot.lane.b32.xlu1 %v1874_v15, %s2316_s11  ;;  %s2326_s11 = smov 120   ;;  %v1896_v15 = vld [vmem:[%s2670_s5 + $0x78] sm:$0xff] }
 0x20d   : > { %1439 = vrot.lane.b32.xlu0 %v1919_v16, %s2317_s12  ;;  %s2327_s12 = smov 127  }
 0x210   : > { %939 = vrot.lane.b32.xlu1 %v1883_v17, %s2318_s17 }
 0x211   : > { %1564 = vrot.lane.b32.xlu0 %v1928_v18, %s2319_s18 }
 0x272   : > { %v647_v19 = vpop.permute.xlu1 %646 }
 0x273   : > { %652 = vst.msk [vmem:[#allocation2 + $0x8] sm:$0xff] %vm650_vm7, %v647_v19  ;;  %v645_v21 = vpop.permute.xlu0 %644  ;;  %v1902_v19 = vld [vmem:[%s2670_s5 + $0x80] sm:$0xff] }
 0x274   : > { %651 = vst.msk [vmem:[#allocation2] sm:$0xff] %vm650_vm7, %v645_v21 }
 0x276   : > { %v1190_v24 = vpop.permute.xlu1 %1189 }
 0x277   : > { %v1065_v26 = vpop.permute.xlu0 %1064 }
 0x27a   : > { %v682_v30 = vld [vmem:[#allocation2 + $0x8] sm:$0xff]  ;;  %v690_v32 = vpop.permute.xlu1 %689 }
 0x27b   : > { %v681_v33 = vld [vmem:[#allocation2] sm:$0xff]  ;;  %v1193_v35 = vmul.f32 %v1190_v24, %v682_v30  ;;  %v1068_v37 = vmul.f32 %v1065_v26, %v682_v30  ;;  %v1315_v38 = vpop.permute.xlu0 %1314  ;;  %v1689_v39 = vmul.f32 %v1937_v27, %v682_v30  ;;  %v693_v43 = vmul.f32 %v690_v32, %v682_v30 }
 0x27c   : > { %v1192_v40 = vmul.f32 %v1190_v24, %v681_v33  ;;  %v1067_v41 = vmul.f32 %v1065_v26, %v681_v33  ;;  %v692_v42 = vmul.f32 %v690_v32, %v681_v33  ;;  %v1688_v45 = vmul.f32 %v1937_v27, %v681_v33 }
 0x27d   : > { %v1317_v49 = vmul.f32 %v1315_v38, %v681_v33  ;;  %v1318_v48 = vmul.f32 %v1315_v38, %v682_v30 }
 0x27e   : > { %v2250_v46 = vpack.i.bf16 %v1193_v35, %v1192_v40  ;;  %v2245_v47 = vpack.i.bf16 %v1068_v37, %v1067_v41  ;;  %v815_v50 = vpop.permute.xlu1 %814  ;;  %v2496_v51 = vpack.c.bf16 %v1689_v39, %v1688_v45  ;;  %v2260_v55 = vpack.i.bf16 %v693_v43, %v692_v42  ;;  %v696_v37 = vld [vmem:[%s2670_s5 + $0x10] sm:$0xff]  ;;  %v697_v42 = vld [vmem:[%s2670_s5 + $0x18] sm:$0xff] }
 0x27f   : > { %v1440_v23 = vpop.permute.xlu0 %1439  ;;  %v817_v52 = vmul.f32 %v815_v50, %v681_v33  ;;  %v818_v25 = vmul.f32 %v815_v50, %v682_v30  ;;  %v2255_v56 = vpack.i.bf16 %v1318_v48, %v1317_v49  ;;  %v1904_v40 = vld [vmem:[%s2670_s5 + $0x90] sm:$0xff]  ;;  %v1905_v45 = vld [vmem:[%s2670_s5 + $0x98] sm:$0xff]  ;;  %v1876_v50 = vld [vmem:[%s2670_s5 + $0x28] sm:$0xff] }
 0x280   : > { %2251 = vrot.lane.b32.xlu1 %v2250_v46, %s2320_s25  ;;  %2246 = vrot.lane.b32.xlu0 %v2245_v47, %s2321_s26  ;;  %v1442_v53 = vmul.f32 %v1440_v23, %v681_v33  ;;  %v1443_v54 = vmul.f32 %v1440_v23, %v682_v30  ;;  %v1875_v46 = vld [vmem:[%s2670_s5 + $0x20] sm:$0xff]  ;;  %v1912_v23 = vld [vmem:[%s2670_s5 + $0xa8] sm:$0xff] }
 0x281   : > { %v2270_v57 = vpack.i.bf16 %v818_v25, %v817_v52  ;;  %v1911_v47 = vld [vmem:[%s2670_s5 + $0xa0] sm:$0xff]  ;;  %v1877_v52 = vld [vmem:[%s2670_s5 + $0x30] sm:$0xff] }
 0x282   : > { %v940_v58 = vpop.permute.xlu1 %939  ;;  %v2265_v60 = vpack.i.bf16 %v1443_v54, %v1442_v53  ;;  %v1913_v53 = vld [vmem:[%s2670_s5 + $0xb0] sm:$0xff]  ;;  %v1878_v54 = vld [vmem:[%s2670_s5 + $0x38] sm:$0xff] }
 0x283   : > { %v1565_v59 = vpop.permute.xlu0 %1564  ;;  %v942_v61 = vmul.f32 %v940_v58, %v681_v33  ;;  %v943_v62 = vmul.f32 %v940_v58, %v682_v30  ;;  %v1920_v58 = vld [vmem:[%s2670_s5 + $0xc0] sm:$0xff] }
 0x284   : > { %2261 = vrot.lane.b32.xlu1 %v2260_v55, %s2322_s29  ;;  %2256 = vrot.lane.b32.xlu0 %v2255_v56, %s2323_s30  ;;  %v1567_v63 = vmul.f32 %v1565_v59, %v681_v33  ;;  %v1568_v34 = vmul.f32 %v1565_v59, %v682_v30  ;;  %v695_v30 = vld [vmem:[%s2670_s5 + $0x8] sm:$0xff]  ;;  %v1914_v55 = vld [vmem:[%s2670_s5 + $0xb8] sm:$0xff] }
 0x285   : > { %v2280_v1 = vpack.i.bf16 %v943_v62, %v942_v61  ;;  %v1903_v33 = vld [vmem:[%s2670_s5 + $0x88] sm:$0xff]  ;;  %v1884_v56 = vld [vmem:[%s2670_s5 + $0x40] sm:$0xff]  ;;  %v1922_v61 = vld [vmem:[%s2670_s5 + $0xd0] sm:$0xff] }
 0x286   : > { %v2275_v20 = vpack.i.bf16 %v1568_v34, %v1567_v63  ;;  %v1885_v59 = vld [vmem:[%s2670_s5 + $0x48] sm:$0xff]  ;;  %v1887_v62 = vld [vmem:[%s2670_s5 + $0x58] sm:$0xff]  ;;  %v1893_v34 = vld [vmem:[%s2670_s5 + $0x60] sm:$0xff] }
 0x287   : > { %v1923_v63 = vld [vmem:[%s2670_s5 + $0xd8] sm:$0xff] }
 0x288   : > { %2271 = vrot.lane.b32.xlu1 %v2270_v57, %s2324_s9  ;;  %2266 = vrot.lane.b32.xlu0 %v2265_v60, %s2325_s10  ;;  %v1921_v57 = vld [vmem:[%s2670_s5 + $0xc8] sm:$0xff]  ;;  %v1886_v60 = vld [vmem:[%s2670_s5 + $0x50] sm:$0xff]  ;;  %s1948_s9 = sshll.u32 %s2675_s28, 5 }
 0x28c   : > { %2281 = vrot.lane.b32.xlu1 %v2280_v1, %s2326_s11  ;;  %2276 = vrot.lane.b32.xlu0 %v2275_v20, %s2327_s12  ;;  %v1929_v1 = vld [vmem:[%s2670_s5 + $0xe0] sm:$0xff]  ;;  %v1894_v20 = vld [vmem:[%s2670_s5 + $0x68] sm:$0xff]  ;;  %s305_s12 = scalar_lea.vmem %s2673_s8, %s1948_s9 }
 0x290   : > { %664 = vperm.xlu1 %2244, %v654_v2   ;;  %659 = vperm.xlu0 %2243, %v653_v0   ;;  %v1930_v2 = vld [vmem:[%s2670_s5 + $0xe8] sm:$0xff]  ;;  %v1931_v0 = vld [vmem:[%s2670_s5 + $0xf0] sm:$0xff] }
 0x294   : > { %674 = vperm.xlu1 %2244, %v656_v22   ;;  %669 = vperm.xlu0 %2243, %v655_v3   ;;  %v1932_v22 = vld [vmem:[%s2670_s5 + $0xf8] sm:$0xff]  ;;  %v1938_v3 = vld [vmem:[%s2670_s5 + $0x100] sm:$0xff] }
 0x2f2   : > { %v2252_v4 = vpop.permute.xlu1 %2251  ;;  %v2247_v5 = vpop.permute.xlu0 %2246 }
 0x2f3   : > { %v2254_v36 = vunpack.i.h.bf16 %v2252_v4  ;;  %v2253_v6 = vunpack.i.l.bf16 %v2252_v4  ;;  %v2249_v28 = vunpack.i.h.bf16 %v2247_v5  ;;  %v2248_v7 = vunpack.i.l.bf16 %v2247_v5  ;;  %v1939_v4 = vld [vmem:[%s2670_s5 + $0x108] sm:$0xff]  ;;  %v1941_v5 = vld [vmem:[%s2670_s5 + $0x118] sm:$0xff] }
 0x2f5   : > { %v2510_v8 = vpack.c.bf16 %v2249_v28, %v2248_v7  ;;  %v2157_v31 = vpack.c.bf16 %v2254_v36, %v2253_v6 }
 0x2f6   : > { %v2262_v9 = vpop.permute.xlu1 %2261  ;;  %v2257_v10 = vpop.permute.xlu0 %2256 }
 0x2f7   : > { %v2264_v11 = vunpack.i.h.bf16 %v2262_v9  ;;  %v2263_v12 = vunpack.i.l.bf16 %v2262_v9  ;;  %v2259_v13 = vunpack.i.h.bf16 %v2257_v10  ;;  %v2258_v14 = vunpack.i.l.bf16 %v2257_v10  ;;  %2177 = vmatprep.subr.bf16.mxu1 %v2510_v8 }
 0x2f8   : > { %2178 = vmatpush3.bf16.msra.mxu1 %v2510_v8 }
 0x2f9   : > { %v2141_v16 = vpack.c.bf16 %v2264_v11, %v2263_v12  ;;  %2158 = vmatprep.subr.bf16.mxu1 %v2157_v31  ;;  %v2161_v21 = vpack.c.bf16 %v2259_v13, %v2258_v14 }
 0x2fa   : > { %v2272_v17 = vpop.permute.xlu1 %2271  ;;  %v2267_v18 = vpop.permute.xlu0 %2266 }
 0x2fb   : > { %v2274_v24 = vunpack.i.h.bf16 %v2272_v17  ;;  %v2273_v26 = vunpack.i.l.bf16 %v2272_v17  ;;  %2142 = vmatprep.subr.bf16.mxu0 %v2141_v16  ;;  %2077 = vmatmul.mubr.msk.f32.vlgmr.msra.gmra.mrb[0].mxu1 %vm706_vm8, %v1896_v15  ;;  %v2269_v27 = vunpack.i.h.bf16 %v2267_v18  ;;  %v2268_v29 = vunpack.i.l.bf16 %v2267_v18 }
 0x2fc   : > { %2144 = vmatpush3.bf16.msra.mxu0 %v2141_v16  ;;  %2160 = vmatpush3.bf16.msra.mxu1 %v2157_v31 }
 0x2fd   : > { %v2145_v32 = vpack.c.bf16 %v2274_v24, %v2273_v26  ;;  %2162 = vmatprep.subr.bf16.mxu1 %v2161_v21  ;;  %2083 = vmatprep.mubr.msk.f32.mxu1 %vm706_vm8, %v1902_v19  ;;  %v2165_v41 = vpack.c.bf16 %v2269_v27, %v2268_v29 }
 0x2fe   : > { %v2282_v35 = vpop.permute.xlu1 %2281  ;;  %v2277_v44 = vpop.permute.xlu0 %2276 }
 0x2ff   : > { %v2284_v38 = vunpack.i.h.bf16 %v2282_v35  ;;  %v2283_v39 = vunpack.i.l.bf16 %v2282_v35  ;;  %2044 = vmatmul.mubr.msk.f32.vlgmr.msra.gmra.mrb[6].mxu0 %vm706_vm8, %v695_v30  ;;  %2146 = vmatprep.subr.bf16.mxu0 %v2145_v32  ;;  %v2279_v49 = vunpack.i.h.bf16 %v2277_v44  ;;  %v2278_v48 = vunpack.i.l.bf16 %v2277_v44 }
 0x300   : > { %2084 = vmatmul.mubr.msk.f32.vlgmr.msra.gmra.mrb[2].mxu1 %vm706_vm8, %v1903_v33  ;;  %2148 = vmatpush3.bf16.msra.mxu0 %v2145_v32 }
 0x301   : > { %v2149_v43 = vpack.c.bf16 %v2284_v38, %v2283_v39  ;;  %2164 = vmatpush3.bf16.msra.mxu1 %v2161_v21  ;;  %2046 = vmatprep.mubr.msk.f32.mxu0 %vm706_vm8, %v696_v37  ;;  %v2169_v25 = vpack.c.bf16 %v2279_v49, %v2278_v48 }
 0x302   : > { %2166 = vmatprep.subr.bf16.mxu1 %v2165_v41  ;;  %2086 = vmatprep.mubr.msk.f32.mxu1 %vm706_vm8, %v1904_v40 }
 0x303   : > { %2047 = vmatmul.mubr.msk.f32.gmra.mrb[8].mxu0 %vm706_vm8, %v697_v42  ;;  %2150 = vmatprep.subr.bf16.mxu0 %v2149_v43 }
 0x304   : > { %2087 = vmatmul.mubr.msk.f32.gmra.mrb[0].mxu1 %vm706_vm8, %v1905_v45  ;;  %2053 = vmatprep.mubr.msk.f32.mxu0 %vm706_vm8, %v1875_v46 }
 0x305   : > { %2093 = vmatprep.mubr.msk.f32.mxu1 %vm706_vm8, %v1911_v47 }
 0x307   : > { %2054 = vmatmul.mubr.msk.f32.vlgmr.msra.gmra.mrb[6].mxu0 %vm706_vm8, %v1876_v50 }
 0x308   : > { %2152 = vmatpush3.bf16.msra.mxu0 %v2149_v43  ;;  %2094 = vmatmul.mubr.msk.f32.vlgmr.msra.gmra.mrb[2].mxu1 %vm706_vm8, %v1912_v23 }
 0x309   : > { %2168 = vmatpush3.bf16.msra.mxu1 %v2165_v41  ;;  %2154 = vmatprep.subr.bf16.mxu0 %v2510_v8 }
 0x30a   : > { %2170 = vmatprep.subr.bf16.mxu1 %v2169_v25  ;;  %2056 = vmatprep.mubr.msk.f32.mxu0 %vm706_vm8, %v1877_v52 }
 0x30b   : > { %2096 = vmatprep.mubr.msk.f32.mxu1 %vm706_vm8, %v1913_v53  ;;  %2057 = vmatmul.mubr.msk.f32.gmra.mrb[8].mxu0 %vm706_vm8, %v1878_v54 }
 0x30c   : > { %2097 = vmatmul.mubr.msk.f32.gmra.mrb[0].mxu1 %vm706_vm8, %v1914_v55  ;;  %2063 = vmatprep.mubr.msk.f32.mxu0 %vm706_vm8, %v1884_v56 }
 0x30d   : > { %2103 = vmatprep.mubr.msk.f32.mxu1 %vm706_vm8, %v1920_v58 }
 0x30f   : > { %2064 = vmatmul.mubr.msk.f32.vlgmr.msra.gmra.mrb[6].mxu0 %vm706_vm8, %v1885_v59  ;;  %v660_v31 = vpop.permute.xlu0 %659 }
 0x310   : > { %2156 = vmatpush3.bf16.msra.mxu0 %v2510_v8  ;;  %2104 = vmatmul.mubr.msk.f32.vlgmr.msra.gmra.mrb[2].mxu1 %vm706_vm8, %v1921_v57  ;;  %v665_v8 = vpop.permute.xlu1 %664 }
 0x311   : > { %2172 = vmatpush3.bf16.msra.mxu1 %v2169_v25  ;;  %2066 = vmatprep.mubr.msk.f32.mxu0 %vm706_vm8, %v1886_v60 }
 0x312   : > { %2174 = vmatprep.subr.bf16.mxu1 %v2496_v51  ;;  %2106 = vmatprep.mubr.msk.f32.mxu1 %vm706_vm8, %v1922_v61 }
 0x313   : > { %2067 = vmatmul.mubr.msk.f32.gmra.mrb[8].mxu0 %vm706_vm8, %v1887_v62  ;;  %v670_v16 = vpop.permute.xlu0 %669 }
 0x314   : > { %2107 = vmatmul.mubr.msk.f32.gmra.mrb[0].mxu1 %vm706_vm8, %v1923_v63  ;;  %2073 = vmatprep.mubr.msk.f32.mxu0 %vm706_vm8, %v1893_v34  ;;  %v675_v14 = vpop.permute.xlu1 %674 }
 0x315   : > { %2113 = vmatprep.mubr.msk.f32.mxu1 %vm706_vm8, %v1929_v1 }
 0x317   : > { %2074 = vmatmul.mubr.msk.f32.vlgmr.msra.gmra.mrb[6].mxu0 %vm706_vm8, %v1894_v20 }
 0x318   : > { %2114 = vmatmul.mubr.msk.f32.vlgmr.msra.gmra.mrb[2].mxu1 %vm706_vm8, %v1930_v2 }
 0x319   : > { %2176 = vmatpush3.bf16.msra.mxu1 %v2496_v51  ;;  %2116 = vmatprep.mubr.msk.f32.mxu1 %vm706_vm8, %v1931_v0  ;;  %v1940_v51 = vld [vmem:[%s2670_s5 + $0x110] sm:$0xff] }
 0x31c   : > { %2117 = vmatmul.mubr.msk.f32.gmra.mrb[0].mxu1 %vm706_vm8, %v1932_v22 }
 0x31d   : > { %2123 = vmatprep.mubr.msk.f32.mxu1 %vm706_vm8, %v1938_v3 }
 0x320   : > { %2124 = vmatmul.mubr.msk.f32.vlgmr.msra.gmra.mrb[2].mxu1 %vm706_vm8, %v1939_v4 }
 0x321   : > { %2126 = vmatprep.mubr.msk.f32.mxu1 %vm706_vm8, %v1940_v51 }
 0x324   : > { %2127 = vmatmul.mubr.msk.f32.gmra.mrb[0].mxu1 %vm706_vm8, %v1941_v5 }
 0x3e6   : > { %v2068_v36 = vpop.f32.mrb[8].mxu0 }
 0x3e7   : > { %v1045_v6 = vpop.f32.mrb[9].mxu0  ;;  %v2183_v17 = vadd.f32 %v2068_v36, %v675_v14 }
 0x3e8   : > { %v2185_v18 = vadd.f32 %v1045_v6, %v670_v16 }
 0x3ea   : > { %v2075_v28 = vpop.f32.mrb[6].mxu0 }
 0x3eb   : > { %v1160_v7 = vpop.f32.mrb[7].mxu0  ;;  %v2179_v9 = vadd.f32 %v2075_v28, %v665_v8 }
 0x3ec   : > { %v2181_v10 = vadd.f32 %v1160_v7, %v660_v31 }
 0x3f3   : > { %v2125_v11 = vpop.f32.mrb[2].mxu1 }
 0x3f4   : > { %v2180_v12 = vadd.f32 %v2179_v9, %v2125_v11  ;;  %v1773_v13 = vpop.f32.mrb[3].mxu1 }
 0x3f5   : > { %v2182_v15 = vadd.f32 %v2181_v10, %v1773_v13 }
 0x3f6   : > { %1797 = vst.msk [vmem:[%s305_s12 + $0x8] sm:$0xff] %vm706_vm8, %v2180_v12 }
 0x3f7   : > { %1796 = vst.msk [vmem:[%s305_s12] sm:$0xff] %vm706_vm8, %v2182_v15  ;;  %v2128_v19 = vpop.f32.mrb[0].mxu1 }
 0x3f8   : > { %v2184_v21 = vadd.f32 %v2183_v17, %v2128_v19  ;;  %v1783_v24 = vpop.f32.mrb[1].mxu1 }
 0x3f9   : > { %v2186_v26 = vadd.f32 %v2185_v18, %v1783_v24 }
 0x3fa   : > { %1799 = vst.msk [vmem:[%s305_s12 + $0x18] sm:$0xff] %vm706_vm8, %v2184_v21 }
 0x3fb   : > { %1798 = vst.msk [vmem:[%s305_s12 + $0x10] sm:$0xff] %vm706_vm8, %v2186_v26 }
 0x3fc PF: > { %s18_s27 = sadd.s32 1, %s2307_s27  }
 0x3fd   : > { %p15_p4 = scmp.ge.s32.totalorder %s18_s27, 4  }
 0x3ff   :  { %17 = sbr.rel (!%p15_p4) target bundleno = 1 (0x1), region = 90 }

// kernel: waveblock_forward.8
= control target key start
LH: loop header
LB: loop body
LE: loop exit
PB: predicated region body
PF: predicated region fallthrough
CT: control target
= control target key end

     0   :  { %s2374_s27 = smov 0   ;;  %s2662_s0 = inlined_call_operand.vmem [shape: f32[2,24,64], index: 0, kind: input, shape index: {}]   ;;  %s2663_s1 = inlined_call_operand.vmem [shape: f32[32,24], index: 1, kind: input, shape index: {}]   ;;  %s2664_s2 = inlined_call_operand.vmem [shape: f32[32,1], index: 2, kind: input, shape index: {}]   ;;  %s2665_s3 = inlined_call_operand.vmem [shape: f32[16,32], index: 3, kind: input, shape index: {}]   ;;  %s2666_s4 = inlined_call_operand.vmem [shape: f32[16,1], index: 4, kind: input, shape index: {}]   ;;  %s2667_s5 = inlined_call_operand.vmem [shape: f32[9,32,16], index: 5, kind: input, shape index: {}]   ;;  %s2668_s6 = inlined_call_operand.vmem [shape: f32[32,1], index: 6, kind: input, shape index: {}]   ;;  %s2669_s7 = inlined_call_operand.vmem [shape: f32[9,64], index: 7, kind: input, shape index: {}]   ;;  %s2670_s8 = inlined_call_operand.vmem [shape: f32[2,32,64], index: 8, kind: output, shape index: {}]  }
   0x1 LB: > { %s1856_s28 = sadd.s32 4294967295, %s2308_s27   ;;  %p1860_p0 = scmp.ge.s32.totalorder %s2308_s27, 1  ;;  %s2308_s27 = sphi %s2374_s27, %s18_s27  }
   0x2   : > { %p262_p1 = scmp.lt.s32.totalorder %s2308_s27, 3 }
   0x4   : > { %p263_p2 = pnand %p1860_p0, %p262_p1 }
   0x5   : > { %p296_p3 = scmp.lt.s32.totalorder (!%p263_p2), %s1856_s28, 1  ;;  %v309_v0 = vld [vmem:[%s2663_s1] sm:$0xff] (!%p263_p2)  ;;  %vm337_vm0 = vcmask (!%p263_p2), 195584   ;;  %v2310_v1 = vmov (!%p263_p2), 0   ;;  %v315_v3 = vld [vmem:[%s2664_s2 + $0x10] sm:$0xff] (!%p263_p2)  ;;  %v314_v4 = vld [vmem:[%s2664_s2 + $0x8] sm:$0xff] (!%p263_p2) }
   0x6   : > { %266 = sbr.rel (%p263_p2) target bundleno = 1020 (0x3fc), region = 52  ;;  %2023 = vmatprep.mubr.msk.f32.mxu0 (!%p263_p2), %vm337_vm0, %v309_v0  ;;  %2244 = vset.pattern.permute.xlu0 (!%p263_p2), %v2310_v1  ;;  %v313_v2 = vld [vmem:[%s2664_s2] sm:$0xff] (!%p263_p2)  ;;  %v316_v5 = vld [vmem:[%s2664_s2 + $0x18] sm:$0xff] (!%p263_p2)  ;;  %v546_v10 = vld [vmem:[%s2666_s4 + $0x8] sm:$0xff] (!%p263_p2)  ;;  %vm557_vm1 = vcmask (!%p263_p2), 261120   ;;  %vm639_vm6 = vcmask (!%p263_p2), 670720  }
   0x7   : > { %319 = vperm.xlu0 (!%p263_p2), %2244, %v313_v2   ;;  %2245 = vset.pattern.permute.xlu1 (!%p263_p2), %v2310_v1  ;;  %v545_v8 = vld [vmem:[%s2666_s4] sm:$0xff] (!%p263_p2)  ;;  %v310_v12 = vld [vmem:[%s2663_s1 + $0x8] sm:$0xff] (!%p263_p2)  ;;  %v311_v13 = vld [vmem:[%s2663_s1 + $0x10] sm:$0xff] (!%p263_p2)  ;;  %s2315_s25 = smov (!%p263_p2), 18   ;;  %s2316_s26 = smov (!%p263_p2), 8   ;;  %vm650_vm7 = vcmask (!%p263_p2), 597064  }
   0x8   : > { %329 = vperm.xlu1 (!%p263_p2), %2245, %v315_v3   ;;  %v312_v14 = vld [vmem:[%s2663_s1 + $0x18] sm:$0xff] (!%p263_p2)  ;;  %v543_v15 = vld [vmem:[%s2665_s3] sm:$0xff] (!%p263_p2)  ;;  %s2317_s11 = smov (!%p263_p2), 17   ;;  %s2318_s12 = smov (!%p263_p2), 2   ;;  %vm706_vm8 = vcmask (!%p263_p2), 130048   ;;  %vm1796_vm9 = vcmask (!%p263_p2), 523264  }
   0x9   : > { %s2319_s17 = smov (!%p263_p2), 16   ;;  %s2320_s18 = smov (!%p263_p2), 1  }
   0xa   : > { %s2323_s29 = smov (!%p263_p2), 110   ;;  %s2324_s30 = smov (!%p263_p2), 120  }
   0xb   : > { %324 = vperm.xlu0 (!%p263_p2), %2244, %v314_v4   ;;  %s2325_s9 = smov (!%p263_p2), 111   ;;  %s2326_s10 = smov (!%p263_p2), 126  }
   0xc   : > { %334 = vperm.xlu1 (!%p263_p2), %2245, %v316_v5  }
   0xd   : > { %s2672_s28 = smov (!%p296_p3, %s1856_s28), 1 }
   0xe   : > { %s2216_s15 = smul.u32 24, %s2672_s28 }
   0xf   : > { %549 = vperm.xlu0 %2244, %v545_v8  }
  0x10   : > { %s300_s20 = scalar_lea.vmem %s2662_s0, %s2216_s15  ;;  %554 = vperm.xlu1 %2245, %v546_v10   ;;  %s2313_s15 = smov 9  }
  0x11   : > { %v306_v6 = vld [vmem:[%s300_s20] sm:$0xff]  ;;  %v307_v7 = vld [vmem:[%s300_s20 + $0x8] sm:$0xff]  ;;  %v308_v11 = vld [vmem:[%s300_s20 + $0x10] sm:$0xff]  ;;  %s2314_s20 = smov 10  }
  0x12   : > { %v2130_v9 = vpack.c.bf16 %v307_v7, %v306_v6 }
  0x14   : > { %2131 = vmatprep.subr.bf16.mxu0 %v2130_v9 }
  0x15   : > { %2133 = vmatpush3.bf16.msra.mxu0 %v2130_v9 }
  0x16   : > { %2021 = vmatprep.subr.mxu0 %v308_v11 }
  0x19   : > { %2022 = vmatpush3.msra.mxu0 %v308_v11 }
  0x1a   : > { %2024 = vmatmul.mubr.msk.f32.vlgmr.msra.gmra.mrb[0].mxu0 %vm337_vm0, %v310_v12 }
  0x1b   : > { %2026 = vmatprep.mubr.msk.f32.mxu0 %vm337_vm0, %v311_v13 }
  0x1e   : > { %2027 = vmatmul.mubr.msk.f32.gmra.mrb[2].mxu0 %vm337_vm0, %v312_v14 }
  0x1f   : > { %2037 = vmatprep.mubr.msk.f32.mxu0 %vm557_vm1, %v543_v15 }
  0x86   : > { %v320_v16 = vpop.permute.xlu0 %319 }
  0x87   : > { %v330_v17 = vpop.permute.xlu1 %329 }
  0x8a   : > { %v325_v18 = vpop.permute.xlu0 %324 }
  0x8b   : > { %v335_v24 = vpop.permute.xlu1 %334 }
  0xed   : > { %v2025_v19 = vpop.f32.mrb[0].mxu0 }
  0xee   : > { %v2426_v20 = vadd.f32 %v2025_v19, %v325_v18  ;;  %v416_v21 = vpop.f32.mrb[1].mxu0 }
  0xef   : > { %v2428_v22 = vadd.f32 %v416_v21, %v320_v16 }
  0xf0   : > { %v2431_v23 = vmul.f32 0.70710677, %v2426_v20 }
  0xf1   : > { %v2434_v25 = vmul.f32 0.70710677, %v2428_v22  ;;  %v2028_v26 = vpop.f32.mrb[2].mxu0 }
  0xf2   : > { %v452_v27 = vand.u32 2147483647, %v2431_v23  ;;  %v2437_v28 = vadd.f32 %v2028_v26, %v335_v24  ;;  %v426_v29 = vpop.f32.mrb[3].mxu0  ;;  %vm444_vm2 = vcmp.ge.f32.partialorder %v2431_v23, 0.0 }
  0xf3   : > { %v451_v30 = vand.u32 2147483647, %v2434_v25  ;;  %v2440_v31 = vadd.f32 %v426_v29, %v330_v17  ;;  %vm443_vm3 = vcmp.ge.f32.partialorder %v2434_v25, 0.0 }
  0xf4   : > { %v456_v32 = vmul.f32 0.3275911, %v452_v27  ;;  %v2443_v34 = vmul.f32 0.70710677, %v2437_v28  ;;  %v508_v43 = vsub.f32 0.0, %v452_v27 }
  0xf5   : > { %v455_v33 = vmul.f32 0.3275911, %v451_v30  ;;  %v2446_v36 = vmul.f32 0.70710677, %v2440_v31  ;;  %v507_v45 = vsub.f32 0.0, %v451_v30 }
  0xf6   : > { %v460_v35 = vadd.f32 1.0, %v456_v32  ;;  %v454_v38 = vand.u32 2147483647, %v2443_v34  ;;  %v512_v47 = vmul.f32 %v508_v43, %v452_v27  ;;  %vm446_vm4 = vcmp.ge.f32.partialorder %v2443_v34, 0.0 }
  0xf7   : > { %v459_v37 = vadd.f32 1.0, %v455_v33  ;;  %v453_v40 = vand.u32 2147483647, %v2446_v36  ;;  %v511_v50 = vmul.f32 %v507_v45, %v451_v30  ;;  %vm445_vm5 = vcmp.ge.f32.partialorder %v2446_v36, 0.0  ;;  %v544_v36 = vld [vmem:[%s2665_s3 + $0x8] sm:$0xff] }
  0xf8   : > { %2286 = vrcp.f32 %v460_v35  ;;  %v458_v39 = vmul.f32 0.3275911, %v454_v38  ;;  %v510_v51 = vsub.f32 0.0, %v454_v38  ;;  %v517_v54 = vmul.f32 1.442695, %v512_v47 }
  0xf9   : > { %2288 = vrcp.f32 %v459_v37  ;;  %v457_v42 = vmul.f32 0.3275911, %v453_v40  ;;  %v509_v56 = vsub.f32 0.0, %v453_v40  ;;  %v515_v59 = vmul.f32 1.442695, %v511_v50 }
  0xfa   : > { %v462_v41 = vadd.f32 1.0, %v458_v39  ;;  %v514_v60 = vmul.f32 %v510_v51, %v454_v38  ;;  %v436_v51 = vmul.f32 0.5, %v2426_v20  ;;  %v438_v20 = vmul.f32 0.5, %v2437_v28  ;;  %v555_v28 = vpop.permute.xlu1 %554 }
  0xfb   : > { %v461_v44 = vadd.f32 1.0, %v457_v42  ;;  %v513_v3 = vmul.f32 %v509_v56, %v453_v40  ;;  %v2311_v42 = vmov -1.0  }
  0xfc   : > { %2290 = vrcp.f32 %v462_v41  ;;  %v521_v5 = vmul.f32 1.442695, %v514_v60  ;;  %v448_v43 = vsel %vm444_vm2, 1.0, %v2311_v42  ;;  %v449_v34 = vsel %vm445_vm5, 1.0, %v2311_v42 }
  0xfd   : > { %2292 = vrcp.f32 %v461_v44  ;;  %v519_v13 = vmul.f32 1.442695, %v513_v3 }
  0xfe   : > { %2294 = vpow2.f32 %v517_v54  ;;  %v435_v54 = vmul.f32 0.5, %v2428_v22  ;;  %v437_v22 = vmul.f32 0.5, %v2440_v31 }
  0xff   : > { %2296 = vpow2.f32 %v515_v59  ;;  %v450_v59 = vsel %vm446_vm4, 1.0, %v2311_v42 }
 0x100   : > { %2298 = vpow2.f32 %v521_v5 }
 0x101   : > { %2300 = vpow2.f32 %v519_v13  ;;  %v1870_v13 = vld [vmem:[%s2669_s7] ss:$0 sm:$0xff] }
 0x102   : > { %v2287_v46 = vpop.eup %2286 }
 0x103   : > { %v2289_v48 = vpop.eup %2288  ;;  %v472_v49 = vmul.f32 1.0614054, %v2287_v46 }
 0x104   : > { %v471_v52 = vmul.f32 1.0614054, %v2289_v48 }
 0x105   : > { %v476_v53 = vadd.f32 -1.4531521, %v472_v49  ;;  %v447_v49 = vsel %vm443_vm3, 1.0, %v2311_v42 }
 0x106   : > { %v475_v55 = vadd.f32 -1.4531521, %v471_v52  ;;  %v2291_v57 = vpop.eup %2290 }
 0x107   : > { %v480_v58 = vmul.f32 %v2287_v46, %v476_v53  ;;  %v474_v62 = vmul.f32 1.0614054, %v2291_v57  ;;  %v2293_v0 = vpop.eup %2292 }
 0x108   : > { %v479_v61 = vmul.f32 %v2289_v48, %v475_v55  ;;  %v473_v6 = vmul.f32 1.0614054, %v2293_v0  ;;  %v2295_v29 = vpop.eup %2294 }
 0x109   : > { %v484_v63 = vadd.f32 1.4214138, %v480_v58  ;;  %v478_v2 = vadd.f32 -1.4531521, %v474_v62  ;;  %v2297_v33 = vpop.eup %2296 }
 0x10a   : > { %v483_v1 = vadd.f32 1.4214138, %v479_v61  ;;  %v477_v10 = vadd.f32 -1.4531521, %v473_v6  ;;  %v2312_v6 = vmov 0.0  }
 0x10b   : > { %v488_v4 = vmul.f32 %v2287_v46, %v484_v63  ;;  %v482_v8 = vmul.f32 %v2291_v57, %v478_v2  ;;  %641 = vst.msk [vmem:[#allocation2 + $0x8] sm:$0xff] %vm639_vm6, %v2312_v6  ;;  %640 = vst.msk [vmem:[#allocation2] sm:$0xff] %vm639_vm6, %v2312_v6 }
 0x10c   : > { %v487_v7 = vmul.f32 %v2289_v48, %v483_v1  ;;  %v481_v15 = vmul.f32 %v2293_v0, %v477_v10 }
 0x10d   : > { %v492_v9 = vadd.f32 -0.28449672, %v488_v4  ;;  %v486_v12 = vadd.f32 1.4214138, %v482_v8  ;;  %v550_v8 = vpop.permute.xlu0 %549 }
 0x10e   : > { %v491_v11 = vadd.f32 -0.28449672, %v487_v7  ;;  %v485_v19 = vadd.f32 1.4214138, %v481_v15  ;;  %v1875_v15 = vld [vmem:[%s2669_s7 + $0x1] ss:$0 sm:$0xff] }
 0x10f   : > { %v496_v14 = vmul.f32 %v2287_v46, %v492_v9  ;;  %v490_v17 = vmul.f32 %v2291_v57, %v486_v12  ;;  %v1893_v12 = vld [vmem:[%s2669_s7 + $0x3] ss:$0 sm:$0xff] }
 0x110   : > { %v495_v16 = vmul.f32 %v2289_v48, %v491_v11  ;;  %v489_v27 = vmul.f32 %v2293_v0, %v485_v19  ;;  %v1902_v11 = vld [vmem:[%s2669_s7 + $0x4] ss:$0 sm:$0xff] }
 0x111   : > { %v500_v18 = vadd.f32 0.2548296, %v496_v14  ;;  %v494_v24 = vadd.f32 -0.28449672, %v490_v17  ;;  %v1911_v14 = vld [vmem:[%s2669_s7 + $0x5] ss:$0 sm:$0xff] }
 0x112   : > { %v499_v21 = vadd.f32 0.2548296, %v495_v16  ;;  %v493_v37 = vadd.f32 -0.28449672, %v489_v27  ;;  %v1920_v16 = vld [vmem:[%s2669_s7 + $0x6] ss:$0 sm:$0xff] }
 0x113   : > { %v504_v26 = vmul.f32 %v2287_v46, %v500_v18  ;;  %v498_v32 = vmul.f32 %v2291_v57, %v494_v24  ;;  %v2299_v46 = vpop.eup %2298  ;;  %v1884_v17 = vld [vmem:[%s2669_s7 + $0x2] ss:$0 sm:$0xff]  ;;  %v1929_v18 = vld [vmem:[%s2669_s7 + $0x7] ss:$0 sm:$0xff]  ;;  %v1938_v27 = vld [vmem:[%s2669_s7 + $0x8] ss:$0 sm:$0xff] }
 0x114   : > { %v503_v30 = vmul.f32 %v2289_v48, %v499_v21  ;;  %v497_v41 = vmul.f32 %v2293_v0, %v493_v37  ;;  %v2301_v53 = vpop.eup %2300 }
 0x115   : > { %v524_v35 = vmul.f32 %v2295_v29, %v504_v26  ;;  %v502_v39 = vadd.f32 0.2548296, %v498_v32  ;;  %v1896_v29 = vld [vmem:[%s2667_s5 + $0x70] sm:$0xff] }
 0x116   : > { %v523_v38 = vmul.f32 %v2297_v33, %v503_v30  ;;  %v501_v48 = vadd.f32 0.2548296, %v497_v41  ;;  %2077 = vmatprep.mubr.msk.f32.mxu1 %vm706_vm8, %v1896_v29 }
 0x117   : > { %v528_v40 = vsub.f32 1.0, %v524_v35  ;;  %v506_v45 = vmul.f32 %v2291_v57, %v502_v39 }
 0x118   : > { %v527_v44 = vsub.f32 1.0, %v523_v38  ;;  %v505_v25 = vmul.f32 %v2293_v0, %v501_v48 }
 0x119   : > { %v532_v47 = vmul.f32 %v528_v40, %v448_v43  ;;  %v526_v23 = vmul.f32 %v2299_v46, %v506_v45 }
 0x11a   : > { %v531_v50 = vmul.f32 %v527_v44, %v447_v49  ;;  %v525_v57 = vmul.f32 %v2301_v53, %v505_v25  ;;  %v694_v44 = vld [vmem:[%s2667_s5] sm:$0xff] }
 0x11b   : > { %v536_v52 = vadd.f32 1.0, %v532_v47  ;;  %v530_v56 = vsub.f32 1.0, %v526_v23 }
 0x11c   : > { %v535_v55 = vadd.f32 1.0, %v531_v50  ;;  %v529_v62 = vsub.f32 1.0, %v525_v57 }
 0x11d   : > { %v540_v58 = vmul.f32 %v536_v52, %v436_v51  ;;  %v534_v61 = vmul.f32 %v530_v56, %v450_v59 }
 0x11e   : > { %v539_v60 = vmul.f32 %v535_v55, %v435_v54  ;;  %v533_v2 = vmul.f32 %v529_v62, %v449_v34 }
 0x11f   : > { %v538_v63 = vadd.f32 1.0, %v534_v61 }
 0x120   : > { %v2134_v1 = vpack.c.bf16 %v540_v58, %v539_v60  ;;  %v537_v3 = vadd.f32 1.0, %v533_v2  ;;  %v654_v2 = vld [vmem:[%s2668_s6 + $0x8] sm:$0xff] }
 0x121   : > { %v542_v0 = vmul.f32 %v538_v63, %v438_v20 }
 0x122   : > { %2135 = vmatprep.subr.bf16.mxu0 %v2134_v1  ;;  %v541_v4 = vmul.f32 %v537_v3, %v437_v22  ;;  %v656_v22 = vld [vmem:[%s2668_s6 + $0x18] sm:$0xff]  ;;  %v655_v3 = vld [vmem:[%s2668_s6 + $0x10] sm:$0xff] }
 0x123   : > { %2137 = vmatpush3.bf16.msra.mxu0 %v2134_v1 }
 0x124   : > { %v2138_v5 = vpack.c.bf16 %v542_v0, %v541_v4  ;;  %v653_v0 = vld [vmem:[%s2668_s6] sm:$0xff] }
 0x126   : > { %2139 = vmatprep.subr.bf16.mxu0 %v2138_v5 }
 0x127   : > { %2141 = vmatpush3.bf16.msra.mxu0 %v2138_v5 }
 0x12a   : > { %2038 = vmatmul.mubr.msk.f32.vlgmr.msra.gmra.mrb[4].mxu0 %vm557_vm1, %v544_v36 }
 0x12b   : > { %2044 = vmatprep.mubr.msk.f32.mxu0 %vm706_vm8, %v694_v44 }
 0x1fd   : > { %v2039_v7 = vpop.f32.mrb[4].mxu0 }
 0x1fe   : > { %v636_v31 = vadd.f32 %v2039_v7, %v555_v28  ;;  %v630_v9 = vpop.f32.mrb[5].mxu0 }
 0x1ff   : > { %v631_v10 = vadd.f32 %v630_v9, %v550_v8 }
 0x200   : > { %646 = vrot.lane.b32.xlu1 %v636_v31, %s2313_s15 }
 0x201   : > { %644 = vrot.lane.b32.xlu0 %v631_v10, %s2313_s15 }
 0x204   : > { %1189 = vrot.lane.b32.xlu1 %v1902_v11, %s2313_s15 }
 0x205   : > { %1064 = vrot.lane.b32.xlu0 %v1893_v12, %s2314_s20 }
 0x208   : > { %689 = vrot.lane.b32.xlu1 %v1870_v13, %s2315_s25  ;;  %s2321_s25 = smov 119  }
 0x209   : > { %1314 = vrot.lane.b32.xlu0 %v1911_v14, %s2316_s26  ;;  %s2322_s26 = smov 118  }
 0x20c   : > { %814 = vrot.lane.b32.xlu1 %v1875_v15, %s2317_s11  ;;  %s2327_s11 = smov 112   ;;  %v1897_v15 = vld [vmem:[%s2667_s5 + $0x78] sm:$0xff] }
 0x20d   : > { %1439 = vrot.lane.b32.xlu0 %v1920_v16, %s2318_s12  ;;  %s2328_s12 = smov 127  }
 0x210   : > { %939 = vrot.lane.b32.xlu1 %v1884_v17, %s2319_s17 }
 0x211   : > { %1564 = vrot.lane.b32.xlu0 %v1929_v18, %s2320_s18 }
 0x272   : > { %v647_v19 = vpop.permute.xlu1 %646 }
 0x273   : > { %652 = vst.msk [vmem:[#allocation2 + $0x8] sm:$0xff] %vm650_vm7, %v647_v19  ;;  %v645_v21 = vpop.permute.xlu0 %644  ;;  %v1903_v19 = vld [vmem:[%s2667_s5 + $0x80] sm:$0xff] }
 0x274   : > { %651 = vst.msk [vmem:[#allocation2] sm:$0xff] %vm650_vm7, %v645_v21 }
 0x276   : > { %v1190_v24 = vpop.permute.xlu1 %1189 }
 0x277   : > { %v1065_v26 = vpop.permute.xlu0 %1064 }
 0x27a   : > { %v682_v30 = vld [vmem:[#allocation2 + $0x8] sm:$0xff]  ;;  %v690_v32 = vpop.permute.xlu1 %689 }
 0x27b   : > { %v681_v33 = vld [vmem:[#allocation2] sm:$0xff]  ;;  %v1193_v35 = vmul.f32 %v1190_v24, %v682_v30  ;;  %v1068_v37 = vmul.f32 %v1065_v26, %v682_v30  ;;  %v1315_v38 = vpop.permute.xlu0 %1314  ;;  %v1689_v39 = vmul.f32 %v1938_v27, %v682_v30  ;;  %v693_v43 = vmul.f32 %v690_v32, %v682_v30 }
 0x27c   : > { %v1192_v40 = vmul.f32 %v1190_v24, %v681_v33  ;;  %v1067_v41 = vmul.f32 %v1065_v26, %v681_v33  ;;  %v692_v42 = vmul.f32 %v690_v32, %v681_v33  ;;  %v1688_v45 = vmul.f32 %v1938_v27, %v681_v33 }
 0x27d   : > { %v1317_v49 = vmul.f32 %v1315_v38, %v681_v33  ;;  %v1318_v48 = vmul.f32 %v1315_v38, %v682_v30 }
 0x27e   : > { %v2251_v46 = vpack.i.bf16 %v1193_v35, %v1192_v40  ;;  %v2246_v47 = vpack.i.bf16 %v1068_v37, %v1067_v41  ;;  %v815_v50 = vpop.permute.xlu1 %814  ;;  %v2497_v51 = vpack.c.bf16 %v1689_v39, %v1688_v45  ;;  %v2261_v55 = vpack.i.bf16 %v693_v43, %v692_v42  ;;  %v696_v37 = vld [vmem:[%s2667_s5 + $0x10] sm:$0xff]  ;;  %v697_v42 = vld [vmem:[%s2667_s5 + $0x18] sm:$0xff] }
 0x27f   : > { %v1440_v23 = vpop.permute.xlu0 %1439  ;;  %v817_v52 = vmul.f32 %v815_v50, %v681_v33  ;;  %v818_v25 = vmul.f32 %v815_v50, %v682_v30  ;;  %v2256_v56 = vpack.i.bf16 %v1318_v48, %v1317_v49  ;;  %v1905_v40 = vld [vmem:[%s2667_s5 + $0x90] sm:$0xff]  ;;  %v1906_v45 = vld [vmem:[%s2667_s5 + $0x98] sm:$0xff]  ;;  %v1877_v50 = vld [vmem:[%s2667_s5 + $0x28] sm:$0xff] }
 0x280   : > { %2252 = vrot.lane.b32.xlu1 %v2251_v46, %s2321_s25  ;;  %2247 = vrot.lane.b32.xlu0 %v2246_v47, %s2322_s26  ;;  %v1442_v53 = vmul.f32 %v1440_v23, %v681_v33  ;;  %v1443_v54 = vmul.f32 %v1440_v23, %v682_v30  ;;  %v1876_v46 = vld [vmem:[%s2667_s5 + $0x20] sm:$0xff]  ;;  %v1913_v23 = vld [vmem:[%s2667_s5 + $0xa8] sm:$0xff] }
 0x281   : > { %v2271_v57 = vpack.i.bf16 %v818_v25, %v817_v52  ;;  %v1912_v47 = vld [vmem:[%s2667_s5 + $0xa0] sm:$0xff]  ;;  %v1878_v52 = vld [vmem:[%s2667_s5 + $0x30] sm:$0xff] }
 0x282   : > { %v940_v58 = vpop.permute.xlu1 %939  ;;  %v2266_v60 = vpack.i.bf16 %v1443_v54, %v1442_v53  ;;  %v1914_v53 = vld [vmem:[%s2667_s5 + $0xb0] sm:$0xff]  ;;  %v1879_v54 = vld [vmem:[%s2667_s5 + $0x38] sm:$0xff] }
 0x283   : > { %v1565_v59 = vpop.permute.xlu0 %1564  ;;  %v942_v61 = vmul.f32 %v940_v58, %v681_v33  ;;  %v943_v62 = vmul.f32 %v940_v58, %v682_v30  ;;  %v1921_v58 = vld [vmem:[%s2667_s5 + $0xc0] sm:$0xff] }
 0x284   : > { %2262 = vrot.lane.b32.xlu1 %v2261_v55, %s2323_s29  ;;  %2257 = vrot.lane.b32.xlu0 %v2256_v56, %s2324_s30  ;;  %v1567_v63 = vmul.f32 %v1565_v59, %v681_v33  ;;  %v1568_v34 = vmul.f32 %v1565_v59, %v682_v30  ;;  %v695_v30 = vld [vmem:[%s2667_s5 + $0x8] sm:$0xff]  ;;  %v1915_v55 = vld [vmem:[%s2667_s5 + $0xb8] sm:$0xff] }
 0x285   : > { %v2281_v1 = vpack.i.bf16 %v943_v62, %v942_v61  ;;  %v1904_v33 = vld [vmem:[%s2667_s5 + $0x88] sm:$0xff]  ;;  %v1885_v56 = vld [vmem:[%s2667_s5 + $0x40] sm:$0xff]  ;;  %v1923_v61 = vld [vmem:[%s2667_s5 + $0xd0] sm:$0xff] }
 0x286   : > { %v2276_v20 = vpack.i.bf16 %v1568_v34, %v1567_v63  ;;  %v1886_v59 = vld [vmem:[%s2667_s5 + $0x48] sm:$0xff]  ;;  %v1888_v62 = vld [vmem:[%s2667_s5 + $0x58] sm:$0xff]  ;;  %v1894_v34 = vld [vmem:[%s2667_s5 + $0x60] sm:$0xff] }
 0x287   : > { %v1924_v63 = vld [vmem:[%s2667_s5 + $0xd8] sm:$0xff] }
 0x288   : > { %2272 = vrot.lane.b32.xlu1 %v2271_v57, %s2325_s9  ;;  %2267 = vrot.lane.b32.xlu0 %v2266_v60, %s2326_s10  ;;  %v1922_v57 = vld [vmem:[%s2667_s5 + $0xc8] sm:$0xff]  ;;  %v1887_v60 = vld [vmem:[%s2667_s5 + $0x50] sm:$0xff]  ;;  %s1949_s9 = sshll.u32 %s2672_s28, 5 }
 0x28c   : > { %2282 = vrot.lane.b32.xlu1 %v2281_v1, %s2327_s11  ;;  %2277 = vrot.lane.b32.xlu0 %v2276_v20, %s2328_s12  ;;  %v1930_v1 = vld [vmem:[%s2667_s5 + $0xe0] sm:$0xff]  ;;  %v1895_v20 = vld [vmem:[%s2667_s5 + $0x68] sm:$0xff]  ;;  %s305_s12 = scalar_lea.vmem %s2670_s8, %s1949_s9 }
 0x290   : > { %664 = vperm.xlu1 %2245, %v654_v2   ;;  %659 = vperm.xlu0 %2244, %v653_v0   ;;  %v1931_v2 = vld [vmem:[%s2667_s5 + $0xe8] sm:$0xff]  ;;  %v1932_v0 = vld [vmem:[%s2667_s5 + $0xf0] sm:$0xff] }
 0x294   : > { %674 = vperm.xlu1 %2245, %v656_v22   ;;  %669 = vperm.xlu0 %2244, %v655_v3   ;;  %v1933_v22 = vld [vmem:[%s2667_s5 + $0xf8] sm:$0xff]  ;;  %v1939_v3 = vld [vmem:[%s2667_s5 + $0x100] sm:$0xff] }
 0x2f2   : > { %v2253_v4 = vpop.permute.xlu1 %2252  ;;  %v2248_v5 = vpop.permute.xlu0 %2247 }
 0x2f3   : > { %v2255_v36 = vunpack.i.h.bf16 %v2253_v4  ;;  %v2254_v6 = vunpack.i.l.bf16 %v2253_v4  ;;  %v2250_v28 = vunpack.i.h.bf16 %v2248_v5  ;;  %v2249_v7 = vunpack.i.l.bf16 %v2248_v5  ;;  %v1940_v4 = vld [vmem:[%s2667_s5 + $0x108] sm:$0xff]  ;;  %v1942_v5 = vld [vmem:[%s2667_s5 + $0x118] sm:$0xff] }
 0x2f5   : > { %v2511_v8 = vpack.c.bf16 %v2250_v28, %v2249_v7  ;;  %v2158_v31 = vpack.c.bf16 %v2255_v36, %v2254_v6 }
 0x2f6   : > { %v2263_v9 = vpop.permute.xlu1 %2262  ;;  %v2258_v10 = vpop.permute.xlu0 %2257 }
 0x2f7   : > { %v2265_v11 = vunpack.i.h.bf16 %v2263_v9  ;;  %v2264_v12 = vunpack.i.l.bf16 %v2263_v9  ;;  %v2260_v13 = vunpack.i.h.bf16 %v2258_v10  ;;  %v2259_v14 = vunpack.i.l.bf16 %v2258_v10  ;;  %2178 = vmatprep.subr.bf16.mxu1 %v2511_v8 }
 0x2f8   : > { %2179 = vmatpush3.bf16.msra.mxu1 %v2511_v8 }
 0x2f9   : > { %v2142_v16 = vpack.c.bf16 %v2265_v11, %v2264_v12  ;;  %2159 = vmatprep.subr.bf16.mxu1 %v2158_v31  ;;  %v2162_v21 = vpack.c.bf16 %v2260_v13, %v2259_v14 }
 0x2fa   : > { %v2273_v17 = vpop.permute.xlu1 %2272  ;;  %v2268_v18 = vpop.permute.xlu0 %2267 }
 0x2fb   : > { %v2275_v24 = vunpack.i.h.bf16 %v2273_v17  ;;  %v2274_v26 = vunpack.i.l.bf16 %v2273_v17  ;;  %2143 = vmatprep.subr.bf16.mxu0 %v2142_v16  ;;  %2078 = vmatmul.mubr.msk.f32.vlgmr.msra.gmra.mrb[0].mxu1 %vm706_vm8, %v1897_v15  ;;  %v2270_v27 = vunpack.i.h.bf16 %v2268_v18  ;;  %v2269_v29 = vunpack.i.l.bf16 %v2268_v18 }
 0x2fc   : > { %2145 = vmatpush3.bf16.msra.mxu0 %v2142_v16  ;;  %2161 = vmatpush3.bf16.msra.mxu1 %v2158_v31 }
 0x2fd   : > { %v2146_v32 = vpack.c.bf16 %v2275_v24, %v2274_v26  ;;  %2163 = vmatprep.subr.bf16.mxu1 %v2162_v21  ;;  %2084 = vmatprep.mubr.msk.f32.mxu1 %vm706_vm8, %v1903_v19  ;;  %v2166_v41 = vpack.c.bf16 %v2270_v27, %v2269_v29 }
 0x2fe   : > { %v2283_v35 = vpop.permute.xlu1 %2282  ;;  %v2278_v44 = vpop.permute.xlu0 %2277 }
 0x2ff   : > { %v2285_v38 = vunpack.i.h.bf16 %v2283_v35  ;;  %v2284_v39 = vunpack.i.l.bf16 %v2283_v35  ;;  %2045 = vmatmul.mubr.msk.f32.vlgmr.msra.gmra.mrb[6].mxu0 %vm706_vm8, %v695_v30  ;;  %2147 = vmatprep.subr.bf16.mxu0 %v2146_v32  ;;  %v2280_v49 = vunpack.i.h.bf16 %v2278_v44  ;;  %v2279_v48 = vunpack.i.l.bf16 %v2278_v44 }
 0x300   : > { %2085 = vmatmul.mubr.msk.f32.vlgmr.msra.gmra.mrb[2].mxu1 %vm706_vm8, %v1904_v33  ;;  %2149 = vmatpush3.bf16.msra.mxu0 %v2146_v32 }
 0x301   : > { %v2150_v43 = vpack.c.bf16 %v2285_v38, %v2284_v39  ;;  %2165 = vmatpush3.bf16.msra.mxu1 %v2162_v21  ;;  %2047 = vmatprep.mubr.msk.f32.mxu0 %vm706_vm8, %v696_v37  ;;  %v2170_v25 = vpack.c.bf16 %v2280_v49, %v2279_v48 }
 0x302   : > { %2167 = vmatprep.subr.bf16.mxu1 %v2166_v41  ;;  %2087 = vmatprep.mubr.msk.f32.mxu1 %vm706_vm8, %v1905_v40 }
 0x303   : > { %2048 = vmatmul.mubr.msk.f32.gmra.mrb[8].mxu0 %vm706_vm8, %v697_v42  ;;  %2151 = vmatprep.subr.bf16.mxu0 %v2150_v43 }
 0x304   : > { %2088 = vmatmul.mubr.msk.f32.gmra.mrb[0].mxu1 %vm706_vm8, %v1906_v45  ;;  %2054 = vmatprep.mubr.msk.f32.mxu0 %vm706_vm8, %v1876_v46 }
 0x305   : > { %2094 = vmatprep.mubr.msk.f32.mxu1 %vm706_vm8, %v1912_v47 }
 0x307   : > { %2055 = vmatmul.mubr.msk.f32.vlgmr.msra.gmra.mrb[6].mxu0 %vm706_vm8, %v1877_v50 }
 0x308   : > { %2153 = vmatpush3.bf16.msra.mxu0 %v2150_v43  ;;  %2095 = vmatmul.mubr.msk.f32.vlgmr.msra.gmra.mrb[2].mxu1 %vm706_vm8, %v1913_v23 }
 0x309   : > { %2169 = vmatpush3.bf16.msra.mxu1 %v2166_v41  ;;  %2155 = vmatprep.subr.bf16.mxu0 %v2511_v8 }
 0x30a   : > { %2171 = vmatprep.subr.bf16.mxu1 %v2170_v25  ;;  %2057 = vmatprep.mubr.msk.f32.mxu0 %vm706_vm8, %v1878_v52 }
 0x30b   : > { %2097 = vmatprep.mubr.msk.f32.mxu1 %vm706_vm8, %v1914_v53  ;;  %2058 = vmatmul.mubr.msk.f32.gmra.mrb[8].mxu0 %vm706_vm8, %v1879_v54 }
 0x30c   : > { %2098 = vmatmul.mubr.msk.f32.gmra.mrb[0].mxu1 %vm706_vm8, %v1915_v55  ;;  %2064 = vmatprep.mubr.msk.f32.mxu0 %vm706_vm8, %v1885_v56 }
 0x30d   : > { %2104 = vmatprep.mubr.msk.f32.mxu1 %vm706_vm8, %v1921_v58 }
 0x30f   : > { %2065 = vmatmul.mubr.msk.f32.vlgmr.msra.gmra.mrb[6].mxu0 %vm706_vm8, %v1886_v59  ;;  %v660_v31 = vpop.permute.xlu0 %659 }
 0x310   : > { %2157 = vmatpush3.bf16.msra.mxu0 %v2511_v8  ;;  %2105 = vmatmul.mubr.msk.f32.vlgmr.msra.gmra.mrb[2].mxu1 %vm706_vm8, %v1922_v57  ;;  %v665_v8 = vpop.permute.xlu1 %664 }
 0x311   : > { %2173 = vmatpush3.bf16.msra.mxu1 %v2170_v25  ;;  %2067 = vmatprep.mubr.msk.f32.mxu0 %vm706_vm8, %v1887_v60 }
 0x312   : > { %2175 = vmatprep.subr.bf16.mxu1 %v2497_v51  ;;  %2107 = vmatprep.mubr.msk.f32.mxu1 %vm706_vm8, %v1923_v61 }
 0x313   : > { %2068 = vmatmul.mubr.msk.f32.gmra.mrb[8].mxu0 %vm706_vm8, %v1888_v62  ;;  %v670_v16 = vpop.permute.xlu0 %669 }
 0x314   : > { %2108 = vmatmul.mubr.msk.f32.gmra.mrb[0].mxu1 %vm706_vm8, %v1924_v63  ;;  %2074 = vmatprep.mubr.msk.f32.mxu0 %vm706_vm8, %v1894_v34  ;;  %v675_v14 = vpop.permute.xlu1 %674 }
 0x315   : > { %2114 = vmatprep.mubr.msk.f32.mxu1 %vm706_vm8, %v1930_v1 }
 0x317   : > { %2075 = vmatmul.mubr.msk.f32.vlgmr.msra.gmra.mrb[6].mxu0 %vm706_vm8, %v1895_v20 }
 0x318   : > { %2115 = vmatmul.mubr.msk.f32.vlgmr.msra.gmra.mrb[2].mxu1 %vm706_vm8, %v1931_v2 }
 0x319   : > { %2177 = vmatpush3.bf16.msra.mxu1 %v2497_v51  ;;  %2117 = vmatprep.mubr.msk.f32.mxu1 %vm706_vm8, %v1932_v0  ;;  %v1941_v51 = vld [vmem:[%s2667_s5 + $0x110] sm:$0xff] }
 0x31c   : > { %2118 = vmatmul.mubr.msk.f32.gmra.mrb[0].mxu1 %vm706_vm8, %v1933_v22 }
 0x31d   : > { %2124 = vmatprep.mubr.msk.f32.mxu1 %vm706_vm8, %v1939_v3 }
 0x320   : > { %2125 = vmatmul.mubr.msk.f32.vlgmr.msra.gmra.mrb[2].mxu1 %vm706_vm8, %v1940_v4 }
 0x321   : > { %2127 = vmatprep.mubr.msk.f32.mxu1 %vm706_vm8, %v1941_v51 }
 0x324   : > { %2128 = vmatmul.mubr.msk.f32.gmra.mrb[0].mxu1 %vm706_vm8, %v1942_v5 }
 0x3e6   : > { %v2069_v36 = vpop.f32.mrb[8].mxu0 }
 0x3e7   : > { %v1045_v6 = vpop.f32.mrb[9].mxu0  ;;  %v2184_v17 = vadd.f32 %v2069_v36, %v675_v14 }
 0x3e8   : > { %v2186_v18 = vadd.f32 %v1045_v6, %v670_v16 }
 0x3ea   : > { %v2076_v28 = vpop.f32.mrb[6].mxu0 }
 0x3eb   : > { %v1160_v7 = vpop.f32.mrb[7].mxu0  ;;  %v2180_v9 = vadd.f32 %v2076_v28, %v665_v8 }
 0x3ec   : > { %v2182_v10 = vadd.f32 %v1160_v7, %v660_v31 }
 0x3f3   : > { %v2126_v11 = vpop.f32.mrb[2].mxu1 }
 0x3f4   : > { %v2181_v12 = vadd.f32 %v2180_v9, %v2126_v11  ;;  %v1773_v13 = vpop.f32.mrb[3].mxu1 }
 0x3f5   : > { %v2183_v15 = vadd.f32 %v2182_v10, %v1773_v13 }
 0x3f6   : > { %1798 = vst.msk [vmem:[%s305_s12 + $0x8] sm:$0xff] %vm1796_vm9, %v2181_v12 }
 0x3f7   : > { %1797 = vst.msk [vmem:[%s305_s12] sm:$0xff] %vm1796_vm9, %v2183_v15  ;;  %v2129_v19 = vpop.f32.mrb[0].mxu1 }
 0x3f8   : > { %v2185_v21 = vadd.f32 %v2184_v17, %v2129_v19  ;;  %v1783_v24 = vpop.f32.mrb[1].mxu1 }
 0x3f9   : > { %v2187_v26 = vadd.f32 %v2186_v18, %v1783_v24 }
 0x3fa   : > { %1800 = vst.msk [vmem:[%s305_s12 + $0x18] sm:$0xff] %vm1796_vm9, %v2185_v21 }
 0x3fb   : > { %1799 = vst.msk [vmem:[%s305_s12 + $0x10] sm:$0xff] %vm1796_vm9, %v2187_v26 }
 0x3fc PF: > { %s18_s27 = sadd.s32 1, %s2308_s27  }
 0x3fd   : > { %p15_p4 = scmp.ge.s32.totalorder %s18_s27, 4  }
 0x3ff   :  { %17 = sbr.rel (!%p15_p4) target bundleno = 1 (0x1), region = 90 }

// kernel: waveblock_forward.5
= control target key start
LH: loop header
LB: loop body
LE: loop exit
PB: predicated region body
PF: predicated region fallthrough
CT: control target
= control target key end

     0   :  { %20 = vsyncpa [#allocation3], 0  ;;  %s6937_s0 = inlined_call_operand.vmem [shape: f32[2,16,32,32], index: 0, kind: input, shape index: {}]   ;;  %s6938_s1 = inlined_call_operand.vmem [shape: f32[16,4], index: 1, kind: input, shape index: {}]   ;;  %s6939_s2 = inlined_call_operand.vmem [shape: f32[4], index: 2, kind: input, shape index: {}]   ;;  %s6940_s3 = inlined_call_operand.vmem [shape: f32[32,32], index: 3, kind: input, shape index: {}]   ;;  %s6941_s4 = inlined_call_operand.vmem [shape: f32[32,32], index: 4, kind: input, shape index: {}]   ;;  %s6942_s5 = inlined_call_operand.vmem [shape: f32[16,16], index: 5, kind: input, shape index: {}]   ;;  %s6943_s6 = inlined_call_operand.vmem [shape: f32[16,16], index: 6, kind: input, shape index: {}]   ;;  %s6944_s7 = inlined_call_operand.vmem [shape: f32[8,8], index: 7, kind: input, shape index: {}]   ;;  %s6945_s8 = inlined_call_operand.vmem [shape: f32[8,8], index: 8, kind: input, shape index: {}]   ;;  %s6946_s9 = inlined_call_operand.vmem [shape: f32[4,4], index: 9, kind: input, shape index: {}]   ;;  %s6947_s10 = inlined_call_operand.vmem [shape: f32[4,4], index: 10, kind: input, shape index: {}]   ;;  %s6948_s11 = inlined_call_operand.vmem [shape: f32[2,16,16,16], index: 11, kind: output, shape index: {0}]   ;;  %s6949_s12 = inlined_call_operand.vmem [shape: f32[2,16,8,8], index: 12, kind: output, shape index: {1}]   ;;  %s6950_s13 = inlined_call_operand.vmem [shape: f32[2,16,4,4], index: 13, kind: output, shape index: {2}]   ;;  %s6951_s14 = inlined_call_operand.vmem [shape: f32[2,16,2,2], index: 14, kind: output, shape index: {3}]  }
   0x1   :  { %21 = vsyncpa [#allocation5], 0  ;;  %s5586_s29 = smov 0  }
   0x2 LB: > { %s384_s16 = sshll.u32 %s6938_s1, 4  ;;  %s5595_s17 = sadd.s32 4294967295, %s5499_s29   ;;  %s5499_s29 = sphi %s5586_s29, %s27_s29   ;;  %s385_s16 = int_to_ptr.vmem [resolvable:$true] %s384_s16 }
   0x3   : > { %p4459_p0 = scmp.ge.s32.totalorder %s5499_s29, 1  ;;  %p372_p1 = scmp.lt.s32.totalorder %s5499_s29, 3 }
   0x4   : > { %p6952_p3 = scmp.eq.s32.totalorder %s5595_s17, 0  ;;  %s398_s21 = sshll.u32 %s6939_s2, 4  ;;  %s399_s21 = int_to_ptr.vmem [resolvable:$true] %s398_s21 }
   0x5   : > { %p5599_p2 = pnand %p4459_p0, %p372_p1  ;;  %s5455_s23 = scalar_lea.vmem %s385_s16, 256 }
   0x6   : > { %p5456_p6 = scmp.ne.s32.totalorder %s385_s16, %s5455_s23  ;;  %p5463_p10 = scmp.lt.s32.totalorder %s385_s16, %s385_s16 }
   0x7   : > { %s7012_s18 = scalar_select %p5599_p2, 1, 0 }
   0x8   : > { %p5416_p4 = pneg %p5599_p2  ;;  %p5464_p11 = scmp.lt.s32.totalorder %s5455_s23, %s5455_s23 }
   0xa   : > { %p5611_p5 = pnand %p6952_p3, %p5416_p4  ;;  %p5465_p12 = por %p5464_p11, %p5463_p10 }
   0xc   : > { %p5457_p7 = pneg %p5611_p5 }
   0xe   : > { %p5458_p8 = pnand %p5457_p7, %p5456_p6 }
  0x10   : > { %p5459_p9 = pneg %p5458_p8 }
  0x12   : > { %p5466_p13 = pnand %p5465_p12, %p5459_p9 }
  0x14   : > { %5469 = shalt.err (!%p5466_p13)
}
  0x15   : > { %s5501_s24 = smov [#allocation2]   ;;  %s5502_s25 = smov 128  }
  0x16   : > { %s5503_s26 = smov 8   ;;  %s5470_s27 = scalar_lea.vmem %s399_s21, 16 }
  0x17   : > { %5419 = dma.vmem_to_smem (!%p5611_p5), %s385_s16, 256, %s5501_s24, [#allocation3], %s5502_s25, %s5502_s25, %s5503_s26  }
  0x18   : > { %p5471_p0 = scmp.ne.s32.totalorder %s399_s21, %s5470_s27  ;;  %p5478_p6 = scmp.lt.s32.totalorder %s399_s21, %s399_s21 }
  0x19   : > { %p5479_p8 = scmp.lt.s32.totalorder %s5470_s27, %s5470_s27 }
  0x1a   : > { %p5473_p1 = pnand %p5471_p0, %p5457_p7 }
  0x1b   : > { %p5480_p3 = por %p5479_p8, %p5478_p6 }
  0x1c   : > { %p5474_p4 = pneg %p5473_p1 }
  0x1e   : > { %p5481_p2 = pnand %p5480_p3, %p5474_p4 }
  0x20   : > { %5484 = shalt.err (!%p5481_p2)
}
  0x21   : > { %s5504_s28 = smov [#allocation4]   ;;  %p7014_p9 = scmp.ne.s32.totalorder %s7012_s18, 0 }
  0x22   : > { %5422 = dma.vmem_to_smem (!%p5611_p5), %s399_s21, 16, %s5504_s28, [#allocation5]  }
  0x23   : > { %443 = sbr.rel (%p7014_p9) target bundleno = 5851 (0x16db), region = 64 }
  0x2a   : > { %p7015_p10 = scmp.eq.s32.totalorder %s5595_s17, 0 }
  0x2c   : > { %5490 = dma.done.wait (%p7015_p10), [#allocation3], 256   ;;  %p7016_p11 = pmov %p7015_p10 }
  0x2d   : > { %p7017_p7 = pmov %p7015_p10 }
  0x2e   : > { %5492 = vsyncadd (%p7016_p11), [#allocation3], 4294967040 }
  0x2f   : > { %5494 = dma.done.wait (%p7017_p7), [#allocation5], 16   ;;  %p7018_p12 = pmov %p7017_p7 }
  0x31   : > { %5496 = vsyncadd (%p7018_p12), [#allocation5], 4294967280 }
  0x32   : > { %453 = sfence }
  0x33   : > { %v534_v0 = vld [vmem:[%s6940_s3] sm:$0xff]  ;;  %v535_v1 = vld [vmem:[%s6940_s3 + $0x8] sm:$0xff]  ;;  %v536_v2 = vld [vmem:[%s6940_s3 + $0x10] sm:$0xff]  ;;  %p509_p2 = scmp.lt.s32.totalorder %s5595_s17, 1  ;;  %s550_s21 = sld [smem:[#allocation2]]  ;;  %vm795_vm0 = vcmask 261120  }
  0x34   : > { %v5647_v3 = vpack.c.bf16 %v535_v1, %v534_v0  ;;  %v537_v4 = vld [vmem:[%s6940_s3 + $0x18] sm:$0xff]  ;;  %s4476_s24 = sld [smem:[#allocation2 + $0x80]]  ;;  %vm990_vm1 = vcmask 130048   ;;  %vm5507_vm2 = vmmov 0   ;;  %vm1178_vm3 = vcmask 64512   ;;  %s5508_s16 = smov 120  }
  0x35   : > { %s4481_s25 = sld [smem:[#allocation2 + $0x100]]  ;;  %v5652_v5 = vpack.c.bf16 %v537_v4, %v536_v2  ;;  %s7131_s17 = smov (!%p509_p2, %s5595_s17), 1  ;;  %vm1355_vm4 = vcmask 1043456   ;;  %vm1339_vm5 = vcmask 27648   ;;  %vm1342_vm6 = vcmask 31748  }
  0x36   : > { %5313 = vmatprep.subr.bf16.mxu0 %v5647_v3  ;;  %s4486_s26 = sld [smem:[#allocation2 + $0x180]]  ;;  %s4931_s28 = sshll.u32 %s7131_s17, 9  ;;  %vm1352_vm7 = vcmask 31744   ;;  %vm1505_vm8 = vcmask 9216   ;;  %vm1508_vm9 = vcmask 11266  }
  0x37   : > { %7019 = vst [vmem:[#allocation8_spill] sm:$0xff] %v5652_v5  ;;  %s4491_s27 = sld [smem:[#allocation2 + $0x200]]  ;;  %5315 = vmatpush3.bf16.msra.mxu0 %v5647_v3  ;;  %s5664_s18 = scalar_lea.vmem %s6937_s0, %s4931_s28 }
  0x38   : > { %s4496_s30 = sld [smem:[#allocation2 + $0x280]]  ;;  %5317 = vmatprep.subr.bf16.mxu0 %v5652_v5  ;;  %v5667_v6 = vld [vmem:[%s5664_s18] sm:$0xff]  ;;  %v5708_v25 = vld [vmem:[%s5664_s18 + $0x8] sm:$0xff]  ;;  %v5772_v52 = vld [vmem:[%s5664_s18 + $0x10] sm:$0xff] }
  0x39   : > { %s4501_s19 = sld [smem:[#allocation2 + $0x300]]  ;;  %v5669_v7 = vstv %s550_s21  ;;  %v5672_v8 = vld [vmem:[%s5664_s18 + $0x20] sm:$0xff]  ;;  %v5711_v26 = vld [vmem:[%s5664_s18 + $0x28] sm:$0xff]  ;;  %v5775_v53 = vld [vmem:[%s5664_s18 + $0x30] sm:$0xff] }
  0x3a   : > { %v5675_v9 = vld [vmem:[%s5664_s18 + $0x40] sm:$0xff]  ;;  %v556_v10 = vmul.f32 %v5669_v7, %v5667_v6  ;;  %v5679_v11 = vstv %s4476_s24  ;;  %s4506_s20 = sld [smem:[#allocation2 + $0x380]]  ;;  %v557_v29 = vmul.f32 %v5669_v7, %v5708_v25  ;;  %v5740_v37 = vld [vmem:[%s5664_s18 + $0x48] sm:$0xff]  ;;  %v5786_v58 = vld [vmem:[%s5664_s18 + $0x50] sm:$0xff] }
  0x3b   : > { %v5681_v12 = vstv %s4481_s25  ;;  %v5684_v13 = vld [vmem:[%s5664_s18 + $0x60] sm:$0xff]  ;;  %5319 = vmatpush3.bf16.msra.mxu0 %v5652_v5  ;;  %v571_v14 = vmul.f32 %v5672_v8, %v5679_v11  ;;  %s4511_s21 = sld [smem:[#allocation2 + $0x400]]  ;;  %v572_v34 = vmul.f32 %v5711_v26, %v5679_v11  ;;  %v5743_v38 = vld [vmem:[%s5664_s18 + $0x68] sm:$0xff]  ;;  %v5802_v0 = vld [vmem:[%s5664_s18 + $0x70] sm:$0xff] }
  0x3c   : > { %v586_v15 = vmul.f32 %v5675_v9, %v5681_v12  ;;  %v5691_v16 = vstv %s4486_s26  ;;  %v5694_v17 = vld [vmem:[%s5664_s18 + $0x80] sm:$0xff]  ;;  %s4516_s22 = sld [smem:[#allocation2 + $0x480]]  ;;  %v5753_v44 = vld [vmem:[%s5664_s18 + $0x88] sm:$0xff]  ;;  %v587_v47 = vmul.f32 %v5740_v37, %v5681_v12 }
  0x3d   : > { %v5696_v18 = vstv %s4491_s27  ;;  %v575_v19 = vadd.f32 %v571_v14, %v556_v10  ;;  %v601_v20 = vmul.f32 %v5684_v13, %v5691_v16  ;;  %v5701_v21 = vld [vmem:[%s5664_s18 + $0xa0] sm:$0xff]  ;;  %s5718_s23 = sld [smem:[#allocation2 + $0x500]]  ;;  %v576_v41 = vadd.f32 %v572_v34, %v557_v29  ;;  %v5769_v51 = vld [vmem:[%s5664_s18 + $0xa8] sm:$0xff] }
  0x3e   : > { %v5703_v22 = vstv %s4496_s30  ;;  %v616_v24 = vmul.f32 %v5694_v17, %v5696_v18  ;;  %v5714_v27 = vld [vmem:[%s5664_s18 + $0xc0] sm:$0xff]  ;;  %s5724_s24 = sld [smem:[#allocation2 + $0x580]]  ;;  %v602_v48 = vmul.f32 %v5743_v38, %v5691_v16  ;;  %v617_v57 = vmul.f32 %v5753_v44, %v5696_v18  ;;  %v5799_v63 = vld [vmem:[%s5664_s18 + $0xc8] sm:$0xff] }
  0x3f   : > { %v590_v23 = vadd.f32 %v586_v15, %v575_v19  ;;  %v5716_v28 = vstv %s4501_s19  ;;  %v631_v31 = vmul.f32 %v5701_v21, %v5703_v22  ;;  %s5726_s25 = sld [smem:[#allocation2 + $0x600]]  ;;  %v5729_v32 = vld [vmem:[%s5664_s18 + $0xe0] sm:$0xff]  ;;  %v591_v56 = vadd.f32 %v587_v47, %v576_v41  ;;  %7023 = vst [vmem:[#allocation12_spill] sm:$0xff] %v5799_v63 }
  0x40   : > { %v5731_v33 = vstv %s4506_s20  ;;  %v646_v36 = vmul.f32 %v5714_v27, %v5716_v28  ;;  %s5737_s26 = sld [smem:[#allocation2 + $0x680]]  ;;  %v5746_v39 = vld [vmem:[%s5664_s18 + $0x100] sm:$0xff]  ;;  %v632_v10 = vmul.f32 %v5769_v51, %v5703_v22  ;;  %v558_v14 = vmul.f32 %v5669_v7, %v5772_v52  ;;  %s5505_s20 = smov 112  }
  0x41   : > { %v605_v30 = vadd.f32 %v601_v20, %v590_v23  ;;  %7020 = vst [vmem:[#allocation9_spill] sm:$0xff] %v5746_v39  ;;  %v5748_v40 = vstv %s4511_s21  ;;  %v661_v43 = vmul.f32 %v5729_v32, %v5731_v33  ;;  %v5756_v45 = vld [vmem:[%s5664_s18 + $0x120] sm:$0xff]  ;;  %s5766_s27 = sld [smem:[#allocation2 + $0x700]]  ;;  %v606_v4 = vadd.f32 %v602_v48, %v591_v56  ;;  %s4605_s21 = sld [smem:[#allocation2 + $0x281]] }
  0x42   : > { %7021 = vst [vmem:[#allocation10_spill] sm:$0xff] %v5756_v45  ;;  %v5758_v46 = vstv %s4516_s22  ;;  %v676_v50 = vmul.f32 %v5746_v39, %v5748_v40  ;;  %v5778_v54 = vld [vmem:[%s5664_s18 + $0x140] sm:$0xff]  ;;  %s5796_s28 = sld [smem:[#allocation2 + $0x780]]  ;;  %v573_v15 = vmul.f32 %v5775_v53, %v5679_v11  ;;  %v588_v29 = vmul.f32 %v5786_v58, %v5681_v12  ;;  %v5905_v39 = vld [vmem:[%s5664_s18 + $0x98] sm:$0xff]  ;;  %s4610_s22 = sld [smem:[#allocation2 + $0x301]] }
  0x43   : > { %v620_v35 = vadd.f32 %v616_v24, %v605_v30  ;;  %7022 = vst [vmem:[#allocation11_spill] sm:$0xff] %v5778_v54  ;;  %v5781_v55 = vstv %s5718_s23  ;;  %v691_v60 = vmul.f32 %v5756_v45, %v5758_v46  ;;  %v5805_v1 = vld [vmem:[%s5664_s18 + $0x160] sm:$0xff]  ;;  %v5822_v24 = vld [vmem:[%s5664_s18 + $0xe8] sm:$0xff]  ;;  %v5827_v30 = vld [vmem:[%s5664_s18 + $0x90] sm:$0xff]  ;;  %v621_v34 = vadd.f32 %v617_v57, %v606_v4  ;;  %s5864_s30 = sld [smem:[#allocation4]]  ;;  %s4615_s23 = sld [smem:[#allocation2 + $0x381]] }
  0x44   : > { %v5791_v61 = vstv %s5724_s24  ;;  %7024 = vst [vmem:[#allocation13_spill] sm:$0xff] %v5805_v1  ;;  %v5808_v2 = vld [vmem:[%s5664_s18 + $0x180] sm:$0xff]  ;;  %v706_v20 = vmul.f32 %v5778_v54, %v5781_v55  ;;  %7026 = vst [vmem:[#allocation15_spill] sm:$0xff] %v5822_v24  ;;  %v577_v41 = vadd.f32 %v573_v15, %v558_v14  ;;  %v662_v57 = vmul.f32 %v5822_v24, %v5731_v33  ;;  %v5854_v4 = vld [vmem:[%s5664_s18 + $0x38] sm:$0xff]  ;;  %s4620_s24 = sld [smem:[#allocation2 + $0x401]] }
  0x45   : > { %v635_v42 = vadd.f32 %v631_v31, %v620_v35  ;;  %v5794_v62 = vstv %s5726_s25  ;;  %7025 = vst [vmem:[#allocation14_spill] sm:$0xff] %v5808_v2  ;;  %v5830_v31 = vld [vmem:[%s5664_s18 + $0x1a0] sm:$0xff]  ;;  %v647_v35 = vmul.f32 %v5799_v63, %v5716_v28  ;;  %v721_v47 = vmul.f32 %v5805_v1, %v5791_v61  ;;  %v5857_v14 = vld [vmem:[%s5664_s18 + $0x58] sm:$0xff]  ;;  %v5888_v45 = vld [vmem:[%s5664_s18 + $0x148] sm:$0xff]  ;;  %s4584_s25 = sld [smem:[#allocation2 + $0x1]] }
  0x46   : > { %v5819_v23 = vstv %s5737_s26  ;;  %7027 = vst [vmem:[#allocation16_spill] sm:$0xff] %v5830_v31  ;;  %v736_v48 = vmul.f32 %v5808_v2, %v5794_v62  ;;  %v636_v56 = vadd.f32 %v632_v10, %v621_v34  ;;  %v5869_v34 = vld [vmem:[%s5664_s18 + $0x128] sm:$0xff]  ;;  %v5875_v5 = vld [vmem:[%s5664_s18 + $0x1c0] sm:$0xff]  ;;  %v5882_v1 = vld [vmem:[%s5664_s18 + $0x78] sm:$0xff]  ;;  %s4585_s26 = sld [smem:[#allocation2 + $0x81]] }
  0x47   : > { %v650_v49 = vadd.f32 %v646_v36, %v635_v42  ;;  %v5835_v36 = vld [vmem:[%s5664_s18 + $0x108] sm:$0xff]  ;;  %v603_v42 = vmul.f32 %v5802_v0, %v5691_v16  ;;  %v5862_v10 = vstv %s5766_s27  ;;  %7030 = vst [vmem:[#allocation19_spill] sm:$0xff] %v5869_v34  ;;  %7031 = vst [vmem:[#allocation20_spill] sm:$0xff] %v5875_v5  ;;  %v5891_v24 = vld [vmem:[%s5664_s18 + $0xf0] sm:$0xff]  ;;  %s4933_s27 = sshll.u32 %s7131_s17, 7 }
  0x48   : > { %7028 = vst [vmem:[#allocation17_spill] sm:$0xff] %v5835_v36  ;;  %v651_v2 = vadd.f32 %v647_v35, %v636_v56  ;;  %7032 = vst [vmem:[#allocation21_spill] sm:$0xff] %v5888_v45  ;;  %v574_v35 = vmul.f32 %v5854_v4, %v5679_v11  ;;  %v5898_v56 = vld [vmem:[%s5664_s18 + $0x1e0] sm:$0xff]  ;;  %v766_v11 = vmul.f32 %v5875_v5, %v5862_v10  ;;  %s6147_s15 = scalar_lea.vmem %s6949_s12, %s4933_s27  ;;  %s4590_s27 = sld [smem:[#allocation2 + $0x101]] }
  0x49   : > { %v665_v59 = vadd.f32 %v661_v43, %v650_v49  ;;  %v5844_v49 = vld [vmem:[%s5664_s18 + $0xb0] sm:$0xff]  ;;  %7033 = vst [vmem:[#allocation22_spill] sm:$0xff] %v5891_v24  ;;  %7034 = vst [vmem:[#allocation23_spill] sm:$0xff] %v5898_v56 }
  0x4a   : > { %7029 = vst [vmem:[#allocation18_spill] sm:$0xff] %v5844_v49 }
  0x4b   : > { %v680_v19 = vadd.f32 %v676_v50, %v665_v59  ;;  %v5847_v50 = vld [vmem:[%s5664_s18 + $0x18] sm:$0xff]  ;;  %v592_v59 = vadd.f32 %v588_v29, %v577_v41  ;;  %v677_v29 = vmul.f32 %v5835_v36, %v5748_v40  ;;  %v5872_v41 = vld [vmem:[%s5664_s18 + $0xd0] sm:$0xff]  ;;  %v5885_v36 = vstv %s5796_s28  ;;  %s4595_s28 = sld [smem:[#allocation2 + $0x181]] }
  0x4d   : > { %v695_v43 = vadd.f32 %v691_v60, %v680_v19  ;;  %v618_v60 = vmul.f32 %v5827_v30, %v5696_v18  ;;  %v751_v19 = vmul.f32 %v5830_v31, %v5819_v23  ;;  %v559_v31 = vmul.f32 %v5669_v7, %v5847_v50 }
  0x4e   : > { %v666_v7 = vadd.f32 %v662_v57, %v651_v2  ;;  %v604_v57 = vmul.f32 %v5882_v1, %v5691_v16  ;;  %v5930_v16 = vld [vmem:[%s5664_s18 + $0x130] sm:$0xff] }
  0x4f   : > { %v710_v15 = vadd.f32 %v706_v20, %v695_v43  ;;  %v607_v20 = vadd.f32 %v603_v42, %v592_v59  ;;  %v633_v43 = vmul.f32 %v5844_v49, %v5703_v22  ;;  %v589_v42 = vmul.f32 %v5857_v14, %v5681_v12  ;;  %v5910_v12 = vld [vmem:[%s5664_s18 + $0x168] sm:$0xff]  ;;  %v5913_v49 = vld [vmem:[%s5664_s18 + $0x110] sm:$0xff] }
  0x50   : > { %v692_v59 = vmul.f32 %v5869_v34, %v5758_v46  ;;  %7035 = vst [vmem:[#allocation24_spill] sm:$0xff] %v5910_v12  ;;  %7036 = vst [vmem:[#allocation25_spill] sm:$0xff] %v5913_v49  ;;  %v578_v2 = vadd.f32 %v574_v35, %v559_v31  ;;  %v781_v31 = vmul.f32 %v5898_v56, %v5885_v36  ;;  %v5927_v35 = vld [vmem:[%s5664_s18 + $0x188] sm:$0xff] }
  0x51   : > { %v725_v54 = vadd.f32 %v721_v47, %v710_v15  ;;  %v622_v47 = vadd.f32 %v618_v60, %v607_v20  ;;  %v648_v15 = vmul.f32 %v5872_v41, %v5716_v28  ;;  %v681_v60 = vadd.f32 %v677_v29, %v666_v7  ;;  %7037 = vst [vmem:[#allocation26_spill] sm:$0xff] %v5927_v35 }
  0x52   : > { %v707_v20 = vmul.f32 %v5888_v45, %v5781_v55  ;;  %v593_v29 = vadd.f32 %v589_v42, %v578_v2  ;;  %v619_v7 = vmul.f32 %v5905_v39, %v5696_v18  ;;  %v5945_v42 = vld [vmem:[%s5664_s18 + $0x1a8] sm:$0xff]  ;;  %v5948_v2 = vld [vmem:[%s5664_s18 + $0x150] sm:$0xff] }
  0x53   : > { %v740_v63 = vadd.f32 %v736_v48, %v725_v54  ;;  %v637_v34 = vadd.f32 %v633_v43, %v622_v47  ;;  %v663_v54 = vmul.f32 %v5891_v24, %v5731_v33  ;;  %v5922_v48 = vld [vmem:[%s5664_s18 + $0xb8] sm:$0xff]  ;;  %v696_v43 = vadd.f32 %v692_v59, %v681_v60  ;;  %7038 = vst [vmem:[#allocation27_spill] sm:$0xff] %v5945_v42 }
  0x54   : > { %v722_v47 = vmul.f32 %v5910_v12, %v5791_v61  ;;  %v5942_v24 = vstv %s5864_s30  ;;  %v608_v18 = vadd.f32 %v604_v57, %v593_v29  ;;  %v634_v59 = vmul.f32 %v5922_v48, %v5703_v22  ;;  %v5963_v57 = vld [vmem:[%s5664_s18 + $0x170] sm:$0xff]  ;;  %s4932_s30 = sshll.u32 %s7131_s17, 8 }
  0x55   : > { %v755_v5 = vadd.f32 %v751_v19, %v740_v63  ;;  %v652_v45 = vadd.f32 %v648_v15, %v637_v34  ;;  %v678_v63 = vmul.f32 %v5913_v49, %v5748_v40  ;;  %v5939_v19 = vld [vmem:[%s5664_s18 + $0xd8] sm:$0xff]  ;;  %v711_v34 = vadd.f32 %v707_v20, %v696_v43  ;;  %v5960_v49 = vld [vmem:[%s5664_s18 + $0x1c8] sm:$0xff]  ;;  %s6092_s19 = scalar_lea.vmem %s6948_s11, %s4932_s30  ;;  %s4600_s30 = sld [smem:[#allocation2 + $0x201]] }
  0x56   : > { %v737_v15 = vmul.f32 %v5927_v35, %v5794_v62  ;;  %7039 = vst [vmem:[#allocation28_spill] sm:$0xff] %v5960_v49  ;;  %v623_v22 = vadd.f32 %v619_v7, %v608_v18  ;;  %v649_v20 = vmul.f32 %v5939_v19, %v5716_v28  ;;  %v708_v43 = vmul.f32 %v5948_v2, %v5781_v55  ;;  %v5976_v35 = vld [vmem:[%s5664_s18 + $0x1e8] sm:$0xff]  ;;  %v5979_v7 = vld [vmem:[%s5664_s18 + $0x190] sm:$0xff] }
  0x57   : > { %v770_v56 = vadd.f32 %v766_v11, %v755_v5  ;;  %v667_v60 = vadd.f32 %v663_v54, %v652_v45  ;;  %v693_v5 = vmul.f32 %v5930_v16, %v5758_v46  ;;  %v5957_v11 = vld [vmem:[%s5664_s18 + $0xf8] sm:$0xff]  ;;  %v726_v29 = vadd.f32 %v722_v47, %v711_v34  ;;  %7040 = vst [vmem:[#allocation29_spill] sm:$0xff] %v5976_v35 }
  0x58   : > { %v752_v45 = vmul.f32 %v5945_v42, %v5819_v23  ;;  %7041 = vst [vmem:[#allocation30_spill] sm:$0xff] %v5979_v7  ;;  %v638_v18 = vadd.f32 %v634_v59, %v623_v22  ;;  %v664_v28 = vmul.f32 %v5957_v11, %v5731_v33  ;;  %v5988_v42 = vld [vmem:[%s5664_s18 + $0x138] sm:$0xff]  ;;  %v782_v22 = vmul.f32 %v5976_v35, %v5885_v36 }
  0x59   : > { %v785_v12 = vadd.f32 %v781_v31, %v770_v56  ;;  %v682_v54 = vadd.f32 %v678_v63, %v667_v60  ;;  %v5972_v56 = vld [vmem:[%s5664_s18 + $0x118] sm:$0xff]  ;;  %v741_v47 = vadd.f32 %v737_v15, %v726_v29  ;;  %v767_v63 = vmul.f32 %v5960_v49, %v5862_v10  ;;  %v6004_v49 = vld [vmem:[%s5664_s18 + $0x1d0] sm:$0xff] }
  0x5a   : > { %v723_v60 = vmul.f32 %v5963_v57, %v5791_v61  ;;  %v653_v59 = vadd.f32 %v649_v20, %v638_v18  ;;  %v679_v33 = vmul.f32 %v5972_v56, %v5748_v40  ;;  %v738_v29 = vmul.f32 %v5979_v7, %v5794_v62 }
  0x5b   : > { %v791_v31 = vadd.f32 %v5942_v24, %v785_v12  ;;  %v697_v34 = vadd.f32 %v693_v5, %v682_v54  ;;  %v5992_v12 = vld [vmem:[%s5664_s18 + $0x1b0] sm:$0xff]  ;;  %v756_v15 = vadd.f32 %v752_v45, %v741_v47  ;;  %v6001_v54 = vld [vmem:[%s5664_s18 + $0x158] sm:$0xff]  ;;  %v694_v20 = vmul.f32 %v5988_v42, %v5758_v46 }
  0x5c   : > { %v753_v45 = vmul.f32 %v5992_v12, %v5819_v23  ;;  %v6011_v47 = vld [vmem:[%s5664_s18 + $0x178] sm:$0xff]  ;;  %v709_v35 = vmul.f32 %v6001_v54, %v5781_v55  ;;  %v768_v46 = vmul.f32 %v6004_v49, %v5862_v10 }
  0x5d   : > { %5072 = vmatprep.mubr.msk.f32.mxu0 %vm795_vm0, %v791_v31  ;;  %v712_v5 = vadd.f32 %v708_v43, %v697_v34  ;;  %v668_v31 = vadd.f32 %v664_v28, %v653_v59  ;;  %v771_v18 = vadd.f32 %v767_v63, %v756_v15  ;;  %v6014_v43 = vld [vmem:[%s5664_s18 + $0x1f0] sm:$0xff]  ;;  %v6021_v63 = vld [vmem:[%s5664_s18 + $0x198] sm:$0xff]  ;;  %v724_v59 = vmul.f32 %v6011_v47, %v5791_v61 }
  0x5f   : > { %v727_v40 = vadd.f32 %v723_v60, %v712_v5  ;;  %v683_v34 = vadd.f32 %v679_v33, %v668_v31  ;;  %v786_v7 = vadd.f32 %v782_v22, %v771_v18  ;;  %v783_v33 = vmul.f32 %v6014_v43, %v5885_v36  ;;  %v6029_v31 = vld [vmem:[%s5664_s18 + $0x1b8] sm:$0xff] }
  0x60   : > { %v739_v22 = vmul.f32 %v6021_v63, %v5794_v62  ;;  %v6035_v18 = vld [vmem:[%s5664_s18 + $0x1d8] sm:$0xff]  ;;  %v754_v61 = vmul.f32 %v6029_v31, %v5819_v23  ;;  %v6053_v23 = vld [vmem:[%s6941_s4] sm:$0xff] }
  0x61   : > { %v742_v28 = vadd.f32 %v738_v29, %v727_v40  ;;  %v698_v60 = vadd.f32 %v694_v20, %v683_v34  ;;  %v792_v15 = vadd.f32 %v5942_v24, %v786_v7  ;;  %v6040_v40 = vld [vmem:[%s5664_s18 + $0x1f8] sm:$0xff]  ;;  %v769_v34 = vmul.f32 %v6035_v18, %v5862_v10  ;;  %5086 = vmatprep.mubr.msk.f32.mxu1 %vm795_vm0, %v6053_v23  ;;  %v543_v10 = vld [vmem:[%s6942_s5 + $0x8] sm:$0xff] }
  0x62   : > { %v784_v62 = vmul.f32 %v6040_v40, %v5885_v36  ;;  %v542_v36 = vld [vmem:[%s6942_s5] sm:$0xff] }
  0x63   : > { %v757_v5 = vadd.f32 %v753_v45, %v742_v28  ;;  %v713_v55 = vadd.f32 %v709_v35, %v698_v60  ;;  %5073 = vmatmul.mubr.msk.f32.vlgmr.msra.gmra.mrb[0].mxu0 %vm795_vm0, %v792_v15  ;;  %v6063_v15 = vpack.c.bf16 %v543_v10, %v542_v36 }
  0x65   : > { %v772_v29 = vadd.f32 %v768_v46, %v757_v5  ;;  %v728_v20 = vadd.f32 %v724_v59, %v713_v55  ;;  %5329 = vmatprep.subr.bf16.mxu0 %v6063_v15 }
  0x66   : > { %5331 = vmatpush3.bf16.msra.mxu0 %v6063_v15 }
  0x67   : > { %v787_v7 = vadd.f32 %v783_v33, %v772_v29  ;;  %v743_v45 = vadd.f32 %v739_v22, %v728_v20  ;;  %v6070_v20 = vld [vmem:[%s6941_s4 + $0x8] sm:$0xff] }
  0x69   : > { %v793_v35 = vadd.f32 %v5942_v24, %v787_v7  ;;  %v758_v28 = vadd.f32 %v754_v61, %v743_v45  ;;  %v6077_v61 = vld [vmem:[%s6941_s4 + $0x10] sm:$0xff]  ;;  %v6082_v7 = vld [vmem:[%s6941_s4 + $0x18] sm:$0xff] }
  0x6b   : > { %5075 = vmatprep.mubr.msk.f32.mxu0 %vm795_vm0, %v793_v35  ;;  %v773_v46 = vadd.f32 %v769_v34, %v758_v28  ;;  %v6105_v35 = vld [vmem:[%s6943_s6] sm:$0xff] }
  0x6d   : > { %v788_v60 = vadd.f32 %v784_v62, %v773_v46 }
  0x6f   : > { %v794_v59 = vadd.f32 %v5942_v24, %v788_v60 }
  0x71   : > { %5076 = vmatmul.mubr.msk.f32.gmra.mrb[2].mxu0 %vm795_vm0, %v794_v59 }
 0x136   : > { %v5074_v24 = vpop.f32.mrb[0].mxu0 }
 0x137   : > { %v874_v5 = vpop.f32.mrb[1].mxu0 }
 0x138   : > { %v5320_v33 = vpack.c.bf16 %v5074_v24, %v874_v5  ;;  %v6122_v24 = vld [vmem:[%s6943_s6 + $0x8] sm:$0xff]  ;;  %v6978_v5 = vmov 0.0  }
 0x139   : > { %7042 = vst [vmem:[#allocation31_spill] sm:$0xff] %v6122_v24  ;;  %5106 = vmatprep.subr.mxu0 %v6978_v5 }
 0x13a   : > { %5321 = vmatprep.subr.bf16.mxu1 %v5320_v33 }
 0x13b   : > { %5323 = vmatpush3.bf16.msra.mxu1 %v5320_v33  ;;  %v6130_v33 = vld [vmem:[%s6944_s7] sm:$0xff] }
 0x13c   : > { %7043 = vst [vmem:[#allocation32_spill] sm:$0xff] %v6130_v33 }
 0x144   : > { %v5077_v55 = vpop.f32.mrb[2].mxu0 }
 0x145   : > { %v884_v22 = vpop.f32.mrb[3].mxu0 }
 0x146   : > { %v5324_v29 = vpack.c.bf16 %v5077_v55, %v884_v22 }
 0x148   : > { %5325 = vmatprep.subr.bf16.mxu1 %v5324_v29 }
 0x149   : > { %5327 = vmatpush3.bf16.msra.mxu1 %v5324_v29 }
 0x14c   : > { %5087 = vmatmul.mubr.msk.f32.vlgmr.msra.gmra.mrb[0].mxu1 %vm795_vm0, %v6070_v20 }
 0x14d   : > { %5089 = vmatprep.mubr.msk.f32.mxu1 %vm795_vm0, %v6077_v61 }
 0x150   : > { %5090 = vmatmul.mubr.msk.f32.gmra.mrb[2].mxu1 %vm795_vm0, %v6082_v7 }
 0x151   : > { %5103 = vmatprep.mubr.msk.f32.mxu1 %vm990_vm1, %v6105_v35 }
 0x21f   : > { %v5088_v45 = vpop.f32.mrb[0].mxu1 }
 0x220   : > { %992 = vst.msk [vmem:[%s6092_s19 + $0x8] sm:$0xff] %vm990_vm1, %v5088_v45  ;;  %1000 = vrot.lane.b32.xlu0 %v5088_v45, %s5505_s20  ;;  %v971_v34 = vpop.f32.mrb[1].mxu1 }
 0x221   : > { %991 = vst.msk [vmem:[%s6092_s19] sm:$0xff] %vm990_vm1, %v971_v34  ;;  %5096 = vmatprep.mubr.msk.f32.mxu0 %vm990_vm1, %v971_v34 }
 0x222   : > { %5097 = vmatmul.mubr.msk.f32.vlgmr.msra.gmra.mrb[4].mxu0 %vm990_vm1, %v5088_v45 }
 0x223   : > { %v5091_v46 = vpop.f32.mrb[2].mxu1  ;;  %5107 = vmatpush3.msra.mxu0 %v6130_v33  ;;  %5108 = vmatprep.mubr.msk.f32.mxu0 %vm5507_vm2, %v6978_v5 }
 0x224   : > { %998 = vrot.lane.b32.xlu0 %v971_v34, %s5505_s20  ;;  %4560 = vst.msk [vmem:[%s6092_s19 + $0x48] sm:$0xff] %vm990_vm1, %v5091_v46  ;;  %1011 = vrot.lane.b32.xlu1 %v5091_v46, %s5505_s20  ;;  %v981_v60 = vpop.f32.mrb[3].mxu1  ;;  %v6161_v34 = vld [vmem:[%s6946_s9] sm:$0xf] }
 0x225   : > { %4559 = vst.msk [vmem:[%s6092_s19 + $0x40] sm:$0xff] %vm990_vm1, %v981_v60  ;;  %5116 = vmatprep.subr.mxu0 %v6978_v5  ;;  %7044 = vst [vmem:[#allocation33_spill] sm:$0xff] %v6161_v34  ;;  %v6173_v46 = vld [vmem:[%s6945_s8] sm:$0xff] }
 0x226   : > { %7045 = vst [vmem:[#allocation34_spill] sm:$0xff] %v6173_v46 }
 0x228   : > { %1009 = vrot.lane.b32.xlu1 %v981_v60, %s5505_s20 }
 0x292   : > { %v1001_v28 = vpop.permute.xlu0 %1000 }
 0x293   : > { %4562 = vst.msk [vmem:[%s6092_s19 + $0x58] sm:$0xff] %vm990_vm1, %v1001_v28 }
 0x296   : > { %v999_v62 = vpop.permute.xlu0 %998  ;;  %v1012_v55 = vpop.permute.xlu1 %1011 }
 0x297   : > { %4561 = vst.msk [vmem:[%s6092_s19 + $0x50] sm:$0xff] %vm990_vm1, %v999_v62  ;;  %4564 = vst.msk [vmem:[%s6092_s19 + $0x68] sm:$0xff] %vm990_vm1, %v1012_v55 }
 0x29a   : > { %v1010_v22 = vpop.permute.xlu1 %1009 }
 0x29b   : > { %4563 = vst.msk [vmem:[%s6092_s19 + $0x60] sm:$0xff] %vm990_vm1, %v1010_v22 }
 0x2f5   : > { %v5098_v59 = vpop.f32.mrb[4].mxu0 }
 0x2f6   : > { %v1088_v36 = vpop.f32.mrb[5].mxu0 }
 0x2f7   : > { %v5332_v10 = vpack.c.bf16 %v5098_v59, %v1088_v36  ;;  %v1523_v36 = vstv %s4584_s25  ;;  %s4625_s25 = sld [smem:[#allocation2 + $0x481]] }
 0x2f8   : > { %v1524_v55 = vmul.f32 %v1523_v36, %v5667_v6 }
 0x2f9   : > { %5333 = vmatprep.subr.bf16.mxu1 %v5332_v10 }
 0x2fa   : > { %5335 = vmatpush3.bf16.msra.mxu1 %v5332_v10  ;;  %v1537_v10 = vstv %s4585_s26  ;;  %s4630_s26 = sld [smem:[#allocation2 + $0x501]] }
 0x2fb   : > { %5111 = vmatprep.subr.mxu1 %v6978_v5  ;;  %v1538_v22 = vmul.f32 %v5672_v8, %v1537_v10  ;;  %v1540_v6 = vmul.f32 %v5775_v53, %v1537_v10 }
 0x2fd   : > { %5104 = vmatmul.mubr.msk.f32.vlgmr.msra.gmra.mrb[4].mxu1 %vm990_vm1, %v6122_v24  ;;  %v1579_v24 = vstv %s4600_s30  ;;  %s4645_s30 = sld [smem:[#allocation2 + $0x681]] }
 0x2fe   : > { %5113 = vmatprep.mubr.msk.f32.mxu1 %vm5507_vm2, %v6978_v5 }
 0x3d0   : > { %v5105_v29 = vpop.f32.mrb[4].mxu1 }
 0x3d1   : > { %4569 = vst.msk [vmem:[%s6147_s15 + $0x20] sm:$0xff] %vm1178_vm3, %v5105_v29  ;;  %1189 = vrot.lane.b32.xlu1 %v5105_v29, %s5508_s16  ;;  %v1169_v45 = vpop.f32.mrb[5].mxu1  ;;  %v1551_v29 = vstv %s4590_s27  ;;  %s4635_s27 = sld [smem:[#allocation2 + $0x581]] }
 0x3d2   : > { %1179 = vst.msk [vmem:[%s6147_s15] sm:$0xff] %vm1178_vm3, %v1169_v45  ;;  %1183 = vrot.lane.b32.xlu0 %v1169_v45, %s5508_s16  ;;  %5109 = vmatmul.mubr.msk.f32.vlgmr.msra.gmra.mrb[6].mxu0 %vm1178_vm3, %v1169_v45  ;;  %v1542_v45 = vadd.f32 %v1538_v22, %v1524_v55  ;;  %v1553_v55 = vmul.f32 %v5740_v37, %v1551_v29 }
 0x3d3   : > { %5118 = vmatprep.mubr.msk.f32.mxu0 %vm5507_vm2, %v6978_v5  ;;  %5117 = vmatpush3.msk.msra.mxu0 %vm1355_vm4, %v6161_v34  ;;  %v1526_v34 = vmul.f32 %v1523_v36, %v5772_v52  ;;  %v1541_v22 = vmul.f32 %v5854_v4, %v1537_v10 }
 0x3d4   : > { %5337 = vmatprep.subr.bf16.mxu0 %v5647_v3 }
 0x443   : > { %v1190_v28 = vpop.permute.xlu1 %1189 }
 0x444   : > { %4571 = vst.msk [vmem:[%s6147_s15 + $0x30] sm:$0xff] %vm1178_vm3, %v1190_v28  ;;  %v1184_v62 = vpop.permute.xlu0 %1183  ;;  %v1552_v28 = vmul.f32 %v5675_v9, %v1551_v29  ;;  %v1527_v9 = vmul.f32 %v1523_v36, %v5847_v50 }
 0x445   : > { %4570 = vst.msk [vmem:[%s6147_s15 + $0x28] sm:$0xff] %vm1178_vm3, %v1184_v62  ;;  %v1565_v62 = vstv %s4595_s28  ;;  %s4640_s28 = sld [smem:[#allocation2 + $0x601]] }
 0x446   : > { %v1567_v53 = vmul.f32 %v5743_v38, %v1565_v62  ;;  %v1568_v4 = vmul.f32 %v5802_v0, %v1565_v62 }
 0x4a5   : > { %v1262_v60 = vpop.f32.mrb[6].mxu0 }
 0x4a6   : > { %v5110_v59 = vpop.f32.mrb[7].mxu0  ;;  %5112 = vmatpush3.msra.mxu1 %v1262_v60  ;;  %v1525_v60 = vmul.f32 %v1523_v36, %v5708_v25  ;;  %v1580_v25 = vmul.f32 %v5694_v17, %v1579_v24 }
 0x4a7   : > { %5114 = vmatmul.mubr.msk.f32.vlgmr.msra.gmra.mrb[6].mxu1 %vm1178_vm3, %v6173_v46  ;;  %5121 = vmatprep.subr.mxu1 %v6978_v5  ;;  %v1539_v59 = vmul.f32 %v5711_v26, %v1537_v10  ;;  %v1566_v46 = vmul.f32 %v5684_v13, %v1565_v62  ;;  %v1544_v26 = vadd.f32 %v1540_v6, %v1526_v34  ;;  %v1593_v13 = vstv %s4605_s21  ;;  %s4650_s21 = sld [smem:[#allocation2 + $0x701]] }
 0x4a8   : > { %5123 = vmatprep.mubr.msk.f32.mxu1 %vm5507_vm2, %v6978_v5  ;;  %v1556_v5 = vadd.f32 %v1552_v28, %v1542_v45  ;;  %v1554_v45 = vmul.f32 %v5786_v58, %v1551_v29  ;;  %v1545_v28 = vadd.f32 %v1541_v22, %v1527_v9  ;;  %v1594_v37 = vmul.f32 %v5701_v21, %v1593_v13  ;;  %v7046_v9 = vld [vmem:[#allocation18_spill] sm:$0xff]  ;;  %v7047_v22 = vld [vmem:[#allocation12_spill] sm:$0xff] }
 0x4a9   : > { %v1543_v8 = vadd.f32 %v1539_v59, %v1525_v60  ;;  %v1555_v60 = vmul.f32 %v5857_v14, %v1551_v29  ;;  %v1581_v34 = vmul.f32 %v5753_v44, %v1579_v24  ;;  %v1582_v14 = vmul.f32 %v5827_v30, %v1579_v24 }
 0x4aa   : > { %v1570_v33 = vadd.f32 %v1566_v46, %v1556_v5  ;;  %v1558_v50 = vadd.f32 %v1554_v45, %v1544_v26  ;;  %v1607_v5 = vstv %s4610_s22  ;;  %v1569_v46 = vmul.f32 %v5882_v1, %v1565_v62  ;;  %s4655_s22 = sld [smem:[#allocation2 + $0x781]] }
 0x4ab   : > { %v1557_v52 = vadd.f32 %v1553_v55, %v1543_v8  ;;  %v1559_v58 = vadd.f32 %v1555_v60, %v1545_v28  ;;  %v1608_v38 = vmul.f32 %v5714_v27, %v1607_v5  ;;  %v1595_v29 = vmul.f32 %v5769_v51, %v1593_v13  ;;  %v7049_v28 = vld [vmem:[#allocation15_spill] sm:$0xff] }
 0x4ac   : > { %v1584_v59 = vadd.f32 %v1580_v25, %v1570_v33  ;;  %v1572_v10 = vadd.f32 %v1568_v4, %v1558_v50  ;;  %v1621_v33 = vstv %s4615_s23  ;;  %v1583_v6 = vmul.f32 %v5905_v39, %v1579_v24  ;;  %v7050_v4 = vld [vmem:[#allocation10_spill] sm:$0xff]  ;;  %s4660_s23 = sld [smem:[#allocation4 + $0x1]] }
 0x4ad   : > { %v1571_v17 = vadd.f32 %v1567_v53, %v1557_v52  ;;  %v1573_v0 = vadd.f32 %v1569_v46, %v1559_v58  ;;  %v1622_v44 = vmul.f32 %v5729_v32, %v1621_v33  ;;  %v1596_v1 = vmul.f32 %v7046_v9, %v1593_v13  ;;  %v7048_v52 = vld [vmem:[#allocation9_spill] sm:$0xff]  ;;  %v7051_v58 = vld [vmem:[#allocation22_spill] sm:$0xff] }
 0x4ae   : > { %v1598_v36 = vadd.f32 %v1594_v37, %v1584_v59  ;;  %v1586_v55 = vadd.f32 %v1582_v14, %v1572_v10  ;;  %v1635_v62 = vstv %s4620_s24  ;;  %v1609_v25 = vmul.f32 %v7047_v22, %v1607_v5  ;;  %v7056_v22 = vld [vmem:[#allocation13_spill] sm:$0xff]  ;;  %s4934_s24 = sshll.u32 %s7131_s17, 6 }
 0x4af   : > { %v1585_v21 = vadd.f32 %v1581_v34, %v1571_v17  ;;  %v1587_v30 = vadd.f32 %v1583_v6, %v1573_v0  ;;  %v1597_v26 = vmul.f32 %v5922_v48, %v1593_v13  ;;  %v1636_v51 = vmul.f32 %v7048_v52, %v1635_v62  ;;  %v7054_v6 = vld [vmem:[#allocation25_spill] sm:$0xff] }
 0x4b0   : > { %v1612_v8 = vadd.f32 %v1608_v38, %v1598_v36  ;;  %v1600_v53 = vadd.f32 %v1596_v1, %v1586_v55  ;;  %v1610_v39 = vmul.f32 %v5872_v41, %v1607_v5  ;;  %v1649_v24 = vstv %s4625_s25  ;;  %v7052_v36 = vld [vmem:[#allocation17_spill] sm:$0xff] }
 0x4b1   : > { %v1599_v27 = vadd.f32 %v1595_v29, %v1585_v21  ;;  %v1623_v60 = vmul.f32 %v7049_v28, %v1621_v33  ;;  %v1601_v59 = vadd.f32 %v1597_v26, %v1587_v30  ;;  %v1611_v37 = vmul.f32 %v5939_v19, %v1607_v5  ;;  %v7053_v21 = vld [vmem:[#allocation11_spill] sm:$0xff] }
 0x4b2   : > { %v1626_v45 = vadd.f32 %v1622_v44, %v1612_v8  ;;  %v1650_v17 = vmul.f32 %v7050_v4, %v1649_v24  ;;  %v1614_v34 = vadd.f32 %v1610_v39, %v1600_v53  ;;  %v1624_v48 = vmul.f32 %v7051_v58, %v1621_v33  ;;  %v7055_v44 = vld [vmem:[#allocation19_spill] sm:$0xff] }
 0x4b3   : > { %v1613_v32 = vadd.f32 %v1609_v25, %v1599_v27  ;;  %v1663_v13 = vstv %s4630_s26  ;;  %v1637_v38 = vmul.f32 %v7052_v36, %v1635_v62  ;;  %v1615_v41 = vadd.f32 %v1611_v37, %v1601_v59  ;;  %v7059_v37 = vld [vmem:[#allocation24_spill] sm:$0xff]  ;;  %v7061_v36 = vld [vmem:[#allocation26_spill] sm:$0xff]  ;;  %s5510_s26 = smov 126  }
 0x4b4   : > { %v1640_v50 = vadd.f32 %v1636_v51, %v1626_v45  ;;  %v1625_v10 = vmul.f32 %v5957_v11, %v1621_v33  ;;  %v1664_v29 = vmul.f32 %v7053_v21, %v1663_v13  ;;  %v1628_v0 = vadd.f32 %v1624_v48, %v1614_v34  ;;  %v7057_v45 = vld [vmem:[#allocation21_spill] sm:$0xff]  ;;  %v7060_v34 = vld [vmem:[#allocation16_spill] sm:$0xff] }
 0x4b5   : > { %v1627_v46 = vadd.f32 %v1623_v60, %v1613_v32  ;;  %v1638_v19 = vmul.f32 %v7054_v6, %v1635_v62  ;;  %v1677_v5 = vstv %s4635_s27  ;;  %v1651_v55 = vmul.f32 %v7055_v44, %v1649_v24  ;;  %v7058_v32 = vld [vmem:[#allocation14_spill] sm:$0xff]  ;;  %s6246_s27 = scalar_lea.vmem %s6950_s13, %s4934_s24  ;;  %s4720_s24 = sld [smem:[#allocation2 + $0x282]] }
 0x4b6   : > { %v1654_v14 = vadd.f32 %v1650_v17, %v1640_v50  ;;  %v1629_v9 = vadd.f32 %v1625_v10, %v1615_v41  ;;  %v1639_v1 = vmul.f32 %v5972_v56, %v1635_v62  ;;  %v1678_v25 = vmul.f32 %v7056_v22, %v1677_v5  ;;  %v7066_v22 = vld [vmem:[#allocation28_spill] sm:$0xff] }
 0x4b7   : > { %v1641_v8 = vadd.f32 %v1637_v38, %v1627_v46  ;;  %v1642_v30 = vadd.f32 %v1638_v19, %v1628_v0  ;;  %v1652_v11 = vmul.f32 %v5930_v16, %v1649_v24  ;;  %v1691_v33 = vstv %s4640_s28  ;;  %v7063_v0 = vld [vmem:[#allocation30_spill] sm:$0xff]  ;;  %v7064_v19 = vld [vmem:[#allocation27_spill] sm:$0xff]  ;;  %s5509_s28 = smov 124  }
 0x4b8   : > { %v1668_v27 = vadd.f32 %v1664_v29, %v1654_v14  ;;  %v1665_v52 = vmul.f32 %v7057_v45, %v1663_v13  ;;  %v1643_v51 = vadd.f32 %v1639_v1, %v1629_v9  ;;  %v1653_v53 = vmul.f32 %v5988_v42, %v1649_v24  ;;  %v7062_v14 = vld [vmem:[#allocation20_spill] sm:$0xff]  ;;  %v7065_v9 = vld [vmem:[#allocation23_spill] sm:$0xff] }
 0x4b9   : > { %v1655_v26 = vadd.f32 %v1651_v55, %v1641_v8  ;;  %v1692_v28 = vmul.f32 %v7058_v32, %v1691_v33  ;;  %v1656_v60 = vadd.f32 %v1652_v11, %v1642_v30  ;;  %v1666_v56 = vmul.f32 %v5948_v2, %v1663_v13 }
 0x4ba   : > { %v1682_v39 = vadd.f32 %v1678_v25, %v1668_v27  ;;  %v1705_v62 = vstv %s4645_s30  ;;  %v1679_v50 = vmul.f32 %v7059_v37, %v1677_v5  ;;  %v1657_v16 = vadd.f32 %v1653_v53, %v1643_v51  ;;  %s4700_s30 = sld [smem:[#allocation2 + $0x82]] }
 0x4bb   : > { %v1669_v59 = vadd.f32 %v1665_v52, %v1655_v26  ;;  %v1667_v4 = vmul.f32 %v6001_v54, %v1663_v13  ;;  %v1706_v58 = vmul.f32 %v7060_v34, %v1705_v62  ;;  %v1670_v48 = vadd.f32 %v1666_v56, %v1656_v60  ;;  %v6273_v34 = vld [vmem:[%s6947_s10] sm:$0xf] }
 0x4bc   : > { %v1696_v17 = vadd.f32 %v1692_v28, %v1682_v39  ;;  %v1680_v42 = vmul.f32 %v5963_v57, %v1677_v5  ;;  %v1719_v24 = vstv %s4650_s21  ;;  %v1693_v38 = vmul.f32 %v7061_v36, %v1691_v33  ;;  %s4705_s21 = sld [smem:[#allocation2 + $0x102]] }
 0x4bd   : > { %v1683_v46 = vadd.f32 %v1679_v50, %v1669_v59  ;;  %v1671_v41 = vadd.f32 %v1667_v4, %v1657_v16  ;;  %v1681_v2 = vmul.f32 %v6011_v47, %v1677_v5  ;;  %v1720_v21 = vmul.f32 %v7062_v14, %v1719_v24  ;;  %v7068_v59 = vld [vmem:[#allocation8_spill] sm:$0xff] }
 0x4be   : > { %v1710_v10 = vadd.f32 %v1706_v58, %v1696_v17  ;;  %v1684_v29 = vadd.f32 %v1680_v42, %v1670_v48  ;;  %v1694_v6 = vmul.f32 %v7063_v0, %v1691_v33  ;;  %v1733_v54 = vstv %s4655_s22  ;;  %s4935_s22 = sshll.u32 %s7131_s17, 5  ;;  %s4699_s17 = sld [smem:[#allocation2 + $0x2]] }
 0x4bf   : > { %v1697_v13 = vadd.f32 %v1693_v38, %v1683_v46  ;;  %v1707_v8 = vmul.f32 %v7064_v19, %v1705_v62  ;;  %v1685_v57 = vadd.f32 %v1681_v2, %v1671_v41  ;;  %v1695_v44 = vmul.f32 %v6021_v63, %v1691_v33  ;;  %v7067_v33 = vld [vmem:[#allocation29_spill] sm:$0xff]  ;;  %s6292_s25 = scalar_lea.vmem %s6951_s14, %s4935_s22  ;;  %s4710_s22 = sld [smem:[#allocation2 + $0x182]] }
 0x4c0   : > { %v1724_v55 = vadd.f32 %v1720_v21, %v1710_v10  ;;  %v1734_v1 = vmul.f32 %v7065_v9, %v1733_v54  ;;  %v1698_v27 = vadd.f32 %v1694_v6, %v1684_v29  ;;  %v1708_v47 = vmul.f32 %v5992_v12, %v1705_v62 }
 0x4c1   : > { %v1711_v5 = vadd.f32 %v1707_v8, %v1697_v13  ;;  %v1721_v25 = vmul.f32 %v7066_v22, %v1719_v24  ;;  %v1699_v30 = vadd.f32 %v1695_v44, %v1685_v57  ;;  %v1709_v11 = vmul.f32 %v6029_v31, %v1705_v62  ;;  %v7071_v13 = vld [vmem:[#allocation31_spill] sm:$0xff]  ;;  %v6356_v22 = vld [vmem:[%s5664_s18] sm:$0xff] }
 0x4c2   : > { %v1738_v26 = vadd.f32 %v1734_v1, %v1724_v55  ;;  %v1712_v45 = vadd.f32 %v1708_v47, %v1698_v27  ;;  %v1722_v52 = vmul.f32 %v6004_v49, %v1719_v24  ;;  %v1743_v51 = vstv %s4660_s23  ;;  %v7072_v55 = vld [vmem:[#allocation33_spill] sm:$0xff]  ;;  %s4715_s23 = sld [smem:[#allocation2 + $0x202]] }
 0x4c3   : > { %v1725_v63 = vadd.f32 %v1721_v25, %v1711_v5  ;;  %v1735_v53 = vmul.f32 %v7067_v33, %v1733_v54  ;;  %v1713_v39 = vadd.f32 %v1709_v11, %v1699_v30  ;;  %v1723_v12 = vmul.f32 %v6035_v18, %v1719_v24  ;;  %v7073_v5 = vld [vmem:[#allocation34_spill] sm:$0xff]  ;;  %v6359_v30 = vld [vmem:[%s5664_s18 + $0x20] sm:$0xff] }
 0x4c4   : > { %v1744_v31 = vadd.f32 %v1743_v51, %v1738_v26  ;;  %v1726_v49 = vadd.f32 %v1722_v52, %v1712_v45  ;;  %v1736_v32 = vmul.f32 %v6014_v43, %v1733_v54  ;;  %v1737_v62 = vmul.f32 %v6040_v40, %v1733_v54  ;;  %v6364_v52 = vld [vmem:[%s5664_s18 + $0x40] sm:$0xff] }
 0x4c5   : > { %v1739_v60 = vadd.f32 %v1735_v53, %v1725_v63  ;;  %v1727_v56 = vadd.f32 %v1723_v12, %v1713_v39  ;;  %v7069_v40 = vmov 0.0   ;;  %v2444_v25 = vstv %s4699_s17  ;;  %v6368_v53 = vld [vmem:[%s5664_s18 + $0x8] sm:$0xff]  ;;  %v6374_v12 = vld [vmem:[%s5664_s18 + $0x60] sm:$0xff]  ;;  %s4725_s17 = sld [smem:[#allocation2 + $0x302]] }
 0x4c6   : > { %v1740_v43 = vadd.f32 %v1736_v32, %v1726_v49  ;;  %v2458_v11 = vstv %s4700_s30  ;;  %v2445_v26 = vmul.f32 %v2444_v25, %v6356_v22  ;;  %v6371_v39 = vld [vmem:[%s5664_s18 + $0x28] sm:$0xff]  ;;  %v6377_v49 = vld [vmem:[%s5664_s18 + $0x10] sm:$0xff]  ;;  %s4730_s30 = sld [smem:[#allocation2 + $0x382]] }
 0x4c7   : > { %v1745_v37 = vadd.f32 %v1743_v51, %v1739_v60  ;;  %v1741_v50 = vadd.f32 %v1737_v62, %v1727_v56  ;;  %v2459_v45 = vmul.f32 %v6359_v30, %v2458_v11  ;;  %v6380_v32 = vld [vmem:[%s5664_s18 + $0x30] sm:$0xff]  ;;  %v6386_v62 = vld [vmem:[%s5664_s18 + $0x48] sm:$0xff] }
 0x4c8   : > { %v1746_v16 = vadd.f32 %v1743_v51, %v1740_v43  ;;  %v2447_v43 = vmul.f32 %v2444_v25, %v6377_v49 }
 0x4c9   : > { %v1747_v4 = vadd.f32 %v1743_v51, %v1741_v50  ;;  %v2472_v51 = vstv %s4705_s21  ;;  %v2463_v63 = vadd.f32 %v2459_v45, %v2445_v26  ;;  %v6391_v50 = vld [vmem:[%s5664_s18 + $0x18] sm:$0xff]  ;;  %s4735_s21 = sld [smem:[#allocation2 + $0x402]] }
 0x4ca   : > { %v2473_v33 = vmul.f32 %v6364_v52, %v2472_v51 }
 0x4cc   : > { %v2477_v60 = vadd.f32 %v2473_v33, %v2463_v63  ;;  %v6446_v63 = vld [vmem:[%s5664_s18 + $0xe0] sm:$0xff]  ;;  %v2542_v33 = vstv %s4730_s30  ;;  %s4760_s30 = sld [smem:[#allocation2 + $0x682]] }
 0x57a   : > { %v1335_v28 = vpop.f32.mrb[6].mxu1 }
 0x57b   : > { %1340 = vst.msk [vmem:[%s6246_s27] sm:$0xf] %vm1339_vm5, %v1335_v28  ;;  %1345 = vrot.lane.b32.xlu0 %v1335_v28, %s5509_s28  ;;  %v5115_v18 = vpop.f32.mrb[7].mxu1  ;;  %5119 = vmatmul.mubr.msk.f32.vlgmr.msra.gmra.mrb[8].mxu0 %vm1352_vm7, %v1335_v28 }
 0x57c   : > { %4574 = vst.msk [vmem:[%s6246_s27 + $0xc] sm:$0xf0] %vm1342_vm6, %v1335_v28  ;;  %5339 = vmatpush3.bf16.msra.mxu0 %v5647_v3  ;;  %5134 = vmatprep.mubr.msk.f32.mxu0 %vm795_vm0, %v1744_v31  ;;  %v2486_v31 = vstv %s4710_s22  ;;  %v2446_v28 = vmul.f32 %v2444_v25, %v6368_v53  ;;  %v2460_v18 = vmul.f32 %v6371_v39, %v2458_v11  ;;  %s4740_s22 = sld [smem:[#allocation2 + $0x482]] }
 0x57d   : > { %5341 = vmatprep.subr.bf16.mxu0 %v7068_v59  ;;  %v2487_v56 = vmul.f32 %v6374_v12, %v2486_v31 }
 0x580   : > { %5343 = vmatpush3.bf16.msra.mxu0 %v7068_v59 }
 0x581   : > { %5353 = vmatprep.subr.bf16.mxu0 %v6063_v15 }
 0x583   : > { %5135 = vmatmul.mubr.msk.f32.vlgmr.msra.gmra.mrb[10].mxu0 %vm795_vm0, %v1745_v37  ;;  %v2461_v37 = vmul.f32 %v6380_v32, %v2458_v11 }
 0x584   : > { %5137 = vmatprep.mubr.msk.f32.mxu0 %vm795_vm0, %v1746_v16  ;;  %5355 = vmatpush3.bf16.msra.mxu0 %v6063_v15  ;;  %v6394_v16 = vld [vmem:[%s5664_s18 + $0x38] sm:$0xff] }
 0x585   : > { %5168 = vmatprep.subr.mxu0 %v7069_v40 }
 0x587   : > { %5138 = vmatmul.mubr.msk.f32.gmra.mrb[12].mxu0 %vm795_vm0, %v1747_v4  ;;  %v6397_v4 = vld [vmem:[%s5664_s18 + $0x80] sm:$0xff] }
 0x5ed   : > { %v1346_v17 = vpop.permute.xlu0 %1345 }
 0x5ee   : > { %4575 = vst.msk [vmem:[%s6246_s27 + $0x14] sm:$0xf] %vm1339_vm5, %v1346_v17 }
 0x5ef   : > { %4576 = vst.msk [vmem:[%s6246_s27 + $0x14] sm:$0xf0] %vm1342_vm6, %v1346_v17  ;;  %v2500_v17 = vstv %s4715_s23  ;;  %s4745_s23 = sld [smem:[#allocation2 + $0x502]] }
 0x64e   : > { %v1425_v58 = vpop.f32.mrb[8].mxu0 }
 0x64f   : > { %v5120_v48 = vpop.f32.mrb[9].mxu0  ;;  %5122 = vmatpush3.msk.msra.mxu1 %vm1355_vm4, %v1425_v58  ;;  %v6400_v58 = vld [vmem:[%s5664_s18 + $0x50] sm:$0xff] }
 0x650   : > { %5124 = vmatmul.mubr.msk.f32.vlgmr.msra.gmra.mrb[8].mxu1 %vm1352_vm7, %v6273_v34  ;;  %v2464_v48 = vadd.f32 %v2460_v18, %v2446_v28  ;;  %v6449_v28 = vld [vmem:[%s5664_s18 + $0xb0] sm:$0xff] }
 0x651   : > { %5148 = vmatprep.mubr.msk.f32.mxu1 %vm795_vm0, %v6053_v23 }
 0x656   : > { %v5136_v42 = vpop.f32.mrb[10].mxu0 }
 0x657   : > { %v1826_v24 = vpop.f32.mrb[11].mxu0 }
 0x658   : > { %v5344_v46 = vpack.c.bf16 %v5136_v42, %v1826_v24  ;;  %v2474_v42 = vmul.f32 %v6386_v62, %v2472_v51  ;;  %v2448_v24 = vmul.f32 %v2444_v25, %v6391_v50 }
 0x65a   : > { %v5139_v36 = vpop.f32.mrb[12].mxu0  ;;  %5345 = vmatprep.subr.bf16.mxu1 %v5344_v46 }
 0x65b   : > { %v1836_v38 = vpop.f32.mrb[13].mxu0  ;;  %5347 = vmatpush3.bf16.msra.mxu1 %v5344_v46  ;;  %v2462_v46 = vmul.f32 %v6394_v16, %v2458_v11  ;;  %v6439_v11 = vld [vmem:[%s5664_s18 + $0xa8] sm:$0xff] }
 0x65c   : > { %v5348_v41 = vpack.c.bf16 %v5139_v36, %v1836_v38  ;;  %v2491_v36 = vadd.f32 %v2487_v56, %v2477_v60  ;;  %v2501_v38 = vmul.f32 %v6397_v4, %v2500_v17 }
 0x65e   : > { %5349 = vmatprep.subr.bf16.mxu1 %v5348_v41 }
 0x65f   : > { %5351 = vmatpush3.bf16.msra.mxu1 %v5348_v41  ;;  %v6407_v41 = vld [vmem:[%s5664_s18 + $0x68] sm:$0xff] }
 0x662   : > { %5149 = vmatmul.mubr.msk.f32.vlgmr.msra.gmra.mrb[10].mxu1 %vm795_vm0, %v6070_v20 }
 0x663   : > { %5151 = vmatprep.mubr.msk.f32.mxu1 %vm795_vm0, %v6077_v61 }
 0x666   : > { %5152 = vmatmul.mubr.msk.f32.gmra.mrb[12].mxu1 %vm795_vm0, %v6082_v7 }
 0x667   : > { %5165 = vmatprep.mubr.msk.f32.mxu1 %vm990_vm1, %v6105_v35  ;;  %v7070_v35 = vld [vmem:[#allocation32_spill] sm:$0xff] }
 0x723   : > { %v1501_v23 = vpop.f32.mrb[8].mxu1 }
 0x724   : > { %1506 = vst.msk [vmem:[%s6292_s25] sm:$0x3] %vm1505_vm8, %v1501_v23  ;;  %v5125_v20 = vpop.f32.mrb[9].mxu1  ;;  %1511 = vrot.lane.b32.xlu1 %v1501_v23, %s5510_s26 }
 0x725   : > { %4581 = vst.msk [vmem:[%s6292_s25 + $0x6] sm:$0xc] %vm1508_vm9, %v1501_v23  ;;  %v2465_v23 = vadd.f32 %v2461_v37, %v2447_v43  ;;  %v2475_v20 = vmul.f32 %v6400_v58, %v2472_v51  ;;  %v2543_v37 = vmul.f32 %v6446_v63, %v2542_v33 }
 0x735   : > { %v5150_v61 = vpop.f32.mrb[10].mxu1 }
 0x736   : > { %4670 = vst.msk [vmem:[%s6092_s19 + $0x18] sm:$0xff] %vm990_vm1, %v5150_v61  ;;  %1940 = vrot.lane.b32.xlu1 %v5150_v61, %s5505_s20  ;;  %v1911_v7 = vpop.f32.mrb[11].mxu1 }
 0x737   : > { %4669 = vst.msk [vmem:[%s6092_s19 + $0x10] sm:$0xff] %vm990_vm1, %v1911_v7  ;;  %1938 = vrot.lane.b32.xlu0 %v1911_v7, %s5505_s20  ;;  %5158 = vmatprep.mubr.msk.f32.mxu0 %vm990_vm1, %v1911_v7  ;;  %v6414_v7 = vld [vmem:[%s5664_s18 + $0xa0] sm:$0xff] }
 0x738   : > { %5159 = vmatmul.mubr.msk.f32.vlgmr.msra.gmra.mrb[14].mxu0 %vm990_vm1, %v5150_v61  ;;  %v6411_v61 = vld [vmem:[%s5664_s18 + $0x58] sm:$0xff] }
 0x739   : > { %5169 = vmatpush3.msra.mxu0 %v7070_v35  ;;  %5170 = vmatprep.mubr.msk.f32.mxu0 %vm5507_vm2, %v7069_v40  ;;  %v5153_v2 = vpop.f32.mrb[12].mxu1  ;;  %v2514_v35 = vstv %s4720_s24  ;;  %s4750_s24 = sld [smem:[#allocation2 + $0x582]] }
 0x73a   : > { %5178 = vmatprep.subr.mxu0 %v7069_v40  ;;  %4672 = vst.msk [vmem:[%s6092_s19 + $0x78] sm:$0xff] %vm990_vm1, %v5153_v2  ;;  %v1921_v10 = vpop.f32.mrb[13].mxu1  ;;  %1951 = vrot.lane.b32.xlu1 %v5153_v2, %s5505_s20  ;;  %v6417_v2 = vld [vmem:[%s5664_s18 + $0x70] sm:$0xff]  ;;  %v2516_v18 = vmul.f32 %v6439_v11, %v2514_v35 }
 0x73b   : > { %4671 = vst.msk [vmem:[%s6092_s19 + $0x70] sm:$0xff] %vm990_vm1, %v1921_v10  ;;  %1949 = vrot.lane.b32.xlu0 %v1921_v10, %s5505_s20  ;;  %v2478_v10 = vadd.f32 %v2474_v42, %v2464_v48  ;;  %v6455_v48 = vld [vmem:[%s5664_s18 + $0xc8] sm:$0xff] }
 0x796   : > { %v1512_v14 = vpop.permute.xlu1 %1511 }
 0x797   : > { %4582 = vst.msk [vmem:[%s6292_s25 + $0xa] sm:$0x3] %vm1505_vm8, %v1512_v14 }
 0x798   : > { %4583 = vst.msk [vmem:[%s6292_s25 + $0xa] sm:$0xc] %vm1508_vm9, %v1512_v14  ;;  %v2488_v14 = vmul.f32 %v6407_v41, %v2486_v31 }
 0x7a8   : > { %v1941_v21 = vpop.permute.xlu1 %1940 }
 0x7a9   : > { %4674 = vst.msk [vmem:[%s6092_s19 + $0x88] sm:$0xff] %vm990_vm1, %v1941_v21  ;;  %v1939_v29 = vpop.permute.xlu0 %1938  ;;  %v2466_v21 = vadd.f32 %v2462_v46, %v2448_v24  ;;  %v2517_v24 = vmul.f32 %v6449_v28, %v2514_v35  ;;  %v6459_v46 = vld [vmem:[%s5664_s18 + $0xb8] sm:$0xff] }
 0x7aa   : > { %4673 = vst.msk [vmem:[%s6092_s19 + $0x80] sm:$0xff] %vm990_vm1, %v1939_v29  ;;  %v2476_v29 = vmul.f32 %v6411_v61, %v2472_v51  ;;  %v6443_v51 = vld [vmem:[%s5664_s18 + $0x98] sm:$0xff] }
 0x7ab   : > { %v2504_v56 = vmul.f32 %v6443_v51, %v2500_v17 }
 0x7ac   : > { %v1952_v19 = vpop.permute.xlu1 %1951 }
 0x7ad   : > { %v1950_v8 = vpop.permute.xlu0 %1949  ;;  %4676 = vst.msk [vmem:[%s6092_s19 + $0x98] sm:$0xff] %vm990_vm1, %v1952_v19  ;;  %v2489_v19 = vmul.f32 %v6417_v2, %v2486_v31 }
 0x7ae   : > { %4675 = vst.msk [vmem:[%s6092_s19 + $0x90] sm:$0xff] %vm990_vm1, %v1950_v8  ;;  %v6427_v8 = vld [vmem:[%s5664_s18 + $0x78] sm:$0xff] }
 0x80b   : > { %v5160_v0 = vpop.f32.mrb[14].mxu0 }
 0x80c   : > { %v2028_v6 = vpop.f32.mrb[15].mxu0 }
 0x80d   : > { %v5356_v54 = vpack.c.bf16 %v5160_v0, %v2028_v6  ;;  %v2505_v0 = vadd.f32 %v2501_v38, %v2491_v36  ;;  %v2515_v6 = vmul.f32 %v6414_v7, %v2514_v35  ;;  %v6462_v36 = vld [vmem:[%s5664_s18 + $0x100] sm:$0xff]  ;;  %v2556_v38 = vstv %s4735_s21  ;;  %s4765_s21 = sld [smem:[#allocation2 + $0x702]] }
 0x80f   : > { %5357 = vmatprep.subr.bf16.mxu1 %v5356_v54 }
 0x810   : > { %5359 = vmatpush3.bf16.msra.mxu1 %v5356_v54  ;;  %v6423_v54 = vld [vmem:[%s5664_s18 + $0x88] sm:$0xff] }
 0x811   : > { %5173 = vmatprep.subr.mxu1 %v7069_v40 }
 0x813   : > { %5166 = vmatmul.mubr.msk.f32.vlgmr.msra.gmra.mrb[14].mxu1 %vm990_vm1, %v7071_v13  ;;  %v2479_v13 = vadd.f32 %v2475_v20, %v2465_v23  ;;  %v6465_v23 = vld [vmem:[%s5664_s18 + $0xd0] sm:$0xff] }
 0x814   : > { %5175 = vmatprep.mubr.msk.f32.mxu1 %vm5507_vm2, %v7069_v40 }
 0x815   : > { %v2493_v26 = vadd.f32 %v2489_v19, %v2479_v13  ;;  %v6475_v19 = vld [vmem:[%s5664_s18 + $0xd8] sm:$0xff] }
 0x8e6   : > { %v5167_v57 = vpop.f32.mrb[14].mxu1 }
 0x8e7   : > { %4682 = vst.msk [vmem:[%s6147_s15 + $0x38] sm:$0xff] %vm1178_vm3, %v5167_v57  ;;  %2123 = vrot.lane.b32.xlu1 %v5167_v57, %s5508_s16  ;;  %v2103_v44 = vpop.f32.mrb[15].mxu1  ;;  %v6430_v57 = vld [vmem:[%s5664_s18 + $0xc0] sm:$0xff] }
 0x8e8   : > { %4681 = vst.msk [vmem:[%s6147_s15 + $0x8] sm:$0xff] %vm1178_vm3, %v2103_v44  ;;  %2117 = vrot.lane.b32.xlu0 %v2103_v44, %s5508_s16  ;;  %5171 = vmatmul.mubr.msk.f32.vlgmr.msra.gmra.mrb[16].mxu0 %vm1178_vm3, %v2103_v44  ;;  %v2528_v44 = vstv %s4725_s17  ;;  %s4755_s17 = sld [smem:[#allocation2 + $0x602]] }
 0x8e9   : > { %5179 = vmatpush3.msk.msra.mxu0 %vm1355_vm4, %v7072_v55  ;;  %5180 = vmatprep.mubr.msk.f32.mxu0 %vm5507_vm2, %v7069_v40  ;;  %v6433_v55 = vld [vmem:[%s5664_s18 + $0x90] sm:$0xff]  ;;  %v2529_v25 = vmul.f32 %v6430_v57, %v2528_v44  ;;  %v2530_v20 = vmul.f32 %v6455_v48, %v2528_v44  ;;  %v2531_v13 = vmul.f32 %v6465_v23, %v2528_v44 }
 0x8ea   : > { %5361 = vmatprep.subr.bf16.mxu0 %v5647_v3  ;;  %v2503_v45 = vmul.f32 %v6433_v55, %v2500_v17 }
 0x8ec   : > { %v2507_v42 = vadd.f32 %v2503_v45, %v2493_v26 }
 0x959   : > { %v2124_v9 = vpop.permute.xlu1 %2123 }
 0x95a   : > { %4684 = vst.msk [vmem:[%s6147_s15 + $0x48] sm:$0xff] %vm1178_vm3, %v2124_v9  ;;  %v2118_v1 = vpop.permute.xlu0 %2117  ;;  %v2492_v9 = vadd.f32 %v2488_v14, %v2478_v10  ;;  %v2518_v14 = vmul.f32 %v6459_v46, %v2514_v35 }
 0x95b   : > { %4683 = vst.msk [vmem:[%s6147_s15 + $0x40] sm:$0xff] %vm1178_vm3, %v2118_v1  ;;  %v2502_v1 = vmul.f32 %v6423_v54, %v2500_v17 }
 0x9bb   : > { %v2196_v27 = vpop.f32.mrb[16].mxu0 }
 0x9bc   : > { %v5172_v47 = vpop.f32.mrb[17].mxu0  ;;  %5174 = vmatpush3.msra.mxu1 %v2196_v27  ;;  %v2480_v27 = vadd.f32 %v2476_v29, %v2466_v21  ;;  %v2557_v29 = vmul.f32 %v6462_v36, %v2556_v38 }
 0x9bd   : > { %5176 = vmatmul.mubr.msk.f32.vlgmr.msra.gmra.mrb[16].mxu1 %vm1178_vm3, %v7073_v5  ;;  %5183 = vmatprep.subr.mxu1 %v7069_v40  ;;  %v2490_v47 = vmul.f32 %v6427_v8, %v2486_v31  ;;  %v2519_v5 = vadd.f32 %v2515_v6, %v2505_v0  ;;  %v2506_v31 = vadd.f32 %v2502_v1, %v2492_v9  ;;  %v6471_v0 = vld [vmem:[%s5664_s18 + $0xe8] sm:$0xff]  ;;  %v6478_v9 = vld [vmem:[%s5664_s18 + $0x120] sm:$0xff]  ;;  %v2570_v1 = vstv %s4740_s22  ;;  %s4770_s22 = sld [smem:[#allocation2 + $0x782]] }
 0x9be   : > { %5185 = vmatprep.mubr.msk.f32.mxu1 %vm5507_vm2, %v7069_v40  ;;  %v2521_v6 = vadd.f32 %v2517_v24, %v2507_v42  ;;  %v2571_v45 = vmul.f32 %v6478_v9, %v2570_v1  ;;  %v6497_v42 = vld [vmem:[%s5664_s18 + $0x110] sm:$0xff] }
 0x9bf   : > { %v2494_v60 = vadd.f32 %v2490_v47, %v2480_v27  ;;  %v2533_v43 = vadd.f32 %v2529_v25, %v2519_v5  ;;  %v2520_v17 = vadd.f32 %v2516_v18, %v2506_v31  ;;  %v6481_v27 = vld [vmem:[%s5664_s18 + $0xf0] sm:$0xff]  ;;  %v2544_v47 = vmul.f32 %v6471_v0, %v2542_v33  ;;  %v6487_v31 = vld [vmem:[%s5664_s18 + $0x108] sm:$0xff]  ;;  %7078 = vst [vmem:[#allocation10_spill] sm:$0xff] %v6497_v42 }
 0x9c0   : > { %7074 = vst [vmem:[#allocation18_spill] sm:$0xff] %v6481_v27  ;;  %v2532_v25 = vmul.f32 %v6475_v19, %v2528_v44  ;;  %7075 = vst [vmem:[#allocation12_spill] sm:$0xff] %v6487_v31  ;;  %v2535_v18 = vadd.f32 %v2531_v13, %v2521_v6  ;;  %v2558_v24 = vmul.f32 %v6487_v31, %v2556_v38  ;;  %v6507_v13 = vld [vmem:[%s5664_s18 + $0x118] sm:$0xff]  ;;  %v6526_v31 = vld [vmem:[%s5664_s18 + $0x180] sm:$0xff] }
 0x9c1   : > { %v2508_v10 = vadd.f32 %v2504_v56, %v2494_v60  ;;  %v2547_v21 = vadd.f32 %v2543_v37, %v2533_v43  ;;  %v2534_v35 = vadd.f32 %v2530_v20, %v2520_v17  ;;  %v2545_v60 = vmul.f32 %v6481_v27, %v2542_v33  ;;  %v6491_v56 = vld [vmem:[%s5664_s18 + $0xf8] sm:$0xff]  ;;  %v6494_v43 = vld [vmem:[%s5664_s18 + $0x140] sm:$0xff]  ;;  %7080 = vst [vmem:[#allocation17_spill] sm:$0xff] %v6507_v13 }
 0x9c2   : > { %7076 = vst [vmem:[#allocation9_spill] sm:$0xff] %v6491_v56  ;;  %7077 = vst [vmem:[#allocation15_spill] sm:$0xff] %v6494_v43  ;;  %v2584_v37 = vstv %s4745_s23  ;;  %v2546_v20 = vmul.f32 %v6491_v56, %v2542_v33  ;;  %v2559_v6 = vmul.f32 %v6497_v42, %v2556_v38  ;;  %v6510_v27 = vld [vmem:[%s5664_s18 + $0x160] sm:$0xff]  ;;  %v6523_v56 = vld [vmem:[%s5664_s18 + $0x138] sm:$0xff]  ;;  %s4775_s23 = sld [smem:[#allocation4 + $0x2]] }
 0x9c3   : > { %v2522_v5 = vadd.f32 %v2518_v14, %v2508_v10  ;;  %v2561_v26 = vadd.f32 %v2557_v29, %v2547_v21  ;;  %v2548_v44 = vadd.f32 %v2544_v47, %v2534_v35  ;;  %v2585_v14 = vmul.f32 %v6494_v43, %v2584_v37  ;;  %v6503_v21 = vld [vmem:[%s5664_s18 + $0x128] sm:$0xff]  ;;  %7081 = vst [vmem:[#allocation11_spill] sm:$0xff] %v6510_v27  ;;  %v6513_v47 = vld [vmem:[%s5664_s18 + $0x130] sm:$0xff] }
 0x9c4   : > { %7079 = vst [vmem:[#allocation22_spill] sm:$0xff] %v6503_v21  ;;  %v2549_v29 = vadd.f32 %v2545_v60, %v2535_v18  ;;  %v2598_v35 = vstv %s4750_s24  ;;  %7082 = vst [vmem:[#allocation25_spill] sm:$0xff] %v6513_v47  ;;  %v6519_v60 = vld [vmem:[%s5664_s18 + $0x148] sm:$0xff]  ;;  %v2573_v43 = vmul.f32 %v6513_v47, %v2570_v1  ;;  %s4830_s24 = sld [smem:[#allocation2 + $0x203]] }
 0x9c5   : > { %v2536_v17 = vadd.f32 %v2532_v25, %v2522_v5  ;;  %v2575_v10 = vadd.f32 %v2571_v45, %v2561_v26  ;;  %v2562_v33 = vadd.f32 %v2558_v24, %v2548_v44  ;;  %v2572_v5 = vmul.f32 %v6503_v21, %v2570_v1  ;;  %7083 = vst [vmem:[#allocation19_spill] sm:$0xff] %v6519_v60  ;;  %v6529_v24 = vld [vmem:[%s5664_s18 + $0x150] sm:$0xff]  ;;  %v6542_v21 = vld [vmem:[%s5664_s18 + $0x1a0] sm:$0xff] }
 0x9c6   : > { %v2560_v26 = vmul.f32 %v6507_v13, %v2556_v38  ;;  %v2599_v18 = vmul.f32 %v6510_v27, %v2598_v35  ;;  %v2563_v42 = vadd.f32 %v2559_v6, %v2549_v29  ;;  %7084 = vst [vmem:[#allocation13_spill] sm:$0xff] %v6523_v56  ;;  %7085 = vst [vmem:[#allocation21_spill] sm:$0xff] %v6526_v31  ;;  %v2612_v44 = vstv %s4755_s17  ;;  %v6535_v6 = vld [vmem:[%s5664_s18 + $0x168] sm:$0xff]  ;;  %v6539_v13 = vld [vmem:[%s5664_s18 + $0x158] sm:$0xff]  ;;  %s4835_s17 = sld [smem:[#allocation2 + $0x283]] }
 0x9c7   : > { %v2550_v25 = vadd.f32 %v2546_v20, %v2536_v17  ;;  %v2589_v45 = vadd.f32 %v2585_v14, %v2575_v10  ;;  %7086 = vst [vmem:[#allocation14_spill] sm:$0xff] %v6529_v24  ;;  %v2576_v38 = vadd.f32 %v2572_v5, %v2562_v33  ;;  %v2586_v17 = vmul.f32 %v6519_v60, %v2584_v37  ;;  %v6545_v5 = vld [vmem:[%s5664_s18 + $0x170] sm:$0xff]  ;;  %v6558_v60 = vld [vmem:[%s5664_s18 + $0x1c0] sm:$0xff] }
 0x9c8   : > { %v2574_v10 = vmul.f32 %v6523_v56, %v2570_v1  ;;  %v2613_v29 = vmul.f32 %v6526_v31, %v2612_v44  ;;  %7087 = vst [vmem:[#allocation24_spill] sm:$0xff] %v6535_v6  ;;  %v2577_v47 = vadd.f32 %v2573_v43, %v2563_v42  ;;  %v2587_v27 = vmul.f32 %v6529_v24, %v2584_v37  ;;  %v6555_v56 = vld [vmem:[%s5664_s18 + $0x178] sm:$0xff] }
 0x9c9   : > { %v2564_v20 = vadd.f32 %v2560_v26, %v2550_v25  ;;  %v2603_v14 = vadd.f32 %v2599_v18, %v2589_v45  ;;  %7088 = vst [vmem:[#allocation16_spill] sm:$0xff] %v6539_v13  ;;  %7089 = vst [vmem:[#allocation26_spill] sm:$0xff] %v6542_v21  ;;  %v2626_v33 = vstv %s4760_s30  ;;  %v2590_v1 = vadd.f32 %v2586_v17, %v2576_v38  ;;  %v6551_v18 = vld [vmem:[%s5664_s18 + $0x188] sm:$0xff]  ;;  %v6561_v17 = vld [vmem:[%s5664_s18 + $0x190] sm:$0xff]  ;;  %s4840_s30 = sld [smem:[#allocation2 + $0x303]] }
 0x9ca   : > { %7090 = vst [vmem:[#allocation20_spill] sm:$0xff] %v6545_v5  ;;  %v2600_v25 = vmul.f32 %v6535_v6, %v2598_v35  ;;  %v2588_v45 = vmul.f32 %v6539_v13, %v2584_v37  ;;  %v2627_v42 = vmul.f32 %v6542_v21, %v2626_v33  ;;  %7091 = vst [vmem:[#allocation30_spill] sm:$0xff] %v6551_v18  ;;  %v2640_v38 = vstv %s4765_s21  ;;  %v6571_v13 = vld [vmem:[%s5664_s18 + $0x198] sm:$0xff]  ;;  %v6574_v6 = vld [vmem:[%s5664_s18 + $0x1e0] sm:$0xff]  ;;  %s4814_s21 = sld [smem:[#allocation2 + $0x3]] }
 0x9cb   : > { %v2578_v26 = vadd.f32 %v2574_v10, %v2564_v20  ;;  %v2617_v43 = vadd.f32 %v2613_v29, %v2603_v14  ;;  %v2591_v24 = vadd.f32 %v2587_v27, %v2577_v47  ;;  %v2601_v31 = vmul.f32 %v6545_v5, %v2598_v35  ;;  %7092 = vst [vmem:[#allocation27_spill] sm:$0xff] %v6555_v56  ;;  %v6567_v47 = vld [vmem:[%s5664_s18 + $0x1a8] sm:$0xff] }
 0x9cc   : > { %7093 = vst [vmem:[#allocation23_spill] sm:$0xff] %v6558_v60  ;;  %7094 = vst [vmem:[#allocation28_spill] sm:$0xff] %v6561_v17  ;;  %v2604_v37 = vadd.f32 %v2600_v25, %v2590_v1  ;;  %v2614_v20 = vmul.f32 %v6551_v18, %v2612_v44  ;;  %v2602_v14 = vmul.f32 %v6555_v56, %v2598_v35  ;;  %v2654_v1 = vstv %s4770_s22  ;;  %v6577_v25 = vld [vmem:[%s5664_s18 + $0x1b0] sm:$0xff]  ;;  %v6587_v56 = vld [vmem:[%s5664_s18 + $0x1b8] sm:$0xff]  ;;  %s4815_s22 = sld [smem:[#allocation2 + $0x83]] }
 0x9cd   : > { %v2592_v10 = vadd.f32 %v2588_v45, %v2578_v26  ;;  %v2631_v29 = vadd.f32 %v2627_v42, %v2617_v43  ;;  %v2641_v27 = vmul.f32 %v6558_v60, %v2640_v38  ;;  %v2605_v5 = vadd.f32 %v2601_v31, %v2591_v24  ;;  %7095 = vst [vmem:[#allocation29_spill] sm:$0xff] %v6574_v6  ;;  %v6583_v42 = vld [vmem:[%s5664_s18 + $0x1c8] sm:$0xff]  ;;  %v6590_v18 = vld [vmem:[%s5664_s18 + $0x1d0] sm:$0xff] }
 0x9ce   : > { %v2615_v21 = vmul.f32 %v6561_v17, %v2612_v44  ;;  %7096 = vst [vmem:[#allocation8_spill] sm:$0xff] %v6577_v25  ;;  %v2618_v35 = vadd.f32 %v2614_v20, %v2604_v37  ;;  %v2628_v26 = vmul.f32 %v6567_v47, %v2626_v33  ;;  %v2616_v43 = vmul.f32 %v6571_v13, %v2612_v44 }
 0x9cf   : > { %v2606_v45 = vadd.f32 %v2602_v14, %v2592_v10  ;;  %v2645_v31 = vadd.f32 %v2641_v27, %v2631_v29  ;;  %v2655_v24 = vmul.f32 %v6574_v6, %v2654_v1  ;;  %v2629_v60 = vmul.f32 %v6577_v25, %v2626_v33  ;;  %7097 = vst [vmem:[#allocation32_spill] sm:$0xff] %v6587_v56  ;;  %v6595_v29 = vld [vmem:[%s5664_s18 + $0x1e8] sm:$0xff]  ;;  %v6602_v6 = vld [vmem:[%s5664_s18 + $0x1f0] sm:$0xff] }
 0x9d0   : > { %v2619_v17 = vadd.f32 %v2615_v21, %v2605_v5  ;;  %v2632_v37 = vadd.f32 %v2628_v26, %v2618_v35  ;;  %v2642_v20 = vmul.f32 %v6583_v42, %v2640_v38  ;;  %v2630_v44 = vmul.f32 %v6587_v56, %v2626_v33  ;;  %v6599_v5 = vld [vmem:[%s5664_s18 + $0x1d8] sm:$0xff] }
 0x9d1   : > { %v2620_v10 = vadd.f32 %v2616_v43, %v2606_v45  ;;  %v2659_v14 = vadd.f32 %v2655_v24, %v2645_v31  ;;  %v2643_v21 = vmul.f32 %v6590_v18, %v2640_v38  ;;  %v2664_v25 = vstv %s4775_s23  ;;  %v6608_v56 = vld [vmem:[%s5664_s18 + $0x1f8] sm:$0xff]  ;;  %s4820_s23 = sld [smem:[#allocation2 + $0x103]] }
 0x9d2   : > { %v2633_v27 = vadd.f32 %v2629_v60, %v2619_v17  ;;  %v2646_v35 = vadd.f32 %v2642_v20, %v2632_v37  ;;  %v2656_v26 = vmul.f32 %v6595_v29, %v2654_v1  ;;  %v2644_v43 = vmul.f32 %v6599_v5, %v2640_v38  ;;  %s4825_s18 = sld [smem:[#allocation2 + $0x183]] }
 0x9d3   : > { %v2634_v45 = vadd.f32 %v2630_v44, %v2620_v10  ;;  %v2665_v33 = vadd.f32 %v2664_v25, %v2659_v14  ;;  %v2657_v24 = vmul.f32 %v6602_v6, %v2654_v1  ;;  %v2658_v38 = vmul.f32 %v6608_v56, %v2654_v1 }
 0x9d4   : > { %v2647_v31 = vadd.f32 %v2643_v21, %v2633_v27  ;;  %v2660_v37 = vadd.f32 %v2656_v26, %v2646_v35 }
 0x9d5   : > { %v2648_v20 = vadd.f32 %v2644_v43, %v2634_v45 }
 0x9d6   : > { %v2661_v10 = vadd.f32 %v2657_v24, %v2647_v31  ;;  %v2666_v44 = vadd.f32 %v2664_v25, %v2660_v37  ;;  %v6658_v37 = vld [vmem:[%s6941_s4 + $0x18] sm:$0xff] }
 0x9d7   : > { %v2662_v14 = vadd.f32 %v2658_v38, %v2648_v20  ;;  %v6665_v20 = vld [vmem:[%s6943_s6] sm:$0xff] }
 0x9d8   : > { %v2667_v27 = vadd.f32 %v2664_v25, %v2661_v10 }
 0x9d9   : > { %v2668_v21 = vadd.f32 %v2664_v25, %v2662_v14  ;;  %v6637_v25 = vld [vmem:[%s6941_s4] sm:$0xff] }
 0xa90   : > { %v2266_v60 = vpop.f32.mrb[16].mxu1 }
 0xa91   : > { %4687 = vst.msk [vmem:[%s6246_s27 + $0x4] sm:$0xf] %vm1339_vm5, %v2266_v60  ;;  %2275 = vrot.lane.b32.xlu0 %v2266_v60, %s5509_s28  ;;  %v5177_v17 = vpop.f32.mrb[17].mxu1  ;;  %5181 = vmatmul.mubr.msk.f32.vlgmr.msra.gmra.mrb[18].mxu0 %vm1352_vm7, %v2266_v60 }
 0xa92   : > { %4688 = vst.msk [vmem:[%s6246_s27 + $0x18] sm:$0xf0] %vm1342_vm6, %v2266_v60  ;;  %5363 = vmatpush3.bf16.msra.mxu0 %v5647_v3  ;;  %5196 = vmatprep.mubr.msk.f32.mxu0 %vm795_vm0, %v2665_v33  ;;  %v6651_v17 = vld [vmem:[%s6941_s4 + $0x10] sm:$0xff] }
 0xa93   : > { %5365 = vmatprep.subr.bf16.mxu0 %v7068_v59 }
 0xa96   : > { %5367 = vmatpush3.bf16.msra.mxu0 %v7068_v59 }
 0xa97   : > { %5377 = vmatprep.subr.bf16.mxu0 %v6063_v15 }
 0xa99   : > { %5197 = vmatmul.mubr.msk.f32.vlgmr.msra.gmra.mrb[20].mxu0 %vm795_vm0, %v2666_v44 }
 0xa9a   : > { %5199 = vmatprep.mubr.msk.f32.mxu0 %vm795_vm0, %v2667_v27  ;;  %5379 = vmatpush3.bf16.msra.mxu0 %v6063_v15  ;;  %v6685_v27 = vld [vmem:[%s6944_s7] sm:$0xff] }
 0xa9b   : > { %5230 = vmatprep.subr.mxu0 %v7069_v40  ;;  %7098 = vst [vmem:[#allocation31_spill] sm:$0xff] %v6685_v27 }
 0xa9d   : > { %5200 = vmatmul.mubr.msk.f32.gmra.mrb[22].mxu0 %vm795_vm0, %v2668_v21 }
 0xb03   : > { %v2276_v1 = vpop.permute.xlu0 %2275 }
 0xb04   : > { %4689 = vst.msk [vmem:[%s6246_s27 + $0x20] sm:$0xf] %vm1339_vm5, %v2276_v1 }
 0xb05   : > { %4690 = vst.msk [vmem:[%s6246_s27 + $0x20] sm:$0xf0] %vm1342_vm6, %v2276_v1 }
 0xb64   : > { %v2350_v35 = vpop.f32.mrb[18].mxu0 }
 0xb65   : > { %v5182_v26 = vpop.f32.mrb[19].mxu0  ;;  %5184 = vmatpush3.msk.msra.mxu1 %vm1355_vm4, %v2350_v35 }
 0xb66   : > { %5186 = vmatmul.mubr.msk.f32.vlgmr.msra.gmra.mrb[18].mxu1 %vm1352_vm7, %v6273_v34  ;;  %v6644_v34 = vld [vmem:[%s6941_s4 + $0x8] sm:$0xff] }
 0xb67   : > { %5210 = vmatprep.mubr.msk.f32.mxu1 %vm795_vm0, %v6637_v25 }
 0xb6c   : > { %v5198_v45 = vpop.f32.mrb[20].mxu0 }
 0xb6d   : > { %v2747_v43 = vpop.f32.mrb[21].mxu0 }
 0xb6e   : > { %v5368_v33 = vpack.c.bf16 %v5198_v45, %v2747_v43 }
 0xb70   : > { %v5201_v31 = vpop.f32.mrb[22].mxu0  ;;  %5369 = vmatprep.subr.bf16.mxu1 %v5368_v33 }
 0xb71   : > { %v2757_v24 = vpop.f32.mrb[23].mxu0  ;;  %5371 = vmatpush3.bf16.msra.mxu1 %v5368_v33 }
 0xb72   : > { %v5372_v60 = vpack.c.bf16 %v5201_v31, %v2757_v24  ;;  %v6709_v24 = vld [vmem:[%s6943_s6 + $0x8] sm:$0xff] }
 0xb73   : > { %7099 = vst [vmem:[#allocation33_spill] sm:$0xff] %v6709_v24 }
 0xb74   : > { %5373 = vmatprep.subr.bf16.mxu1 %v5372_v60 }
 0xb75   : > { %5375 = vmatpush3.bf16.msra.mxu1 %v5372_v60 }
 0xb78   : > { %5211 = vmatmul.mubr.msk.f32.vlgmr.msra.gmra.mrb[20].mxu1 %vm795_vm0, %v6644_v34 }
 0xb79   : > { %5213 = vmatprep.mubr.msk.f32.mxu1 %vm795_vm0, %v6651_v17 }
 0xb7c   : > { %5214 = vmatmul.mubr.msk.f32.gmra.mrb[22].mxu1 %vm795_vm0, %v6658_v37 }
 0xb7d   : > { %5227 = vmatprep.mubr.msk.f32.mxu1 %vm990_vm1, %v6665_v20 }
 0xc39   : > { %v2423_v38 = vpop.f32.mrb[18].mxu1 }
 0xc3a   : > { %4695 = vst.msk [vmem:[%s6292_s25 + $0x2] sm:$0x3] %vm1505_vm8, %v2423_v38  ;;  %v5187_v10 = vpop.f32.mrb[19].mxu1  ;;  %2432 = vrot.lane.b32.xlu1 %v2423_v38, %s5510_s26 }
 0xc3b   : > { %4696 = vst.msk [vmem:[%s6292_s25 + $0xc] sm:$0xc] %vm1508_vm9, %v2423_v38 }
 0xc4b   : > { %v5212_v44 = vpop.f32.mrb[20].mxu1 }
 0xc4c   : > { %4785 = vst.msk [vmem:[%s6092_s19 + $0x28] sm:$0xff] %vm990_vm1, %v5212_v44  ;;  %2861 = vrot.lane.b32.xlu1 %v5212_v44, %s5505_s20  ;;  %v2832_v14 = vpop.f32.mrb[21].mxu1 }
 0xc4d   : > { %4784 = vst.msk [vmem:[%s6092_s19 + $0x20] sm:$0xff] %vm990_vm1, %v2832_v14  ;;  %2859 = vrot.lane.b32.xlu0 %v2832_v14, %s5505_s20  ;;  %5220 = vmatprep.mubr.msk.f32.mxu0 %vm990_vm1, %v2832_v14  ;;  %v6729_v14 = vld [vmem:[%s6946_s9] sm:$0xf] }
 0xc4e   : > { %5221 = vmatmul.mubr.msk.f32.vlgmr.msra.gmra.mrb[24].mxu0 %vm990_vm1, %v5212_v44  ;;  %7100 = vst [vmem:[#allocation34_spill] sm:$0xff] %v6729_v14 }
 0xc4f   : > { %5231 = vmatpush3.msra.mxu0 %v6685_v27  ;;  %5232 = vmatprep.mubr.msk.f32.mxu0 %vm5507_vm2, %v7069_v40  ;;  %v5215_v21 = vpop.f32.mrb[22].mxu1 }
 0xc50   : > { %5240 = vmatprep.subr.mxu0 %v7069_v40  ;;  %4787 = vst.msk [vmem:[%s6092_s19 + $0xa8] sm:$0xff] %vm990_vm1, %v5215_v21  ;;  %v2842_v1 = vpop.f32.mrb[23].mxu1  ;;  %2872 = vrot.lane.b32.xlu1 %v5215_v21, %s5505_s20 }
 0xc51   : > { %4786 = vst.msk [vmem:[%s6092_s19 + $0xa0] sm:$0xff] %vm990_vm1, %v2842_v1  ;;  %2870 = vrot.lane.b32.xlu0 %v2842_v1, %s5505_s20 }
 0xcac   : > { %v2433_v35 = vpop.permute.xlu1 %2432 }
 0xcad   : > { %4697 = vst.msk [vmem:[%s6292_s25 + $0x10] sm:$0x3] %vm1505_vm8, %v2433_v35 }
 0xcae   : > { %4698 = vst.msk [vmem:[%s6292_s25 + $0x10] sm:$0xc] %vm1508_vm9, %v2433_v35 }
 0xcbe   : > { %v2862_v26 = vpop.permute.xlu1 %2861 }
 0xcbf   : > { %4789 = vst.msk [vmem:[%s6092_s19 + $0xb8] sm:$0xff] %vm990_vm1, %v2862_v26  ;;  %v2860_v45 = vpop.permute.xlu0 %2859 }
 0xcc0   : > { %4788 = vst.msk [vmem:[%s6092_s19 + $0xb0] sm:$0xff] %vm990_vm1, %v2860_v45  ;;  %v6743_v45 = vld [vmem:[%s6945_s8] sm:$0xff] }
 0xcc1   : > { %7101 = vst [vmem:[#allocation35_spill] sm:$0xff] %v6743_v45 }
 0xcc2   : > { %v2873_v60 = vpop.permute.xlu1 %2872 }
 0xcc3   : > { %v2871_v38 = vpop.permute.xlu0 %2870  ;;  %4791 = vst.msk [vmem:[%s6092_s19 + $0xc8] sm:$0xff] %vm990_vm1, %v2873_v60 }
 0xcc4   : > { %4790 = vst.msk [vmem:[%s6092_s19 + $0xc0] sm:$0xff] %vm990_vm1, %v2871_v38  ;;  %v3393_v38 = vstv %s4820_s23  ;;  %s4855_s23 = sld [smem:[#allocation2 + $0x483]] }
 0xd21   : > { %v5222_v43 = vpop.f32.mrb[24].mxu0 }
 0xd22   : > { %v2949_v33 = vpop.f32.mrb[25].mxu0 }
 0xd23   : > { %v5380_v31 = vpack.c.bf16 %v5222_v43, %v2949_v33  ;;  %v3365_v43 = vstv %s4814_s21  ;;  %v3379_v33 = vstv %s4815_s22  ;;  %s4845_s21 = sld [smem:[#allocation2 + $0x383]] }
 0xd24   : > { %v3380_v60 = vmul.f32 %v6359_v30, %v3379_v33  ;;  %s4850_s22 = sld [smem:[#allocation2 + $0x403]] }
 0xd25   : > { %5381 = vmatprep.subr.bf16.mxu1 %v5380_v31 }
 0xd26   : > { %5383 = vmatpush3.bf16.msra.mxu1 %v5380_v31  ;;  %v3366_v31 = vmul.f32 %v3365_v43, %v6356_v22  ;;  %v3382_v22 = vmul.f32 %v6380_v32, %v3379_v33 }
 0xd27   : > { %5235 = vmatprep.subr.mxu1 %v7069_v40 }
 0xd29   : > { %5228 = vmatmul.mubr.msk.f32.vlgmr.msra.gmra.mrb[24].mxu1 %vm990_vm1, %v6709_v24  ;;  %v3421_v24 = vstv %s4830_s24  ;;  %s4865_s24 = sld [smem:[#allocation2 + $0x583]] }
 0xd2a   : > { %5237 = vmatprep.mubr.msk.f32.mxu1 %vm5507_vm2, %v7069_v40 }
 0xdfc   : > { %v5229_v10 = vpop.f32.mrb[24].mxu1 }
 0xdfd   : > { %4797 = vst.msk [vmem:[%s6147_s15 + $0x50] sm:$0xff] %vm1178_vm3, %v5229_v10  ;;  %3044 = vrot.lane.b32.xlu1 %v5229_v10, %s5508_s16  ;;  %v3024_v44 = vpop.f32.mrb[25].mxu1  ;;  %v3384_v10 = vadd.f32 %v3380_v60, %v3366_v31  ;;  %v3395_v31 = vmul.f32 %v6386_v62, %v3393_v38  ;;  %v3383_v60 = vmul.f32 %v6394_v16, %v3379_v33 }
 0xdfe   : > { %4796 = vst.msk [vmem:[%s6147_s15 + $0x10] sm:$0xff] %vm1178_vm3, %v3024_v44  ;;  %3038 = vrot.lane.b32.xlu0 %v3024_v44, %s5508_s16  ;;  %5233 = vmatmul.mubr.msk.f32.vlgmr.msra.gmra.mrb[26].mxu0 %vm1178_vm3, %v3024_v44  ;;  %v3394_v44 = vmul.f32 %v6364_v52, %v3393_v38  ;;  %v3369_v52 = vmul.f32 %v3365_v43, %v6391_v50 }
 0xdff   : > { %5241 = vmatpush3.msk.msra.mxu0 %vm1355_vm4, %v6729_v14  ;;  %5242 = vmatprep.mubr.msk.f32.mxu0 %vm5507_vm2, %v7069_v40  ;;  %v3368_v14 = vmul.f32 %v3365_v43, %v6377_v49 }
 0xe00   : > { %5385 = vmatprep.subr.bf16.mxu0 %v5647_v3 }
 0xe6f   : > { %v3045_v21 = vpop.permute.xlu1 %3044 }
 0xe70   : > { %4799 = vst.msk [vmem:[%s6147_s15 + $0x60] sm:$0xff] %vm1178_vm3, %v3045_v21  ;;  %v3039_v1 = vpop.permute.xlu0 %3038  ;;  %v3407_v21 = vstv %s4825_s18  ;;  %s4860_s18 = sld [smem:[#allocation2 + $0x503]] }
 0xe71   : > { %4798 = vst.msk [vmem:[%s6147_s15 + $0x58] sm:$0xff] %vm1178_vm3, %v3039_v1  ;;  %v3367_v1 = vmul.f32 %v3365_v43, %v6368_v53  ;;  %v3422_v53 = vmul.f32 %v6397_v4, %v3421_v24  ;;  %v3409_v32 = vmul.f32 %v6407_v41, %v3407_v21  ;;  %v3410_v16 = vmul.f32 %v6417_v2, %v3407_v21 }
 0xe72   : > { %v3411_v43 = vmul.f32 %v6427_v8, %v3407_v21 }
 0xed1   : > { %v3117_v35 = vpop.f32.mrb[26].mxu0 }
 0xed2   : > { %v5234_v26 = vpop.f32.mrb[27].mxu0  ;;  %5236 = vmatpush3.msra.mxu1 %v3117_v35  ;;  %v3381_v35 = vmul.f32 %v6371_v39, %v3379_v33  ;;  %v3386_v39 = vadd.f32 %v3382_v22, %v3368_v14  ;;  %v3423_v14 = vmul.f32 %v6423_v54, %v3421_v24  ;;  %v3425_v22 = vmul.f32 %v6443_v51, %v3421_v24 }
 0xed3   : > { %5238 = vmatmul.mubr.msk.f32.vlgmr.msra.gmra.mrb[26].mxu1 %vm1178_vm3, %v6743_v45  ;;  %5245 = vmatprep.subr.mxu1 %v7069_v40  ;;  %v3398_v26 = vadd.f32 %v3394_v44, %v3384_v10  ;;  %v3408_v45 = vmul.f32 %v6374_v12, %v3407_v21  ;;  %v3396_v10 = vmul.f32 %v6400_v58, %v3393_v38  ;;  %v3435_v12 = vstv %s4835_s17  ;;  %s4870_s17 = sld [smem:[#allocation2 + $0x603]] }
 0xed4   : > { %5247 = vmatprep.mubr.msk.f32.mxu1 %vm5507_vm2, %v7069_v40  ;;  %v3385_v30 = vadd.f32 %v3381_v35, %v3367_v1  ;;  %v3387_v44 = vadd.f32 %v3383_v60, %v3369_v52  ;;  %v3397_v1 = vmul.f32 %v6411_v61, %v3393_v38  ;;  %v3436_v62 = vmul.f32 %v6414_v7, %v3435_v12 }
 0xed5   : > { %v3412_v27 = vadd.f32 %v3408_v45, %v3398_v26  ;;  %v3400_v50 = vadd.f32 %v3396_v10, %v3386_v39  ;;  %v3449_v45 = vstv %s4840_s30  ;;  %v3424_v61 = vmul.f32 %v6433_v55, %v3421_v24  ;;  %s4875_s30 = sld [smem:[#allocation2 + $0x683]] }
 0xed6   : > { %v3399_v49 = vadd.f32 %v3395_v31, %v3385_v30  ;;  %v3401_v58 = vadd.f32 %v3397_v1, %v3387_v44  ;;  %v3450_v41 = vmul.f32 %v6430_v57, %v3449_v45  ;;  %v3437_v38 = vmul.f32 %v6439_v11, %v3435_v12  ;;  %v7102_v1 = vld [vmem:[#allocation18_spill] sm:$0xff] }
 0xed7   : > { %v3426_v35 = vadd.f32 %v3422_v53, %v3412_v27  ;;  %v3414_v26 = vadd.f32 %v3410_v16, %v3400_v50  ;;  %v3463_v27 = vstv %s4845_s21  ;;  %v3438_v8 = vmul.f32 %v6449_v28, %v3435_v12  ;;  %v7104_v50 = vld [vmem:[#allocation9_spill] sm:$0xff]  ;;  %s4880_s21 = sld [smem:[#allocation2 + $0x703]] }
 0xed8   : > { %v3413_v4 = vadd.f32 %v3409_v32, %v3399_v49  ;;  %v3415_v2 = vadd.f32 %v3411_v43, %v3401_v58  ;;  %v3464_v54 = vmul.f32 %v6446_v63, %v3463_v27  ;;  %v3477_v21 = vstv %s4850_s22  ;;  %v7106_v43 = vld [vmem:[#allocation10_spill] sm:$0xff]  ;;  %s4885_s22 = sld [smem:[#allocation2 + $0x783]] }
 0xed9   : > { %v3440_v33 = vadd.f32 %v3436_v62, %v3426_v35  ;;  %v3428_v31 = vadd.f32 %v3424_v61, %v3414_v26  ;;  %v3451_v52 = vmul.f32 %v6455_v48, %v3449_v45  ;;  %v3439_v60 = vmul.f32 %v6459_v46, %v3435_v12  ;;  %v7103_v35 = vld [vmem:[#allocation12_spill] sm:$0xff]  ;;  %v7108_v61 = vld [vmem:[#allocation17_spill] sm:$0xff] }
 0xeda   : > { %v3427_v7 = vadd.f32 %v3423_v14, %v3413_v4  ;;  %v3429_v55 = vadd.f32 %v3425_v22, %v3415_v2  ;;  %v3478_v11 = vmul.f32 %v6462_v36, %v3477_v21  ;;  %v3452_v51 = vmul.f32 %v6465_v23, %v3449_v45  ;;  %v7105_v14 = vld [vmem:[#allocation15_spill] sm:$0xff] }
 0xedb   : > { %v3454_v30 = vadd.f32 %v3450_v41, %v3440_v33  ;;  %v3442_v39 = vadd.f32 %v3438_v8, %v3428_v31  ;;  %v3491_v24 = vstv %s4855_s23  ;;  %v3465_v10 = vmul.f32 %v6471_v0, %v3463_v27  ;;  %v7107_v33 = vld [vmem:[#allocation22_spill] sm:$0xff]  ;;  %v7109_v2 = vld [vmem:[#allocation11_spill] sm:$0xff]  ;;  %s4890_s23 = sld [smem:[#allocation4 + $0x3]] }
 0xedc   : > { %v3441_v57 = vadd.f32 %v3437_v38, %v3427_v7  ;;  %v3443_v28 = vadd.f32 %v3439_v60, %v3429_v55  ;;  %v3453_v49 = vmul.f32 %v6475_v19, %v3449_v45  ;;  %v3492_v48 = vmul.f32 %v6478_v9, %v3491_v24  ;;  %v7112_v60 = vld [vmem:[#allocation13_spill] sm:$0xff] }
 0xedd   : > { %v3468_v53 = vadd.f32 %v3464_v54, %v3454_v30  ;;  %v3456_v44 = vadd.f32 %v3452_v51, %v3442_v39  ;;  %v3466_v46 = vmul.f32 %v7102_v1, %v3463_v27  ;;  %v3505_v12 = vstv %s4860_s18  ;;  %v7110_v54 = vld [vmem:[#allocation25_spill] sm:$0xff]  ;;  %v7116_v1 = vld [vmem:[#allocation16_spill] sm:$0xff] }
 0xede   : > { %v3455_v63 = vadd.f32 %v3451_v52, %v3441_v57  ;;  %v3479_v62 = vmul.f32 %v7103_v35, %v3477_v21  ;;  %v3457_v23 = vadd.f32 %v3453_v49, %v3443_v28  ;;  %v3467_v16 = vmul.f32 %v7104_v50, %v3463_v27  ;;  %v7111_v57 = vld [vmem:[#allocation19_spill] sm:$0xff]  ;;  %v7113_v39 = vld [vmem:[#allocation21_spill] sm:$0xff]  ;;  %v7117_v35 = vld [vmem:[#allocation26_spill] sm:$0xff] }
 0xedf   : > { %v3482_v32 = vadd.f32 %v3478_v11, %v3468_v53  ;;  %v3506_v0 = vmul.f32 %v7105_v14, %v3505_v12  ;;  %v3470_v58 = vadd.f32 %v3466_v46, %v3456_v44  ;;  %v3480_v19 = vmul.f32 %v7106_v43, %v3477_v21  ;;  %v7118_v50 = vld [vmem:[#allocation20_spill] sm:$0xff]  ;;  %v7119_v14 = vld [vmem:[#allocation30_spill] sm:$0xff]  ;;  %v7120_v43 = vld [vmem:[#allocation27_spill] sm:$0xff] }
 0xee0   : > { %v3469_v36 = vadd.f32 %v3465_v10, %v3455_v63  ;;  %v3519_v45 = vstv %s4865_s24  ;;  %v3493_v41 = vmul.f32 %v7107_v33, %v3491_v24  ;;  %v3471_v26 = vadd.f32 %v3467_v16, %v3457_v23  ;;  %v7114_v10 = vld [vmem:[#allocation14_spill] sm:$0xff]  ;;  %v7121_v33 = vld [vmem:[#allocation23_spill] sm:$0xff] }
 0xee1   : > { %v3496_v4 = vadd.f32 %v3492_v48, %v3482_v32  ;;  %v3481_v7 = vmul.f32 %v7108_v61, %v3477_v21  ;;  %v3520_v22 = vmul.f32 %v7109_v2, %v3519_v45  ;;  %v3484_v30 = vadd.f32 %v3480_v19, %v3470_v58  ;;  %v7115_v32 = vld [vmem:[#allocation24_spill] sm:$0xff] }
 0xee2   : > { %v3483_v9 = vadd.f32 %v3479_v62, %v3469_v36  ;;  %v3494_v27 = vmul.f32 %v7110_v54, %v3491_v24  ;;  %v3533_v31 = vstv %s4870_s17  ;;  %v3507_v52 = vmul.f32 %v7111_v57, %v3505_v12  ;;  %v7122_v61 = vld [vmem:[#allocation28_spill] sm:$0xff] }
 0xee3   : > { %v3510_v38 = vadd.f32 %v3506_v0, %v3496_v4  ;;  %v3485_v55 = vadd.f32 %v3481_v7, %v3471_v26  ;;  %v3495_v53 = vmul.f32 %v7112_v60, %v3491_v24  ;;  %v3534_v51 = vmul.f32 %v7113_v39, %v3533_v31 }
 0xee4   : > { %v3497_v8 = vadd.f32 %v3493_v41, %v3483_v9  ;;  %v3498_v63 = vadd.f32 %v3494_v27, %v3484_v30  ;;  %v3508_v21 = vmul.f32 %v7114_v10, %v3505_v12  ;;  %v3547_v28 = vstv %s4875_s30  ;;  %v7123_v27 = vld [vmem:[#allocation29_spill] sm:$0xff] }
 0xee5   : > { %v3524_v11 = vadd.f32 %v3520_v22, %v3510_v38  ;;  %v3521_v48 = vmul.f32 %v7115_v32, %v3519_v45  ;;  %v3499_v44 = vadd.f32 %v3495_v53, %v3485_v55  ;;  %v3509_v46 = vmul.f32 %v7116_v1, %v3505_v12 }
 0xee6   : > { %v3511_v49 = vadd.f32 %v3507_v52, %v3497_v8  ;;  %v3548_v62 = vmul.f32 %v7117_v35, %v3547_v28  ;;  %v3512_v23 = vadd.f32 %v3508_v21, %v3498_v63  ;;  %v3522_v24 = vmul.f32 %v7118_v50, %v3519_v45  ;;  %v7124_v52 = vld [vmem:[#allocation8_spill] sm:$0xff] }
 0xee7   : > { %v3538_v36 = vadd.f32 %v3534_v51, %v3524_v11  ;;  %v3561_v16 = vstv %s4880_s21  ;;  %v3535_v0 = vmul.f32 %v7119_v14, %v3533_v31  ;;  %v3513_v58 = vadd.f32 %v3509_v46, %v3499_v44  ;;  %v7125_v11 = vld [vmem:[#allocation32_spill] sm:$0xff] }
 0xee8   : > { %v3525_v4 = vadd.f32 %v3521_v48, %v3511_v49  ;;  %v3523_v19 = vmul.f32 %v7120_v43, %v3519_v45  ;;  %v3562_v41 = vmul.f32 %v7121_v33, %v3561_v16  ;;  %v3526_v26 = vadd.f32 %v3522_v24, %v3512_v23 }
 0xee9   : > { %v3552_v9 = vadd.f32 %v3548_v62, %v3538_v36  ;;  %v3536_v7 = vmul.f32 %v7122_v61, %v3533_v31  ;;  %v3575_v12 = vstv %s4885_s22  ;;  %v3549_v2 = vmul.f32 %v6567_v47, %v3547_v28  ;;  %v6838_v62 = vld [vmem:[%s6947_s10] sm:$0xf] }
 0xeea   : > { %v3539_v38 = vadd.f32 %v3535_v0, %v3525_v4  ;;  %v3527_v22 = vadd.f32 %v3523_v19, %v3513_v58  ;;  %v3537_v30 = vmul.f32 %v6571_v13, %v3533_v31  ;;  %v3576_v8 = vmul.f32 %v7123_v27, %v3575_v12 }
 0xeeb   : > { %v3566_v54 = vadd.f32 %v3562_v41, %v3552_v9  ;;  %v3540_v57 = vadd.f32 %v3536_v7, %v3526_v26  ;;  %v3550_v45 = vmul.f32 %v7124_v52, %v3547_v28  ;;  %v3563_v60 = vmul.f32 %v6583_v42, %v3561_v16  ;;  %v7127_v26 = vld [vmem:[#allocation33_spill] sm:$0xff] }
 0xeec   : > { %v3553_v55 = vadd.f32 %v3549_v2, %v3539_v38  ;;  %v3541_v53 = vadd.f32 %v3537_v30, %v3527_v22  ;;  %v3551_v39 = vmul.f32 %v7125_v11, %v3547_v28  ;;  %v3564_v47 = vmul.f32 %v6590_v18, %v3561_v16  ;;  %v7128_v2 = vld [vmem:[#allocation34_spill] sm:$0xff] }
 0xeed   : > { %v3580_v51 = vadd.f32 %v3576_v8, %v3566_v54  ;;  %v3554_v63 = vadd.f32 %v3550_v45, %v3540_v57  ;;  %v3585_v10 = vstv %s4890_s23  ;;  %v3577_v31 = vmul.f32 %v6595_v29, %v3575_v12  ;;  %v7129_v8 = vld [vmem:[#allocation35_spill] sm:$0xff] }
 0xeee   : > { %v3567_v13 = vadd.f32 %v3563_v60, %v3553_v55  ;;  %v3555_v21 = vadd.f32 %v3551_v39, %v3541_v53  ;;  %v3565_v49 = vmul.f32 %v6599_v5, %v3561_v16  ;;  %v3578_v44 = vmul.f32 %v6602_v6, %v3575_v12 }
 0xeef   : > { %v3586_v32 = vadd.f32 %v3585_v10, %v3580_v51  ;;  %v3568_v48 = vadd.f32 %v3564_v47, %v3554_v63  ;;  %v3579_v29 = vmul.f32 %v6608_v56, %v3575_v12 }
 0xef0   : > { %v3581_v18 = vadd.f32 %v3577_v31, %v3567_v13  ;;  %v3569_v1 = vadd.f32 %v3565_v49, %v3555_v21 }
 0xef1   : > { %v3582_v6 = vadd.f32 %v3578_v44, %v3568_v48 }
 0xef2   : > { %v3587_v5 = vadd.f32 %v3585_v10, %v3581_v18  ;;  %v3583_v46 = vadd.f32 %v3579_v29, %v3569_v1 }
 0xef3   : > { %v3588_v36 = vadd.f32 %v3585_v10, %v3582_v6 }
 0xef4   : > { %v3589_v35 = vadd.f32 %v3585_v10, %v3583_v46 }
 0xfa6   : > { %v3187_v42 = vpop.f32.mrb[26].mxu1 }
 0xfa7   : > { %4802 = vst.msk [vmem:[%s6246_s27 + $0x8] sm:$0xf] %vm1339_vm5, %v3187_v42  ;;  %3196 = vrot.lane.b32.xlu0 %v3187_v42, %s5509_s28  ;;  %v5239_v28 = vpop.f32.mrb[27].mxu1  ;;  %5243 = vmatmul.mubr.msk.f32.vlgmr.msra.gmra.mrb[28].mxu0 %vm1352_vm7, %v3187_v42 }
 0xfa8   : > { %4803 = vst.msk [vmem:[%s6246_s27 + $0x24] sm:$0xf0] %vm1342_vm6, %v3187_v42  ;;  %5387 = vmatpush3.bf16.msra.mxu0 %v5647_v3  ;;  %5258 = vmatprep.mubr.msk.f32.mxu0 %vm795_vm0, %v3586_v32 }
 0xfa9   : > { %5389 = vmatprep.subr.bf16.mxu0 %v7068_v59 }
 0xfac   : > { %5391 = vmatpush3.bf16.msra.mxu0 %v7068_v59 }
 0xfad   : > { %5401 = vmatprep.subr.bf16.mxu0 %v6063_v15 }
 0xfaf   : > { %5259 = vmatmul.mubr.msk.f32.vlgmr.msra.gmra.mrb[30].mxu0 %vm795_vm0, %v3587_v5 }
 0xfb0   : > { %5261 = vmatprep.mubr.msk.f32.mxu0 %vm795_vm0, %v3588_v36  ;;  %5403 = vmatpush3.bf16.msra.mxu0 %v6063_v15 }
 0xfb1   : > { %5292 = vmatprep.subr.mxu0 %v7069_v40 }
 0xfb3   : > { %5262 = vmatmul.mubr.msk.f32.gmra.mrb[32].mxu0 %vm795_vm0, %v3589_v35 }
0x1019   : > { %v3197_v3 = vpop.permute.xlu0 %3196 }
0x101a   : > { %4804 = vst.msk [vmem:[%s6246_s27 + $0x2c] sm:$0xf] %vm1339_vm5, %v3197_v3 }
0x101b   : > { %4805 = vst.msk [vmem:[%s6246_s27 + $0x2c] sm:$0xf0] %vm1342_vm6, %v3197_v3 }
0x107a   : > { %v3271_v59 = vpop.f32.mrb[28].mxu0 }
0x107b   : > { %v5244_v56 = vpop.f32.mrb[29].mxu0  ;;  %5246 = vmatpush3.msk.msra.mxu1 %vm1355_vm4, %v3271_v59 }
0x107c   : > { %5248 = vmatmul.mubr.msk.f32.vlgmr.msra.gmra.mrb[28].mxu1 %vm1352_vm7, %v6838_v62 }
0x107d   : > { %5272 = vmatprep.mubr.msk.f32.mxu1 %vm795_vm0, %v6637_v25 }
0x1082   : > { %v5260_v15 = vpop.f32.mrb[30].mxu0 }
0x1083   : > { %v3668_v23 = vpop.f32.mrb[31].mxu0 }
0x1084   : > { %v5392_v50 = vpack.c.bf16 %v5260_v15, %v3668_v23 }
0x1086   : > { %v5263_v24 = vpop.f32.mrb[32].mxu0  ;;  %5393 = vmatprep.subr.bf16.mxu1 %v5392_v50 }
0x1087   : > { %v3678_v16 = vpop.f32.mrb[33].mxu0  ;;  %5395 = vmatpush3.bf16.msra.mxu1 %v5392_v50 }
0x1088   : > { %v5396_v4 = vpack.c.bf16 %v5263_v24, %v3678_v16 }
0x108a   : > { %5397 = vmatprep.subr.bf16.mxu1 %v5396_v4 }
0x108b   : > { %5399 = vmatpush3.bf16.msra.mxu1 %v5396_v4 }
0x108e   : > { %5273 = vmatmul.mubr.msk.f32.vlgmr.msra.gmra.mrb[30].mxu1 %vm795_vm0, %v6644_v34 }
0x108f   : > { %5275 = vmatprep.mubr.msk.f32.mxu1 %vm795_vm0, %v6651_v17 }
0x1092   : > { %5276 = vmatmul.mubr.msk.f32.gmra.mrb[32].mxu1 %vm795_vm0, %v6658_v37  ;;  %v7126_v37 = vld [vmem:[#allocation31_spill] sm:$0xff] }
0x1093   : > { %5289 = vmatprep.mubr.msk.f32.mxu1 %vm990_vm1, %v6665_v20 }
0x114f   : > { %v3344_v25 = vpop.f32.mrb[28].mxu1 }
0x1150   : > { %4810 = vst.msk [vmem:[%s6292_s25 + $0x4] sm:$0x3] %vm1505_vm8, %v3344_v25  ;;  %v5249_v14 = vpop.f32.mrb[29].mxu1  ;;  %3353 = vrot.lane.b32.xlu1 %v3344_v25, %s5510_s26 }
0x1151   : > { %4811 = vst.msk [vmem:[%s6292_s25 + $0x12] sm:$0xc] %vm1508_vm9, %v3344_v25 }
0x1161   : > { %v5274_v34 = vpop.f32.mrb[30].mxu1 }
0x1162   : > { %4900 = vst.msk [vmem:[%s6092_s19 + $0x38] sm:$0xff] %vm990_vm1, %v5274_v34  ;;  %3782 = vrot.lane.b32.xlu1 %v5274_v34, %s5505_s20  ;;  %v3753_v17 = vpop.f32.mrb[31].mxu1 }
0x1163   : > { %4899 = vst.msk [vmem:[%s6092_s19 + $0x30] sm:$0xff] %vm990_vm1, %v3753_v17  ;;  %3780 = vrot.lane.b32.xlu0 %v3753_v17, %s5505_s20  ;;  %5282 = vmatprep.mubr.msk.f32.mxu0 %vm990_vm1, %v3753_v17 }
0x1164   : > { %5283 = vmatmul.mubr.msk.f32.vlgmr.msra.gmra.mrb[34].mxu0 %vm990_vm1, %v5274_v34 }
0x1165   : > { %5293 = vmatpush3.msra.mxu0 %v7126_v37  ;;  %5294 = vmatprep.mubr.msk.f32.mxu0 %vm5507_vm2, %v7069_v40  ;;  %v5277_v20 = vpop.f32.mrb[32].mxu1 }
0x1166   : > { %5302 = vmatprep.subr.mxu0 %v7069_v40  ;;  %4902 = vst.msk [vmem:[%s6092_s19 + $0xd8] sm:$0xff] %vm990_vm1, %v5277_v20  ;;  %v3763_v0 = vpop.f32.mrb[33].mxu1  ;;  %3793 = vrot.lane.b32.xlu1 %v5277_v20, %s5505_s20 }
0x1167   : > { %4901 = vst.msk [vmem:[%s6092_s19 + $0xd0] sm:$0xff] %vm990_vm1, %v3763_v0  ;;  %3791 = vrot.lane.b32.xlu0 %v3763_v0, %s5505_s20 }
0x11c2   : > { %v3354_v58 = vpop.permute.xlu1 %3353 }
0x11c3   : > { %4812 = vst.msk [vmem:[%s6292_s25 + $0x16] sm:$0x3] %vm1505_vm8, %v3354_v58 }
0x11c4   : > { %4813 = vst.msk [vmem:[%s6292_s25 + $0x16] sm:$0xc] %vm1508_vm9, %v3354_v58 }
0x11d4   : > { %v3783_v43 = vpop.permute.xlu1 %3782 }
0x11d5   : > { %4904 = vst.msk [vmem:[%s6092_s19 + $0xe8] sm:$0xff] %vm990_vm1, %v3783_v43  ;;  %v3781_v19 = vpop.permute.xlu0 %3780 }
0x11d6   : > { %4903 = vst.msk [vmem:[%s6092_s19 + $0xe0] sm:$0xff] %vm990_vm1, %v3781_v19 }
0x11d8   : > { %v3794_v61 = vpop.permute.xlu1 %3793 }
0x11d9   : > { %v3792_v7 = vpop.permute.xlu0 %3791  ;;  %4906 = vst.msk [vmem:[%s6092_s19 + $0xf8] sm:$0xff] %vm990_vm1, %v3794_v61 }
0x11da   : > { %4905 = vst.msk [vmem:[%s6092_s19 + $0xf0] sm:$0xff] %vm990_vm1, %v3792_v7 }
0x1237   : > { %v5284_v9 = vpop.f32.mrb[34].mxu0 }
0x1238   : > { %v3870_v33 = vpop.f32.mrb[35].mxu0 }
0x1239   : > { %v5404_v41 = vpack.c.bf16 %v5284_v9, %v3870_v33 }
0x123b   : > { %5405 = vmatprep.subr.bf16.mxu1 %v5404_v41 }
0x123c   : > { %5407 = vmatpush3.bf16.msra.mxu1 %v5404_v41 }
0x123d   : > { %5297 = vmatprep.subr.mxu1 %v7069_v40 }
0x123f   : > { %5290 = vmatmul.mubr.msk.f32.vlgmr.msra.gmra.mrb[34].mxu1 %vm990_vm1, %v7127_v26 }
0x1240   : > { %5299 = vmatprep.mubr.msk.f32.mxu1 %vm5507_vm2, %v7069_v40 }
0x1312   : > { %v5291_v12 = vpop.f32.mrb[34].mxu1 }
0x1313   : > { %4912 = vst.msk [vmem:[%s6147_s15 + $0x68] sm:$0xff] %vm1178_vm3, %v5291_v12  ;;  %v3945_v38 = vpop.f32.mrb[35].mxu1  ;;  %3965 = vrot.lane.b32.xlu1 %v5291_v12, %s5508_s16 }
0x1314   : > { %4911 = vst.msk [vmem:[%s6147_s15 + $0x18] sm:$0xff] %vm1178_vm3, %v3945_v38  ;;  %5295 = vmatmul.mubr.msk.f32.vlgmr.msra.gmra.mrb[36].mxu0 %vm1178_vm3, %v3945_v38  ;;  %3959 = vrot.lane.b32.xlu0 %v3945_v38, %s5508_s16 }
0x1315   : > { %5303 = vmatpush3.msk.msra.mxu0 %vm1355_vm4, %v7128_v2  ;;  %5304 = vmatprep.mubr.msk.f32.mxu0 %vm5507_vm2, %v7069_v40 }
0x1385   : > { %v3966_v22 = vpop.permute.xlu1 %3965 }
0x1386   : > { %4914 = vst.msk [vmem:[%s6147_s15 + $0x78] sm:$0xff] %vm1178_vm3, %v3966_v22  ;;  %v3960_v30 = vpop.permute.xlu0 %3959 }
0x1387   : > { %4913 = vst.msk [vmem:[%s6147_s15 + $0x70] sm:$0xff] %vm1178_vm3, %v3960_v30 }
0x13e7   : > { %v4038_v54 = vpop.f32.mrb[36].mxu0 }
0x13e8   : > { %v5296_v27 = vpop.f32.mrb[37].mxu0  ;;  %5298 = vmatpush3.msra.mxu1 %v4038_v54 }
0x13e9   : > { %5300 = vmatmul.mubr.msk.f32.vlgmr.msra.gmra.mrb[36].mxu1 %vm1178_vm3, %v7129_v8  ;;  %5307 = vmatprep.subr.mxu1 %v7069_v40 }
0x13ea   : > { %5309 = vmatprep.mubr.msk.f32.mxu1 %vm5507_vm2, %v7069_v40 }
0x14bc   : > { %v4108_v57 = vpop.f32.mrb[36].mxu1 }
0x14bd   : > { %4917 = vst.msk [vmem:[%s6246_s27 + $0xc] sm:$0xf] %vm1339_vm5, %v4108_v57  ;;  %v5301_v52 = vpop.f32.mrb[37].mxu1  ;;  %5305 = vmatmul.mubr.msk.f32.vlgmr.msra.gmra.mrb[38].mxu0 %vm1352_vm7, %v4108_v57  ;;  %4117 = vrot.lane.b32.xlu0 %v4108_v57, %s5509_s28 }
0x14be   : > { %4918 = vst.msk [vmem:[%s6246_s27 + $0x30] sm:$0xf0] %vm1342_vm6, %v4108_v57 }
0x152f   : > { %v4118_v45 = vpop.permute.xlu0 %4117 }
0x1530   : > { %4919 = vst.msk [vmem:[%s6246_s27 + $0x38] sm:$0xf] %vm1339_vm5, %v4118_v45 }
0x1531   : > { %4920 = vst.msk [vmem:[%s6246_s27 + $0x38] sm:$0xf0] %vm1342_vm6, %v4118_v45 }
0x1590   : > { %v4192_v55 = vpop.f32.mrb[38].mxu0 }
0x1591   : > { %v5306_v40 = vpop.f32.mrb[39].mxu0  ;;  %5308 = vmatpush3.msk.msra.mxu1 %vm1355_vm4, %v4192_v55 }
0x1592   : > { %5310 = vmatmul.mubr.msk.f32.vlgmr.msra.gmra.mrb[38].mxu1 %vm1352_vm7, %v6838_v62 }
0x1665   : > { %v4265_v60 = vpop.f32.mrb[38].mxu1 }
0x1666   : > { %4925 = vst.msk [vmem:[%s6292_s25 + $0x6] sm:$0x3] %vm1505_vm8, %v4265_v60  ;;  %v5311_v53 = vpop.f32.mrb[39].mxu1  ;;  %4274 = vrot.lane.b32.xlu1 %v4265_v60, %s5510_s26 }
0x1667   : > { %4926 = vst.msk [vmem:[%s6292_s25 + $0x18] sm:$0xc] %vm1508_vm9, %v4265_v60 }
0x16d8   : > { %v4275_v11 = vpop.permute.xlu1 %4274 }
0x16d9   : > { %4927 = vst.msk [vmem:[%s6292_s25 + $0x1c] sm:$0x3] %vm1505_vm8, %v4275_v11 }
0x16da   : > { %4928 = vst.msk [vmem:[%s6292_s25 + $0x1c] sm:$0xc] %vm1508_vm9, %v4275_v11 }
0x16db PF: > { %s27_s29 = sadd.s32 1, %s5499_s29  }
0x16dc   : > { %p24_p3 = scmp.ge.s32.totalorder %s27_s29, 4  }
0x16de   :  { %26 = sbr.rel (!%p24_p3) target bundleno = 2 (0x2), region = 214 }
0x16e5   :  { %4350 = vsyncpa [#allocation3], 1 }
0x16e6   :  { %4352 = vsyncpa [#allocation3 + $0x1], 1 }
0x16e7   :  { %4353 = vsyncpa [#allocation5], 1 }

// kernel: waveblock_forward.9
= control target key start
LH: loop header
LB: loop body
LE: loop exit
PB: predicated region body
PF: predicated region fallthrough
CT: control target
= control target key end

     0   :  { %s3429_s27 = smov 0   ;;  %s4218_s0 = inlined_call_operand.vmem [shape: f32[2,24,256], index: 0, kind: input, shape index: {}]   ;;  %s4219_s1 = inlined_call_operand.vmem [shape: f32[32,24], index: 1, kind: input, shape index: {}]   ;;  %s4220_s2 = inlined_call_operand.vmem [shape: f32[32,1], index: 2, kind: input, shape index: {}]   ;;  %s4221_s3 = inlined_call_operand.vmem [shape: f32[16,32], index: 3, kind: input, shape index: {}]   ;;  %s4222_s4 = inlined_call_operand.vmem [shape: f32[16,1], index: 4, kind: input, shape index: {}]   ;;  %s4223_s5 = inlined_call_operand.vmem [shape: f32[9,64,16], index: 5, kind: input, shape index: {}]   ;;  %s4224_s6 = inlined_call_operand.vmem [shape: f32[64,1], index: 6, kind: input, shape index: {}]   ;;  %s4225_s7 = inlined_call_operand.vmem [shape: f32[9,256], index: 7, kind: input, shape index: {}]   ;;  %s4226_s8 = inlined_call_operand.vmem [shape: f32[2,64,256], index: 8, kind: output, shape index: {}]  }
   0x1 LB: > { %s2822_s28 = sadd.s32 4294967295, %s3363_s27   ;;  %p2826_p0 = scmp.ge.s32.totalorder %s3363_s27, 1  ;;  %s3363_s27 = sphi %s3429_s27, %s18_s27  }
   0x2   : > { %p262_p1 = scmp.lt.s32.totalorder %s3363_s27, 3 }
   0x4   : > { %p263_p2 = pnand %p2826_p0, %p262_p1 }
   0x5   : > { %p296_p3 = scmp.lt.s32.totalorder (!%p263_p2), %s2822_s28, 1  ;;  %v3365_v0 = vmov (!%p263_p2), 0.0   ;;  %v316_v1 = vld [vmem:[%s4220_s2] sm:$0xff] (!%p263_p2)  ;;  %v318_v2 = vld [vmem:[%s4220_s2 + $0x10] sm:$0xff] (!%p263_p2)  ;;  %v3366_v3 = vmov (!%p263_p2), 0   ;;  %v317_v4 = vld [vmem:[%s4220_s2 + $0x8] sm:$0xff] (!%p263_p2) }
   0x6   : > { %266 = sbr.rel (%p263_p2) target bundleno = 1281 (0x501), region = 52  ;;  %417 = vmatprep.mubr.f32.mxu0 (!%p263_p2), %v3365_v0  ;;  %756 = vst [vmem:[#allocation2] sm:$0xff] (!%p263_p2), %v3365_v0  ;;  %760 = vst [vmem:[#allocation2 + $0x18] sm:$0xff] (!%p263_p2), %v3365_v0  ;;  %1859 = vmatprep.mubr.f32.mxu1 (!%p263_p2), %v3365_v0  ;;  %v319_v5 = vld [vmem:[%s4220_s2 + $0x18] sm:$0xff] (!%p263_p2)  ;;  %v660_v11 = vld [vmem:[%s4222_s4] sm:$0xff] (!%p263_p2)  ;;  %vm340_vm0 = vcmask (!%p263_p2), 195584  }
   0x7   : > { %3203 = vset.pattern.permute.xlu0 (!%p263_p2), %v3366_v3  ;;  %3204 = vset.pattern.permute.xlu1 (!%p263_p2), %v3366_v3  ;;  %v661_v14 = vld [vmem:[%s4222_s4 + $0x8] sm:$0xff] (!%p263_p2)  ;;  %v312_v16 = vld [vmem:[%s4219_s1] sm:$0xff] (!%p263_p2)  ;;  %v314_v18 = vld [vmem:[%s4219_s1 + $0x10] sm:$0xff] (!%p263_p2)  ;;  %vm672_vm9 = vcmask (!%p263_p2), 261120   ;;  %vm758_vm10 = vcmask (!%p263_p2), 277504   ;;  %s3368_s15 = smov (!%p263_p2), 17  }
   0x8   : > { %322 = vperm.xlu0 (!%p263_p2), %3203, %v316_v1   ;;  %332 = vperm.xlu1 (!%p263_p2), %3204, %v318_v2   ;;  %v313_v17 = vld [vmem:[%s4219_s1 + $0x8] sm:$0xff] (!%p263_p2)  ;;  %v315_v19 = vld [vmem:[%s4219_s1 + $0x18] sm:$0xff] (!%p263_p2)  ;;  %759 = vst.msk [vmem:[#allocation2 + $0x10] sm:$0xff] (!%p263_p2), %vm758_vm10, %v3365_v0  ;;  %762 = vst.msk [vmem:[#allocation2 + $0x28] sm:$0xff] (!%p263_p2), %vm758_vm10, %v3365_v0  ;;  %s3369_s22 = smov (!%p263_p2), 34   ;;  %s3370_s25 = smov (!%p263_p2), 16  }
   0x9   : > { %s3371_s26 = smov (!%p263_p2), 33   ;;  %vm784_vm11 = vcmask (!%p263_p2), 1047688   ;;  %vm775_vm12 = vcmask (!%p263_p2), 138240   ;;  %s3372_s29 = smov (!%p263_p2), 111   ;;  %vm912_vm13 = vcmask (!%p263_p2), 130048   ;;  %vm1081_vm14 = vcmask (!%p263_p2), 269312  }
   0xa   : > { %s3373_s10 = smov (!%p263_p2), 2   ;;  %s3374_s13 = smov (!%p263_p2), 94   ;;  %vm1762_vm15 = vcmask (!%p263_p2), 908288  }
   0xb   : > { %s3375_s14 = smov (!%p263_p2), 112   ;;  %s3378_s19 = smov (!%p263_p2), 95  }
   0xc   : > { %327 = vperm.xlu0 (!%p263_p2), %3203, %v317_v4   ;;  %337 = vperm.xlu1 (!%p263_p2), %3204, %v319_v5   ;;  %v3367_v5 = vmov (!%p263_p2), -1.0   ;;  %s3379_s24 = smov (!%p263_p2), 126   ;;  %s3381_s12 = smov (!%p263_p2), 96  }
   0xd   : > { %s4228_s28 = smov (!%p296_p3, %s2822_s28), 1  ;;  %s3382_s21 = smov 127  }
   0xe   : > { %s3175_s11 = smul.u32 48, %s4228_s28  ;;  %s2982_s9 = sshll.u32 %s4228_s28, 7 }
  0x10   : > { %s300_s18 = scalar_lea.vmem %s4218_s0, %s3175_s11  ;;  %664 = vperm.xlu0 %3203, %v660_v11   ;;  %669 = vperm.xlu1 %3204, %v661_v14  }
  0x11   : > { %v307_v6 = vld [vmem:[%s300_s18 + $0x8] sm:$0xff]  ;;  %v309_v7 = vld [vmem:[%s300_s18 + $0x18] sm:$0xff]  ;;  %v306_v8 = vld [vmem:[%s300_s18] sm:$0xff] }
  0x12   : > { %v2983_v9 = vpack.c.bf16 %v309_v7, %v307_v6  ;;  %v308_v10 = vld [vmem:[%s300_s18 + $0x10] sm:$0xff]  ;;  %v311_v13 = vld [vmem:[%s300_s18 + $0x28] sm:$0xff]  ;;  %v310_v15 = vld [vmem:[%s300_s18 + $0x20] sm:$0xff]  ;;  %s3377_s18 = smov 1  }
  0x13   : > { %v2985_v12 = vpack.c.bf16 %v308_v10, %v306_v8 }
  0x14   : > { %2984 = vmatprep.subr.bf16.mxu0 %v2983_v9 }
  0x15   : > { %2986 = vmatpush1.bf16.msra.mxu0 %v2985_v12 }
  0x16   : > { %357 = vmatprep.subr.mxu0 %v311_v13 }
  0x19   : > { %358 = vmatpush1.msra.mxu0 %v310_v15 }
  0x1a   : > { %2830 = vmatmul.mubr.msk.f32.vlgmr.msra.gmra.mrb[0].mxu0 %vm340_vm0, %v312_v16 }
  0x1b   : > { %423 = vmatprep.mubr.f32.mxu0 %v3365_v0 }
  0x1e   : > { %2831 = vmatmul.mubr.msk.f32.gmra.mrb[2].mxu0 %vm340_vm0, %v313_v17 }
  0x1f   : > { %429 = vmatprep.mubr.f32.mxu0 %v3365_v0 }
  0x22   : > { %2832 = vmatmul.mubr.msk.f32.gmra.mrb[4].mxu0 %vm340_vm0, %v314_v18 }
  0x23   : > { %435 = vmatprep.mubr.f32.mxu0 %v3365_v0 }
  0x26   : > { %2833 = vmatmul.mubr.msk.f32.gmra.mrb[6].mxu0 %vm340_vm0, %v315_v19  ;;  %vm2153_vm0 = vcmask 15360  }
  0x27   : > { %743 = vmatprep.mubr.f32.mxu0 %v3365_v0 }
  0x87   : > { %v323_v20 = vpop.permute.xlu0 %322  ;;  %v333_v43 = vpop.permute.xlu1 %332 }
  0x8b   : > { %v328_v26 = vpop.permute.xlu0 %327  ;;  %v338_v61 = vpop.permute.xlu1 %337 }
  0xed   : > { %v419_v21 = vpop.f32.mrb[0].mxu0 }
  0xee   : > { %v420_v22 = vadd.f32 %v419_v21, %v323_v20  ;;  %v421_v23 = vpop.f32.mrb[1].mxu0 }
  0xef   : > { %v3481_v24 = vadd.f32 %v421_v23, %v323_v20 }
  0xf0   : > { %v450_v25 = vmul.f32 0.70710677, %v420_v22  ;;  %v3504_v60 = vmul.f32 0.5, %v420_v22 }
  0xf1   : > { %v451_v27 = vmul.f32 0.70710677, %v3481_v24  ;;  %v425_v28 = vpop.f32.mrb[2].mxu0 }
  0xf2   : > { %v474_v29 = vand.u32 2147483647, %v450_v25  ;;  %v426_v30 = vadd.f32 %v425_v28, %v328_v26  ;;  %v427_v31 = vpop.f32.mrb[3].mxu0  ;;  %vm458_vm1 = vcmp.ge.f32.partialorder %v450_v25, 0.0 }
  0xf3   : > { %v475_v32 = vand.u32 2147483647, %v451_v27  ;;  %v3484_v33 = vadd.f32 %v427_v31, %v328_v26  ;;  %vm459_vm2 = vcmp.ge.f32.partialorder %v451_v27, 0.0  ;;  %v3512_v6 = vsel %vm458_vm1, 1.0, %v3367_v5 }
  0xf4   : > { %v482_v34 = vmul.f32 0.3275911, %v474_v29  ;;  %v452_v36 = vmul.f32 0.70710677, %v426_v30  ;;  %v586_v46 = vsub.f32 0.0, %v474_v29  ;;  %v3521_v14 = vsel %vm459_vm2, 1.0, %v3367_v5 }
  0xf5   : > { %v483_v35 = vmul.f32 0.3275911, %v475_v32  ;;  %v3487_v38 = vmul.f32 0.70710677, %v3484_v33  ;;  %v431_v39 = vpop.f32.mrb[4].mxu0  ;;  %v587_v54 = vsub.f32 0.0, %v475_v32 }
  0xf6   : > { %v490_v37 = vadd.f32 1.0, %v482_v34  ;;  %v476_v41 = vand.u32 2147483647, %v452_v36  ;;  %v433_v42 = vpop.f32.mrb[5].mxu0  ;;  %v3490_v48 = vadd.f32 %v431_v39, %v333_v43  ;;  %v594_v56 = vmul.f32 %v586_v46, %v474_v29 }
  0xf7   : > { %v491_v40 = vadd.f32 1.0, %v483_v35  ;;  %v477_v47 = vand.u32 2147483647, %v3487_v38  ;;  %v3492_v51 = vadd.f32 %v433_v42, %v333_v43  ;;  %v595_v63 = vmul.f32 %v587_v54, %v475_v32 }
  0xf8   : > { %3325 = vrcp.f32 %v490_v37  ;;  %v484_v44 = vmul.f32 0.3275911, %v476_v41  ;;  %v3495_v53 = vmul.f32 0.70710677, %v3490_v48  ;;  %v588_v1 = vsub.f32 0.0, %v476_v41 }
  0xf9   : > { %3327 = vrcp.f32 %v491_v40  ;;  %v437_v45 = vpop.f32.mrb[6].mxu0  ;;  %v485_v52 = vmul.f32 0.3275911, %v477_v47  ;;  %v3498_v55 = vmul.f32 0.70710677, %v3492_v51  ;;  %vm460_vm3 = vcmp.ge.f32.partialorder %v452_v36, 0.0 }
  0xfa   : > { %v439_v49 = vpop.f32.mrb[7].mxu0  ;;  %v492_v50 = vadd.f32 1.0, %v484_v44  ;;  %v478_v58 = vand.u32 2147483647, %v3495_v53  ;;  %v3507_v3 = vadd.f32 %v437_v45, %v338_v61  ;;  %v602_v7 = vmul.f32 1.442695, %v594_v56 }
  0xfb   : > { %v493_v57 = vadd.f32 1.0, %v485_v52  ;;  %v3502_v59 = vand.u32 2147483647, %v3498_v55  ;;  %v589_v11 = vsub.f32 0.0, %v477_v47  ;;  %v3517_v13 = vadd.f32 %v439_v49, %v338_v61 }
  0xfc   : > { %3329 = vrcp.f32 %v492_v50  ;;  %v486_v62 = vmul.f32 0.3275911, %v478_v58  ;;  %v3525_v16 = vmul.f32 0.70710677, %v3507_v3  ;;  %v604_v18 = vmul.f32 1.442695, %v595_v63 }
  0xfd   : > { %3331 = vrcp.f32 %v493_v57  ;;  %v487_v2 = vmul.f32 0.3275911, %v3502_v59  ;;  %v596_v19 = vmul.f32 %v588_v1, %v476_v41  ;;  %v3527_v21 = vmul.f32 0.5, %v426_v30 }
  0xfe   : > { %v494_v8 = vadd.f32 1.0, %v486_v62  ;;  %v3531_v22 = vsel %vm460_vm3, 1.0, %v3367_v5  ;;  %v480_v23 = vand.u32 2147483647, %v3525_v16  ;;  %v597_v27 = vmul.f32 %v589_v11, %v477_v47 }
  0xff   : > { %v495_v12 = vadd.f32 1.0, %v487_v2  ;;  %v3538_v28 = vmul.f32 0.70710677, %v3517_v13  ;;  %v590_v31 = vsub.f32 0.0, %v478_v58  ;;  %v606_v35 = vmul.f32 1.442695, %v596_v19 }
 0x100   : > { %3333 = vrcp.f32 %v494_v8  ;;  %v488_v32 = vmul.f32 0.3275911, %v480_v23  ;;  %v591_v41 = vsub.f32 0.0, %v3502_v59  ;;  %v608_v45 = vmul.f32 1.442695, %v597_v27 }
 0x101   : > { %3335 = vrcp.f32 %v495_v12  ;;  %v3543_v36 = vand.u32 2147483647, %v3538_v28  ;;  %v598_v50 = vmul.f32 %v590_v31, %v478_v58  ;;  %v592_v1 = vsub.f32 0.0, %v480_v23 }
 0x102   : > { %v3509_v4 = vpop.eup %3325  ;;  %3337 = vpow2.f32 %v602_v7  ;;  %v496_v42 = vadd.f32 1.0, %v488_v32  ;;  %v599_v63 = vmul.f32 %v591_v41, %v3502_v59  ;;  %vm461_vm4 = vcmp.ge.f32.partialorder %v3487_v38, 0.0 }
 0x103   : > { %v3514_v9 = vpop.eup %3327  ;;  %v514_v10 = vmul.f32 1.0614054, %v3509_v4  ;;  %3339 = vpow2.f32 %v604_v18  ;;  %v489_v46 = vmul.f32 0.3275911, %v3543_v36  ;;  %v610_v12 = vmul.f32 1.442695, %v598_v50 }
 0x104   : > { %v515_v15 = vmul.f32 1.0614054, %v3514_v9  ;;  %3341 = vrcp.f32 %v496_v42  ;;  %v593_v42 = vsub.f32 0.0, %v3543_v36  ;;  %vm462_vm5 = vcmp.ge.f32.partialorder %v3495_v53, 0.0 }
 0x105   : > { %v522_v17 = vadd.f32 -1.4531521, %v514_v10  ;;  %3343 = vpow2.f32 %v606_v35  ;;  %v497_v56 = vadd.f32 1.0, %v489_v46  ;;  %v612_v35 = vmul.f32 1.442695, %v599_v63 }
 0x106   : > { %v523_v20 = vadd.f32 -1.4531521, %v515_v15  ;;  %v3534_v25 = vpop.eup %3329  ;;  %vm463_vm6 = vcmp.ge.f32.partialorder %v3498_v55, 0.0  ;;  %vm464_vm7 = vcmp.ge.f32.partialorder %v3525_v16, 0.0  ;;  %vm465_vm8 = vcmp.ge.f32.partialorder %v3538_v28, 0.0 }
 0x107   : > { %v530_v26 = vmul.f32 %v3509_v4, %v522_v17  ;;  %v516_v30 = vmul.f32 1.0614054, %v3534_v25  ;;  %v3545_v37 = vpop.eup %3331  ;;  %3345 = vrcp.f32 %v497_v56  ;;  %v446_v16 = vmul.f32 0.5, %v3490_v48  ;;  %v658_v48 = vld [vmem:[%s4221_s3] sm:$0xff] }
 0x108   : > { %v531_v29 = vmul.f32 %v3514_v9, %v523_v20  ;;  %v517_v44 = vmul.f32 1.0614054, %v3545_v37  ;;  %3347 = vpow2.f32 %v608_v45  ;;  %vm903_vm1 = vcmask 769024  }
 0x109   : > { %v538_v34 = vadd.f32 1.4214138, %v530_v26  ;;  %v524_v40 = vadd.f32 -1.4531521, %v516_v30  ;;  %3349 = vpow2.f32 %v610_v12  ;;  %vm1976_vm2 = vcmask 916480  }
 0x10a   : > { %v539_v39 = vadd.f32 1.4214138, %v531_v29  ;;  %v525_v54 = vadd.f32 -1.4531521, %v517_v44  ;;  %v3553_v57 = vpop.eup %3333  ;;  %v600_v29 = vmul.f32 %v592_v1, %v480_v23  ;;  %v601_v1 = vmul.f32 %v593_v42, %v3543_v36 }
 0x10b   : > { %v546_v43 = vmul.f32 %v3509_v4, %v538_v34  ;;  %v532_v49 = vmul.f32 %v3534_v25, %v524_v40  ;;  %v3556_v2 = vpop.eup %3335  ;;  %v518_v58 = vmul.f32 1.0614054, %v3553_v57  ;;  %3351 = vpow2.f32 %v612_v35 }
 0x10c   : > { %v547_v47 = vmul.f32 %v3514_v9, %v539_v39  ;;  %v533_v8 = vmul.f32 %v3545_v37, %v525_v54  ;;  %v519_v15 = vmul.f32 1.0614054, %v3556_v2  ;;  %v3338_v17 = vpop.eup %3337  ;;  %vm2368_vm3 = vcmask 7168  }
 0x10d   : > { %v554_v52 = vadd.f32 -0.28449672, %v546_v43  ;;  %v540_v62 = vadd.f32 1.4214138, %v532_v49  ;;  %v526_v19 = vadd.f32 -1.4531521, %v518_v58  ;;  %v3340_v30 = vpop.eup %3339 }
 0x10e   : > { %v555_v61 = vadd.f32 -0.28449672, %v547_v47  ;;  %v541_v59 = vadd.f32 1.4214138, %v533_v8  ;;  %v527_v27 = vadd.f32 -1.4531521, %v519_v15 }
 0x10f   : > { %v562_v7 = vmul.f32 %v3509_v4, %v554_v52  ;;  %v548_v11 = vmul.f32 %v3534_v25, %v540_v62  ;;  %v534_v34 = vmul.f32 %v3553_v57, %v526_v19  ;;  %v614_v49 = vmul.f32 1.442695, %v600_v29 }
 0x110   : > { %v563_v10 = vmul.f32 %v3514_v9, %v555_v61  ;;  %v549_v32 = vmul.f32 %v3545_v37, %v541_v59  ;;  %v535_v41 = vmul.f32 %v3556_v2, %v527_v27  ;;  %v616_v27 = vmul.f32 1.442695, %v601_v1 }
 0x111   : > { %v570_v18 = vadd.f32 0.2548296, %v562_v7  ;;  %v556_v26 = vadd.f32 -0.28449672, %v548_v11  ;;  %v542_v44 = vadd.f32 1.4214138, %v534_v34  ;;  %3353 = vpow2.f32 %v614_v49 }
 0x112   : > { %v571_v20 = vadd.f32 0.2548296, %v563_v10  ;;  %v557_v23 = vadd.f32 -0.28449672, %v549_v32  ;;  %v543_v47 = vadd.f32 1.4214138, %v535_v41  ;;  %3355 = vpow2.f32 %v616_v27 }
 0x113   : > { %v578_v31 = vmul.f32 %v3509_v4, %v570_v18  ;;  %v564_v40 = vmul.f32 %v3534_v25, %v556_v26  ;;  %v3572_v4 = vpop.eup %3341  ;;  %v550_v54 = vmul.f32 %v3553_v57, %v542_v44  ;;  %v448_v27 = vmul.f32 0.5, %v3507_v3 }
 0x114   : > { %v579_v39 = vmul.f32 %v3514_v9, %v571_v20  ;;  %v3344_v50 = vpop.eup %3343  ;;  %v565_v52 = vmul.f32 %v3545_v37, %v557_v23  ;;  %v520_v56 = vmul.f32 1.0614054, %v3572_v4  ;;  %v551_v63 = vmul.f32 %v3556_v2, %v543_v47 }
 0x115   : > { %v618_v43 = vmul.f32 %v3338_v17, %v578_v31  ;;  %v572_v46 = vadd.f32 0.2548296, %v564_v40  ;;  %v3580_v7 = vpop.eup %3345  ;;  %v558_v58 = vadd.f32 -0.28449672, %v550_v54  ;;  %v469_v40 = vsel %vm461_vm4, 1.0, %v3367_v5 }
 0x116   : > { %v619_v45 = vmul.f32 %v3340_v30, %v579_v39  ;;  %v573_v8 = vadd.f32 0.2548296, %v565_v52  ;;  %v528_v10 = vadd.f32 -1.4531521, %v520_v56  ;;  %v559_v15 = vadd.f32 -0.28449672, %v551_v63  ;;  %v3348_v18 = vpop.eup %3347 }
 0x117   : > { %v626_v9 = vsub.f32 1.0, %v618_v43  ;;  %v580_v62 = vmul.f32 %v3534_v25, %v572_v46  ;;  %v521_v17 = vmul.f32 1.0614054, %v3580_v7  ;;  %v566_v25 = vmul.f32 %v3553_v57, %v558_v58  ;;  %v3350_v39 = vpop.eup %3349 }
 0x118   : > { %v627_v61 = vsub.f32 1.0, %v619_v45  ;;  %v581_v59 = vmul.f32 %v3545_v37, %v573_v8  ;;  %v536_v19 = vmul.f32 %v3572_v4, %v528_v10  ;;  %v567_v20 = vmul.f32 %v3556_v2, %v559_v15 }
 0x119   : > { %v634_v11 = vmul.f32 %v626_v9, %v3512_v6  ;;  %v620_v12 = vmul.f32 %v3344_v50, %v580_v62  ;;  %v529_v26 = vadd.f32 -1.4531521, %v521_v17  ;;  %v574_v30 = vadd.f32 0.2548296, %v566_v25  ;;  %v3352_v9 = vpop.eup %3351 }
 0x11a   : > { %v635_v29 = vmul.f32 %v627_v61, %v3521_v14  ;;  %v621_v6 = vmul.f32 %v3348_v18, %v581_v59  ;;  %v544_v31 = vadd.f32 1.4214138, %v536_v19  ;;  %v575_v35 = vadd.f32 0.2548296, %v567_v20 }
 0x11b   : > { %v628_v36 = vsub.f32 1.0, %v620_v12  ;;  %v642_v32 = vadd.f32 1.0, %v634_v11  ;;  %v537_v37 = vmul.f32 %v3580_v7, %v529_v26  ;;  %v582_v42 = vmul.f32 %v3553_v57, %v574_v30  ;;  %v3354_v63 = vpop.eup %3353 }
 0x11c   : > { %v629_v41 = vsub.f32 1.0, %v621_v6  ;;  %v552_v43 = vmul.f32 %v3572_v4, %v544_v31  ;;  %v583_v23 = vmul.f32 %v3556_v2, %v575_v35  ;;  %v643_v45 = vadd.f32 1.0, %v635_v29  ;;  %v3356_v17 = vpop.eup %3355 }
 0x11d   : > { %v636_v34 = vmul.f32 %v628_v36, %v3531_v22  ;;  %v545_v44 = vadd.f32 1.4214138, %v537_v37  ;;  %v622_v46 = vmul.f32 %v3350_v39, %v582_v42  ;;  %v650_v49 = vmul.f32 %v642_v32, %v3504_v60 }
 0x11e   : > { %v637_v22 = vmul.f32 %v629_v41, %v469_v40  ;;  %v560_v47 = vadd.f32 -0.28449672, %v552_v43  ;;  %v443_v57 = vmul.f32 0.5, %v3481_v24  ;;  %v445_v52 = vmul.f32 0.5, %v3484_v33 }
 0x11f   : > { %v644_v14 = vadd.f32 1.0, %v636_v34  ;;  %v553_v38 = vmul.f32 %v3580_v7, %v545_v44  ;;  %v623_v61 = vmul.f32 %v3352_v9, %v583_v23  ;;  %v630_v8 = vsub.f32 1.0, %v622_v46  ;;  %v2895_v46 = vld [vmem:[%s4225_s7 + $0x4] ss:$8 sm:$0x3] }
 0x120   : > { %v645_v54 = vadd.f32 1.0, %v637_v22  ;;  %v568_v2 = vmul.f32 %v3572_v4, %v560_v47  ;;  %v651_v1 = vmul.f32 %v643_v45, %v443_v57  ;;  %v470_v33 = vsel %vm462_vm5, 1.0, %v3367_v5  ;;  %v670_v45 = vpop.permute.xlu1 %669 }
 0x121   : > { %v652_v50 = vmul.f32 %v644_v14, %v3527_v21  ;;  %v561_v62 = vadd.f32 -0.28449672, %v553_v38  ;;  %v631_v11 = vsub.f32 1.0, %v623_v61  ;;  %v638_v15 = vmul.f32 %v630_v8, %v470_v33 }
 0x122   : > { %v653_v60 = vmul.f32 %v645_v54, %v445_v52  ;;  %v576_v21 = vadd.f32 0.2548296, %v568_v2  ;;  %v471_v59 = vsel %vm463_vm6, 1.0, %v3367_v5  ;;  %v472_v19 = vsel %vm464_vm7, 1.0, %v3367_v5 }
 0x123   : > { %v2989_v56 = vpack.c.bf16 %v652_v50, %v650_v49  ;;  %v569_v58 = vmul.f32 %v3580_v7, %v561_v62  ;;  %v646_v36 = vadd.f32 1.0, %v638_v15  ;;  %v447_v34 = vmul.f32 0.5, %v3492_v51  ;;  %v659_v51 = vld [vmem:[%s4221_s3 + $0x8] sm:$0xff] }
 0x124   : > { %v584_v10 = vmul.f32 %v3572_v4, %v576_v21  ;;  %v2987_v24 = vpack.c.bf16 %v653_v60, %v651_v1  ;;  %v639_v4 = vmul.f32 %v631_v11, %v471_v59  ;;  %v449_v35 = vmul.f32 0.5, %v3517_v13  ;;  %v665_v13 = vpop.permute.xlu0 %664  ;;  %v853_v52 = vld [vmem:[%s4225_s7] ss:$8 sm:$0x3] }
 0x125   : > { %v577_v12 = vadd.f32 0.2548296, %v569_v58  ;;  %v654_v31 = vmul.f32 %v646_v36, %v446_v16  ;;  %v855_v3 = vlaneseq  ;;  %vm2191_vm4 = vcmask 1031168  }
 0x126   : > { %v624_v53 = vmul.f32 %v3354_v63, %v584_v10  ;;  %2988 = vmatprep.subr.bf16.mxu0 %v2987_v24  ;;  %v647_v6 = vadd.f32 1.0, %v639_v4  ;;  %v2844_v63 = vld [vmem:[%s4225_s7 + $0x1] ss:$8 sm:$0x3]  ;;  %vm1510_vm5 = vcmask 146432   ;;  %vm1119_vm6 = vcmask 777216  }
 0x127   : > { %v585_v18 = vmul.f32 %v3580_v7, %v577_v12  ;;  %2990 = vmatpush1.bf16.msra.mxu0 %v2989_v56  ;;  %v473_v7 = vsel %vm465_vm8, 1.0, %v3367_v5  ;;  %v856_v5 = vshrl.u32 %v855_v3, 7  ;;  %v2912_v56 = vld [vmem:[%s4225_s7 + $0x5] ss:$8 sm:$0x3]  ;;  %vm2406_vm7 = vcmask 1039360  }
 0x128   : > { %v632_v25 = vsub.f32 1.0, %v624_v53  ;;  %v655_v39 = vmul.f32 %v647_v6, %v447_v34  ;;  %vm1333_vm8 = vcmask 785408  }
 0x129   : > { %v625_v55 = vmul.f32 %v3356_v17, %v585_v18  ;;  %v3632_v44 = vsub.s32 0, %v856_v5  ;;  %v3637_v47 = vsub.s32 1, %v856_v5  ;;  %v2861_v5 = vld [vmem:[%s4225_s7 + $0x2] ss:$8 sm:$0x3] }
 0x12a   : > { %v640_v20 = vmul.f32 %v632_v25, %v472_v19 }
 0x12b   : > { %v633_v26 = vsub.f32 1.0, %v625_v55  ;;  %v1716_v9 = vrot.slane %v2895_v46, %v3632_v44  ;;  %v1720_v57 = vrot.slane %v2895_v46, %v3637_v47  ;;  %v858_v54 = vrot.slane %v853_v52, %v3632_v44 }
 0x12c   : > { %v648_v29 = vadd.f32 1.0, %v640_v20  ;;  %v862_v2 = vrot.slane %v853_v52, %v3637_v47  ;;  %v1930_v61 = vrot.slane %v2912_v56, %v3632_v44  ;;  %v1934_v62 = vrot.slane %v2912_v56, %v3637_v47  ;;  %v2946_v52 = vld [vmem:[%s4225_s7 + $0x7] ss:$8 sm:$0x3] }
 0x12d   : > { %v641_v30 = vmul.f32 %v633_v26, %v473_v7  ;;  %v1072_v1 = vrot.slane %v2844_v63, %v3632_v44  ;;  %v1076_v60 = vrot.slane %v2844_v63, %v3637_v47 }
 0x12e   : > { %v656_v32 = vmul.f32 %v648_v29, %v448_v27  ;;  %v2929_v29 = vld [vmem:[%s4225_s7 + $0x6] ss:$8 sm:$0x3] }
 0x12f   : > { %v649_v28 = vadd.f32 1.0, %v641_v30 }
 0x130   : > { %v2993_v37 = vpack.c.bf16 %v656_v32, %v654_v31 }
 0x131   : > { %v657_v40 = vmul.f32 %v649_v28, %v449_v35  ;;  %v2144_v35 = vrot.slane %v2929_v29, %v3632_v44  ;;  %v2148_v28 = vrot.slane %v2929_v29, %v3637_v47 }
 0x133   : > { %v2991_v41 = vpack.c.bf16 %v657_v40, %v655_v39 }
 0x135   : > { %2992 = vmatprep.subr.bf16.mxu0 %v2991_v41 }
 0x136   : > { %2994 = vmatpush1.bf16.msra.mxu0 %v2993_v37 }
 0x139   : > { %2834 = vmatmul.mubr.msk.f32.vlgmr.msra.gmra.mrb[8].mxu0 %vm672_vm9, %v658_v48 }
 0x13a   : > { %749 = vmatprep.mubr.f32.mxu0 %v3365_v0 }
 0x13d   : > { %2835 = vmatmul.mubr.msk.f32.gmra.mrb[10].mxu0 %vm672_vm9, %v659_v51 }
 0x13e   : > { %1001 = vmatprep.mubr.f32.mxu0 %v3365_v0 }
 0x20c   : > { %v745_v42 = vpop.f32.mrb[8].mxu0 }
 0x20d   : > { %v746_v43 = vadd.f32 %v745_v42, %v665_v13  ;;  %v747_v14 = vpop.f32.mrb[9].mxu0  ;;  %v1287_v42 = vrot.slane %v2861_v5, %v3632_v44 }
 0x20e   : > { %v748_v23 = vadd.f32 %v747_v14, %v665_v13 }
 0x20f   : > { %767 = vrot.lane.b32.xlu0 %v746_v43, %s3368_s15 }
 0x210   : > { %v751_v22 = vpop.f32.mrb[10].mxu0  ;;  %769 = vrot.lane.b32.xlu1 %v748_v23, %s3368_s15 }
 0x211   : > { %v752_v49 = vadd.f32 %v751_v22, %v670_v45  ;;  %v753_v50 = vpop.f32.mrb[11].mxu0 }
 0x212   : > { %v754_v38 = vadd.f32 %v753_v50, %v670_v45  ;;  %v1291_v45 = vrot.slane %v2861_v5, %v3637_v47 }
 0x213   : > { %771 = vrot.lane.b32.xlu0 %v752_v49, %s3368_s15 }
 0x214   : > { %773 = vrot.lane.b32.xlu1 %v754_v38, %s3368_s15 }
 0x217   : > { %1721 = vrot.lane.b32.xlu0 %v1716_v9, %s3368_s15 }
 0x218   : > { %1723 = vrot.lane.b32.xlu1 %v1720_v57, %s3368_s15  ;;  %s3376_s15 = smov 32  }
 0x21b   : > { %863 = vrot.lane.b32.xlu0 %v858_v54, %s3369_s22 }
 0x21c   : > { %865 = vrot.lane.b32.xlu1 %v862_v2, %s3369_s22 }
 0x21f   : > { %1935 = vrot.lane.b32.xlu0 %v1930_v61, %s3370_s25  ;;  %v2359_v61 = vrot.slane %v2946_v52, %v3632_v44 }
 0x220   : > { %1937 = vrot.lane.b32.xlu1 %v1934_v62, %s3370_s25  ;;  %v2363_v62 = vrot.slane %v2946_v52, %v3637_v47 }
 0x223   : > { %1077 = vrot.lane.b32.xlu0 %v1072_v1, %s3371_s26 }
 0x224   : > { %1079 = vrot.lane.b32.xlu1 %v1076_v60, %s3371_s26 }
 0x281   : > { %v768_v8 = vpop.permute.xlu0 %767 }
 0x282   : > { %785 = vst.msk [vmem:[#allocation2] sm:$0xff] %vm784_vm11, %v768_v8  ;;  %v770_v21 = vpop.permute.xlu1 %769 }
 0x283   : > { %v3656_v58 = vsel %vm775_vm12, %v768_v8, %v770_v21  ;;  %787 = vst.msk [vmem:[#allocation2 + $0x10] sm:$0xff] %vm775_vm12, %v770_v21 }
 0x285   : > { %v772_v10 = vpop.permute.xlu0 %771 }
 0x286   : > { %788 = vst.msk [vmem:[#allocation2 + $0x18] sm:$0xff] %vm784_vm11, %v772_v10  ;;  %v774_v24 = vpop.permute.xlu1 %773 }
 0x287   : > { %v3658_v33 = vsel %vm775_vm12, %v772_v10, %v774_v24  ;;  %790 = vst.msk [vmem:[#allocation2 + $0x28] sm:$0xff] %vm775_vm12, %v774_v24 }
 0x289   : > { %v1722_v11 = vpop.permute.xlu0 %1721  ;;  %v3664_v59 = vld [vmem:[#allocation2] sm:$0xff] }
 0x28a   : > { %v3660_v12 = vld [vmem:[#allocation2 + $0x10] sm:$0xff]  ;;  %v1724_v15 = vpop.permute.xlu1 %1723  ;;  %v1729_v27 = vmul.f32 %v1722_v11, %v3664_v59 }
 0x28b   : > { %v1725_v53 = vsel %vm775_vm12, %v1722_v11, %v1724_v15  ;;  %v1731_v17 = vmul.f32 %v1724_v15, %v3660_v12 }
 0x28c   : > { %v1730_v18 = vmul.f32 %v1725_v53, %v3656_v58  ;;  %v1733_v26 = vmul.f32 %v1725_v53, %v3658_v33 }
 0x28d   : > { %v3666_v25 = vld [vmem:[#allocation2 + $0x18] sm:$0xff]  ;;  %v864_v4 = vpop.permute.xlu0 %863 }
 0x28e   : > { %v1732_v19 = vmul.f32 %v1722_v11, %v3666_v25  ;;  %v3669_v55 = vld [vmem:[#allocation2 + $0x28] sm:$0xff]  ;;  %v866_v36 = vpop.permute.xlu1 %865  ;;  %v3205_v20 = vpack.i.bf16 %v1731_v17, %v1730_v18  ;;  %v871_v48 = vmul.f32 %v864_v4, %v3664_v59  ;;  %v874_v51 = vmul.f32 %v864_v4, %v3666_v25 }
 0x28f   : > { %v1734_v16 = vmul.f32 %v1724_v15, %v3669_v55  ;;  %v867_v30 = vsel %vm758_vm10, %v864_v4, %v866_v36  ;;  %v873_v39 = vmul.f32 %v866_v36, %v3660_v12  ;;  %v876_v23 = vmul.f32 %v866_v36, %v3669_v55 }
 0x290   : > { %3206 = vrot.lane.b32.xlu0 %v3205_v20, %s3372_s29  ;;  %v3210_v32 = vpack.i.bf16 %v1732_v19, %v1729_v27  ;;  %v872_v37 = vmul.f32 %v867_v30, %v3656_v58  ;;  %v3225_v43 = vpack.i.bf16 %v874_v51, %v871_v48  ;;  %v875_v14 = vmul.f32 %v867_v30, %v3658_v33 }
 0x291   : > { %v1936_v7 = vpop.permute.xlu0 %1935  ;;  %v3215_v6 = vpack.i.bf16 %v1734_v16, %v1733_v26 }
 0x292   : > { %v1938_v31 = vpop.permute.xlu1 %1937  ;;  %v3220_v3 = vpack.i.bf16 %v873_v39, %v872_v37  ;;  %v1943_v49 = vmul.f32 %v1936_v7, %v3664_v59  ;;  %v1946_v50 = vmul.f32 %v1936_v7, %v3666_v25  ;;  %v3235_v38 = vpack.i.bf16 %v876_v23, %v875_v14  ;;  %v2896_v37 = vld [vmem:[%s4223_s5 + $0x100] sm:$0xff] }
 0x293   : > { %v1939_v34 = vsel %vm912_vm13, %v1936_v7, %v1938_v31  ;;  %3216 = vrot.lane.b32.xlu1 %v3215_v6, %s3372_s29  ;;  %v1945_v41 = vmul.f32 %v1938_v31, %v3660_v12  ;;  %v1948_v46 = vmul.f32 %v1938_v31, %v3669_v55 }
 0x294   : > { %3211 = vrot.lane.b32.xlu0 %v3210_v32, %s3372_s29  ;;  %v1944_v40 = vmul.f32 %v1939_v34, %v3656_v58  ;;  %v1947_v22 = vmul.f32 %v1939_v34, %v3658_v33  ;;  %v3240_v56 = vpack.i.bf16 %v1946_v50, %v1943_v49  ;;  %s3380_s29 = smov 18   ;;  %v2898_v50 = vld [vmem:[%s4223_s5 + $0x110] sm:$0xff] }
 0x295   : > { %v1078_v9 = vpop.permute.xlu0 %1077 }
 0x296   : > { %v3230_v13 = vpack.i.bf16 %v1945_v41, %v1944_v40  ;;  %v3698_v57 = vpop.permute.xlu1 %1079  ;;  %v3245_v54 = vpack.i.bf16 %v1948_v46, %v1947_v22  ;;  %v1086_v60 = vmul.f32 %v1078_v9, %v3664_v59  ;;  %v1089_v8 = vmul.f32 %v1078_v9, %v3666_v25  ;;  %v2878_v40 = vld [vmem:[%s4225_s7 + $0x3] ss:$8 sm:$0x3] }
 0x297   : > { %2149 = vrot.lane.b32.xlu1 %v2144_v35, %s3373_s10  ;;  %v1082_v2 = vsel %vm1081_vm14, %v1078_v9, %v3698_v57  ;;  %v1088_v1 = vmul.f32 %v3698_v57, %v3660_v12  ;;  %v1501_v5 = vrot.slane %v2878_v40, %v3632_v44 }
 0x298   : > { %2151 = vrot.lane.b32.xlu0 %v2148_v28, %s3373_s10  ;;  %v1087_v63 = vmul.f32 %v1082_v2, %v3656_v58  ;;  %v3255_v10 = vpack.i.bf16 %v1089_v8, %v1086_v60 }
 0x29a   : > { %v3250_v21 = vpack.i.bf16 %v1088_v1, %v1087_v63 }
 0x29b   : > { %3221 = vrot.lane.b32.xlu1 %v3220_v3, %s3374_s13  ;;  %v1505_v3 = vrot.slane %v2878_v40, %v3637_v47  ;;  %v2900_v40 = vld [vmem:[%s4223_s5 + $0x120] sm:$0xff] }
 0x29c   : > { %3231 = vrot.lane.b32.xlu0 %v3230_v13, %s3375_s14  ;;  %v2897_v13 = vld [vmem:[%s4223_s5 + $0x108] sm:$0xff] }
 0x29f   : > { %3226 = vrot.lane.b32.xlu1 %v3225_v43, %s3374_s13  ;;  %v1091_v43 = vmul.f32 %v3698_v57, %v3669_v55 }
 0x2a0   : > { %1292 = vrot.lane.b32.xlu0 %v1287_v42, %s3376_s15  ;;  %v1090_v42 = vmul.f32 %v1082_v2, %v3658_v33 }
 0x2a2   : > { %v3265_v57 = vpack.i.bf16 %v1091_v43, %v1090_v42 }
 0x2a3   : > { %1294 = vrot.lane.b32.xlu1 %v1291_v45, %s3376_s15 }
 0x2a4   : > { %3236 = vrot.lane.b32.xlu0 %v3235_v38, %s3374_s13 }
 0x2a7   : > { %3246 = vrot.lane.b32.xlu1 %v3245_v54, %s3375_s14 }
 0x2a8   : > { %3241 = vrot.lane.b32.xlu0 %v3240_v56, %s3375_s14  ;;  %s3383_s14 = smov 110  }
 0x2ab   : > { %2364 = vrot.lane.b32.xlu1 %v2359_v61, %s3377_s18 }
 0x2ac   : > { %2366 = vrot.lane.b32.xlu0 %v2363_v62, %s3377_s18 }
 0x2af   : > { %3251 = vrot.lane.b32.xlu1 %v3250_v21, %s3378_s19 }
 0x2b3   : > { %3256 = vrot.lane.b32.xlu1 %v3255_v10, %s3378_s19 }
 0x302   : > { %v3207_v24 = vpop.permute.xlu0 %3206 }
 0x303   : > { %v3209_v11 = vunpack.i.h.bf16 %v3207_v24  ;;  %v3208_v15 = vunpack.i.l.bf16 %v3207_v24 }
 0x305   : > { %v3217_v53 = vpop.permute.xlu1 %3216  ;;  %v1764_v20 = vsel %vm1762_vm15, %v3208_v15, %v3209_v11  ;;  %v2899_v11 = vld [vmem:[%s4223_s5 + $0x118] sm:$0xff] }
 0x306   : > { %v3219_v17 = vunpack.i.h.bf16 %v3217_v53  ;;  %v3218_v18 = vunpack.i.l.bf16 %v3217_v53  ;;  %v3212_v4 = vpop.permute.xlu0 %3211 }
 0x307   : > { %v3214_v19 = vunpack.i.h.bf16 %v3212_v4  ;;  %v3213_v36 = vunpack.i.l.bf16 %v3212_v4 }
 0x308   : > { %v1766_v26 = vsel %vm1762_vm15, %v3218_v18, %v3219_v17 }
 0x309   : > { %v2150_v16 = vpop.permute.xlu1 %2149  ;;  %v3011_v27 = vpack.c.bf16 %v1766_v26, %v1764_v20  ;;  %v1763_v29 = vsel %vm1762_vm15, %v3213_v36, %v3208_v15  ;;  %v1765_v7 = vsel %vm1762_vm15, %v3214_v19, %v3218_v18 }
 0x30a   : > { %v2152_v6 = vpop.permute.xlu0 %2151  ;;  %v3013_v30 = vpack.c.bf16 %v1765_v7, %v1763_v29  ;;  %v2158_v23 = vmul.f32 %v2150_v16, %v3664_v59  ;;  %v2161_v45 = vmul.f32 %v2150_v16, %v3666_v25 }
 0x30b   : > { %v2154_v31 = vsel %vm2153_vm0, %v2150_v16, %v2152_v6  ;;  %v2160_v32 = vmul.f32 %v2152_v6, %v3660_v12  ;;  %v2163_v34 = vmul.f32 %v2152_v6, %v3669_v55  ;;  %3012 = vmatprep.subr.bf16.mxu1 %v3011_v27 }
 0x30c   : > { %v2159_v35 = vmul.f32 %v2154_v31, %v3656_v58  ;;  %v2162_v28 = vmul.f32 %v2154_v31, %v3658_v33  ;;  %3014 = vmatpush1.bf16.msra.mxu1 %v3013_v30  ;;  %v3275_v61 = vpack.i.bf16 %v2161_v45, %v2158_v23  ;;  %v2901_v23 = vld [vmem:[%s4223_s5 + $0x128] sm:$0xff] }
 0x30d   : > { %v3222_v39 = vpop.permute.xlu1 %3221  ;;  %v878_v45 = vld [vmem:[%s4223_s5 + $0x8] sm:$0xff] }
 0x30e   : > { %v3723_v41 = vpop.permute.xlu0 %3231  ;;  %v3270_v48 = vpack.i.bf16 %v2163_v34, %v2162_v28  ;;  %v3260_v51 = vpack.i.bf16 %v2160_v32, %v2159_v35  ;;  %v3224_v46 = vunpack.i.h.bf16 %v3222_v39  ;;  %v3223_v49 = vunpack.i.l.bf16 %v3222_v39  ;;  %v877_v28 = vld [vmem:[%s4223_s5] sm:$0xff] }
 0x30f   : > { %2904 = vmatmul.mubr.msk.f32.vlgmr.msra.gmra.mrb[0].mxu1 %vm912_vm13, %v2896_v37  ;;  %v3234_v52 = vunpack.i.h.bf16 %v3723_v41  ;;  %v3233_v8 = vunpack.i.l.bf16 %v3723_v41 }
 0x310   : > { %3271 = vrot.lane.b32.xlu1 %v3270_v48, %s3379_s24  ;;  %3261 = vrot.lane.b32.xlu0 %v3260_v51, %s3379_s24  ;;  %v905_v24 = vsel %vm903_vm1, %v3223_v49, %v3224_v46 }
 0x311   : > { %v3227_v14 = vpop.permute.xlu1 %3226  ;;  %1865 = vmatprep.mubr.f32.mxu1 %v3365_v0  ;;  %v1978_v6 = vsel %vm1976_vm2, %v3233_v8, %v3234_v52  ;;  %v880_v52 = vld [vmem:[%s4223_s5 + $0x18] sm:$0xff] }
 0x312   : > { %v1293_v22 = vpop.permute.xlu0 %1292  ;;  %v3228_v38 = vunpack.i.l.bf16 %v3227_v14  ;;  %v3229_v62 = vunpack.i.h.bf16 %v3227_v14 }
 0x313   : > { %2905 = vmatmul.mubr.msk.f32.gmra.mrb[2].mxu1 %vm912_vm13, %v2897_v13  ;;  %v1300_v21 = vmul.f32 %v1293_v22, %v3664_v59  ;;  %v1303_v10 = vmul.f32 %v1293_v22, %v3666_v25 }
 0x314   : > { %1508 = vrot.lane.b32.xlu1 %v1505_v3, %s3380_s29  ;;  %1506 = vrot.lane.b32.xlu0 %v1501_v5, %s3380_s29  ;;  %v904_v15 = vsel %vm903_vm1, %v3228_v38, %v3223_v49  ;;  %v879_v38 = vld [vmem:[%s4223_s5 + $0x10] sm:$0xff] }
 0x315   : > { %v3743_v9 = vpop.permute.xlu1 %1294  ;;  %1871 = vmatprep.mubr.f32.mxu1 %v3365_v0  ;;  %v3285_v7 = vpack.i.bf16 %v1303_v10, %v1300_v21  ;;  %v2918_v21 = vld [vmem:[%s4223_s5 + $0x168] sm:$0xff]  ;;  %v2919_v10 = vld [vmem:[%s4223_s5 + $0x170] sm:$0xff] }
 0x316   : > { %v1296_v54 = vsel %vm672_vm9, %v1293_v22, %v3743_v9  ;;  %v1302_v2 = vmul.f32 %v3743_v9, %v3660_v12  ;;  %v3237_v56 = vpop.permute.xlu0 %3236  ;;  %v1305_v42 = vmul.f32 %v3743_v9, %v3669_v55  ;;  %vm1548_vm9 = vcmask 900096  }
 0x317   : > { %v1301_v63 = vmul.f32 %v1296_v54, %v3656_v58  ;;  %v3239_v1 = vunpack.i.h.bf16 %v3237_v56  ;;  %v3238_v60 = vunpack.i.l.bf16 %v3237_v56  ;;  %2906 = vmatmul.mubr.msk.f32.gmra.mrb[4].mxu1 %vm912_vm13, %v2898_v50  ;;  %v1304_v13 = vmul.f32 %v1296_v54, %v3658_v33  ;;  %v2902_v50 = vld [vmem:[%s4223_s5 + $0x130] sm:$0xff]  ;;  %v2913_v54 = vld [vmem:[%s4223_s5 + $0x140] sm:$0xff]  ;;  %v2914_v56 = vld [vmem:[%s4223_s5 + $0x148] sm:$0xff] }
 0x318   : > { %3266 = vrot.lane.b32.xlu0 %v3265_v57, %s3378_s19  ;;  %1877 = vmatprep.mubr.f32.mxu1 %v3365_v0  ;;  %v2903_v57 = vld [vmem:[%s4223_s5 + $0x138] sm:$0xff] }
 0x319   : > { %v906_v53 = vsel %vm903_vm1, %v3229_v62, %v3238_v60  ;;  %v3247_v17 = vpop.permute.xlu1 %3246  ;;  %v3280_v18 = vpack.i.bf16 %v1302_v2, %v1301_v63  ;;  %v907_v4 = vsel %vm903_vm1, %v3238_v60, %v3239_v1  ;;  %v3295_v49 = vpack.i.bf16 %v1305_v42, %v1304_v13  ;;  %v881_v2 = vld [vmem:[%s4223_s5 + $0x20] sm:$0xff]  ;;  %v2915_v62 = vld [vmem:[%s4223_s5 + $0x150] sm:$0xff]  ;;  %v2916_v1 = vld [vmem:[%s4223_s5 + $0x158] sm:$0xff] }
 0x31a   : > { %v2997_v19 = vpack.c.bf16 %v906_v53, %v904_v15  ;;  %v3249_v36 = vunpack.i.h.bf16 %v3247_v17  ;;  %v3248_v20 = vunpack.i.l.bf16 %v3247_v17  ;;  %v3242_v26 = vpop.permute.xlu0 %3241  ;;  %v2995_v16 = vpack.c.bf16 %v907_v4, %v905_v24  ;;  %v883_v63 = vld [vmem:[%s4223_s5 + $0x30] sm:$0xff]  ;;  %v884_v60 = vld [vmem:[%s4223_s5 + $0x38] sm:$0xff]  ;;  %v791_v42 = vld [vmem:[%s4224_s6] sm:$0xff] }
 0x31b   : > { %v3244_v27 = vunpack.i.h.bf16 %v3242_v26  ;;  %v3243_v29 = vunpack.i.l.bf16 %v3242_v26  ;;  %3281 = vrot.lane.b32.xlu1 %v3280_v18, %s3381_s12  ;;  %2907 = vmatmul.mubr.msk.f32.gmra.mrb[6].mxu1 %vm912_vm13, %v2899_v11  ;;  %v2920_v24 = vld [vmem:[%s4223_s5 + $0x178] sm:$0xff] }
 0x31c   : > { %3276 = vrot.lane.b32.xlu0 %v3275_v61, %s3379_s24  ;;  %2996 = vmatprep.subr.bf16.mxu0 %v2995_v16  ;;  %v1980_v30 = vsel %vm1976_vm2, %v3248_v20, %v3249_v36  ;;  %v882_v61 = vld [vmem:[%s4223_s5 + $0x28] sm:$0xff] }
 0x31d   : > { %v1979_v31 = vsel %vm1976_vm2, %v3244_v27, %v3248_v20  ;;  %v1977_v32 = vsel %vm1976_vm2, %v3243_v29, %v3233_v8  ;;  %2998 = vmatpush1.bf16.msra.mxu0 %v2997_v19  ;;  %v2365_v34 = vpop.permute.xlu1 %2364  ;;  %v3015_v35 = vpack.c.bf16 %v1980_v30, %v1978_v6  ;;  %1883 = vmatprep.mubr.f32.mxu1 %v3365_v0  ;;  %v2917_v8 = vld [vmem:[%s4223_s5 + $0x160] sm:$0xff] }
 0x31e   : > { %v3017_v37 = vpack.c.bf16 %v1979_v31, %v1977_v32  ;;  %v2367_v39 = vpop.permute.xlu0 %2366  ;;  %v2373_v22 = vmul.f32 %v2365_v34, %v3664_v59  ;;  %v2376_v46 = vmul.f32 %v2365_v34, %v3666_v25 }
 0x31f   : > { %v2369_v41 = vsel %vm2368_vm3, %v2365_v34, %v2367_v39  ;;  %v2375_v48 = vmul.f32 %v2367_v39, %v3660_v12  ;;  %v2378_v51 = vmul.f32 %v2367_v39, %v3669_v55  ;;  %3286 = vrot.lane.b32.xlu1 %v3285_v7, %s3381_s12  ;;  %3016 = vmatprep.subr.bf16.mxu1 %v3015_v35 }
 0x320   : > { %v2374_v3 = vmul.f32 %v2369_v41, %v3656_v58  ;;  %v2377_v5 = vmul.f32 %v2369_v41, %v3658_v33  ;;  %3018 = vmatpush1.bf16.msra.mxu1 %v3017_v37  ;;  %2836 = vmatmul.mubr.msk.f32.vlgmr.msra.gmra.mrb[12].mxu0 %vm912_vm13, %v877_v28  ;;  %v3305_v9 = vpack.i.bf16 %v2376_v46, %v2373_v22 }
 0x321   : > { %2908 = vmatmul.mubr.msk.f32.gmra.mrb[8].mxu1 %vm912_vm13, %v2900_v40  ;;  %1007 = vmatprep.mubr.f32.mxu0 %v3365_v0  ;;  %v3252_v11 = vpop.permute.xlu1 %3251 }
 0x322   : > { %v3300_v43 = vpack.i.bf16 %v2378_v51, %v2377_v5  ;;  %v3290_v14 = vpack.i.bf16 %v2375_v48, %v2374_v3  ;;  %1889 = vmatprep.mubr.f32.mxu1 %v3365_v0  ;;  %v3254_v34 = vunpack.i.h.bf16 %v3252_v11  ;;  %v3253_v35 = vunpack.i.l.bf16 %v3252_v11  ;;  %v2846_v11 = vld [vmem:[%s4223_s5 + $0x48] sm:$0xff] }
 0x324   : > { %3301 = vrot.lane.b32.xlu1 %v3300_v43, %s3382_s21  ;;  %3291 = vrot.lane.b32.xlu0 %v3290_v14, %s3382_s21  ;;  %v1121_v43 = vsel %vm1119_vm6, %v3253_v35, %v3254_v34 }
 0x325   : > { %2909 = vmatmul.mubr.msk.f32.gmra.mrb[10].mxu1 %vm912_vm13, %v2901_v23  ;;  %2837 = vmatmul.mubr.msk.f32.gmra.mrb[14].mxu0 %vm912_vm13, %v878_v45  ;;  %v3257_v15 = vpop.permute.xlu1 %3256 }
 0x326   : > { %1895 = vmatprep.mubr.f32.mxu1 %v3365_v0  ;;  %1013 = vmatprep.mubr.f32.mxu0 %v3365_v0  ;;  %v3258_v28 = vunpack.i.l.bf16 %v3257_v15 }
 0x328   : > { %3296 = vrot.lane.b32.xlu0 %v3295_v49, %s3381_s12  ;;  %v1120_v3 = vsel %vm1119_vm6, %v3258_v28, %v3253_v35  ;;  %v2932_v35 = vld [vmem:[%s4223_s5 + $0x190] sm:$0xff]  ;;  %s4193_s12 = scalar_lea.vmem %s4226_s8, %s2982_s9 }
 0x329   : > { %2910 = vmatmul.mubr.msk.f32.gmra.mrb[12].mxu1 %vm912_vm13, %v2902_v50  ;;  %2838 = vmatmul.mubr.msk.f32.gmra.mrb[16].mxu0 %vm912_vm13, %v879_v38 }
 0x32a   : > { %1901 = vmatprep.mubr.f32.mxu1 %v3365_v0  ;;  %1019 = vmatprep.mubr.f32.mxu0 %v3365_v0 }
 0x32c   : > { %3306 = vrot.lane.b32.xlu0 %v3305_v9, %s3382_s21 }
 0x32d   : > { %2911 = vmatmul.mubr.msk.f32.gmra.mrb[14].mxu1 %vm912_vm13, %v2903_v57  ;;  %2839 = vmatmul.mubr.msk.f32.gmra.mrb[18].mxu0 %vm912_vm13, %v880_v52  ;;  %v793_v52 = vld [vmem:[%s4224_s6 + $0x10] sm:$0xff] }
 0x32e   : > { %2073 = vmatprep.mubr.f32.mxu1 %v3365_v0  ;;  %1025 = vmatprep.mubr.f32.mxu0 %v3365_v0 }
 0x331   : > { %2921 = vmatmul.mubr.msk.f32.vlgmr.msra.gmra.mrb[0].mxu1 %vm912_vm13, %v2913_v54  ;;  %2840 = vmatmul.mubr.msk.f32.gmra.mrb[20].mxu0 %vm912_vm13, %v881_v2  ;;  %v792_v54 = vld [vmem:[%s4224_s6 + $0x8] sm:$0xff] }
 0x332   : > { %2079 = vmatprep.mubr.f32.mxu1 %v3365_v0  ;;  %1031 = vmatprep.mubr.f32.mxu0 %v3365_v0 }
 0x335   : > { %2922 = vmatmul.mubr.msk.f32.gmra.mrb[2].mxu1 %vm912_vm13, %v2914_v56  ;;  %2841 = vmatmul.mubr.msk.f32.gmra.mrb[22].mxu0 %vm912_vm13, %v882_v61  ;;  %v2845_v56 = vld [vmem:[%s4223_s5 + $0x40] sm:$0xff] }
 0x336   : > { %2085 = vmatprep.mubr.f32.mxu1 %v3365_v0  ;;  %1037 = vmatprep.mubr.f32.mxu0 %v3365_v0  ;;  %v2930_v61 = vld [vmem:[%s4223_s5 + $0x180] sm:$0xff] }
 0x339   : > { %2923 = vmatmul.mubr.msk.f32.gmra.mrb[4].mxu1 %vm912_vm13, %v2915_v62  ;;  %2842 = vmatmul.mubr.msk.f32.gmra.mrb[24].mxu0 %vm912_vm13, %v883_v63  ;;  %v795_v62 = vld [vmem:[%s4224_s6 + $0x20] sm:$0xff] }
 0x33a   : > { %2091 = vmatprep.mubr.f32.mxu1 %v3365_v0  ;;  %1043 = vmatprep.mubr.f32.mxu0 %v3365_v0 }
 0x33d   : > { %2924 = vmatmul.mubr.msk.f32.gmra.mrb[6].mxu1 %vm912_vm13, %v2916_v1  ;;  %2843 = vmatmul.mubr.msk.f32.gmra.mrb[26].mxu0 %vm912_vm13, %v884_v60  ;;  %v794_v60 = vld [vmem:[%s4224_s6 + $0x18] sm:$0xff] }
 0x33e   : > { %2097 = vmatprep.mubr.f32.mxu1 %v3365_v0  ;;  %1216 = vmatprep.mubr.f32.mxu0 %v3365_v0 }
 0x341   : > { %2925 = vmatmul.mubr.msk.f32.gmra.mrb[8].mxu1 %vm912_vm13, %v2917_v8 }
 0x342   : > { %2103 = vmatprep.mubr.f32.mxu1 %v3365_v0 }
 0x345   : > { %2926 = vmatmul.mubr.msk.f32.gmra.mrb[10].mxu1 %vm912_vm13, %v2918_v21 }
 0x346   : > { %2109 = vmatprep.mubr.f32.mxu1 %v3365_v0 }
 0x349   : > { %2927 = vmatmul.mubr.msk.f32.gmra.mrb[12].mxu1 %vm912_vm13, %v2919_v10 }
 0x34a   : > { %2115 = vmatprep.mubr.f32.mxu1 %v3365_v0 }
 0x34d   : > { %2928 = vmatmul.mubr.msk.f32.gmra.mrb[14].mxu1 %vm912_vm13, %v2920_v24 }
 0x34e   : > { %2288 = vmatprep.mubr.f32.mxu1 %v3365_v0 }
 0x382   : > { %v3272_v53 = vpop.permute.xlu1 %3271  ;;  %v3262_v17 = vpop.permute.xlu0 %3261 }
 0x383   : > { %v3274_v18 = vunpack.i.h.bf16 %v3272_v53  ;;  %v3273_v4 = vunpack.i.l.bf16 %v3272_v53  ;;  %v3264_v19 = vunpack.i.h.bf16 %v3262_v17  ;;  %v3263_v36 = vunpack.i.l.bf16 %v3262_v17 }
 0x385   : > { %v2193_v20 = vsel %vm2191_vm4, %v3263_v36, %v3264_v19  ;;  %v2195_v26 = vsel %vm2191_vm4, %v3273_v4, %v3274_v18  ;;  %v2931_v18 = vld [vmem:[%s4223_s5 + $0x188] sm:$0xff] }
 0x386   : > { %v1509_v16 = vpop.permute.xlu1 %1508  ;;  %v1507_v27 = vpop.permute.xlu0 %1506  ;;  %v3019_v29 = vpack.c.bf16 %v2195_v26, %v2193_v20  ;;  %v796_v26 = vld [vmem:[%s4224_s6 + $0x28] sm:$0xff] }
 0x387   : > { %v1517_v7 = vmul.f32 %v1509_v16, %v3660_v12  ;;  %v1520_v6 = vmul.f32 %v1509_v16, %v3669_v55  ;;  %v1511_v30 = vsel %vm1510_vm5, %v1507_v27, %v1509_v16  ;;  %v1515_v37 = vmul.f32 %v1507_v27, %v3664_v59 }
 0x388   : > { %v1516_v31 = vmul.f32 %v1511_v30, %v3656_v58  ;;  %v1519_v32 = vmul.f32 %v1511_v30, %v3658_v33  ;;  %3020 = vmatprep.subr.bf16.mxu1 %v3019_v29  ;;  %v1518_v39 = vmul.f32 %v1507_v27, %v3666_v25  ;;  %v3259_v12 = vunpack.i.h.bf16 %v3257_v15  ;;  %v2847_v30 = vld [vmem:[%s4223_s5 + $0x50] sm:$0xff] }
 0x38a   : > { %v3267_v40 = vpop.permute.xlu0 %3266  ;;  %v3315_v41 = vpack.i.bf16 %v1520_v6, %v1519_v32  ;;  %v3310_v48 = vpack.i.bf16 %v1517_v7, %v1516_v31  ;;  %v3320_v22 = vpack.i.bf16 %v1518_v39, %v1515_v37  ;;  %v2963_v6 = vld [vmem:[%s4225_s7 + $0x10] ss:$8 sm:$0x3] }
 0x38b   : > { %v3269_v51 = vunpack.i.h.bf16 %v3267_v40  ;;  %v3268_v55 = vunpack.i.l.bf16 %v3267_v40  ;;  %v798_v40 = vld [vmem:[%s4224_s6 + $0x38] sm:$0xff] }
 0x38c   : > { %3316 = vrot.lane.b32.xlu0 %v3315_v41, %s3383_s14  ;;  %3311 = vrot.lane.b32.xlu1 %v3310_v48, %s3383_s14  ;;  %v2582_v48 = vrot.slane %v2963_v6, %v3637_v47  ;;  %v2933_v47 = vld [vmem:[%s4223_s5 + $0x198] sm:$0xff] }
 0x38d   : > { %v1122_v5 = vsel %vm1119_vm6, %v3259_v12, %v3268_v55  ;;  %v3894_v13 = vpop.permute.xlu1 %3281  ;;  %v1123_v14 = vsel %vm1119_vm6, %v3268_v55, %v3269_v51  ;;  %v2848_v55 = vld [vmem:[%s4223_s5 + $0x58] sm:$0xff] }
 0x38e   : > { %v3001_v23 = vpack.c.bf16 %v1122_v5, %v1120_v3  ;;  %v3277_v45 = vpop.permute.xlu0 %3276  ;;  %v2999_v46 = vpack.c.bf16 %v1123_v14, %v1121_v43  ;;  %v3284_v15 = vunpack.i.h.bf16 %v3894_v13  ;;  %v3283_v53 = vunpack.i.l.bf16 %v3894_v13 }
 0x38f   : > { %v3279_v49 = vunpack.i.h.bf16 %v3277_v45  ;;  %v3278_v50 = vunpack.i.l.bf16 %v3277_v45  ;;  %v2588_v3 = vmul.f32 %v2582_v48, %v3658_v33  ;;  %v2586_v43 = vmul.f32 %v2582_v48, %v3656_v58  ;;  %v2849_v33 = vld [vmem:[%s4223_s5 + $0x60] sm:$0xff]  ;;  %v2850_v58 = vld [vmem:[%s4223_s5 + $0x68] sm:$0xff] }
 0x390   : > { %801 = vperm.xlu0 %3203, %v791_v42   ;;  %3321 = vrot.lane.b32.xlu1 %v3320_v22, %s3383_s14  ;;  %v1335_v31 = vsel %vm1333_vm8, %v3283_v53, %v3284_v15  ;;  %v2935_v45 = vld [vmem:[%s4223_s5 + $0x1a8] sm:$0xff]  ;;  %v2851_v22 = vld [vmem:[%s4223_s5 + $0x70] sm:$0xff]  ;;  %v2964_v15 = vld [vmem:[%s4223_s5 + $0x200] sm:$0xff] }
 0x391   : > { %v2194_v38 = vsel %vm2191_vm4, %v3279_v49, %v3273_v4  ;;  %v2192_v9 = vsel %vm2191_vm4, %v3278_v50, %v3263_v36  ;;  %3000 = vmatprep.subr.bf16.mxu0 %v2999_v46  ;;  %v3287_v57 = vpop.permute.xlu1 %3286  ;;  %v797_v4 = vld [vmem:[%s4224_s6 + $0x30] sm:$0xff]  ;;  %v3027_v14 = vpack.c.bf16 %v2588_v3, %v2586_v43  ;;  %v2852_v49 = vld [vmem:[%s4223_s5 + $0x78] sm:$0xff]  ;;  %v2578_v50 = vrot.slane %v2963_v6, %v3632_v44  ;;  %v2947_v44 = vld [vmem:[%s4223_s5 + $0x1c0] sm:$0xff] }
 0x392   : > { %v3021_v2 = vpack.c.bf16 %v2194_v38, %v2192_v9  ;;  %3002 = vmatpush1.bf16.msra.mxu0 %v3001_v23  ;;  %v3288_v17 = vunpack.i.l.bf16 %v3287_v57  ;;  %v3289_v27 = vunpack.i.h.bf16 %v3287_v57  ;;  %v2934_v23 = vld [vmem:[%s4223_s5 + $0x1a0] sm:$0xff]  ;;  %v2936_v46 = vld [vmem:[%s4223_s5 + $0x1b0] sm:$0xff]  ;;  %v2937_v38 = vld [vmem:[%s4223_s5 + $0x1b8] sm:$0xff] }
 0x393   : > { %v2587_v9 = vmul.f32 %v2578_v50, %v3666_v25  ;;  %v2862_v57 = vld [vmem:[%s4223_s5 + $0x80] sm:$0xff]  ;;  %v2863_v25 = vld [vmem:[%s4223_s5 + $0x88] sm:$0xff] }
 0x394   : > { %811 = vperm.xlu0 %3203, %v793_v52   ;;  %806 = vperm.xlu1 %3204, %v792_v54   ;;  %v1334_v32 = vsel %vm1333_vm8, %v3288_v17, %v3283_v53  ;;  %v2585_v52 = vmul.f32 %v2578_v50, %v3664_v59  ;;  %v2864_v59 = vld [vmem:[%s4223_s5 + $0x90] sm:$0xff]  ;;  %v2965_v53 = vld [vmem:[%s4223_s5 + $0x208] sm:$0xff] }
 0x395   : > { %3022 = vmatpush1.bf16.msra.mxu1 %v3021_v2  ;;  %2853 = vmatmul.mubr.msk.f32.vlgmr.msra.gmra.mrb[12].mxu0 %vm912_vm13, %v2845_v56  ;;  %v2948_v2 = vld [vmem:[%s4223_s5 + $0x1c8] sm:$0xff]  ;;  %v2949_v56 = vld [vmem:[%s4223_s5 + $0x1d0] sm:$0xff] }
 0x396   : > { %v3302_v63 = vpop.permute.xlu1 %3301  ;;  %v3292_v1 = vpop.permute.xlu0 %3291  ;;  %1222 = vmatprep.mubr.f32.mxu0 %v3365_v0  ;;  %v3029_v54 = vpack.c.bf16 %v2587_v9, %v2585_v52  ;;  %v2966_v17 = vld [vmem:[%s4223_s5 + $0x210] sm:$0xff]  ;;  %v2880_v48 = vld [vmem:[%s4223_s5 + $0xc8] sm:$0xff] }
 0x397   : > { %v3304_v8 = vunpack.i.h.bf16 %v3302_v63  ;;  %v3303_v21 = vunpack.i.l.bf16 %v3302_v63  ;;  %v3294_v10 = vunpack.i.h.bf16 %v3292_v1  ;;  %v3293_v24 = vunpack.i.l.bf16 %v3292_v1  ;;  %v2866_v63 = vld [vmem:[%s4223_s5 + $0xa0] sm:$0xff]  ;;  %v2884_v3 = vld [vmem:[%s4223_s5 + $0xe8] sm:$0xff] }
 0x398   : > { %2938 = vmatmul.mubr.msk.f32.vlgmr.msra.gmra.mrb[0].mxu1 %vm912_vm13, %v2930_v61  ;;  %821 = vperm.xlu0 %3203, %v795_v62   ;;  %v2865_v61 = vld [vmem:[%s4223_s5 + $0x98] sm:$0xff]  ;;  %v2951_v1 = vld [vmem:[%s4223_s5 + $0x1e0] sm:$0xff] }
 0x399   : > { %816 = vperm.xlu1 %3204, %v794_v60   ;;  %2294 = vmatprep.mubr.f32.mxu1 %v3365_v0  ;;  %v2408_v19 = vsel %vm2406_vm7, %v3293_v24, %v3294_v10  ;;  %v2410_v36 = vsel %vm2406_vm7, %v3303_v21, %v3304_v8  ;;  %v2950_v62 = vld [vmem:[%s4223_s5 + $0x1d8] sm:$0xff]  ;;  %v2867_v60 = vld [vmem:[%s4223_s5 + $0xa8] sm:$0xff]  ;;  %v2953_v10 = vld [vmem:[%s4223_s5 + $0x1f0] sm:$0xff] }
 0x39a   : > { %v3297_v20 = vpop.permute.xlu0 %3296  ;;  %v3023_v16 = vpack.c.bf16 %v2410_v36, %v2408_v19  ;;  %2854 = vmatmul.mubr.msk.f32.gmra.mrb[14].mxu0 %vm912_vm13, %v2846_v11  ;;  %v2952_v8 = vld [vmem:[%s4223_s5 + $0x1e8] sm:$0xff]  ;;  %v2954_v11 = vld [vmem:[%s4223_s5 + $0x1f8] sm:$0xff]  ;;  %v2970_v36 = vld [vmem:[%s4223_s5 + $0x230] sm:$0xff] }
 0x39b   : > { %v3299_v29 = vunpack.i.h.bf16 %v3297_v20  ;;  %v3298_v7 = vunpack.i.l.bf16 %v3297_v20  ;;  %1228 = vmatprep.mubr.f32.mxu0 %v3365_v0  ;;  %v2969_v19 = vld [vmem:[%s4223_s5 + $0x228] sm:$0xff]  ;;  %v2971_v20 = vld [vmem:[%s4223_s5 + $0x238] sm:$0xff] }
 0x39c   : > { %2939 = vmatmul.mubr.msk.f32.gmra.mrb[2].mxu1 %vm912_vm13, %v2931_v18  ;;  %831 = vperm.xlu0 %3203, %v797_v4   ;;  %v2967_v18 = vld [vmem:[%s4223_s5 + $0x218] sm:$0xff]  ;;  %v2968_v4 = vld [vmem:[%s4223_s5 + $0x220] sm:$0xff] }
 0x39d   : > { %v1336_v34 = vsel %vm1333_vm8, %v3289_v27, %v3298_v7  ;;  %826 = vperm.xlu1 %3204, %v796_v26   ;;  %3024 = vmatprep.subr.bf16.mxu1 %v3023_v16  ;;  %v1337_v28 = vsel %vm1333_vm8, %v3298_v7, %v3299_v29 }
 0x39e   : > { %v3005_v37 = vpack.c.bf16 %v1336_v34, %v1334_v32  ;;  %v3307_v39 = vpop.permute.xlu0 %3306  ;;  %2300 = vmatprep.mubr.f32.mxu1 %v3365_v0  ;;  %v3003_v41 = vpack.c.bf16 %v1337_v28, %v1335_v31  ;;  %2855 = vmatmul.mubr.msk.f32.gmra.mrb[16].mxu0 %vm912_vm13, %v2847_v30 }
 0x39f   : > { %v3309_v12 = vunpack.i.h.bf16 %v3307_v39  ;;  %v3308_v51 = vunpack.i.l.bf16 %v3307_v39  ;;  %1234 = vmatprep.mubr.f32.mxu0 %v3365_v0 }
 0x3a0   : > { %2940 = vmatmul.mubr.msk.f32.gmra.mrb[4].mxu1 %vm912_vm13, %v2932_v35  ;;  %3004 = vmatprep.subr.bf16.mxu0 %v3003_v41  ;;  %v2879_v41 = vld [vmem:[%s4223_s5 + $0xc0] sm:$0xff] }
 0x3a1   : > { %v2409_v5 = vsel %vm2406_vm7, %v3309_v12, %v3303_v21  ;;  %v2407_v13 = vsel %vm2406_vm7, %v3308_v51, %v3293_v24  ;;  %836 = vperm.xlu1 %3204, %v798_v40   ;;  %3006 = vmatpush1.bf16.msra.mxu0 %v3005_v37  ;;  %v2868_v21 = vld [vmem:[%s4223_s5 + $0xb0] sm:$0xff]  ;;  %v2869_v24 = vld [vmem:[%s4223_s5 + $0xb8] sm:$0xff] }
 0x3a2   : > { %v3025_v42 = vpack.c.bf16 %v2409_v5, %v2407_v13  ;;  %2306 = vmatprep.mubr.f32.mxu1 %v3365_v0  ;;  %2856 = vmatmul.mubr.msk.f32.gmra.mrb[18].mxu0 %vm912_vm13, %v2848_v55  ;;  %v2881_v12 = vld [vmem:[%s4223_s5 + $0xd0] sm:$0xff]  ;;  %v2882_v51 = vld [vmem:[%s4223_s5 + $0xd8] sm:$0xff]  ;;  %v2883_v55 = vld [vmem:[%s4223_s5 + $0xe0] sm:$0xff] }
 0x3a3   : > { %1240 = vmatprep.mubr.f32.mxu0 %v3365_v0  ;;  %v2885_v5 = vld [vmem:[%s4223_s5 + $0xf0] sm:$0xff]  ;;  %v2886_v13 = vld [vmem:[%s4223_s5 + $0xf8] sm:$0xff] }
 0x3a4   : > { %2941 = vmatmul.mubr.msk.f32.gmra.mrb[6].mxu1 %vm912_vm13, %v2933_v47 }
 0x3a5   : > { %3026 = vmatpush1.bf16.msra.mxu1 %v3025_v42  ;;  %2312 = vmatprep.mubr.f32.mxu1 %v3365_v0 }
 0x3a6   : > { %3028 = vmatprep.subr.bf16.mxu1 %v3027_v14  ;;  %2857 = vmatmul.mubr.msk.f32.gmra.mrb[20].mxu0 %vm912_vm13, %v2849_v33 }
 0x3a7   : > { %1246 = vmatprep.mubr.f32.mxu0 %v3365_v0 }
 0x3a8   : > { %2942 = vmatmul.mubr.msk.f32.gmra.mrb[8].mxu1 %vm912_vm13, %v2934_v23 }
 0x3a9   : > { %2318 = vmatprep.mubr.f32.mxu1 %v3365_v0 }
 0x3aa   : > { %2858 = vmatmul.mubr.msk.f32.gmra.mrb[22].mxu0 %vm912_vm13, %v2850_v58 }
 0x3ab   : > { %1252 = vmatprep.mubr.f32.mxu0 %v3365_v0 }
 0x3ac   : > { %2943 = vmatmul.mubr.msk.f32.gmra.mrb[10].mxu1 %vm912_vm13, %v2935_v45 }
 0x3ad   : > { %2324 = vmatprep.mubr.f32.mxu1 %v3365_v0 }
 0x3ae   : > { %2859 = vmatmul.mubr.msk.f32.gmra.mrb[24].mxu0 %vm912_vm13, %v2851_v22 }
 0x3af   : > { %1258 = vmatprep.mubr.f32.mxu0 %v3365_v0 }
 0x3b0   : > { %2944 = vmatmul.mubr.msk.f32.gmra.mrb[12].mxu1 %vm912_vm13, %v2936_v46 }
 0x3b1   : > { %2330 = vmatprep.mubr.f32.mxu1 %v3365_v0 }
 0x3b2   : > { %2860 = vmatmul.mubr.msk.f32.gmra.mrb[26].mxu0 %vm912_vm13, %v2852_v49 }
 0x3b3   : > { %1430 = vmatprep.mubr.f32.mxu0 %v3365_v0 }
 0x3b4   : > { %2945 = vmatmul.mubr.msk.f32.gmra.mrb[14].mxu1 %vm912_vm13, %v2937_v38 }
 0x3b5   : > { %2503 = vmatprep.mubr.f32.mxu1 %v3365_v0 }
 0x3b6   : > { %2870 = vmatmul.mubr.msk.f32.vlgmr.msra.gmra.mrb[12].mxu0 %vm912_vm13, %v2862_v57 }
 0x3b7   : > { %1436 = vmatprep.mubr.f32.mxu0 %v3365_v0 }
 0x3b8   : > { %2955 = vmatmul.mubr.msk.f32.vlgmr.msra.gmra.mrb[0].mxu1 %vm912_vm13, %v2947_v44 }
 0x3b9   : > { %3030 = vmatpush1.bf16.msra.mxu1 %v3029_v54  ;;  %2509 = vmatprep.mubr.f32.mxu1 %v3365_v0 }
 0x3ba   : > { %2871 = vmatmul.mubr.msk.f32.gmra.mrb[14].mxu0 %vm912_vm13, %v2863_v25 }
 0x3bb   : > { %1442 = vmatprep.mubr.f32.mxu0 %v3365_v0 }
 0x3bc   : > { %2956 = vmatmul.mubr.msk.f32.gmra.mrb[2].mxu1 %vm912_vm13, %v2948_v2 }
 0x3bd   : > { %2515 = vmatprep.mubr.f32.mxu1 %v3365_v0 }
 0x3be   : > { %2872 = vmatmul.mubr.msk.f32.gmra.mrb[16].mxu0 %vm912_vm13, %v2864_v59 }
 0x3bf   : > { %1448 = vmatprep.mubr.f32.mxu0 %v3365_v0 }
 0x3c0   : > { %2957 = vmatmul.mubr.msk.f32.gmra.mrb[4].mxu1 %vm912_vm13, %v2949_v56 }
 0x3c1   : > { %2521 = vmatprep.mubr.f32.mxu1 %v3365_v0 }
 0x3c2   : > { %2873 = vmatmul.mubr.msk.f32.gmra.mrb[18].mxu0 %vm912_vm13, %v2865_v61 }
 0x3c3   : > { %1454 = vmatprep.mubr.f32.mxu0 %v3365_v0 }
 0x3c4   : > { %2958 = vmatmul.mubr.msk.f32.gmra.mrb[6].mxu1 %vm912_vm13, %v2950_v62 }
 0x3c5   : > { %2527 = vmatprep.mubr.f32.mxu1 %v3365_v0 }
 0x3c6   : > { %2874 = vmatmul.mubr.msk.f32.gmra.mrb[20].mxu0 %vm912_vm13, %v2866_v63 }
 0x3c7   : > { %1460 = vmatprep.mubr.f32.mxu0 %v3365_v0 }
 0x3c8   : > { %2959 = vmatmul.mubr.msk.f32.gmra.mrb[8].mxu1 %vm912_vm13, %v2951_v1 }
 0x3c9   : > { %2533 = vmatprep.mubr.f32.mxu1 %v3365_v0 }
 0x3ca   : > { %2875 = vmatmul.mubr.msk.f32.gmra.mrb[22].mxu0 %vm912_vm13, %v2867_v60 }
 0x3cb   : > { %1466 = vmatprep.mubr.f32.mxu0 %v3365_v0 }
 0x3cc   : > { %2960 = vmatmul.mubr.msk.f32.gmra.mrb[10].mxu1 %vm912_vm13, %v2952_v8 }
 0x3cd   : > { %2539 = vmatprep.mubr.f32.mxu1 %v3365_v0 }
 0x3ce   : > { %2876 = vmatmul.mubr.msk.f32.gmra.mrb[24].mxu0 %vm912_vm13, %v2868_v21 }
 0x3cf   : > { %1472 = vmatprep.mubr.f32.mxu0 %v3365_v0 }
 0x3d0   : > { %2961 = vmatmul.mubr.msk.f32.gmra.mrb[12].mxu1 %vm912_vm13, %v2953_v10 }
 0x3d1   : > { %2545 = vmatprep.mubr.f32.mxu1 %v3365_v0 }
 0x3d2   : > { %2877 = vmatmul.mubr.msk.f32.gmra.mrb[26].mxu0 %vm912_vm13, %v2869_v24 }
 0x3d3   : > { %1645 = vmatprep.mubr.f32.mxu0 %v3365_v0 }
 0x3d4   : > { %2962 = vmatmul.mubr.msk.f32.gmra.mrb[14].mxu1 %vm912_vm13, %v2954_v11 }
 0x3d5   : > { %2686 = vmatprep.mubr.f32.mxu1 %v3365_v0 }
 0x3d8   : > { %2972 = vmatmul.mubr.msk.f32.vlgmr.msra.gmra.mrb[0].mxu1 %vm912_vm13, %v2964_v15 }
 0x3d9   : > { %2692 = vmatprep.mubr.f32.mxu1 %v3365_v0 }
 0x3dc   : > { %2973 = vmatmul.mubr.msk.f32.gmra.mrb[2].mxu1 %vm912_vm13, %v2965_v53 }
 0x3dd   : > { %2698 = vmatprep.mubr.f32.mxu1 %v3365_v0 }
 0x3e0   : > { %2974 = vmatmul.mubr.msk.f32.gmra.mrb[4].mxu1 %vm912_vm13, %v2966_v17 }
 0x3e1   : > { %2704 = vmatprep.mubr.f32.mxu1 %v3365_v0 }
 0x3e4   : > { %2975 = vmatmul.mubr.msk.f32.gmra.mrb[6].mxu1 %vm912_vm13, %v2967_v18 }
 0x3e5   : > { %2710 = vmatprep.mubr.f32.mxu1 %v3365_v0 }
 0x3e8   : > { %2976 = vmatmul.mubr.msk.f32.gmra.mrb[8].mxu1 %vm912_vm13, %v2968_v4 }
 0x3e9   : > { %2716 = vmatprep.mubr.f32.mxu1 %v3365_v0 }
 0x3ec   : > { %2977 = vmatmul.mubr.msk.f32.gmra.mrb[10].mxu1 %vm912_vm13, %v2969_v19 }
 0x3ed   : > { %2722 = vmatprep.mubr.f32.mxu1 %v3365_v0 }
 0x3f0   : > { %2978 = vmatmul.mubr.msk.f32.gmra.mrb[12].mxu1 %vm912_vm13, %v2970_v36 }
 0x3f1   : > { %2728 = vmatprep.mubr.f32.mxu1 %v3365_v0 }
 0x3f4   : > { %2979 = vmatmul.mubr.msk.f32.gmra.mrb[14].mxu1 %vm912_vm13, %v2971_v20 }
 0x3fe   : > { %v3312_v26 = vpop.permute.xlu1 %3311  ;;  %v3317_v16 = vpop.permute.xlu0 %3316 }
 0x3ff   : > { %v3314_v27 = vunpack.i.h.bf16 %v3312_v26  ;;  %v3313_v29 = vunpack.i.l.bf16 %v3312_v26  ;;  %v3319_v7 = vunpack.i.h.bf16 %v3317_v16  ;;  %v3318_v6 = vunpack.i.l.bf16 %v3317_v16 }
 0x401   : > { %v1550_v30 = vsel %vm1548_vm9, %v3313_v29, %v3314_v27  ;;  %v1552_v31 = vsel %vm1548_vm9, %v3318_v6, %v3319_v7 }
 0x402   : > { %v3322_v32 = vpop.permute.xlu1 %3321  ;;  %v3007_v34 = vpack.c.bf16 %v1552_v31, %v1550_v30 }
 0x403   : > { %v3324_v35 = vunpack.i.h.bf16 %v3322_v32  ;;  %v3323_v28 = vunpack.i.l.bf16 %v3322_v32 }
 0x404   : > { %3008 = vmatprep.subr.bf16.mxu0 %v3007_v34 }
 0x405   : > { %v1549_v37 = vsel %vm1548_vm9, %v3323_v28, %v3313_v29  ;;  %v1551_v39 = vsel %vm1548_vm9, %v3324_v35, %v3318_v6 }
 0x406   : > { %v3009_v40 = vpack.c.bf16 %v1551_v39, %v1549_v37 }
 0x408   : > { %3010 = vmatpush1.bf16.msra.mxu0 %v3009_v40 }
 0x40b   : > { %2887 = vmatmul.mubr.msk.f32.vlgmr.msra.gmra.mrb[12].mxu0 %vm912_vm13, %v2879_v41 }
 0x40c   : > { %1651 = vmatprep.mubr.f32.mxu0 %v3365_v0 }
 0x40f   : > { %2888 = vmatmul.mubr.msk.f32.gmra.mrb[14].mxu0 %vm912_vm13, %v2880_v48  ;;  %v802_v44 = vpop.permute.xlu0 %801 }
 0x410   : > { %1657 = vmatprep.mubr.f32.mxu0 %v3365_v0 }
 0x413   : > { %2889 = vmatmul.mubr.msk.f32.gmra.mrb[16].mxu0 %vm912_vm13, %v2881_v12  ;;  %v807_v56 = vpop.permute.xlu1 %806  ;;  %v812_v21 = vpop.permute.xlu0 %811 }
 0x414   : > { %1663 = vmatprep.mubr.f32.mxu0 %v3365_v0 }
 0x417   : > { %2890 = vmatmul.mubr.msk.f32.gmra.mrb[18].mxu0 %vm912_vm13, %v2882_v51  ;;  %v822_v27 = vpop.permute.xlu0 %821 }
 0x418   : > { %1669 = vmatprep.mubr.f32.mxu0 %v3365_v0  ;;  %v817_v18 = vpop.permute.xlu1 %816 }
 0x41b   : > { %2891 = vmatmul.mubr.msk.f32.gmra.mrb[20].mxu0 %vm912_vm13, %v2883_v55  ;;  %v832_v48 = vpop.permute.xlu0 %831 }
 0x41c   : > { %1675 = vmatprep.mubr.f32.mxu0 %v3365_v0  ;;  %v827_v34 = vpop.permute.xlu1 %826 }
 0x41f   : > { %2892 = vmatmul.mubr.msk.f32.gmra.mrb[22].mxu0 %vm912_vm13, %v2884_v3 }
 0x420   : > { %1681 = vmatprep.mubr.f32.mxu0 %v3365_v0 }
 0x423   : > { %2893 = vmatmul.mubr.msk.f32.gmra.mrb[24].mxu0 %vm912_vm13, %v2885_v5 }
 0x424   : > { %1687 = vmatprep.mubr.f32.mxu0 %v3365_v0 }
 0x427   : > { %2894 = vmatmul.mubr.msk.f32.gmra.mrb[26].mxu0 %vm912_vm13, %v2886_v13 }
 0x4ab   : > { %v2688_v47 = vpop.f32.mrb[0].mxu1 }
 0x4ac   : > { %v2690_v42 = vpop.f32.mrb[1].mxu1 }
 0x4af   : > { %v2694_v43 = vpop.f32.mrb[2].mxu1 }
 0x4b0   : > { %v2696_v33 = vpop.f32.mrb[3].mxu1 }
 0x4b3   : > { %v2700_v14 = vpop.f32.mrb[4].mxu1 }
 0x4b4   : > { %v2702_v23 = vpop.f32.mrb[5].mxu1 }
 0x4b7   : > { %v2706_v58 = vpop.f32.mrb[6].mxu1 }
 0x4b8   : > { %v2708_v45 = vpop.f32.mrb[7].mxu1 }
 0x4bb   : > { %v2712_v22 = vpop.f32.mrb[8].mxu1 }
 0x4bc   : > { %v2714_v46 = vpop.f32.mrb[9].mxu1 }
 0x4bf   : > { %v2718_v49 = vpop.f32.mrb[10].mxu1 }
 0x4c0   : > { %v2720_v50 = vpop.f32.mrb[11].mxu1 }
 0x4c3   : > { %v4181_v0 = vpop.f32.mrb[12].mxu1 }
 0x4c4   : > { %v4183_v38 = vpop.f32.mrb[13].mxu1 }
 0x4c7   : > { %v4185_v9 = vpop.f32.mrb[14].mxu1 }
 0x4c8   : > { %v4187_v57 = vpop.f32.mrb[15].mxu1 }
 0x4de   : > { %v1647_v52 = vpop.f32.mrb[12].mxu0 }
 0x4df   : > { %v3031_v54 = vadd.f32 %v1647_v52, %v802_v44  ;;  %v1649_v25 = vpop.f32.mrb[13].mxu0 }
 0x4e0   : > { %v3033_v2 = vadd.f32 %v1649_v25, %v802_v44 }
 0x4e1   : > { %v3032_v59 = vadd.f32 %v3031_v54, %v2688_v47  ;;  %v837_v47 = vpop.permute.xlu1 %836 }
 0x4e2   : > { %v3034_v61 = vadd.f32 %v3033_v2, %v2690_v42  ;;  %v1653_v62 = vpop.f32.mrb[14].mxu0 }
 0x4e3   : > { %2751 = vst [vmem:[%s4193_s12] sm:$0xff] %v3032_v59  ;;  %v3035_v63 = vadd.f32 %v1653_v62, %v807_v56  ;;  %v1655_v1 = vpop.f32.mrb[15].mxu0 }
 0x4e4   : > { %2752 = vst [vmem:[%s4193_s12 + $0x8] sm:$0xff] %v3034_v61  ;;  %v3037_v60 = vadd.f32 %v1655_v1, %v807_v56 }
 0x4e5   : > { %v3036_v8 = vadd.f32 %v3035_v63, %v2694_v43 }
 0x4e6   : > { %v3038_v10 = vadd.f32 %v3037_v60, %v2696_v33  ;;  %v1659_v24 = vpop.f32.mrb[16].mxu0 }
 0x4e7   : > { %2753 = vst [vmem:[%s4193_s12 + $0x10] sm:$0xff] %v3036_v8  ;;  %v3039_v11 = vadd.f32 %v1659_v24, %v812_v21  ;;  %v1661_v15 = vpop.f32.mrb[17].mxu0 }
 0x4e8   : > { %2754 = vst [vmem:[%s4193_s12 + $0x18] sm:$0xff] %v3038_v10  ;;  %v3041_v53 = vadd.f32 %v1661_v15, %v812_v21 }
 0x4e9   : > { %v3040_v17 = vadd.f32 %v3039_v11, %v2700_v14 }
 0x4ea   : > { %v3042_v4 = vadd.f32 %v3041_v53, %v2702_v23  ;;  %v1665_v19 = vpop.f32.mrb[18].mxu0 }
 0x4eb   : > { %2755 = vst [vmem:[%s4193_s12 + $0x20] sm:$0xff] %v3040_v17  ;;  %v3043_v36 = vadd.f32 %v1665_v19, %v817_v18  ;;  %v1667_v20 = vpop.f32.mrb[19].mxu0 }
 0x4ec   : > { %2756 = vst [vmem:[%s4193_s12 + $0x28] sm:$0xff] %v3042_v4  ;;  %v3045_v26 = vadd.f32 %v1667_v20, %v817_v18 }
 0x4ed   : > { %v3044_v16 = vadd.f32 %v3043_v36, %v2706_v58 }
 0x4ee   : > { %v3046_v29 = vadd.f32 %v3045_v26, %v2708_v45  ;;  %v1671_v7 = vpop.f32.mrb[20].mxu0 }
 0x4ef   : > { %2757 = vst [vmem:[%s4193_s12 + $0x30] sm:$0xff] %v3044_v16  ;;  %v3047_v6 = vadd.f32 %v1671_v7, %v822_v27  ;;  %v1673_v30 = vpop.f32.mrb[21].mxu0 }
 0x4f0   : > { %2758 = vst [vmem:[%s4193_s12 + $0x38] sm:$0xff] %v3046_v29  ;;  %v3049_v31 = vadd.f32 %v1673_v30, %v822_v27 }
 0x4f1   : > { %v3048_v32 = vadd.f32 %v3047_v6, %v2712_v22 }
 0x4f2   : > { %v3050_v35 = vadd.f32 %v3049_v31, %v2714_v46  ;;  %v1677_v28 = vpop.f32.mrb[22].mxu0 }
 0x4f3   : > { %2759 = vst [vmem:[%s4193_s12 + $0x40] sm:$0xff] %v3048_v32  ;;  %v3051_v37 = vadd.f32 %v1677_v28, %v827_v34  ;;  %v1679_v39 = vpop.f32.mrb[23].mxu0 }
 0x4f4   : > { %2760 = vst [vmem:[%s4193_s12 + $0x48] sm:$0xff] %v3050_v35  ;;  %v3053_v40 = vadd.f32 %v1679_v39, %v827_v34 }
 0x4f5   : > { %v3052_v41 = vadd.f32 %v3051_v37, %v2718_v49 }
 0x4f6   : > { %v3054_v12 = vadd.f32 %v3053_v40, %v2720_v50  ;;  %v1683_v51 = vpop.f32.mrb[24].mxu0 }
 0x4f7   : > { %2761 = vst [vmem:[%s4193_s12 + $0x50] sm:$0xff] %v3052_v41  ;;  %v3055_v55 = vadd.f32 %v1683_v51, %v832_v48  ;;  %v1685_v3 = vpop.f32.mrb[25].mxu0 }
 0x4f8   : > { %2762 = vst [vmem:[%s4193_s12 + $0x58] sm:$0xff] %v3054_v12  ;;  %v3057_v5 = vadd.f32 %v1685_v3, %v832_v48 }
 0x4f9   : > { %v3056_v13 = vadd.f32 %v3055_v55, %v4181_v0 }
 0x4fa   : > { %v3058_v42 = vadd.f32 %v3057_v5, %v4183_v38  ;;  %v1689_v43 = vpop.f32.mrb[26].mxu0 }
 0x4fb   : > { %2763 = vst [vmem:[%s4193_s12 + $0x60] sm:$0xff] %v3056_v13  ;;  %v3059_v33 = vadd.f32 %v1689_v43, %v837_v47  ;;  %v1691_v14 = vpop.f32.mrb[27].mxu0 }
 0x4fc   : > { %2764 = vst [vmem:[%s4193_s12 + $0x68] sm:$0xff] %v3058_v42  ;;  %v3061_v23 = vadd.f32 %v1691_v14, %v837_v47 }
 0x4fd   : > { %v3060_v58 = vadd.f32 %v3059_v33, %v4185_v9 }
 0x4fe   : > { %v3062_v45 = vadd.f32 %v3061_v23, %v4187_v57 }
 0x4ff   : > { %2765 = vst [vmem:[%s4193_s12 + $0x70] sm:$0xff] %v3060_v58 }
 0x500   : > { %2766 = vst [vmem:[%s4193_s12 + $0x78] sm:$0xff] %v3062_v45 }
 0x501 PF: > { %s18_s27 = sadd.s32 1, %s3363_s27  }
 0x502   : > { %p15_p4 = scmp.ge.s32.totalorder %s18_s27, 4  }
 0x504   :  { %17 = sbr.rel (!%p15_p4) target bundleno = 1 (0x1), region = 98 }

</bundles_post_ra>
